<compile_context>
chip_gen: v5e
topology: v5e:2x2
jax: 0.10.0
libtpu: 0.0.40
codegen_flags: <defaults>
</compile_context>

<pallas_src>
import functools

import jax
import jax.numpy as jnp
from jax.experimental import pallas as pl
from jax.experimental.pallas import tpu as pltpu

H_FEAT = 7
W_FEAT = 7
P_FEAT = H_FEAT * W_FEAT            # 49 valid spatial positions
PP = 56                             # positions padded to a multiple of 8
NPOS = 2 * PP                       # depth-stacked positions (d=0 | d=1)
C_FEAT = 512                        # in_channels of NL block / fusion
C_INTER = 256                       # NLBlockND inter_channels = 512 // 2
PATCH = 8                           # simplified encoder patch size
IMG = H_FEAT * PATCH                # 56x56 input images
PATCH_DIM = (3 + 1) * PATCH * PATCH  # rgb(3)+depth(1) patch features = 256
DEC_HID = 64
OUT_H, OUT_W = 16, 16               # out_dim = (output_size[1], output_size[0])
NPIX = OUT_H * OUT_W                # 256 resized pixels (lane-dense output)


# ----------------------------------------------------------------------------
# Probe: can this JAX/Mosaic single-buffer invariant inputs (pl.Buffered(1))?
# ----------------------------------------------------------------------------
def _probe_single_buffering():
    def _probe_kernel(x_ref, o_ref):
        o_ref[...] = x_ref[...] + 1.0

    try:
        spec = pl.BlockSpec((8, 128), lambda i: (0, 0),
                            pipeline_mode=pl.Buffered(buffer_count=1))
        fn = pl.pallas_call(
            _probe_kernel,
            out_shape=jax.ShapeDtypeStruct((8, 128), jnp.float32),
            grid=(2,),
            in_specs=[spec],
            out_specs=pl.BlockSpec((8, 128), lambda i: (0, 0)),
        )
        jax.jit(fn).lower(jnp.zeros((8, 128), jnp.float32)).compile()
        return True
    except Exception:
        return False


_SINGLE_BUFFER = _probe_single_buffering()


def _pick_nb(batch):
    """Samples per grid step: block batches but keep >= 2 grid steps (v7x)."""
    for nb in (4, 2):
        if batch % nb == 0 and batch // nb >= 2:
            return nb
    return 1


# ----------------------------------------------------------------------------
# Fused kernel: encoder proj -> warp apply -> NL attention + fusion -> decoder
# ----------------------------------------------------------------------------
def _fused_forward_kernel(
        nb, patches_ref, z_ref, warp_ref, kmask_ref, rsel_ref,
        wenc_ref, benc_ref, wproj_ref, bproj_ref, wz_ref, bz_ref,
        wf0_ref, wf1_ref, wd1_ref, bd1_ref, wd2_ref, bd2_ref,
        newz_ref, depth_ref, xcat_ref):
    f32 = jnp.float32
    bf16 = jnp.bfloat16

    def stack(parts):
        return parts[0] if nb == 1 else jnp.concatenate(parts, axis=0)

    # ---- A: encoder patch projection + ReLU, M = nb*PP on the MXU ----------
    # TODO(synk): RGBDepthResnet source not provided; the ResNet backbone is
    # replaced by an 8x8 patch projection producing the same [B,512,7,7] shape.
    patches = stack([patches_ref[n] for n in range(nb)])       # [nb*56,256] bf16
    x_enc = jnp.maximum(
        jnp.dot(patches, wenc_ref[...], preferred_element_type=f32)
        + benc_ref[...], 0.0)                                    # [nb*56,512] f32

    # ---- B: prev_z = (composed rotate+translate warp) @ z, per sample ------
    # Write both depth slices straight into the bf16 VMEM scratch (per-sample
    # rows contiguous: [x_enc_n ; prev_z_n]); nothing f32 stays live here.
    for n in range(nb):
        xcat_ref[pl.ds(n * NPOS, PP), :] = (
            x_enc[n * PP:(n + 1) * PP, :].astype(bf16))
        prev_z = jnp.dot(warp_ref[n], z_ref[n],
                         preferred_element_type=f32)             # [56, 512]
        xcat_ref[pl.ds(n * NPOS + PP, PP), :] = prev_z.astype(bf16)

    # ---- C: NLBlockND (embedded gaussian), fused g/theta/phi projection ----
    proj = (jnp.dot(xcat_ref[...], wproj_ref[...],
                    preferred_element_type=f32)
            + bproj_ref[...])                                    # [nb*112, 768]

    y_parts = []
    for n in range(nb):
        r0 = n * NPOS
        g = proj[r0:r0 + NPOS, 0:C_INTER].astype(bf16)
        th = proj[r0:r0 + NPOS, C_INTER:2 * C_INTER].astype(bf16)
        ph = proj[r0:r0 + NPOS, 2 * C_INTER:3 * C_INTER].astype(bf16)
        # f[i, j] = <theta_i, phi_j>; mask padded keys; f32 softmax over j
        logits = jax.lax.dot_general(th, ph, (((1,), (1,)), ((), ())),
                                     preferred_element_type=f32)  # [112, 112]
        logits = logits + kmask_ref[...]
        m = jnp.max(logits, axis=-1, keepdims=True)
        e = jnp.exp(logits - m)
        p = e / jnp.sum(e, axis=-1, keepdims=True)   # exact divide (parity)
        y_parts.append(jnp.dot(p.astype(bf16), g,
                               preferred_element_type=f32))       # [112, 256]
    y = stack(y_parts).astype(bf16)                               # [nb*112, 256]

    # W_z conv with BatchNorm3d folded (wrapper) + residual.  Re-read the
    # scratch for the residual and write the attention output back so the
    # fusion taps below read ref slices (no long-lived xcat in vregs).
    wy = jnp.dot(y, wz_ref[...], preferred_element_type=f32) + bz_ref[...]
    attn = wy + xcat_ref[...].astype(f32)
    xcat_ref[...] = attn.astype(bf16)

    # ---- fusion Conv3d(512,512,(2,1,1)) + ReLU over the two depth taps -----
    x0 = stack([xcat_ref[pl.ds(n * NPOS, PP), :] for n in range(nb)])
    x1 = stack([xcat_ref[pl.ds(n * NPOS + PP, PP), :] for n in range(nb)])
    new_z = jnp.maximum(
        jnp.dot(x0, wf0_ref[...], preferred_element_type=f32) +
        jnp.dot(x1, wf1_ref[...], preferred_element_type=f32), 0.0)  # [nb*56,512]
    for n in range(nb):
        newz_ref[n] = new_z[n * PP:(n + 1) * PP, :]

    # ---- D: decoder head + nearest F.interpolate (hoisted selection) -------
    # TODO(synk): ResNet18Dec source not provided; decoder replaced by a
    # 1x1-conv MLP head (512->64->1, sigmoid) with matching output shape.
    h = jnp.maximum(
        jnp.dot(new_z.astype(bf16), wd1_ref[...],
                preferred_element_type=f32) + bd1_ref[...], 0.0)   # [nb*56, 64]
    logit = jnp.sum(h * wd2_ref[...], axis=-1, keepdims=True) + bd2_ref[0, 0]
    for n in range(nb):
        sel = jnp.sum(rsel_ref[...] * logit[n * PP:(n + 1) * PP, :],
                      axis=0, keepdims=True)                       # [1, NPIX]
        depth_ref[n] = jax.nn.sigmoid(sel)


def fused_forward(patches, z_flat, w_warp, key_mask, r_sel, params):
    B = patches.shape[0]
    nb = _pick_nb(B)
    bf16 = jnp.bfloat16

    # fold BatchNorm3d (running_mean=0, running_var=1, eps=1e-5) into W_z and
    # fuse the g/theta/phi projection weights into one [512, 768] matrix.
    bn_scale = params["gamma"] * (1.0 / jnp.sqrt(1.0 + 1e-5))
    wz_f = (params["wz"] * bn_scale).astype(bf16)
    bz_f = params["bz"] * bn_scale + params["beta"]
    wproj = jnp.concatenate([params["wg"], params["wt"], params["wp"]],
                            axis=1).astype(bf16)                   # [512, 768]
    bproj = jnp.concatenate([params["bg"], params["bt"], params["bp"]], axis=1)
    wd2_row = params["wd2"].reshape(1, DEC_HID)

    def cspec(*shape):
        n = len(shape)
        kw = ({"pipeline_mode": pl.Buffered(buffer_count=1)}
              if _SINGLE_BUFFER else {})
        return pl.BlockSpec(shape, lambda i, _n=n: (0,) * _n, **kw)

    def bspec(*tail):
        return pl.BlockSpec((nb,) + tail, lambda i: (i, 0, 0))

    return pl.pallas_call(
        functools.partial(_fused_forward_kernel, nb),
        out_shape=(jax.ShapeDtypeStruct((B, PP, C_FEAT), jnp.float32),
                   jax.ShapeDtypeStruct((B, 1, NPIX), jnp.float32)),
        grid=(B // nb,),
        in_specs=[
            bspec(PP, PATCH_DIM),                                # patches (bf16)
            bspec(PP, C_FEAT),                                   # z (bf16)
            bspec(PP, PP),                                       # composed warp
            cspec(1, NPOS),                                      # key mask (f32)
            cspec(PP, NPIX),                                     # resize select
            cspec(PATCH_DIM, C_FEAT), cspec(1, C_FEAT),          # encoder
            cspec(C_FEAT, 3 * C_INTER), cspec(1, 3 * C_INTER),   # fused g/th/ph
            cspec(C_INTER, C_FEAT), cspec(1, C_FEAT),            # W_z (BN folded)
            cspec(C_FEAT, C_FEAT), cspec(C_FEAT, C_FEAT),        # fusion taps
            cspec(C_FEAT, DEC_HID), cspec(1, DEC_HID),           # dec fc1
            cspec(1, DEC_HID),                                   # dec fc2 (row)
            pl.BlockSpec(memory_space=pltpu.MemorySpace.SMEM),   # dec fc2 bias
        ],
        out_specs=(
            pl.BlockSpec((nb, PP, C_FEAT), lambda i: (i, 0, 0)),
            pl.BlockSpec((nb, 1, NPIX), lambda i: (i, 0, 0)),
        ),
        scratch_shapes=[pltpu.VMEM((nb * NPOS, C_FEAT), jnp.bfloat16)],
        compiler_params=pltpu.CompilerParams(
            dimension_semantics=("parallel",),
            vmem_limit_bytes=16 * 1024 * 1024),
    )(patches.astype(bf16), z_flat.astype(bf16), w_warp.astype(bf16),
      key_mask, r_sel,
      params["enc_w"].astype(bf16), params["enc_b"],
      wproj, bproj, wz_f, bz_f,
      params["wf0"].astype(bf16), params["wf1"].astype(bf16),
      params["wd1"].astype(bf16), params["bd1"],
      wd2_row, params["bd2"])


# ----------------------------------------------------------------------------
# Parameter init (deterministic, synthetic) and top-level forward
# ----------------------------------------------------------------------------
def init_params(key):
    ks = jax.random.split(key, 12)
    s = 0.02
    return {
        "enc_w": jax.random.normal(ks[0], (PATCH_DIM, C_FEAT), jnp.float32) * s,
        "enc_b": jnp.zeros((1, C_FEAT), jnp.float32),
        "wg": jax.random.normal(ks[1], (C_FEAT, C_INTER), jnp.float32) * s,
        "bg": jnp.zeros((1, C_INTER), jnp.float32),
        "wt": jax.random.normal(ks[2], (C_FEAT, C_INTER), jnp.float32) * s,
        "bt": jnp.zeros((1, C_INTER), jnp.float32),
        "wp": jax.random.normal(ks[3], (C_FEAT, C_INTER), jnp.float32) * s,
        "bp": jnp.zeros((1, C_INTER), jnp.float32),
        "wz": jax.random.normal(ks[4], (C_INTER, C_FEAT), jnp.float32) * s,
        "bz": jnp.zeros((1, C_FEAT), jnp.float32),
        "gamma": jnp.ones((1, C_FEAT), jnp.float32) * 0.5,
        "beta": jnp.zeros((1, C_FEAT), jnp.float32),
        # fusion Conv3d weight [out=512, in=512, 2, 1, 1] stored as two
        # transposed [in, out] matrices (one per depth tap).
        "wf0": jax.random.normal(ks[5], (C_FEAT, C_FEAT), jnp.float32) * s,
        "wf1": jax.random.normal(ks[6], (C_FEAT, C_FEAT), jnp.float32) * s,
        "wd1": jax.random.normal(ks[7], (C_FEAT, DEC_HID), jnp.float32) * s,
        "bd1": jnp.zeros((1, DEC_HID), jnp.float32),
        "wd2": jax.random.normal(ks[8], (DEC_HID, 1), jnp.float32) * s,
        "bd2": jnp.zeros((1, 1), jnp.float32),
    }


@jax.jit
def resnet_depth_map_forward(params, rgb_img, depth_img, dx, dy, dtheta, z):
    B = rgb_img.shape[0]
    f32 = jnp.float32

    # -- encoder input layout: 8x8 patch features, positions padded 49->56 --
    img = jnp.concatenate([rgb_img, depth_img], axis=1)          # [B,4,56,56]
    patches = img.reshape(B, 4, H_FEAT, PATCH, W_FEAT, PATCH)
    patches = patches.transpose(0, 2, 4, 1, 3, 5).reshape(B, P_FEAT, PATCH_DIM)
    patches = jnp.pad(patches, ((0, 0), (0, PP - P_FEAT), (0, 0)))

    z_flat = z.reshape(B, C_FEAT, P_FEAT).transpose(0, 2, 1)     # [B,49,512]
    z_flat = jnp.pad(z_flat, ((0, 0), (0, PP - P_FEAT), (0, 0)))

    # -- composed rotate+translate warp as one [56,56] matrix per sample ----
    # TODO(synk): kornia rotate/translate border/align_corners conventions are
    # approximated by OpenCV-style inverse-map bilinear warps (zeros padding).
    ridx = jnp.arange(PP)
    yv = (ridx // W_FEAT).astype(f32)
    xv = (ridx % W_FEAT).astype(f32)
    xo, yo = xv[None, :, None], yv[None, :, None]                # output coords
    xs, ys = xv[None, None, :], yv[None, None, :]                # source coords
    cx, cy = (W_FEAT - 1) / 2.0, (H_FEAT - 1) / 2.0
    angle = -dtheta                                              # radians
    ca, sa = jnp.cos(angle)[:, None, None], jnp.sin(angle)[:, None, None]
    scale = 1.0 / 0.05 / (200.0 / 7.0)
    tx, ty = (dy * scale)[:, None, None], (dx * scale)[:, None, None]
    sx = ca * (xo - cx) - sa * (yo - cy) + cx
    sy = sa * (xo - cx) + ca * (yo - cy) + cy
    w_rot = (jnp.maximum(0.0, 1.0 - jnp.abs(sx - xs)) *
             jnp.maximum(0.0, 1.0 - jnp.abs(sy - ys)))
    w_rot = jnp.where(yo < float(H_FEAT), w_rot, 0.0)   # keep zeros padding
    w_tr = (jnp.maximum(0.0, 1.0 - jnp.abs((xo - tx) - xs)) *
            jnp.maximum(0.0, 1.0 - jnp.abs((yo - ty) - ys)))
    w_warp = jnp.einsum('bij,bjk->bik', w_tr, w_rot)             # [B,56,56]

    # -- grid-invariant constants (hoisted out of the kernel) --
    pos = jnp.arange(NPOS)
    key_mask = jnp.where((pos % PP) < P_FEAT, 0.0, -1e30)
    key_mask = key_mask.astype(f32).reshape(1, NPOS)

    pix = jnp.arange(NPIX)
    si = ((pix // OUT_W) * H_FEAT) // OUT_H
    sj = ((pix % OUT_W) * W_FEAT) // OUT_W
    src = si * W_FEAT + sj
    r_sel = (jnp.arange(PP)[:, None] == src[None, :]).astype(f32)

    # -- fused kernel: encoder -> warp -> attention+fusion -> decoder --
    new_z_pad, depth = fused_forward(patches, z_flat, w_warp,
                                     key_mask, r_sel, params)

    new_z = new_z_pad[:, :P_FEAT, :].transpose(0, 2, 1).reshape(
        B, C_FEAT, H_FEAT, W_FEAT)
    x_out = depth.reshape(B, 1, OUT_H, OUT_W)
    return x_out, new_z


if __name__ == "__main__":
    key = jax.random.PRNGKey(0)
    kp, k1, k2, k3, k4, k5, k6 = jax.random.split(key, 7)
    params = init_params(kp)

    B = 2
    rgb_img = jax.random.normal(k1, (B, 3, IMG, IMG), jnp.float32)
    depth_img = jax.random.normal(k2, (B, 1, IMG, IMG), jnp.float32)
    dx = jax.random.normal(k3, (B,), jnp.float32) * 0.02
    dy = jax.random.normal(k4, (B,), jnp.float32) * 0.02
    dtheta = jax.random.normal(k5, (B,), jnp.float32) * 0.1
    z = jax.random.normal(k6, (B, C_FEAT, H_FEAT, W_FEAT), jnp.float32)

    x_out, new_z = resnet_depth_map_forward(params, rgb_img, depth_img,
                                            dx, dy, dtheta, z)
    jax.block_until_ready((x_out, new_z))
    assert x_out.shape == (B, 1, OUT_H, OUT_W)
    assert new_z.shape == (B, C_FEAT, H_FEAT, W_FEAT)
    print("KERNEL_OK")
</pallas_src>

<mosaic_0001>
module attributes {stable_mosaic.version = 11 : i64} {
  func.func @_fused_forward_kernel(%arg0: i32, %arg1: memref<1x56x256xbf16, #tpu.memory_space<vmem>>, %arg2: memref<1x56x512xbf16, #tpu.memory_space<vmem>>, %arg3: memref<1x56x56xbf16, #tpu.memory_space<vmem>>, %arg4: memref<1x112xf32, #tpu.memory_space<vmem>>, %arg5: memref<56x256xf32, #tpu.memory_space<vmem>>, %arg6: memref<256x512xbf16, #tpu.memory_space<vmem>>, %arg7: memref<1x512xf32, #tpu.memory_space<vmem>>, %arg8: memref<512x768xbf16, #tpu.memory_space<vmem>>, %arg9: memref<1x768xf32, #tpu.memory_space<vmem>>, %arg10: memref<256x512xbf16, #tpu.memory_space<vmem>>, %arg11: memref<1x512xf32, #tpu.memory_space<vmem>>, %arg12: memref<512x512xbf16, #tpu.memory_space<vmem>>, %arg13: memref<512x512xbf16, #tpu.memory_space<vmem>>, %arg14: memref<512x64xbf16, #tpu.memory_space<vmem>>, %arg15: memref<1x64xf32, #tpu.memory_space<vmem>>, %arg16: memref<1x64xf32, #tpu.memory_space<vmem>>, %arg17: memref<1x1xf32, #tpu.memory_space<smem>>, %arg18: memref<1x56x512xf32, #tpu.memory_space<vmem>>, %arg19: memref<1x1x256xf32, #tpu.memory_space<vmem>>, %arg20: memref<112x512xbf16, #tpu.memory_space<vmem>>) attributes {dimension_semantics = [#tpu.dimension_semantics<parallel>], iteration_bounds = array<i64: 2>, scalar_prefetch = 0 : i64, scratch_operands = 1 : i64, tpu.core_type = #tpu.core_type<tc>, window_params = [{transform_indices = @transform_0, window_bounds = array<i64: 1, 56, 256>}, {transform_indices = @transform_1, window_bounds = array<i64: 1, 56, 512>}, {transform_indices = @transform_2, window_bounds = array<i64: 1, 56, 56>}, {pipeline_mode = #tpu.pipeline_mode<synchronous>, transform_indices = @transform_3, window_bounds = array<i64: 1, 112>}, {pipeline_mode = #tpu.pipeline_mode<synchronous>, transform_indices = @transform_4, window_bounds = array<i64: 56, 256>}, {pipeline_mode = #tpu.pipeline_mode<synchronous>, transform_indices = @transform_5, window_bounds = array<i64: 256, 512>}, {pipeline_mode = #tpu.pipeline_mode<synchronous>, transform_indices = @transform_6, window_bounds = array<i64: 1, 512>}, {pipeline_mode = #tpu.pipeline_mode<synchronous>, transform_indices = @transform_7, window_bounds = array<i64: 512, 768>}, {pipeline_mode = #tpu.pipeline_mode<synchronous>, transform_indices = @transform_8, window_bounds = array<i64: 1, 768>}, {pipeline_mode = #tpu.pipeline_mode<synchronous>, transform_indices = @transform_9, window_bounds = array<i64: 256, 512>}, {pipeline_mode = #tpu.pipeline_mode<synchronous>, transform_indices = @transform_10, window_bounds = array<i64: 1, 512>}, {pipeline_mode = #tpu.pipeline_mode<synchronous>, transform_indices = @transform_11, window_bounds = array<i64: 512, 512>}, {pipeline_mode = #tpu.pipeline_mode<synchronous>, transform_indices = @transform_12, window_bounds = array<i64: 512, 512>}, {pipeline_mode = #tpu.pipeline_mode<synchronous>, transform_indices = @transform_13, window_bounds = array<i64: 512, 64>}, {pipeline_mode = #tpu.pipeline_mode<synchronous>, transform_indices = @transform_14, window_bounds = array<i64: 1, 64>}, {pipeline_mode = #tpu.pipeline_mode<synchronous>, transform_indices = @transform_15, window_bounds = array<i64: 1, 64>}, {transform_indices = @transform_16, window_bounds = array<i64: 1, 1>}, {transform_indices = @transform_17, window_bounds = array<i64: 1, 56, 512>}, {transform_indices = @transform_18, window_bounds = array<i64: 1, 1, 256>}]} {
    %c0 = arith.constant 0 : index
    %c0_0 = arith.constant 0 : index
    %c0_1 = arith.constant 0 : index
    %0 = vector.load %arg1[%c0, %c0_0, %c0_1] : memref<1x56x256xbf16, #tpu.memory_space<vmem>>, vector<1x56x256xbf16>
    %1 = vector.shape_cast %0 : vector<1x56x256xbf16> to vector<56x256xbf16>
    %c0_2 = arith.constant 0 : index
    %c0_3 = arith.constant 0 : index
    %2 = vector.load %arg6[%c0_2, %c0_3] : memref<256x512xbf16, #tpu.memory_space<vmem>>, vector<256x512xbf16>
    %cst = arith.constant dense<0.000000e+00> : vector<56x512xf32>
    %3 = tpu.matmul %1, %2, %cst {dimension_numbers = #tpu.dot_dimension_numbers<[1], [0], [0], [1], [0, 0, 1, 1], [], []>} : vector<56x256xbf16>, vector<256x512xbf16>, vector<56x512xf32> -> vector<56x512xf32>
    %c0_4 = arith.constant 0 : index
    %c0_5 = arith.constant 0 : index
    %4 = vector.load %arg7[%c0_4, %c0_5] : memref<1x512xf32, #tpu.memory_space<vmem>>, vector<1x512xf32>
    %5 = vector.broadcast %4 : vector<1x512xf32> to vector<56x512xf32>
    %6 = arith.addf %3, %5 : vector<56x512xf32>
    %cst_6 = arith.constant 0.000000e+00 : f32
    %7 = vector.broadcast %cst_6 : f32 to vector<56x512xf32>
    %8 = arith.maximumf %6, %7 : vector<56x512xf32>
    %9 = arith.truncf %8 : vector<56x512xf32> to vector<56x512xbf16>
    %c0_7 = arith.constant 0 : index
    %c0_8 = arith.constant 0 : index
    %10 = vector.load %arg20[%c0_7, %c0_8] : memref<112x512xbf16, #tpu.memory_space<vmem>>, vector<56x512xbf16>
    tpu.vector_store %arg20[%c0_7, %c0_8], %9 {strides = array<i32>} : memref<112x512xbf16, #tpu.memory_space<vmem>>, vector<56x512xbf16>,
    %c0_9 = arith.constant 0 : index
    %c0_10 = arith.constant 0 : index
    %c0_11 = arith.constant 0 : index
    %11 = vector.load %arg3[%c0_9, %c0_10, %c0_11] : memref<1x56x56xbf16, #tpu.memory_space<vmem>>, vector<1x56x56xbf16>
    %12 = vector.shape_cast %11 : vector<1x56x56xbf16> to vector<56x56xbf16>
    %c0_12 = arith.constant 0 : index
    %c0_13 = arith.constant 0 : index
    %c0_14 = arith.constant 0 : index
    %13 = vector.load %arg2[%c0_12, %c0_13, %c0_14] : memref<1x56x512xbf16, #tpu.memory_space<vmem>>, vector<1x56x512xbf16>
    %14 = vector.shape_cast %13 : vector<1x56x512xbf16> to vector<56x512xbf16>
    %cst_15 = arith.constant dense<0.000000e+00> : vector<56x512xf32>
    %15 = tpu.matmul %12, %14, %cst_15 {dimension_numbers = #tpu.dot_dimension_numbers<[1], [0], [0], [1], [0, 0, 1, 1], [], []>} : vector<56x56xbf16>, vector<56x512xbf16>, vector<56x512xf32> -> vector<56x512xf32>
    %16 = arith.truncf %15 : vector<56x512xf32> to vector<56x512xbf16>
    %c56 = arith.constant 56 : index
    %c0_16 = arith.constant 0 : index
    %17 = vector.load %arg20[%c56, %c0_16] : memref<112x512xbf16, #tpu.memory_space<vmem>>, vector<56x512xbf16>
    tpu.vector_store %arg20[%c56, %c0_16], %16 {strides = array<i32>} : memref<112x512xbf16, #tpu.memory_space<vmem>>, vector<56x512xbf16>,
    %c0_17 = arith.constant 0 : index
    %c0_18 = arith.constant 0 : index
    %18 = vector.load %arg20[%c0_17, %c0_18] : memref<112x512xbf16, #tpu.memory_space<vmem>>, vector<112x512xbf16>
    %c0_19 = arith.constant 0 : index
    %c0_20 = arith.constant 0 : index
    %19 = vector.load %arg8[%c0_19, %c0_20] : memref<512x768xbf16, #tpu.memory_space<vmem>>, vector<512x768xbf16>
    %cst_21 = arith.constant dense<0.000000e+00> : vector<112x768xf32>
    %20 = tpu.matmul %18, %19, %cst_21 {dimension_numbers = #tpu.dot_dimension_numbers<[1], [0], [0], [1], [0, 0, 1, 1], [], []>} : vector<112x512xbf16>, vector<512x768xbf16>, vector<112x768xf32> -> vector<112x768xf32>
    %c0_22 = arith.constant 0 : index
    %c0_23 = arith.constant 0 : index
    %21 = vector.load %arg9[%c0_22, %c0_23] : memref<1x768xf32, #tpu.memory_space<vmem>>, vector<1x768xf32>
    %22 = vector.broadcast %21 : vector<1x768xf32> to vector<112x768xf32>
    %23 = arith.addf %20, %22 : vector<112x768xf32>
    %24 = vector.extract_strided_slice %23 {offsets = [0, 0], sizes = [112, 256], strides = [1, 1]} : vector<112x768xf32> to vector<112x256xf32>
    %25 = arith.truncf %24 : vector<112x256xf32> to vector<112x256xbf16>
    %26 = vector.extract_strided_slice %23 {offsets = [0, 256], sizes = [112, 256], strides = [1, 1]} : vector<112x768xf32> to vector<112x256xf32>
    %27 = arith.truncf %26 : vector<112x256xf32> to vector<112x256xbf16>
    %28 = vector.extract_strided_slice %23 {offsets = [0, 512], sizes = [112, 256], strides = [1, 1]} : vector<112x768xf32> to vector<112x256xf32>
    %29 = arith.truncf %28 : vector<112x256xf32> to vector<112x256xbf16>
    %cst_24 = arith.constant dense<0.000000e+00> : vector<112x112xf32>
    %30 = tpu.matmul %27, %29, %cst_24 {dimension_numbers = #tpu.dot_dimension_numbers<[1], [1], [0], [0], [0, 0, 1, 0], [], []>} : vector<112x256xbf16>, vector<112x256xbf16>, vector<112x112xf32> -> vector<112x112xf32>
    %c0_25 = arith.constant 0 : index
    %c0_26 = arith.constant 0 : index
    %31 = vector.load %arg4[%c0_25, %c0_26] : memref<1x112xf32, #tpu.memory_space<vmem>>, vector<1x112xf32>
    %32 = vector.broadcast %31 : vector<1x112xf32> to vector<112x112xf32>
    %33 = arith.addf %30, %32 : vector<112x112xf32>
    %cst_27 = arith.constant dense<0xFF800000> : vector<112xf32>
    %34 = vector.multi_reduction <maximumf>, %33, %cst_27 [1] : vector<112x112xf32> to vector<112xf32>
    %35 = vector.shape_cast %34 : vector<112xf32> to vector<112x1xf32>
    %36 = vector.broadcast %35 : vector<112x1xf32> to vector<112x112xf32>
    %37 = arith.subf %33, %36 : vector<112x112xf32>
    %38 = math.exp %37 : vector<112x112xf32>
    %cst_28 = arith.constant dense<0.000000e+00> : vector<112xf32>
    %39 = vector.multi_reduction <add>, %38, %cst_28 [1] : vector<112x112xf32> to vector<112xf32>
    %40 = vector.shape_cast %39 : vector<112xf32> to vector<112x1xf32>
    %41 = vector.broadcast %40 : vector<112x1xf32> to vector<112x112xf32>
    %42 = arith.divf %38, %41 : vector<112x112xf32>
    %43 = arith.truncf %42 : vector<112x112xf32> to vector<112x112xbf16>
    %cst_29 = arith.constant dense<0.000000e+00> : vector<112x256xf32>
    %44 = tpu.matmul %43, %25, %cst_29 {dimension_numbers = #tpu.dot_dimension_numbers<[1], [0], [0], [1], [0, 0, 1, 1], [], []>} : vector<112x112xbf16>, vector<112x256xbf16>, vector<112x256xf32> -> vector<112x256xf32>
    %45 = arith.truncf %44 : vector<112x256xf32> to vector<112x256xbf16>
    %c0_30 = arith.constant 0 : index
    %c0_31 = arith.constant 0 : index
    %46 = vector.load %arg10[%c0_30, %c0_31] : memref<256x512xbf16, #tpu.memory_space<vmem>>, vector<256x512xbf16>
    %cst_32 = arith.constant dense<0.000000e+00> : vector<112x512xf32>
    %47 = tpu.matmul %45, %46, %cst_32 {dimension_numbers = #tpu.dot_dimension_numbers<[1], [0], [0], [1], [0, 0, 1, 1], [], []>} : vector<112x256xbf16>, vector<256x512xbf16>, vector<112x512xf32> -> vector<112x512xf32>
    %c0_33 = arith.constant 0 : index
    %c0_34 = arith.constant 0 : index
    %48 = vector.load %arg11[%c0_33, %c0_34] : memref<1x512xf32, #tpu.memory_space<vmem>>, vector<1x512xf32>
    %49 = vector.broadcast %48 : vector<1x512xf32> to vector<112x512xf32>
    %50 = arith.addf %47, %49 : vector<112x512xf32>
    %c0_35 = arith.constant 0 : index
    %c0_36 = arith.constant 0 : index
    %51 = vector.load %arg20[%c0_35, %c0_36] : memref<112x512xbf16, #tpu.memory_space<vmem>>, vector<112x512xbf16>
    %52 = arith.extf %51 : vector<112x512xbf16> to vector<112x512xf32>
    %53 = arith.addf %50, %52 : vector<112x512xf32>
    %54 = arith.truncf %53 : vector<112x512xf32> to vector<112x512xbf16>
    %c0_37 = arith.constant 0 : index
    %c0_38 = arith.constant 0 : index
    %55 = vector.load %arg20[%c0_37, %c0_38] : memref<112x512xbf16, #tpu.memory_space<vmem>>, vector<112x512xbf16>
    tpu.vector_store %arg20[%c0_37, %c0_38], %54 {strides = array<i32>} : memref<112x512xbf16, #tpu.memory_space<vmem>>, vector<112x512xbf16>,
    %c0_39 = arith.constant 0 : index
    %c0_40 = arith.constant 0 : index
    %56 = vector.load %arg20[%c0_39, %c0_40] : memref<112x512xbf16, #tpu.memory_space<vmem>>, vector<56x512xbf16>
    %c56_41 = arith.constant 56 : index
    %c0_42 = arith.constant 0 : index
    %57 = vector.load %arg20[%c56_41, %c0_42] : memref<112x512xbf16, #tpu.memory_space<vmem>>, vector<56x512xbf16>
    %c0_43 = arith.constant 0 : index
    %c0_44 = arith.constant 0 : index
    %58 = vector.load %arg12[%c0_43, %c0_44] : memref<512x512xbf16, #tpu.memory_space<vmem>>, vector<512x512xbf16>
    %cst_45 = arith.constant dense<0.000000e+00> : vector<56x512xf32>
    %59 = tpu.matmul %56, %58, %cst_45 {dimension_numbers = #tpu.dot_dimension_numbers<[1], [0], [0], [1], [0, 0, 1, 1], [], []>} : vector<56x512xbf16>, vector<512x512xbf16>, vector<56x512xf32> -> vector<56x512xf32>
    %c0_46 = arith.constant 0 : index
    %c0_47 = arith.constant 0 : index
    %60 = vector.load %arg13[%c0_46, %c0_47] : memref<512x512xbf16, #tpu.memory_space<vmem>>, vector<512x512xbf16>
    %cst_48 = arith.constant dense<0.000000e+00> : vector<56x512xf32>
    %61 = tpu.matmul %57, %60, %cst_48 {dimension_numbers = #tpu.dot_dimension_numbers<[1], [0], [0], [1], [0, 0, 1, 1], [], []>} : vector<56x512xbf16>, vector<512x512xbf16>, vector<56x512xf32> -> vector<56x512xf32>
    %62 = arith.addf %59, %61 : vector<56x512xf32>
    %cst_49 = arith.constant 0.000000e+00 : f32
    %63 = vector.broadcast %cst_49 : f32 to vector<56x512xf32>
    %64 = arith.maximumf %62, %63 : vector<56x512xf32>
    %c0_50 = arith.constant 0 : index
    %c0_51 = arith.constant 0 : index
    %c0_52 = arith.constant 0 : index
    %65 = vector.load %arg18[%c0_50, %c0_51, %c0_52] : memref<1x56x512xf32, #tpu.memory_space<vmem>>, vector<1x56x512xf32>
    %66 = vector.shape_cast %65 : vector<1x56x512xf32> to vector<56x512xf32>
    %67 = vector.shape_cast %64 : vector<56x512xf32> to vector<1x56x512xf32>
    tpu.vector_store %arg18[%c0_50, %c0_51, %c0_52], %67 {strides = array<i32>} : memref<1x56x512xf32, #tpu.memory_space<vmem>>, vector<1x56x512xf32>,
    %68 = arith.truncf %64 : vector<56x512xf32> to vector<56x512xbf16>
    %c0_53 = arith.constant 0 : index
    %c0_54 = arith.constant 0 : index
    %69 = vector.load %arg14[%c0_53, %c0_54] : memref<512x64xbf16, #tpu.memory_space<vmem>>, vector<512x64xbf16>
    %cst_55 = arith.constant dense<0.000000e+00> : vector<56x64xf32>
    %70 = tpu.matmul %68, %69, %cst_55 {dimension_numbers = #tpu.dot_dimension_numbers<[1], [0], [0], [1], [0, 0, 1, 1], [], []>} : vector<56x512xbf16>, vector<512x64xbf16>, vector<56x64xf32> -> vector<56x64xf32>
    %c0_56 = arith.constant 0 : index
    %c0_57 = arith.constant 0 : index
    %71 = vector.load %arg15[%c0_56, %c0_57] : memref<1x64xf32, #tpu.memory_space<vmem>>, vector<1x64xf32>
    %72 = vector.broadcast %71 : vector<1x64xf32> to vector<56x64xf32>
    %73 = arith.addf %70, %72 : vector<56x64xf32>
    %cst_58 = arith.constant 0.000000e+00 : f32
    %74 = vector.broadcast %cst_58 : f32 to vector<56x64xf32>
    %75 = arith.maximumf %73, %74 : vector<56x64xf32>
    %c0_59 = arith.constant 0 : index
    %c0_60 = arith.constant 0 : index
    %76 = vector.load %arg16[%c0_59, %c0_60] : memref<1x64xf32, #tpu.memory_space<vmem>>, vector<1x64xf32>
    %77 = vector.broadcast %76 : vector<1x64xf32> to vector<56x64xf32>
    %78 = arith.mulf %75, %77 : vector<56x64xf32>
    %cst_61 = arith.constant dense<0.000000e+00> : vector<56xf32>
    %79 = vector.multi_reduction <add>, %78, %cst_61 [1] : vector<56x64xf32> to vector<56xf32>
    %80 = vector.shape_cast %79 : vector<56xf32> to vector<56x1xf32>
    %c0_62 = arith.constant 0 : index
    %c0_63 = arith.constant 0 : index
    %81 = memref.load %arg17[%c0_62, %c0_63] : memref<1x1xf32, #tpu.memory_space<smem>>
    %82 = vector.broadcast %81 : f32 to vector<56x1xf32>
    %83 = arith.addf %80, %82 : vector<56x1xf32>
    %c0_64 = arith.constant 0 : index
    %c0_65 = arith.constant 0 : index
    %84 = vector.load %arg5[%c0_64, %c0_65] : memref<56x256xf32, #tpu.memory_space<vmem>>, vector<56x256xf32>
    %85 = vector.broadcast %83 : vector<56x1xf32> to vector<56x256xf32>
    %86 = arith.mulf %84, %85 : vector<56x256xf32>
    %cst_66 = arith.constant dense<0.000000e+00> : vector<256xf32>
    %87 = vector.multi_reduction <add>, %86, %cst_66 [0] : vector<56x256xf32> to vector<256xf32>
    %88 = vector.shape_cast %87 : vector<256xf32> to vector<1x256xf32>
    %89 = arith.negf %88 : vector<1x256xf32>
    %90 = math.exp %89 : vector<1x256xf32>
    %cst_67 = arith.constant 1.000000e+00 : f32
    %91 = vector.broadcast %cst_67 : f32 to vector<1x256xf32>
    %92 = arith.addf %91, %90 : vector<1x256xf32>
    %93 = arith.divf %91, %92 : vector<1x256xf32>
    %c0_68 = arith.constant 0 : index
    %c0_69 = arith.constant 0 : index
    %c0_70 = arith.constant 0 : index
    %94 = vector.load %arg19[%c0_68, %c0_69, %c0_70] : memref<1x1x256xf32, #tpu.memory_space<vmem>>, vector<1x1x256xf32>
    %95 = vector.shape_cast %94 : vector<1x1x256xf32> to vector<1x256xf32>
    %96 = vector.shape_cast %93 : vector<1x256xf32> to vector<1x1x256xf32>
    tpu.vector_store %arg19[%c0_68, %c0_69, %c0_70], %96 {strides = array<i32>} : memref<1x1x256xf32, #tpu.memory_space<vmem>>, vector<1x1x256xf32>,
    return
  }
  func.func @transform_0(%arg0: i32) -> (i32, i32, i32) {
    %c0_i32 = arith.constant 0 : i32
    %c0_i32_0 = arith.constant 0 : i32
    %c0_i32_1 = arith.constant 0 : i32
    return %arg0, %c0_i32, %c0_i32_0 : i32, i32, i32
  }
  func.func @transform_1(%arg0: i32) -> (i32, i32, i32) {
    %c0_i32 = arith.constant 0 : i32
    %c0_i32_0 = arith.constant 0 : i32
    %c0_i32_1 = arith.constant 0 : i32
    return %arg0, %c0_i32, %c0_i32_0 : i32, i32, i32
  }
  func.func @transform_2(%arg0: i32) -> (i32, i32, i32) {
    %c0_i32 = arith.constant 0 : i32
    %c0_i32_0 = arith.constant 0 : i32
    %c0_i32_1 = arith.constant 0 : i32
    return %arg0, %c0_i32, %c0_i32_0 : i32, i32, i32
  }
  func.func @transform_3(%arg0: i32) -> (i32, i32) {
    %c0_i32 = arith.constant 0 : i32
    %c0_i32_0 = arith.constant 0 : i32
    %c0_i32_1 = arith.constant 0 : i32
    return %c0_i32, %c0_i32_0 : i32, i32
  }
  func.func @transform_4(%arg0: i32) -> (i32, i32) {
    %c0_i32 = arith.constant 0 : i32
    %c0_i32_0 = arith.constant 0 : i32
    %c0_i32_1 = arith.constant 0 : i32
    return %c0_i32, %c0_i32_0 : i32, i32
  }
  func.func @transform_5(%arg0: i32) -> (i32, i32) {
    %c0_i32 = arith.constant 0 : i32
    %c0_i32_0 = arith.constant 0 : i32
    %c0_i32_1 = arith.constant 0 : i32
    return %c0_i32, %c0_i32_0 : i32, i32
  }
  func.func @transform_6(%arg0: i32) -> (i32, i32) {
    %c0_i32 = arith.constant 0 : i32
    %c0_i32_0 = arith.constant 0 : i32
    %c0_i32_1 = arith.constant 0 : i32
    return %c0_i32, %c0_i32_0 : i32, i32
  }
  func.func @transform_7(%arg0: i32) -> (i32, i32) {
    %c0_i32 = arith.constant 0 : i32
    %c0_i32_0 = arith.constant 0 : i32
    %c0_i32_1 = arith.constant 0 : i32
    return %c0_i32, %c0_i32_0 : i32, i32
  }
  func.func @transform_8(%arg0: i32) -> (i32, i32) {
    %c0_i32 = arith.constant 0 : i32
    %c0_i32_0 = arith.constant 0 : i32
    %c0_i32_1 = arith.constant 0 : i32
    return %c0_i32, %c0_i32_0 : i32, i32
  }
  func.func @transform_9(%arg0: i32) -> (i32, i32) {
    %c0_i32 = arith.constant 0 : i32
    %c0_i32_0 = arith.constant 0 : i32
    %c0_i32_1 = arith.constant 0 : i32
    return %c0_i32, %c0_i32_0 : i32, i32
  }
  func.func @transform_10(%arg0: i32) -> (i32, i32) {
    %c0_i32 = arith.constant 0 : i32
    %c0_i32_0 = arith.constant 0 : i32
    %c0_i32_1 = arith.constant 0 : i32
    return %c0_i32, %c0_i32_0 : i32, i32
  }
  func.func @transform_11(%arg0: i32) -> (i32, i32) {
    %c0_i32 = arith.constant 0 : i32
    %c0_i32_0 = arith.constant 0 : i32
    %c0_i32_1 = arith.constant 0 : i32
    return %c0_i32, %c0_i32_0 : i32, i32
  }
  func.func @transform_12(%arg0: i32) -> (i32, i32) {
    %c0_i32 = arith.constant 0 : i32
    %c0_i32_0 = arith.constant 0 : i32
    %c0_i32_1 = arith.constant 0 : i32
    return %c0_i32, %c0_i32_0 : i32, i32
  }
  func.func @transform_13(%arg0: i32) -> (i32, i32) {
    %c0_i32 = arith.constant 0 : i32
    %c0_i32_0 = arith.constant 0 : i32
    %c0_i32_1 = arith.constant 0 : i32
    return %c0_i32, %c0_i32_0 : i32, i32
  }
  func.func @transform_14(%arg0: i32) -> (i32, i32) {
    %c0_i32 = arith.constant 0 : i32
    %c0_i32_0 = arith.constant 0 : i32
    %c0_i32_1 = arith.constant 0 : i32
    return %c0_i32, %c0_i32_0 : i32, i32
  }
  func.func @transform_15(%arg0: i32) -> (i32, i32) {
    %c0_i32 = arith.constant 0 : i32
    %c0_i32_0 = arith.constant 0 : i32
    %c0_i32_1 = arith.constant 0 : i32
    return %c0_i32, %c0_i32_0 : i32, i32
  }
  func.func @transform_16(%arg0: i32) -> (i32, i32) {
    %c0_i32 = arith.constant 0 : i32
    %c0_i32_0 = arith.constant 0 : i32
    %c0_i32_1 = arith.constant 0 : i32
    return %c0_i32, %c0_i32_0 : i32, i32
  }
  func.func @transform_17(%arg0: i32) -> (i32, i32, i32) {
    %c0_i32 = arith.constant 0 : i32
    %c0_i32_0 = arith.constant 0 : i32
    %c0_i32_1 = arith.constant 0 : i32
    return %arg0, %c0_i32, %c0_i32_0 : i32, i32, i32
  }
  func.func @transform_18(%arg0: i32) -> (i32, i32, i32) {
    %c0_i32 = arith.constant 0 : i32
    %c0_i32_0 = arith.constant 0 : i32
    %c0_i32_1 = arith.constant 0 : i32
    return %arg0, %c0_i32, %c0_i32_0 : i32, i32, i32
  }
}

</mosaic_0001>

<bundles_post_ra>
// kernel: resnet_depth_map_forward.1
= control target key start
LH: loop header
LB: loop body
LE: loop exit
PB: predicated region body
PF: predicated region fallthrough
CT: control target
= control target key end

     0   :  { %s12475_s29 = smov 0   ;;  %s17911_s0 = inlined_call_operand.vmem [shape: bf16[2,56,256], index: 0, kind: input, shape index: {}]   ;;  %s17912_s1 = inlined_call_operand.vmem [shape: bf16[2,56,512], index: 1, kind: input, shape index: {}]   ;;  %s17913_s2 = inlined_call_operand.vmem [shape: bf16[2,56,56], index: 2, kind: input, shape index: {}]   ;;  %s17914_s3 = inlined_call_operand.vmem [shape: f32[1,112], index: 3, kind: input, shape index: {}]   ;;  %s17915_s4 = inlined_call_operand.vmem [shape: f32[56,256], index: 4, kind: input, shape index: {}]   ;;  %s17916_s5 = inlined_call_operand.vmem [shape: bf16[256,512], index: 5, kind: input, shape index: {}]   ;;  %s17917_s6 = inlined_call_operand.vmem [shape: f32[1,512], index: 6, kind: input, shape index: {}]   ;;  %s17918_s7 = inlined_call_operand.vmem [shape: bf16[512,768], index: 7, kind: input, shape index: {}]   ;;  %s17919_s8 = inlined_call_operand.vmem [shape: f32[1,768], index: 8, kind: input, shape index: {}]   ;;  %s17920_s9 = inlined_call_operand.vmem [shape: bf16[256,512], index: 9, kind: input, shape index: {}]   ;;  %s17921_s10 = inlined_call_operand.vmem [shape: f32[1,512], index: 10, kind: input, shape index: {}]   ;;  %s17922_s11 = inlined_call_operand.vmem [shape: bf16[512,512], index: 11, kind: input, shape index: {}]   ;;  %s17923_s12 = inlined_call_operand.vmem [shape: bf16[512,512], index: 12, kind: input, shape index: {}]   ;;  %s17924_s13 = inlined_call_operand.vmem [shape: bf16[512,64], index: 13, kind: input, shape index: {}]   ;;  %s17925_s14 = inlined_call_operand.vmem [shape: f32[1,64], index: 14, kind: input, shape index: {}]   ;;  %s17926_s15 = inlined_call_operand.vmem [shape: f32[1,64], index: 15, kind: input, shape index: {}]   ;;  %s17927_s16 = inlined_call_operand.<no memory space> [shape: f32[1,1], index: 16, kind: input, shape index: {}]   ;;  %s17928_s17 = inlined_call_operand.vmem [shape: f32[2,56,512], index: 17, kind: output, shape index: {0}]   ;;  %s17929_s18 = inlined_call_operand.vmem [shape: f32[2,1,256], index: 18, kind: output, shape index: {1}]  }
   0x1   :  { %17970 = sst [smem:[#allocation26_spill]] %s17911_s0 }
   0x2   :  { %17971 = sst [smem:[#allocation27_spill]] %s17912_s1 }
   0x3   :  { %17972 = sst [smem:[#allocation28_spill]] %s17913_s2 }
   0x4   :  { %24 = sst [smem:[#allocation3]] %s17927_s16 }
   0x5 LB: > { %s8839_s30 = sadd.s32 4294967295, %s12375_s29   ;;  %p8843_p0 = scmp.ge.s32.totalorder %s12375_s29, 1  ;;  %s12375_s29 = sphi %s12475_s29, %s30_s29  }
   0x6   : > { %p536_p1 = scmp.lt.s32.totalorder %s12375_s29, 3 }
   0x8   : > { %p537_p2 = pnand %p8843_p0, %p536_p1 }
   0xa   : > { %540 = sbr.rel (%p537_p2) target bundleno = 3017 (0xbc9), region = 88 }
   0xf   : > { %v8987_v0 = vld [vmem:[%s17916_s5 + $0xe0] sm:$0xf]  ;;  %v11643_v1 = vld [vmem:[%s17916_s5 + $0xec] sm:$0xf0]  ;;  %v11641_v5 = vld [vmem:[%s17916_s5 + $0xe4] sm:$0xf] }
  0x10   : > { %v9115_v2 = vld [vmem:[%s17916_s5 + $0x1e0] sm:$0xf]  ;;  %v8988_v3 = vor.u32 %v11643_v1, %v8987_v0  ;;  %v11675_v4 = vld [vmem:[%s17916_s5 + $0x1ec] sm:$0xf0]  ;;  %v8989_v6 = vld [vmem:[%s17916_s5 + $0xf0] sm:$0xf0] }
  0x11   : > { %v9116_v7 = vor.u32 %v11675_v4, %v9115_v2  ;;  %v8992_v8 = vor.u32 %v11641_v5, %v8989_v6  ;;  %v11673_v9 = vld [vmem:[%s17916_s5 + $0x1e4] sm:$0xf]  ;;  %v9117_v10 = vld [vmem:[%s17916_s5 + $0x1f0] sm:$0xf0]  ;;  %v8971_v11 = vld [vmem:[%s17916_s5 + $0xc0] sm:$0xf] }
  0x12   : > { %1067 = vmatpush.bf16.msra.mxu0 %v8988_v3  ;;  %v9120_v12 = vor.u32 %v11673_v9, %v9117_v10  ;;  %v11639_v13 = vld [vmem:[%s17916_s5 + $0xcc] sm:$0xf0]  ;;  %v9099_v14 = vld [vmem:[%s17916_s5 + $0x1c0] sm:$0xf]  ;;  %v11637_v18 = vld [vmem:[%s17916_s5 + $0xc4] sm:$0xf] }
  0x13   : > { %v11671_v15 = vld [vmem:[%s17916_s5 + $0x1cc] sm:$0xf0]  ;;  %1095 = vmatpush.bf16.msra.mxu1 %v9116_v7  ;;  %1123 = vmatpush.bf16.msra.mxu2 %v8992_v8  ;;  %v8972_v16 = vor.u32 %v11639_v13, %v8971_v11  ;;  %v8973_v19 = vld [vmem:[%s17916_s5 + $0xd0] sm:$0xf0]  ;;  %v11669_v20 = vld [vmem:[%s17916_s5 + $0x1c4] sm:$0xf] }
  0x14   : > { %v9100_v17 = vor.u32 %v11671_v15, %v9099_v14  ;;  %1151 = vmatpush.bf16.msra.mxu3 %v9120_v12  ;;  %v8976_v21 = vor.u32 %v11637_v18, %v8973_v19  ;;  %v9101_v22 = vld [vmem:[%s17916_s5 + $0x1d0] sm:$0xf0]  ;;  %v8955_v23 = vld [vmem:[%s17916_s5 + $0xa0] sm:$0xf]  ;;  %v11635_v24 = vld [vmem:[%s17916_s5 + $0xac] sm:$0xf0] }
  0x15   : > { %v9104_v25 = vor.u32 %v11669_v20, %v9101_v22  ;;  %v9083_v26 = vld [vmem:[%s17916_s5 + $0x1a0] sm:$0xf]  ;;  %v11667_v27 = vld [vmem:[%s17916_s5 + $0x1ac] sm:$0xf0]  ;;  %v11633_v28 = vld [vmem:[%s17916_s5 + $0xa4] sm:$0xf]  ;;  %v8956_v29 = vor.u32 %v11635_v24, %v8955_v23 }
  0x16   : > { %1068 = vmatpush.bf16.msra.mxu0 %v8972_v16  ;;  %v8957_v30 = vld [vmem:[%s17916_s5 + $0xb0] sm:$0xf0]  ;;  %v11665_v31 = vld [vmem:[%s17916_s5 + $0x1a4] sm:$0xf]  ;;  %v9084_v33 = vor.u32 %v11667_v27, %v9083_v26  ;;  %v8939_v35 = vld [vmem:[%s17916_s5 + $0x80] sm:$0xf] }
  0x17   : > { %v9085_v32 = vld [vmem:[%s17916_s5 + $0x1b0] sm:$0xf0]  ;;  %1096 = vmatpush.bf16.msra.mxu1 %v9100_v17  ;;  %1124 = vmatpush.bf16.msra.mxu2 %v8976_v21  ;;  %v8960_v34 = vor.u32 %v11633_v28, %v8957_v30  ;;  %v11631_v36 = vld [vmem:[%s17916_s5 + $0x8c] sm:$0xf0]  ;;  %v9067_v37 = vld [vmem:[%s17916_s5 + $0x180] sm:$0xf] }
  0x18   : > { %1152 = vmatpush.bf16.msra.mxu3 %v9104_v25  ;;  %v9088_v38 = vor.u32 %v11665_v31, %v9085_v32  ;;  %v11663_v39 = vld [vmem:[%s17916_s5 + $0x18c] sm:$0xf0]  ;;  %v11629_v40 = vld [vmem:[%s17916_s5 + $0x84] sm:$0xf]  ;;  %v8941_v41 = vld [vmem:[%s17916_s5 + $0x90] sm:$0xf0]  ;;  %v8940_v44 = vor.u32 %v11631_v36, %v8939_v35 }
  0x19   : > { %v11661_v42 = vld [vmem:[%s17916_s5 + $0x184] sm:$0xf]  ;;  %v9069_v43 = vld [vmem:[%s17916_s5 + $0x190] sm:$0xf0]  ;;  %v9068_v45 = vor.u32 %v11663_v39, %v9067_v37  ;;  %v8944_v46 = vor.u32 %v11629_v40, %v8941_v41  ;;  %v8923_v47 = vld [vmem:[%s17916_s5 + $0x60] sm:$0xf] }
  0x1a   : > { %1069 = vmatpush.bf16.msra.mxu0 %v8956_v29  ;;  %v11627_v48 = vld [vmem:[%s17916_s5 + $0x6c] sm:$0xf0]  ;;  %v9051_v49 = vld [vmem:[%s17916_s5 + $0x160] sm:$0xf]  ;;  %v9072_v50 = vor.u32 %v11661_v42, %v9069_v43  ;;  %v11625_v52 = vld [vmem:[%s17916_s5 + $0x64] sm:$0xf] }
  0x1b   : > { %1097 = vmatpush.bf16.msra.mxu1 %v9084_v33  ;;  %1125 = vmatpush.bf16.msra.mxu2 %v8960_v34  ;;  %v11659_v51 = vld [vmem:[%s17916_s5 + $0x16c] sm:$0xf0]  ;;  %v8925_v53 = vld [vmem:[%s17916_s5 + $0x70] sm:$0xf0]  ;;  %v11657_v54 = vld [vmem:[%s17916_s5 + $0x164] sm:$0xf]  ;;  %v8924_v56 = vor.u32 %v11627_v48, %v8923_v47 }
  0x1c   : > { %1153 = vmatpush.bf16.msra.mxu3 %v9088_v38  ;;  %v9053_v55 = vld [vmem:[%s17916_s5 + $0x170] sm:$0xf0]  ;;  %v9052_v57 = vor.u32 %v11659_v51, %v9051_v49  ;;  %v8928_v58 = vor.u32 %v11625_v52, %v8925_v53  ;;  %v8907_v59 = vld [vmem:[%s17916_s5 + $0x40] sm:$0xf]  ;;  %v11623_v60 = vld [vmem:[%s17916_s5 + $0x4c] sm:$0xf0] }
  0x1d   : > { %v9035_v61 = vld [vmem:[%s17916_s5 + $0x140] sm:$0xf]  ;;  %v9056_v62 = vor.u32 %v11657_v54, %v9053_v55  ;;  %v11655_v63 = vld [vmem:[%s17916_s5 + $0x14c] sm:$0xf0]  ;;  %v11621_v0 = vld [vmem:[%s17916_s5 + $0x44] sm:$0xf]  ;;  %v8908_v4 = vor.u32 %v11623_v60, %v8907_v59 }
  0x1e   : > { %1070 = vmatpush.bf16.msra.mxu0 %v8940_v44  ;;  %v8909_v1 = vld [vmem:[%s17916_s5 + $0x50] sm:$0xf0]  ;;  %v11653_v2 = vld [vmem:[%s17916_s5 + $0x144] sm:$0xf]  ;;  %v8891_v5 = vld [vmem:[%s17916_s5 + $0x20] sm:$0xf]  ;;  %v9036_v8 = vor.u32 %v11655_v63, %v9035_v61 }
  0x1f   : > { %1098 = vmatpush.bf16.msra.mxu1 %v9068_v45  ;;  %1126 = vmatpush.bf16.msra.mxu2 %v8944_v46  ;;  %v9037_v3 = vld [vmem:[%s17916_s5 + $0x150] sm:$0xf0]  ;;  %v11619_v6 = vld [vmem:[%s17916_s5 + $0x2c] sm:$0xf0]  ;;  %v9019_v7 = vld [vmem:[%s17916_s5 + $0x120] sm:$0xf]  ;;  %v8912_v9 = vor.u32 %v11621_v0, %v8909_v1 }
  0x20   : > { %1154 = vmatpush.bf16.msra.mxu3 %v9072_v50  ;;  %v11651_v10 = vld [vmem:[%s17916_s5 + $0x12c] sm:$0xf0]  ;;  %v11617_v11 = vld [vmem:[%s17916_s5 + $0x24] sm:$0xf]  ;;  %v8893_v12 = vld [vmem:[%s17916_s5 + $0x30] sm:$0xf0]  ;;  %v9040_v13 = vor.u32 %v11653_v2, %v9037_v3  ;;  %v8892_v16 = vor.u32 %v11619_v6, %v8891_v5 }
  0x21   : > { %v11649_v14 = vld [vmem:[%s17916_s5 + $0x124] sm:$0xf]  ;;  %p604_p3 = scmp.lt.s32.totalorder %s8839_s30, 1  ;;  %v9021_v15 = vld [vmem:[%s17916_s5 + $0x130] sm:$0xf0]  ;;  %v9020_v18 = vor.u32 %v11651_v10, %v9019_v7  ;;  %v8896_v19 = vor.u32 %v11617_v11, %v8893_v12  ;;  %s17973_s21 = sld [smem:[#allocation26_spill]] }
  0x22   : > { %1071 = vmatpush.bf16.msra.mxu0 %v8924_v56  ;;  %v8875_v17 = vld [vmem:[%s17916_s5] sm:$0xf]  ;;  %v11615_v20 = vld [vmem:[%s17916_s5 + $0xc] sm:$0xf0]  ;;  %v9024_v23 = vor.u32 %v11649_v14, %v9021_v15  ;;  %v11613_v24 = vld [vmem:[%s17916_s5 + $0x4] sm:$0xf] }
  0x23   : > { %1099 = vmatpush.bf16.msra.mxu1 %v9052_v57  ;;  %1127 = vmatpush.bf16.msra.mxu2 %v8928_v58  ;;  %s18093_s30 = smov (!%p604_p3, %s8839_s30), 1  ;;  %v9003_v21 = vld [vmem:[%s17916_s5 + $0x100] sm:$0xf]  ;;  %v11647_v22 = vld [vmem:[%s17916_s5 + $0x10c] sm:$0xf0]  ;;  %v8876_v28 = vor.u32 %v11615_v20, %v8875_v17  ;;  %s17974_s2 = sld [smem:[#allocation27_spill]] }
  0x24   : > { %1155 = vmatpush.bf16.msra.mxu3 %v9056_v62  ;;  %v8877_v25 = vld [vmem:[%s17916_s5 + $0x10] sm:$0xf0]  ;;  %s12288_s27 = smul.u32 56, %s18093_s30  ;;  %v11645_v26 = vld [vmem:[%s17916_s5 + $0x104] sm:$0xf]  ;;  %v9004_v29 = vor.u32 %v11647_v22, %v9003_v21  ;;  %vm1469_vm0 = vcmask 1043456  }
  0x25   : > { %v9005_v27 = vld [vmem:[%s17916_s5 + $0x110] sm:$0xf0]  ;;  %v8880_v30 = vor.u32 %v11613_v24, %v8877_v25  ;;  %v8995_v38 = vld [vmem:[%s17916_s5 + $0xe8] sm:$0xf]  ;;  %v11644_v39 = vld [vmem:[%s17916_s5 + $0xf4] sm:$0xf0] }
  0x26   : > { %1072 = vmatpush.bf16.msra.mxu0 %v8908_v4  ;;  %v9008_v34 = vor.u32 %v11645_v26, %v9005_v27  ;;  %v9123_v40 = vld [vmem:[%s17916_s5 + $0x1e8] sm:$0xf]  ;;  %v8996_v41 = vor.u32 %v11644_v39, %v8995_v38  ;;  %v11676_v42 = vld [vmem:[%s17916_s5 + $0x1f4] sm:$0xf0]  ;;  %v11642_v43 = vld [vmem:[%s17916_s5 + $0xec] sm:$0xf] }
  0x27   : > { %1100 = vmatpush.bf16.msra.mxu1 %v9036_v8  ;;  %1128 = vmatpush.bf16.msra.mxu2 %v8912_v9  ;;  %s12685_s22 = scalar_lea.vmem %s17973_s21, %s12288_s27  ;;  %v8997_v44 = vld [vmem:[%s17916_s5 + $0xf8] sm:$0xf0]  ;;  %v9124_v45 = vor.u32 %v11676_v42, %v9123_v40  ;;  %v11674_v47 = vld [vmem:[%s17916_s5 + $0x1ec] sm:$0xf]  ;;  %v8979_v49 = vld [vmem:[%s17916_s5 + $0xc8] sm:$0xf] }
  0x28   : > { %1156 = vmatpush.bf16.msra.mxu3 %v9040_v13  ;;  %v8851_v31 = vld [vmem:[%s12685_s22] sm:$0xf]  ;;  %v11608_v32 = vld [vmem:[%s12685_s22 + $0x4] sm:$0xf0]  ;;  %v11607_v33 = vld [vmem:[%s12685_s22 + $0x4] sm:$0xf]  ;;  %v9000_v46 = vor.u32 %v11642_v43, %v8997_v44 }
  0x29   : > { %v8853_v35 = vld [vmem:[%s12685_s22 + $0x8] sm:$0xf0]  ;;  %v12691_v36 = vor.u32 %v11608_v32, %v8851_v31  ;;  %v9125_v48 = vld [vmem:[%s17916_s5 + $0x1f8] sm:$0xf0]  ;;  %v11640_v51 = vld [vmem:[%s17916_s5 + $0xd4] sm:$0xf0] }
  0x2a   : > { %1073 = vmatpush.bf16.msra.mxu0 %v8892_v16  ;;  %v12693_v37 = vor.u32 %v11607_v33, %v8853_v35  ;;  %v9128_v50 = vor.u32 %v11674_v47, %v9125_v48  ;;  %v9107_v52 = vld [vmem:[%s17916_s5 + $0x1c8] sm:$0xf]  ;;  %v11672_v53 = vld [vmem:[%s17916_s5 + $0x1d4] sm:$0xf0]  ;;  %v8980_v54 = vor.u32 %v11640_v51, %v8979_v49  ;;  %v11638_v56 = vld [vmem:[%s17916_s5 + $0xcc] sm:$0xf] }
  0x2b   : > { %1101 = vmatpush.bf16.msra.mxu1 %v9020_v18  ;;  %1129 = vmatpush.bf16.msra.mxu2 %v8896_v19  ;;  %v9108_v55 = vor.u32 %v11672_v53, %v9107_v52  ;;  %v8981_v57 = vld [vmem:[%s17916_s5 + $0xd8] sm:$0xf0]  ;;  %v11670_v58 = vld [vmem:[%s17916_s5 + $0x1cc] sm:$0xf]  ;;  %v8963_v61 = vld [vmem:[%s17916_s5 + $0xa8] sm:$0xf] }
  0x2c   : > { %1157 = vmatpush.bf16.msra.mxu3 %v9024_v23  ;;  %v8984_v59 = vor.u32 %v11638_v56, %v8981_v57  ;;  %v9109_v60 = vld [vmem:[%s17916_s5 + $0x1d8] sm:$0xf0]  ;;  %v11636_v62 = vld [vmem:[%s17916_s5 + $0xb4] sm:$0xf0]  ;;  %v9091_v0 = vld [vmem:[%s17916_s5 + $0x1a8] sm:$0xf] }
  0x2d   : > { %v9112_v63 = vor.u32 %v11670_v58, %v9109_v60  ;;  %v11668_v1 = vld [vmem:[%s17916_s5 + $0x1b4] sm:$0xf0]  ;;  %v11634_v2 = vld [vmem:[%s17916_s5 + $0xac] sm:$0xf]  ;;  %v8964_v3 = vor.u32 %v11636_v62, %v8963_v61  ;;  %v8965_v4 = vld [vmem:[%s17916_s5 + $0xb8] sm:$0xf0] }
  0x2e   : > { %1074 = vmatpush.bf16.msra.mxu0 %v8876_v28  ;;  %v11666_v5 = vld [vmem:[%s17916_s5 + $0x1ac] sm:$0xf]  ;;  %v9093_v6 = vld [vmem:[%s17916_s5 + $0x1b8] sm:$0xf0]  ;;  %v8859_v7 = vld [vmem:[%s12685_s22 + $0x10] sm:$0xf]  ;;  %v9092_v8 = vor.u32 %v11668_v1, %v9091_v0  ;;  %v8968_v9 = vor.u32 %v11634_v2, %v8965_v4 }
  0x2f   : > { %1102 = vmatpush.bf16.msra.mxu1 %v9004_v29  ;;  %1130 = vmatpush.bf16.msra.mxu2 %v8880_v30  ;;  %v8947_v10 = vld [vmem:[%s17916_s5 + $0x88] sm:$0xf]  ;;  %v11632_v11 = vld [vmem:[%s17916_s5 + $0x94] sm:$0xf0]  ;;  %v9096_v13 = vor.u32 %v11666_v5, %v9093_v6  ;;  %v11609_v16 = vld [vmem:[%s12685_s22 + $0x14] sm:$0xf] }
  0x30   : > { %1158 = vmatpush.bf16.msra.mxu3 %v9008_v34  ;;  %v11610_v12 = vld [vmem:[%s12685_s22 + $0x14] sm:$0xf0]  ;;  %v9075_v14 = vld [vmem:[%s17916_s5 + $0x188] sm:$0xf]  ;;  %v8861_v17 = vld [vmem:[%s12685_s22 + $0x18] sm:$0xf0]  ;;  %v8948_v18 = vor.u32 %v11632_v11, %v8947_v10 }
  0x31   : > { %1075 = vmatmul.bf16.vlgmr.msra.gmra.mxu0 %v12691_v36  ;;  %v11664_v15 = vld [vmem:[%s17916_s5 + $0x194] sm:$0xf0]  ;;  %v11630_v19 = vld [vmem:[%s17916_s5 + $0x8c] sm:$0xf]  ;;  %v8949_v20 = vld [vmem:[%s17916_s5 + $0x98] sm:$0xf0]  ;;  %v12793_v21 = vor.u32 %v11610_v12, %v8859_v7  ;;  %v12801_v25 = vor.u32 %v11609_v16, %v8861_v17 }
  0x32   : > { %1103 = vmatmul.bf16.vlgmr.msra.gmra.mxu1 %v12693_v37  ;;  %1131 = vmatmul.bf16.vlgmr.msra.gmra.mxu2 %v12691_v36  ;;  %v9076_v22 = vor.u32 %v11664_v15, %v9075_v14  ;;  %v11662_v23 = vld [vmem:[%s17916_s5 + $0x18c] sm:$0xf]  ;;  %v9077_v24 = vld [vmem:[%s17916_s5 + $0x198] sm:$0xf0]  ;;  %v8952_v26 = vor.u32 %v11630_v19, %v8949_v20  ;;  %v8931_v28 = vld [vmem:[%s17916_s5 + $0x68] sm:$0xf] }
  0x33   : > { %1159 = vmatmul.bf16.vlgmr.msra.gmra.mxu3 %v12693_v37  ;;  %1179 = vmatpush.bf16.msrb.mxu0 %v8996_v41  ;;  %v9080_v27 = vor.u32 %v11662_v23, %v9077_v24  ;;  %v11628_v29 = vld [vmem:[%s17916_s5 + $0x74] sm:$0xf0]  ;;  %v9059_v30 = vld [vmem:[%s17916_s5 + $0x168] sm:$0xf]  ;;  %v11626_v33 = vld [vmem:[%s17916_s5 + $0x6c] sm:$0xf] }
  0x34   : > { %1207 = vmatpush.bf16.msrb.mxu1 %v9124_v45  ;;  %1235 = vmatpush.bf16.msrb.mxu2 %v9000_v46  ;;  %v8932_v31 = vor.u32 %v11628_v29, %v8931_v28  ;;  %v11660_v32 = vld [vmem:[%s17916_s5 + $0x174] sm:$0xf0]  ;;  %v8933_v34 = vld [vmem:[%s17916_s5 + $0x78] sm:$0xf0]  ;;  %v11658_v39 = vld [vmem:[%s17916_s5 + $0x16c] sm:$0xf] }
  0x35   : > { %1263 = vmatpush.bf16.msrb.mxu3 %v9128_v50  ;;  %v9060_v35 = vor.u32 %v11660_v32, %v9059_v30  ;;  %v8936_v38 = vor.u32 %v11626_v33, %v8933_v34  ;;  %v9061_v40 = vld [vmem:[%s17916_s5 + $0x178] sm:$0xf0]  ;;  %v8915_v41 = vld [vmem:[%s17916_s5 + $0x48] sm:$0xf]  ;;  %v11624_v43 = vld [vmem:[%s17916_s5 + $0x54] sm:$0xf0] }
  0x36   : > { %v9064_v42 = vor.u32 %v11658_v39, %v9061_v40  ;;  %v9043_v44 = vld [vmem:[%s17916_s5 + $0x148] sm:$0xf]  ;;  %v11656_v45 = vld [vmem:[%s17916_s5 + $0x154] sm:$0xf0]  ;;  %v8916_v46 = vor.u32 %v11624_v43, %v8915_v41  ;;  %v11622_v48 = vld [vmem:[%s17916_s5 + $0x4c] sm:$0xf] }
  0x37   : > { %1180 = vmatpush.bf16.msrb.mxu0 %v8980_v54  ;;  %v9044_v47 = vor.u32 %v11656_v45, %v9043_v44  ;;  %v8917_v49 = vld [vmem:[%s17916_s5 + $0x58] sm:$0xf0]  ;;  %v11654_v50 = vld [vmem:[%s17916_s5 + $0x14c] sm:$0xf]  ;;  %v8899_v52 = vld [vmem:[%s17916_s5 + $0x28] sm:$0xf] }
  0x38   : > { %1208 = vmatpush.bf16.msrb.mxu1 %v9108_v55  ;;  %1236 = vmatpush.bf16.msrb.mxu2 %v8984_v59  ;;  %v9045_v51 = vld [vmem:[%s17916_s5 + $0x158] sm:$0xf0]  ;;  %v11620_v53 = vld [vmem:[%s17916_s5 + $0x34] sm:$0xf0]  ;;  %v8920_v54 = vor.u32 %v11622_v48, %v8917_v49  ;;  %v9027_v55 = vld [vmem:[%s17916_s5 + $0x128] sm:$0xf] }
  0x39   : > { %1264 = vmatpush.bf16.msrb.mxu3 %v9112_v63  ;;  %v11652_v56 = vld [vmem:[%s17916_s5 + $0x134] sm:$0xf0]  ;;  %v8867_v57 = vld [vmem:[%s12685_s22 + $0x20] sm:$0xf]  ;;  %v9048_v58 = vor.u32 %v11654_v50, %v9045_v51  ;;  %v8900_v59 = vor.u32 %v11620_v53, %v8899_v52  ;;  %v11618_v60 = vld [vmem:[%s17916_s5 + $0x2c] sm:$0xf] }
  0x3a   : > { %v8901_v61 = vld [vmem:[%s17916_s5 + $0x38] sm:$0xf0]  ;;  %v11650_v62 = vld [vmem:[%s17916_s5 + $0x12c] sm:$0xf]  ;;  %v9028_v63 = vor.u32 %v11652_v56, %v9027_v55  ;;  %v8883_v1 = vld [vmem:[%s17916_s5 + $0x8] sm:$0xf] }
  0x3b   : > { %1181 = vmatpush.bf16.msrb.mxu0 %v8964_v3  ;;  %v9029_v0 = vld [vmem:[%s17916_s5 + $0x138] sm:$0xf0]  ;;  %v11616_v2 = vld [vmem:[%s17916_s5 + $0x14] sm:$0xf0]  ;;  %v11612_v3 = vld [vmem:[%s12685_s22 + $0x24] sm:$0xf0] }
  0x3c   : > { %1209 = vmatpush.bf16.msrb.mxu1 %v9092_v8  ;;  %1237 = vmatpush.bf16.msrb.mxu2 %v8968_v9  ;;  %v9011_v4 = vld [vmem:[%s17916_s5 + $0x108] sm:$0xf]  ;;  %v11648_v5 = vld [vmem:[%s17916_s5 + $0x114] sm:$0xf0]  ;;  %v11611_v6 = vld [vmem:[%s12685_s22 + $0x24] sm:$0xf]  ;;  %v8904_v8 = vor.u32 %v11618_v60, %v8901_v61  ;;  %v9032_v9 = vor.u32 %v11650_v62, %v9029_v0  ;;  %v8884_v10 = vor.u32 %v11616_v2, %v8883_v1 }
  0x3d   : > { %1265 = vmatpush.bf16.msrb.mxu3 %v9096_v13  ;;  %v8869_v7 = vld [vmem:[%s12685_s22 + $0x28] sm:$0xf0]  ;;  %v8885_v12 = vld [vmem:[%s17916_s5 + $0x18] sm:$0xf0]  ;;  %v12901_v13 = vor.u32 %v11612_v3, %v8867_v57  ;;  %v9012_v14 = vor.u32 %v11648_v5, %v9011_v4  ;;  %v635_v20 = vld [vmem:[%s12685_s22 + $0x30] sm:$0xff]  ;;  %s12289_s22 = smul.u32 112, %s18093_s30 }
  0x3e   : > { %v11614_v11 = vld [vmem:[%s17916_s5 + $0xc] sm:$0xf]  ;;  %v9013_v16 = vld [vmem:[%s17916_s5 + $0x118] sm:$0xf0]  ;;  %v12909_v17 = vor.u32 %v11611_v6, %v8869_v7  ;;  %v730_v23 = vunpack.c.h.b16 %v635_v20  ;;  %s12290_s24 = smul.u32 28, %s18093_s30  ;;  %s17975_s0 = sld [smem:[#allocation28_spill]] }
  0x3f   : > { %1182 = vmatpush.bf16.msrb.mxu0 %v8948_v18  ;;  %v11646_v15 = vld [vmem:[%s17916_s5 + $0x10c] sm:$0xf]  ;;  %v8888_v18 = vor.u32 %v11614_v11, %v8885_v12  ;;  %s12932_s23 = scalar_lea.vmem %s17974_s2, %s12289_s22  ;;  %v12976_v11 = vld [vmem:[%s17917_s6] sm:$0xf]  ;;  %vm1456_vm1 = vcmask 457728   ;;  %vm4146_vm2 = vcmask 916480  }
  0x40   : > { %1210 = vmatpush.bf16.msrb.mxu1 %v9076_v22  ;;  %1238 = vmatpush.bf16.msrb.mxu2 %v8952_v26  ;;  %v9016_v19 = vor.u32 %v11646_v15, %v9013_v16  ;;  %v729_v22 = vunpack.c.l.b16 %v635_v20  ;;  %v12918_v26 = vpack.c.b16 %v730_v23, %v730_v23  ;;  %v1367_v28 = vld [vmem:[%s12932_s23 + $0x68] sm:$0xff]  ;;  %v9175_v41 = vld [vmem:[%s12932_s23 + $0x40] sm:$0xf]  ;;  %v9177_v43 = vld [vmem:[%s12932_s23 + $0x50] sm:$0xf0]  ;;  %v12984_v12 = vperm.slane %v12976_v11, 0 }
  0x41   : > { %1080 = vmatmul.bf16.gmra.mxu0 %v12793_v21  ;;  %1266 = vmatpush.bf16.msrb.mxu3 %v9080_v27  ;;  %v1366_v27 = vld [vmem:[%s12932_s23 + $0x60] sm:$0xff]  ;;  %v1427_v32 = vunpack.c.h.b16 %v1367_v28  ;;  %v9183_v45 = vld [vmem:[%s12932_s23 + $0x48] sm:$0xf]  ;;  %v9185_v49 = vld [vmem:[%s12932_s23 + $0x58] sm:$0xf0]  ;;  %s8619_s16 = sld [smem:[#allocation3]] }
  0x42   : > { %1108 = vmatmul.bf16.gmra.mxu1 %v12801_v25  ;;  %1136 = vmatmul.bf16.gmra.mxu2 %v12793_v21  ;;  %v12916_v24 = vpack.c.b16 %v729_v22, %v729_v22  ;;  %v1424_v29 = vunpack.c.l.b16 %v1366_v27  ;;  %v1425_v30 = vunpack.c.h.b16 %v1366_v27  ;;  %v9159_v50 = vld [vmem:[%s12932_s23 + $0x20] sm:$0xf]  ;;  %v11686_v51 = vld [vmem:[%s12932_s23 + $0x2c] sm:$0xf0]  ;;  %v11684_v53 = vld [vmem:[%s12932_s23 + $0x24] sm:$0xf] }
  0x43   : > { %1164 = vmatmul.bf16.gmra.mxu3 %v12801_v25  ;;  %1183 = vmatpush.bf16.msrb.mxu0 %v8932_v31  ;;  %v1426_v31 = vunpack.c.l.b16 %v1367_v28  ;;  %v1443_v34 = vpack.c.b16 %v1427_v32, %v1427_v32  ;;  %v9167_v55 = vld [vmem:[%s12932_s23 + $0x28] sm:$0xf]  ;;  %v9160_v56 = vor.u32 %v11686_v51, %v9159_v50  ;;  %v9169_v60 = vld [vmem:[%s12932_s23 + $0x38] sm:$0xf0]  ;;  %v11682_v0 = vld [vmem:[%s12932_s23 + $0xc] sm:$0xf0] }
  0x44   : > { %1211 = vmatpush.bf16.msrb.mxu1 %v9060_v35  ;;  %1239 = vmatpush.bf16.msrb.mxu2 %v8936_v38  ;;  %v11680_v1 = vld [vmem:[%s12932_s23 + $0x4] sm:$0xf]  ;;  %v9145_v3 = vld [vmem:[%s12932_s23 + $0x10] sm:$0xf0]  ;;  %v9151_v4 = vld [vmem:[%s12932_s23 + $0x8] sm:$0xf]  ;;  %s12981_s19 = scalar_lea.vmem %s17975_s0, %s12290_s24 }
  0x45   : > { %1267 = vmatpush.bf16.msrb.mxu3 %v9064_v42  ;;  %v1442_v33 = vpack.c.b16 %v1426_v31, %v1426_v31  ;;  %v1480_v40 = vsel %vm1469_vm0, %v1443_v34, 0  ;;  %v11690_v42 = vld [vmem:[%s12932_s23 + $0x4c] sm:$0xf0]  ;;  %v11683_v5 = vld [vmem:[%s12932_s23 + $0x14] sm:$0xf0]  ;;  %v9148_v6 = vor.u32 %v11680_v1, %v9145_v3  ;;  %s12291_s24 = smul.u32 224, %s18093_s30 }
  0x46   : > { %v9152_v7 = vor.u32 %v11683_v5, %v9151_v4  ;;  %v9679_v22 = vld [vmem:[%s17918_s7 + $0x2d0] sm:$0xf]  ;;  %v11813_v23 = vld [vmem:[%s17918_s7 + $0x2e4] sm:$0xf0]  ;;  %v9463_v28 = vld [vmem:[%s17918_s7 + $0x120] sm:$0xf] }
  0x47   : > { %1184 = vmatpush.bf16.msrb.mxu0 %v8916_v46  ;;  %v1477_v39 = vsel %vm1469_vm0, %v1442_v33, 0  ;;  %v11691_v46 = vld [vmem:[%s12932_s23 + $0x54] sm:$0xf0]  ;;  %v9607_v51 = vld [vmem:[%s17918_s7 + $0x240] sm:$0xf]  ;;  %s17554_s2 = scalar_lea.vmem %s17928_s17, %s12291_s24  ;;  %s8848_s1 = sshll.u32 %s18093_s30, 1 }
  0x48   : > { %1212 = vmatpush.bf16.msrb.mxu1 %v9044_v47  ;;  %1240 = vmatpush.bf16.msrb.mxu2 %v8920_v54  ;;  %v11689_v47 = vld [vmem:[%s12932_s23 + $0x4c] sm:$0xf]  ;;  %v9184_v48 = vor.u32 %v11691_v46, %v9183_v45  ;;  %v9161_v54 = vld [vmem:[%s12932_s23 + $0x30] sm:$0xf0]  ;;  %v11807_v33 = vld [vmem:[%s17918_s7 + $0x2b4] sm:$0xf0]  ;;  %s627_s21 = scalar_lea.vmem %s17929_s18, %s8848_s1 }
  0x49   : > { %1268 = vmatpush.bf16.msrb.mxu3 %v9048_v58  ;;  %v9188_v52 = vor.u32 %v11689_v47, %v9185_v49  ;;  %v9164_v57 = vor.u32 %v11684_v53, %v9161_v54  ;;  %v11687_v58 = vld [vmem:[%s12932_s23 + $0x34] sm:$0xf0]  ;;  %v11678_v47 = vld [vmem:[%s12981_s19 + $0x8] sm:$0xff]  ;;  %v9415_v49 = vld [vmem:[%s17918_s7 + $0xc0] sm:$0xf] }
  0x4a   : > { %v9168_v61 = vor.u32 %v11687_v58, %v9167_v55  ;;  %v11747_v50 = vld [vmem:[%s17918_s7 + $0xd4] sm:$0xf0]  ;;  %v11789_v4 = vld [vmem:[%s17918_s7 + $0x224] sm:$0xf0] }
  0x4b   : > { %1185 = vmatpush.bf16.msrb.mxu0 %v8900_v59  ;;  %v11685_v59 = vld [vmem:[%s12932_s23 + $0x2c] sm:$0xf] }
  0x4c   : > { %1213 = vmatpush.bf16.msrb.mxu1 %v9028_v63  ;;  %1241 = vmatpush.bf16.msrb.mxu2 %v8904_v8  ;;  %v9172_v62 = vor.u32 %v11685_v59, %v9169_v60  ;;  %v9143_v63 = vld [vmem:[%s12932_s23] sm:$0xf]  ;;  %v11681_v8 = vld [vmem:[%s12932_s23 + $0xc] sm:$0xf] }
  0x4d   : > { %1269 = vmatpush.bf16.msrb.mxu3 %v9032_v9  ;;  %v9144_v2 = vor.u32 %v11682_v0, %v9143_v63  ;;  %v9153_v9 = vld [vmem:[%s12932_s23 + $0x18] sm:$0xf0]  ;;  %v11741_v63 = vld [vmem:[%s17918_s7 + $0xa4] sm:$0xf0]  ;;  %v9583_v0 = vld [vmem:[%s17918_s7 + $0x210] sm:$0xf] }
  0x4e   : > { %v9584_v5 = vor.u32 %v11789_v4, %v9583_v0 }
  0x4f   : > { %1186 = vmatpush.bf16.msrb.mxu0 %v8884_v10  ;;  %v9156_v10 = vor.u32 %v11681_v8, %v9153_v9  ;;  %v9367_v9 = vld [vmem:[%s17918_s7 + $0x60] sm:$0xf] }
  0x50   : > { %1214 = vmatpush.bf16.msrb.mxu1 %v9012_v14  ;;  %1242 = vmatpush.bf16.msrb.mxu2 %v8888_v18  ;;  %v11765_v18 = vld [vmem:[%s17918_s7 + $0x164] sm:$0xf0] }
  0x51   : > { %1085 = vmatmul.bf16.gmra.mxu0 %v12901_v13  ;;  %1270 = vmatpush.bf16.msrb.mxu3 %v9016_v19  ;;  %v12998_v19 = vperm.slane %v12976_v11, 1 }
  0x52   : > { %1113 = vmatmul.bf16.gmra.mxu1 %v12909_v17  ;;  %1141 = vmatmul.bf16.gmra.mxu2 %v12901_v13 }
  0x53   : > { %1169 = vmatmul.bf16.gmra.mxu3 %v12909_v17 }
  0x54   : > { %1542 = vmatpush.bf16.msra.mxu2 %v1477_v39 }
  0x55   : > { %1570 = vmatpush.bf16.msra.mxu3 %v1480_v40  ;;  %v9439_v40 = vld [vmem:[%s17918_s7 + $0xf0] sm:$0xf] }
  0x58   : > { %1543 = vmatpush.bf16.msra.mxu2 %v9184_v48 }
  0x59   : > { %1571 = vmatpush.bf16.msra.mxu3 %v9188_v52 }
  0x5c   : > { %1544 = vmatpush.bf16.msra.mxu2 %v9168_v61 }
  0x5d   : > { %1572 = vmatpush.bf16.msra.mxu3 %v9172_v62  ;;  %v9391_v62 = vld [vmem:[%s17918_s7 + $0x90] sm:$0xf] }
  0x5e   : > { %v9392_v3 = vor.u32 %v11741_v63, %v9391_v62 }
  0x60   : > { %1545 = vmatpush.bf16.msra.mxu2 %v9152_v7 }
  0x61   : > { %1090 = vmatmul.bf16.gmra.mxu0 %v12916_v24  ;;  %1573 = vmatpush.bf16.msra.mxu3 %v9156_v10  ;;  %v11735_v10 = vld [vmem:[%s17918_s7 + $0x74] sm:$0xf0] }
  0x62   : > { %1118 = vmatmul.bf16.gmra.mxu1 %v12918_v26  ;;  %1146 = vmatmul.bf16.gmra.mxu2 %v12916_v24 }
  0x63   : > { %1174 = vmatmul.bf16.gmra.mxu3 %v12918_v26 }
  0x71   : > { %1187 = vmatmul.bf16.vlgmr.msrb.gmra.mxu0 %v12691_v36 }
  0x72   : > { %1215 = vmatmul.bf16.vlgmr.msrb.gmra.mxu1 %v12693_v37  ;;  %1243 = vmatmul.bf16.vlgmr.msrb.gmra.mxu2 %v12691_v36  ;;  %v1440_v36 = vpack.c.b16 %v1424_v29, %v1424_v29  ;;  %v11759_v29 = vld [vmem:[%s17918_s7 + $0x134] sm:$0xf0] }
  0x73   : > { %1271 = vmatmul.bf16.vlgmr.msrb.gmra.mxu3 %v12693_v37  ;;  %v1441_v37 = vpack.c.b16 %v1425_v30, %v1425_v30  ;;  %v9655_v30 = vld [vmem:[%s17918_s7 + $0x2a0] sm:$0xf] }
  0x74   : > { %v1471_v35 = vsel %vm1469_vm0, %v1440_v36, 0 }
  0x75   : > { %v1474_v38 = vsel %vm1469_vm0, %v1441_v37, 0  ;;  %1486 = vmatpush.bf16.msra.mxu0 %v1471_v35  ;;  %v9464_v37 = vor.u32 %v11759_v29, %v9463_v28  ;;  %v9656_v35 = vor.u32 %v11807_v33, %v9655_v30  ;;  %v9535_v28 = vld [vmem:[%s17918_s7 + $0x1b0] sm:$0xf] }
  0x76   : > { %1514 = vmatpush.bf16.msra.mxu1 %v1474_v38  ;;  %v11679_v33 = vld [vmem:[%s12981_s19 + $0x10] sm:$0xff] }
  0x81   : > { %1192 = vmatmul.bf16.gmra.mxu0 %v12793_v21 }
  0x82   : > { %1220 = vmatmul.bf16.gmra.mxu1 %v12801_v25  ;;  %1248 = vmatmul.bf16.gmra.mxu2 %v12793_v21  ;;  %v11688_v21 = vld [vmem:[%s12932_s23 + $0x44] sm:$0xf] }
  0x83   : > { %1276 = vmatmul.bf16.gmra.mxu3 %v12801_v25  ;;  %v9176_v25 = vor.u32 %v11690_v42, %v9175_v41  ;;  %v9180_v44 = vor.u32 %v11688_v21, %v9177_v43  ;;  %v11753_v41 = vld [vmem:[%s17918_s7 + $0x104] sm:$0xf0]  ;;  %v9631_v42 = vld [vmem:[%s17918_s7 + $0x270] sm:$0xf] }
  0x85   : > { %1487 = vmatpush.bf16.msra.mxu0 %v9176_v25  ;;  %1515 = vmatpush.bf16.msra.mxu1 %v9180_v44  ;;  %v9440_v25 = vor.u32 %v11753_v41, %v9439_v40  ;;  %v11801_v44 = vld [vmem:[%s17918_s7 + $0x284] sm:$0xf0] }
  0x86   : > { %v9632_v45 = vor.u32 %v11801_v44, %v9631_v42 }
  0x89   : > { %1488 = vmatpush.bf16.msra.mxu0 %v9160_v56  ;;  %1516 = vmatpush.bf16.msra.mxu1 %v9164_v57  ;;  %v9416_v56 = vor.u32 %v11747_v50, %v9415_v49  ;;  %v11795_v57 = vld [vmem:[%s17918_s7 + $0x254] sm:$0xf0] }
  0x8a   : > { %v9608_v59 = vor.u32 %v11795_v57, %v9607_v51 }
  0x8d   : > { %1489 = vmatpush.bf16.msra.mxu0 %v9144_v2  ;;  %1517 = vmatpush.bf16.msra.mxu1 %v9148_v6 }
  0x91   : > { %1197 = vmatmul.bf16.gmra.mxu0 %v12901_v13 }
  0x92   : > { %1225 = vmatmul.bf16.gmra.mxu1 %v12909_v17  ;;  %1253 = vmatmul.bf16.gmra.mxu2 %v12901_v13  ;;  %v11677_v13 = vld [vmem:[%s12981_s19] sm:$0xff] }
  0x93   : > { %1281 = vmatmul.bf16.gmra.mxu3 %v12909_v17  ;;  %v9487_v17 = vld [vmem:[%s17918_s7 + $0x150] sm:$0xf] }
  0x94   : > { %v9488_v20 = vor.u32 %v11765_v18, %v9487_v17  ;;  %v9368_v17 = vor.u32 %v11735_v10, %v9367_v9  ;;  %v11783_v18 = vld [vmem:[%s17918_s7 + $0x1f4] sm:$0xf0]  ;;  %v9823_v9 = vld [vmem:[%s17918_s7 + $0x3f0] sm:$0xf]  ;;  %v11849_v10 = vld [vmem:[%s17918_s7 + $0x404] sm:$0xf0] }
  0x96   : > { %2956 = vmatpush.bf16.msrb.mxu0 %v9488_v20 }
  0x9a   : > { %2957 = vmatpush.bf16.msrb.mxu0 %v9464_v37 }
  0x9e   : > { %2958 = vmatpush.bf16.msrb.mxu0 %v9440_v25  ;;  %v11771_v25 = vld [vmem:[%s17918_s7 + $0x194] sm:$0xf0] }
  0xa1   : > { %1202 = vmatmul.bf16.gmra.mxu0 %v12916_v24 }
  0xa2   : > { %1230 = vmatmul.bf16.gmra.mxu1 %v12918_v26  ;;  %1258 = vmatmul.bf16.gmra.mxu2 %v12916_v24  ;;  %v9680_v24 = vor.u32 %v11813_v23, %v9679_v22 }
  0xa3   : > { %1286 = vmatmul.bf16.gmra.mxu3 %v12918_v26  ;;  %2959 = vmatpush.bf16.msrb.mxu0 %v9416_v56 }
  0xa4   : > { %3000 = vmatpush.bf16.msrb.mxu1 %v9680_v24 }
  0xa7   : > { %2960 = vmatpush.bf16.msrb.mxu0 %v9392_v3  ;;  %v11903_v3 = vld [vmem:[%s17918_s7 + $0x5b4] sm:$0xf0] }
  0xa8   : > { %3001 = vmatpush.bf16.msrb.mxu1 %v9656_v35  ;;  %v9319_v35 = vld [vmem:[%s17918_s7] sm:$0xf] }
  0xab   : > { %2961 = vmatpush.bf16.msrb.mxu0 %v9368_v17  ;;  %v11897_v17 = vld [vmem:[%s17918_s7 + $0x584] sm:$0xf0] }
  0xac   : > { %3002 = vmatpush.bf16.msrb.mxu1 %v9632_v45 }
  0xae   : > { %v1076_v14 = vpop.f32.mrf.mxu0 }
  0xaf   : > { %v1104_v15 = vpop.f32.mrf.mxu1  ;;  %v1077_v16 = vadd.f32 %v1076_v14, %v12984_v12 }
  0xb0   : > { %3003 = vmatpush.bf16.msrb.mxu1 %v9608_v59  ;;  %v9847_v59 = vld [vmem:[%s17918_s7 + $0x420] sm:$0xf] }
  0xb1   : > { %9189 = vmatmul.msk.bf16.vlgmr.msra.gmra.mxu0 %vm1456_vm1, %v11677_v13  ;;  %v1105_v26 = vadd.f32 %v1104_v15, %v1077_v16 }
  0xb2   : > { %9193 = vmatmul.msk.bf16.vlgmr.msra.gmra.mxu1 %vm1456_vm1, %v11677_v13  ;;  %9197 = vmatmul.msk.bf16.vlgmr.msra.gmra.mxu2 %vm1456_vm1, %v11677_v13 }
  0xb3   : > { %9201 = vmatmul.msk.bf16.vlgmr.msra.gmra.mxu3 %vm1456_vm1, %v11677_v13  ;;  %v1291_v38 = vmax.f32 %v1105_v26, 0.0  ;;  %v9559_v13 = vld [vmem:[%s17918_s7 + $0x1e0] sm:$0xf]  ;;  %v9343_v26 = vld [vmem:[%s17918_s7 + $0x30] sm:$0xf] }
  0xb4   : > { %3004 = vmatpush.bf16.msrb.mxu1 %v9584_v5  ;;  %v9560_v22 = vor.u32 %v11783_v18, %v9559_v13  ;;  %v10015_v13 = vld [vmem:[%s17918_s7 + $0x570] sm:$0xf] }
  0xb5   : > { %v1132_v27 = vpop.f32.mrf.mxu2  ;;  %v10016_v18 = vor.u32 %v11897_v17, %v10015_v13 }
  0xb6   : > { %v1133_v31 = vadd.f32 %v1132_v27, %v12998_v19  ;;  %v1160_v32 = vpop.f32.mrf.mxu3  ;;  %v1078_v36 = vpop.f32.mrf.mxu0  ;;  %v11729_v27 = vld [vmem:[%s17918_s7 + $0x44] sm:$0xf0] }
  0xb7   : > { %v1106_v34 = vpop.f32.mrf.mxu1  ;;  %v1079_v43 = vadd.f32 %v1078_v36, %v12984_v12 }
  0xb8   : > { %v1161_v39 = vadd.f32 %v1160_v32, %v1133_v31  ;;  %3005 = vmatpush.bf16.msrb.mxu1 %v9560_v22  ;;  %v9344_v31 = vor.u32 %v11729_v27, %v9343_v26  ;;  %v11777_v32 = vld [vmem:[%s17918_s7 + $0x1c4] sm:$0xf0]  ;;  %v11843_v26 = vld [vmem:[%s17918_s7 + $0x3d4] sm:$0xf0]  ;;  %v9991_v27 = vld [vmem:[%s17918_s7 + $0x540] sm:$0xf] }
  0xb9   : > { %v1107_v52 = vadd.f32 %v1106_v34, %v1079_v43  ;;  %v9536_v36 = vor.u32 %v11777_v32, %v9535_v28 }
  0xba   : > { %v1292_v21 = vmax.f32 %v1161_v39, 0.0  ;;  %2962 = vmatpush.bf16.msrb.mxu0 %v9344_v31  ;;  %v9511_v39 = vld [vmem:[%s17918_s7 + $0x180] sm:$0xf] }
  0xbb   : > { %v1295_v1 = vmax.f32 %v1107_v52, 0.0  ;;  %v9512_v45 = vor.u32 %v11771_v25, %v9511_v39  ;;  %v11909_v52 = vld [vmem:[%s17918_s7 + $0x5e4] sm:$0xf0] }
  0xbc   : > { %v1319_v46 = vpack.c.bf16 %v1292_v21, %v1291_v38  ;;  %3006 = vmatpush.bf16.msrb.mxu1 %v9536_v36  ;;  %v11723_v38 = vld [vmem:[%s17918_s7 + $0x14] sm:$0xf0]  ;;  %v11837_v39 = vld [vmem:[%s17918_s7 + $0x3a4] sm:$0xf0] }
  0xbd   : > { %v1134_v48 = vpop.f32.mrf.mxu2  ;;  %v9320_v43 = vor.u32 %v11723_v38, %v9319_v35  ;;  %v11891_v36 = vld [vmem:[%s17918_s7 + $0x554] sm:$0xf0]  ;;  %v9775_v38 = vld [vmem:[%s17918_s7 + $0x390] sm:$0xf] }
  0xbe   : > { %1333 = vst [vmem:[#allocation2] sm:$0xff] %v1319_v46  ;;  %v1135_v53 = vadd.f32 %v1134_v48, %v12998_v19  ;;  %v1162_v54 = vpop.f32.mrf.mxu3  ;;  %v1081_v55 = vpop.f32.mrf.mxu0  ;;  %v9871_v46 = vld [vmem:[%s17918_s7 + $0x450] sm:$0xf] }
  0xbf   : > { %v1109_v58 = vpop.f32.mrf.mxu1  ;;  %v1082_v61 = vadd.f32 %v1081_v55, %v12984_v12  ;;  %v10063_v48 = vld [vmem:[%s17918_s7 + $0x5d0] sm:$0xf]  ;;  %2963 = vmatpush.bf16.msrb.mxu0 %v9320_v43 }
  0xc0   : > { %v1163_v60 = vadd.f32 %v1162_v54, %v1135_v53  ;;  %3007 = vmatpush.bf16.msrb.mxu1 %v9512_v45  ;;  %v10064_v53 = vor.u32 %v11909_v52, %v10063_v48  ;;  %v9943_v48 = vld [vmem:[%s17918_s7 + $0x4e0] sm:$0xf] }
  0xc1   : > { %9190 = vmatmul.msk.bf16.gmra.mxu0 %vm1456_vm1, %v11678_v47  ;;  %v1110_v7 = vadd.f32 %v1109_v58, %v1082_v61  ;;  %v10039_v61 = vld [vmem:[%s17918_s7 + $0x5a0] sm:$0xf] }
  0xc2   : > { %v1296_v2 = vmax.f32 %v1163_v60, 0.0  ;;  %9194 = vmatmul.msk.bf16.gmra.mxu1 %vm1456_vm1, %v11678_v47  ;;  %9198 = vmatmul.msk.bf16.gmra.mxu2 %vm1456_vm1, %v11678_v47  ;;  %v11855_v60 = vld [vmem:[%s17918_s7 + $0x434] sm:$0xf0]  ;;  %v10040_v5 = vor.u32 %v11903_v3, %v10039_v61 }
  0xc3   : > { %9202 = vmatmul.msk.bf16.gmra.mxu3 %vm1456_vm1, %v11678_v47  ;;  %v1299_v23 = vmax.f32 %v1110_v7, 0.0  ;;  %v11861_v47 = vld [vmem:[%s17918_s7 + $0x464] sm:$0xf0] }
  0xc4   : > { %v1321_v6 = vpack.c.bf16 %v1296_v2, %v1295_v1  ;;  %v9872_v51 = vor.u32 %v11861_v47, %v9871_v46  ;;  %3088 = vmatpush.bf16.msrb.mxu3 %v10064_v53  ;;  %v1353_v1 = vld [vmem:[%s12981_s19 + $0x18] sm:$0xf]  ;;  %v9848_v2 = vor.u32 %v11855_v60, %v9847_v59  ;;  %v9751_v46 = vld [vmem:[%s17918_s7 + $0x360] sm:$0xf]  ;;  %v9919_v59 = vld [vmem:[%s17918_s7 + $0x4b0] sm:$0xf] }
  0xc5   : > { %v1137_v8 = vpop.f32.mrf.mxu2  ;;  %v11831_v47 = vld [vmem:[%s17918_s7 + $0x374] sm:$0xf0]  ;;  %v11692_v17 = vld [vmem:[#allocation2 + $0x4] sm:$0xf] }
  0xc6   : > { %1335 = vst [vmem:[#allocation2 + $0x10] sm:$0xff] %v1321_v6  ;;  %v1138_v14 = vadd.f32 %v1137_v8, %v12998_v19  ;;  %v1165_v15 = vpop.f32.mrf.mxu3  ;;  %v1083_v16 = vpop.f32.mrf.mxu0  ;;  %3044 = vmatpush.bf16.msrb.mxu2 %v9872_v51  ;;  %v1381_v8 = vunpack.c.l.b16 %v1353_v1  ;;  %v9752_v52 = vor.u32 %v11831_v47, %v9751_v46  ;;  %v11879_v53 = vld [vmem:[%s17918_s7 + $0x4f4] sm:$0xf0]  ;;  %v13204_v1 = vperm.slane %v12976_v11, 2 }
  0xc7   : > { %v1111_v20 = vpop.f32.mrf.mxu1  ;;  %v1084_v30 = vadd.f32 %v1083_v16, %v12984_v12  ;;  %v9824_v16 = vor.u32 %v11849_v10, %v9823_v9  ;;  %v9207_v10 = vld [vmem:[#allocation2] sm:$0xf] }
  0xc8   : > { %v1166_v24 = vadd.f32 %v1165_v15, %v1138_v14  ;;  %3089 = vmatpush.bf16.msrb.mxu3 %v10040_v5  ;;  %v9703_v5 = vld [vmem:[%s17918_s7 + $0x300] sm:$0xf] }
  0xc9   : > { %v1112_v40 = vadd.f32 %v1111_v20, %v1084_v30 }
  0xca   : > { %v1300_v29 = vmax.f32 %v1166_v24, 0.0  ;;  %3045 = vmatpush.bf16.msrb.mxu2 %v9848_v2  ;;  %v9799_v24 = vld [vmem:[%s17918_s7 + $0x3c0] sm:$0xf] }
  0xcb   : > { %v1303_v54 = vmax.f32 %v1112_v40, 0.0  ;;  %v9800_v32 = vor.u32 %v11843_v26, %v9799_v24  ;;  %v9967_v40 = vld [vmem:[%s17918_s7 + $0x510] sm:$0xf] }
  0xcc   : > { %v1323_v37 = vpack.c.bf16 %v1300_v29, %v1299_v23  ;;  %v1385_v23 = vpack.c.b16 %v1381_v8, %v1381_v8  ;;  %3090 = vmatpush.bf16.msrb.mxu3 %v10016_v18 }
  0xcd   : > { %v1139_v34 = vpop.f32.mrf.mxu2  ;;  %v11694_v2 = vld [vmem:[#allocation2 + $0xc] sm:$0xf0]  ;;  %v9209_v3 = vld [vmem:[#allocation2 + $0x10] sm:$0xf0] }
  0xce   : > { %1337 = vst [vmem:[#allocation2 + $0x20] sm:$0xff] %v1323_v37  ;;  %v1140_v41 = vadd.f32 %v1139_v34, %v12998_v19  ;;  %v1167_v42 = vpop.f32.mrf.mxu3  ;;  %v1086_v21 = vpop.f32.mrf.mxu0  ;;  %3046 = vmatpush.bf16.msrb.mxu2 %v9824_v16  ;;  %v13218_v16 = vor.u32 %v11694_v2, %v9207_v10 }
  0xcf   : > { %v1114_v44 = vpop.f32.mrf.mxu1  ;;  %v1087_v50 = vadd.f32 %v1086_v21, %v12984_v12  ;;  %v11885_v21 = vld [vmem:[%s17918_s7 + $0x524] sm:$0xf0] }
  0xd0   : > { %v1168_v49 = vadd.f32 %v1167_v42, %v1140_v41  ;;  %v9968_v43 = vor.u32 %v11885_v21, %v9967_v40 }
  0xd1   : > { %9191 = vmatmul.msk.bf16.gmra.mxu0 %vm1456_vm1, %v11679_v33  ;;  %v1115_v57 = vadd.f32 %v1114_v44, %v1087_v50 }
  0xd2   : > { %v1304_v55 = vmax.f32 %v1168_v49, 0.0  ;;  %9195 = vmatmul.msk.bf16.gmra.mxu1 %vm1456_vm1, %v11679_v33  ;;  %9199 = vmatmul.msk.bf16.gmra.mxu2 %vm1456_vm1, %v11679_v33 }
  0xd3   : > { %9203 = vmatmul.msk.bf16.gmra.mxu3 %vm1456_vm1, %v11679_v33  ;;  %v1307_v6 = vmax.f32 %v1115_v57, 0.0  ;;  %v9992_v33 = vor.u32 %v11891_v36, %v9991_v27  ;;  %3047 = vmatpush.bf16.msrb.mxu2 %v9800_v32 }
  0xd4   : > { %v1325_v56 = vpack.c.bf16 %v1304_v55, %v1303_v54  ;;  %v9944_v55 = vor.u32 %v11879_v53, %v9943_v48 }
  0xd5   : > { %v1142_v58 = vpop.f32.mrf.mxu2  ;;  %3091 = vmatpush.bf16.msrb.mxu3 %v9992_v33 }
  0xd6   : > { %1339 = vst [vmem:[#allocation2 + $0x30] sm:$0xff] %v1325_v56  ;;  %v1143_v62 = vadd.f32 %v1142_v58, %v12998_v19  ;;  %v1170_v63 = vpop.f32.mrf.mxu3  ;;  %v1088_v0 = vpop.f32.mrf.mxu0  ;;  %v9727_v58 = vld [vmem:[%s17918_s7 + $0x330] sm:$0xf] }
  0xd7   : > { %v1116_v4 = vpop.f32.mrf.mxu1  ;;  %v1089_v15 = vadd.f32 %v1088_v0, %v12984_v12 }
  0xd8   : > { %v1171_v7 = vadd.f32 %v1170_v63, %v1143_v62  ;;  %v11873_v62 = vld [vmem:[%s17918_s7 + $0x4c4] sm:$0xf0] }
  0xd9   : > { %v1117_v28 = vadd.f32 %v1116_v4, %v1089_v15  ;;  %3092 = vmatpush.bf16.msrb.mxu3 %v9968_v43  ;;  %v9920_v63 = vor.u32 %v11873_v62, %v9919_v59  ;;  %v11696_v43 = vld [vmem:[#allocation2 + $0x24] sm:$0xf] }
  0xda   : > { %v1308_v14 = vmax.f32 %v1171_v7, 0.0  ;;  %v9895_v7 = vld [vmem:[%s17918_s7 + $0x480] sm:$0xf] }
  0xdb   : > { %v1311_v41 = vmax.f32 %v1117_v28, 0.0 }
  0xdc   : > { %v1327_v20 = vpack.c.bf16 %v1308_v14, %v1307_v6  ;;  %v11819_v6 = vld [vmem:[%s17918_s7 + $0x314] sm:$0xf0] }
  0xdd   : > { %v1144_v22 = vpop.f32.mrf.mxu2  ;;  %3093 = vmatpush.bf16.msrb.mxu3 %v9944_v55  ;;  %v9704_v13 = vor.u32 %v11819_v6, %v9703_v5  ;;  %v11867_v14 = vld [vmem:[%s17918_s7 + $0x494] sm:$0xf0] }
  0xde   : > { %1341 = vst [vmem:[#allocation2 + $0x40] sm:$0xff] %v1327_v20  ;;  %v1145_v29 = vadd.f32 %v1144_v22, %v12998_v19  ;;  %v1172_v30 = vpop.f32.mrf.mxu3  ;;  %v1091_v31 = vpop.f32.mrf.mxu0  ;;  %v9896_v18 = vor.u32 %v11867_v14, %v9895_v7  ;;  %v13221_v22 = vor.u32 %v11692_v17, %v9209_v3 }
  0xdf   : > { %v1119_v37 = vpop.f32.mrf.mxu1  ;;  %v1092_v35 = vadd.f32 %v1091_v31, %v12984_v12  ;;  %v9776_v12 = vor.u32 %v11837_v39, %v9775_v38  ;;  %v9225_v38 = vld [vmem:[#allocation2 + $0x30] sm:$0xf0] }
  0xe0   : > { %v1173_v34 = vadd.f32 %v1172_v30, %v1145_v29 }
  0xe1   : > { %9192 = vmatmul.msk.bf16.gmra.mxu0 %vm1456_vm1, %v1385_v23  ;;  %v1120_v44 = vadd.f32 %v1119_v37, %v1092_v35  ;;  %3048 = vmatpush.bf16.msrb.mxu2 %v9776_v12 }
  0xe2   : > { %v1312_v42 = vmax.f32 %v1173_v34, 0.0  ;;  %9196 = vmatmul.msk.bf16.gmra.mxu1 %vm1456_vm1, %v1385_v23  ;;  %9200 = vmatmul.msk.bf16.gmra.mxu2 %vm1456_vm1, %v1385_v23  ;;  %v11698_v34 = vld [vmem:[#allocation2 + $0x2c] sm:$0xf0] }
  0xe3   : > { %9204 = vmatmul.msk.bf16.gmra.mxu3 %vm1456_vm1, %v1385_v23  ;;  %v1315_v56 = vmax.f32 %v1120_v44, 0.0  ;;  %v13226_v23 = vperm.slane %v12976_v11, 3 }
  0xe4   : > { %v1329_v25 = vpack.c.bf16 %v1312_v42, %v1311_v41  ;;  %3094 = vmatpush.bf16.msrb.mxu3 %v9920_v63  ;;  %v9223_v42 = vld [vmem:[#allocation2 + $0x20] sm:$0xf] }
  0xe5   : > { %v1147_v45 = vpop.f32.mrf.mxu2  ;;  %3049 = vmatpush.bf16.msrb.mxu2 %v9752_v52  ;;  %v13231_v21 = vor.u32 %v11698_v34, %v9223_v42  ;;  %v11700_v14 = vld [vmem:[#allocation2 + $0x44] sm:$0xf] }
  0xe6   : > { %1343 = vst [vmem:[#allocation2 + $0x50] sm:$0xff] %v1329_v25  ;;  %v1148_v49 = vadd.f32 %v1147_v45, %v12998_v19  ;;  %v1175_v50 = vpop.f32.mrf.mxu3  ;;  %v1093_v51 = vpop.f32.mrf.mxu0  ;;  %v11825_v19 = vld [vmem:[%s17918_s7 + $0x344] sm:$0xf0]  ;;  %v13234_v45 = vor.u32 %v11696_v43, %v9225_v38 }
  0xe7   : > { %v1121_v54 = vpop.f32.mrf.mxu1  ;;  %v9728_v61 = vor.u32 %v11825_v19, %v9727_v58 }
  0xe8   : > { %v1176_v57 = vadd.f32 %v1175_v50, %v1148_v49  ;;  %3095 = vmatpush.bf16.msrb.mxu3 %v9896_v18 }
  0xe9   : > { %3050 = vmatpush.bf16.msrb.mxu2 %v9728_v61 }
  0xea   : > { %v1316_v60 = vmax.f32 %v1176_v57, 0.0 }
  0xec   : > { %v1331_v0 = vpack.c.bf16 %v1316_v60, %v1315_v56 }
  0xed   : > { %v1149_v4 = vpop.f32.mrf.mxu2  ;;  %3051 = vmatpush.bf16.msrb.mxu2 %v9704_v13  ;;  %v11702_v60 = vld [vmem:[#allocation2 + $0x4c] sm:$0xf0]  ;;  %v9241_v61 = vld [vmem:[#allocation2 + $0x50] sm:$0xf0] }
  0xee   : > { %1345 = vst [vmem:[#allocation2 + $0x60] sm:$0xff] %v1331_v0  ;;  %v1177_v8 = vpop.f32.mrf.mxu3  ;;  %v1188_v9 = vpop.f32.mrf.mxu0  ;;  %v13250_v18 = vor.u32 %v11700_v14, %v9241_v61  ;;  %v9873_v61 = vld [vmem:[%s17918_s7 + $0x468] sm:$0xf0] }
  0xef   : > { %v1216_v15 = vpop.f32.mrf.mxu1  ;;  %v1189_v20 = vadd.f32 %v1188_v9, %v13204_v1  ;;  %v9239_v9 = vld [vmem:[#allocation2 + $0x40] sm:$0xf] }
  0xf0   : > { %v13245_v13 = vor.u32 %v11702_v60, %v9239_v9  ;;  %17977 = vst [vmem:[#allocation5_spill] sm:$0xff] %v13250_v18 }
  0xf1   : > { %2964 = vmatmul.bf16.vlgmr.msrb.gmra.mxu0 %v13218_v16  ;;  %v1217_v24 = vadd.f32 %v1216_v15, %v1189_v20 }
  0xf2   : > { %3008 = vmatmul.bf16.vlgmr.msrb.gmra.mxu1 %v13221_v22  ;;  %17976 = vst [vmem:[#allocation4_spill] sm:$0xff] %v13245_v13 }
  0xf3   : > { %v1293_v31 = vmax.f32 %v1217_v24, 0.0 }
  0xf5   : > { %v1244_v26 = vpop.f32.mrf.mxu2 }
  0xf6   : > { %v1245_v27 = vadd.f32 %v1244_v26, %v13226_v23  ;;  %v1272_v28 = vpop.f32.mrf.mxu3  ;;  %v1190_v29 = vpop.f32.mrf.mxu0 }
  0xf7   : > { %v1218_v30 = vpop.f32.mrf.mxu1  ;;  %v1191_v37 = vadd.f32 %v1190_v29, %v13204_v1 }
  0xf8   : > { %v1273_v32 = vadd.f32 %v1272_v28, %v1245_v27 }
  0xf9   : > { %v1219_v39 = vadd.f32 %v1218_v30, %v1191_v37 }
  0xfa   : > { %v1294_v36 = vmax.f32 %v1273_v32, 0.0 }
  0xfb   : > { %v1297_v46 = vmax.f32 %v1219_v39, 0.0 }
  0xfc   : > { %v1320_v33 = vpack.c.bf16 %v1294_v36, %v1293_v31 }
  0xfd   : > { %v1246_v35 = vpop.f32.mrf.mxu2 }
  0xfe   : > { %1334 = vst [vmem:[#allocation2 + $0x8] sm:$0xff] %v1320_v33  ;;  %v1247_v11 = vadd.f32 %v1246_v35, %v13226_v23  ;;  %v1274_v40 = vpop.f32.mrf.mxu3  ;;  %v1193_v41 = vpop.f32.mrf.mxu0 }
  0xff   : > { %v1221_v12 = vpop.f32.mrf.mxu1  ;;  %v1194_v44 = vadd.f32 %v1193_v41, %v13204_v1 }
 0x100   : > { %v1275_v25 = vadd.f32 %v1274_v40, %v1247_v11 }
 0x101   : > { %2969 = vmatmul.bf16.gmra.mxu0 %v13231_v21  ;;  %v1222_v49 = vadd.f32 %v1221_v12, %v1194_v44 }
 0x102   : > { %v1298_v47 = vmax.f32 %v1275_v25, 0.0  ;;  %3013 = vmatmul.bf16.gmra.mxu1 %v13234_v45 }
 0x103   : > { %v1301_v55 = vmax.f32 %v1222_v49, 0.0 }
 0x104   : > { %v1322_v48 = vpack.c.bf16 %v1298_v47, %v1297_v46 }
 0x105   : > { %v1249_v50 = vpop.f32.mrf.mxu2  ;;  %v9215_v59 = vld [vmem:[#allocation2 + $0x8] sm:$0xf]  ;;  %v11693_v0 = vld [vmem:[#allocation2 + $0xc] sm:$0xf] }
 0x106   : > { %1336 = vst [vmem:[#allocation2 + $0x18] sm:$0xff] %v1322_v48  ;;  %v1250_v51 = vadd.f32 %v1249_v50, %v13226_v23  ;;  %v1277_v52 = vpop.f32.mrf.mxu3  ;;  %v1195_v53 = vpop.f32.mrf.mxu0 }
 0x107   : > { %v1223_v54 = vpop.f32.mrf.mxu1  ;;  %v1196_v58 = vadd.f32 %v1195_v53, %v13204_v1 }
 0x108   : > { %v1278_v56 = vadd.f32 %v1277_v52, %v1250_v51 }
 0x109   : > { %v1224_v3 = vadd.f32 %v1223_v54, %v1196_v58 }
 0x10a   : > { %v1302_v57 = vmax.f32 %v1278_v56, 0.0 }
 0x10b   : > { %v1305_v20 = vmax.f32 %v1224_v3, 0.0 }
 0x10c   : > { %v1324_v19 = vpack.c.bf16 %v1302_v57, %v1301_v55 }
 0x10d   : > { %v1251_v62 = vpop.f32.mrf.mxu2  ;;  %v11695_v63 = vld [vmem:[#allocation2 + $0x14] sm:$0xf0]  ;;  %v9217_v2 = vld [vmem:[#allocation2 + $0x18] sm:$0xf0] }
 0x10e   : > { %1338 = vst [vmem:[#allocation2 + $0x28] sm:$0xff] %v1324_v19  ;;  %v1252_v4 = vadd.f32 %v1251_v62, %v13226_v23  ;;  %v1279_v5 = vpop.f32.mrf.mxu3  ;;  %v1198_v6 = vpop.f32.mrf.mxu0  ;;  %v13241_v7 = vor.u32 %v11695_v63, %v9215_v59  ;;  %v13243_v8 = vor.u32 %v11693_v0, %v9217_v2 }
 0x10f   : > { %v1226_v10 = vpop.f32.mrf.mxu1  ;;  %v1199_v17 = vadd.f32 %v1198_v6, %v13204_v1 }
 0x110   : > { %v1280_v15 = vadd.f32 %v1279_v5, %v1252_v4  ;;  %3052 = vmatmul.bf16.vlgmr.msrb.gmra.mxu2 %v13241_v7  ;;  %3096 = vmatmul.bf16.vlgmr.msrb.gmra.mxu3 %v13243_v8 }
 0x111   : > { %2974 = vmatmul.bf16.gmra.mxu0 %v13245_v13  ;;  %v1227_v27 = vadd.f32 %v1226_v10, %v1199_v17  ;;  %v11762_v17 = vld [vmem:[%s17918_s7 + $0x154] sm:$0xf] }
 0x112   : > { %v1306_v24 = vmax.f32 %v1280_v15, 0.0  ;;  %3018 = vmatmul.bf16.gmra.mxu1 %v13250_v18 }
 0x113   : > { %v1309_v36 = vmax.f32 %v1227_v27, 0.0  ;;  %v10065_v27 = vld [vmem:[%s17918_s7 + $0x5e8] sm:$0xf0] }
 0x114   : > { %v1326_v26 = vpack.c.bf16 %v1306_v24, %v1305_v20  ;;  %v9489_v20 = vld [vmem:[%s17918_s7 + $0x168] sm:$0xf0]  ;;  %v11906_v24 = vld [vmem:[%s17918_s7 + $0x5d4] sm:$0xf] }
 0x115   : > { %v1254_v28 = vpop.f32.mrf.mxu2  ;;  %v9231_v38 = vld [vmem:[#allocation2 + $0x28] sm:$0xf]  ;;  %v11697_v40 = vld [vmem:[#allocation2 + $0x2c] sm:$0xf] }
 0x116   : > { %1340 = vst [vmem:[#allocation2 + $0x38] sm:$0xff] %v1326_v26  ;;  %v1255_v29 = vadd.f32 %v1254_v28, %v13226_v23  ;;  %v1282_v30 = vpop.f32.mrf.mxu3  ;;  %v1200_v31 = vpop.f32.mrf.mxu0  ;;  %v9492_v26 = vor.u32 %v11762_v17, %v9489_v20  ;;  %v11810_v28 = vld [vmem:[%s17918_s7 + $0x2d4] sm:$0xf]  ;;  %v9633_v17 = vld [vmem:[%s17918_s7 + $0x288] sm:$0xf0] }
 0x117   : > { %v1228_v32 = vpop.f32.mrf.mxu1  ;;  %v1201_v34 = vadd.f32 %v1200_v31, %v13204_v1 }
 0x118   : > { %v1283_v37 = vadd.f32 %v1282_v30, %v1255_v29  ;;  %v10068_v29 = vor.u32 %v11906_v24, %v10065_v27  ;;  %v9681_v30 = vld [vmem:[%s17918_s7 + $0x2e8] sm:$0xf0]  ;;  %3132 = vmatpush.bf16.msra.mxu0 %v9492_v26 }
 0x119   : > { %v1229_v42 = vadd.f32 %v1228_v32, %v1201_v34  ;;  %v9684_v31 = vor.u32 %v11810_v28, %v9681_v30 }
 0x11a   : > { %v1310_v33 = vmax.f32 %v1283_v37, 0.0  ;;  %3264 = vmatpush.bf16.msra.mxu3 %v10068_v29 }
 0x11b   : > { %v1313_v50 = vmax.f32 %v1229_v42, 0.0  ;;  %3176 = vmatpush.bf16.msra.mxu1 %v9684_v31 }
 0x11c   : > { %v1328_v35 = vpack.c.bf16 %v1310_v33, %v1309_v36 }
 0x11d   : > { %v1256_v39 = vpop.f32.mrf.mxu2  ;;  %v11699_v11 = vld [vmem:[#allocation2 + $0x34] sm:$0xf0]  ;;  %v9233_v41 = vld [vmem:[#allocation2 + $0x38] sm:$0xf0] }
 0x11e   : > { %1342 = vst [vmem:[#allocation2 + $0x48] sm:$0xff] %v1328_v35  ;;  %v1257_v12 = vadd.f32 %v1256_v39, %v13226_v23  ;;  %v1284_v43 = vpop.f32.mrf.mxu3  ;;  %v1203_v25 = vpop.f32.mrf.mxu0  ;;  %v13257_v44 = vor.u32 %v11699_v11, %v9231_v38  ;;  %v13259_v46 = vor.u32 %v11697_v40, %v9233_v41  ;;  %v9255_v38 = vld [vmem:[#allocation2 + $0x60] sm:$0xf]  ;;  %v11704_v39 = vld [vmem:[#allocation2 + $0x64] sm:$0xf] }
 0x11f   : > { %v1231_v47 = vpop.f32.mrf.mxu1  ;;  %v1204_v49 = vadd.f32 %v1203_v25, %v13204_v1  ;;  %v11858_v1 = vld [vmem:[%s17918_s7 + $0x454] sm:$0xf] }
 0x120   : > { %v1285_v48 = vadd.f32 %v1284_v43, %v1257_v12  ;;  %3057 = vmatmul.bf16.gmra.mxu2 %v13257_v44  ;;  %3101 = vmatmul.bf16.gmra.mxu3 %v13259_v46  ;;  %v9876_v62 = vor.u32 %v11858_v1, %v9873_v61  ;;  %v11852_v12 = vld [vmem:[%s17918_s7 + $0x424] sm:$0xf]  ;;  %v9849_v43 = vld [vmem:[%s17918_s7 + $0x438] sm:$0xf0] }
 0x121   : > { %v1232_v53 = vadd.f32 %v1231_v47, %v1204_v49  ;;  %v9852_v25 = vor.u32 %v11852_v12, %v9849_v43  ;;  %v11756_v47 = vld [vmem:[%s17918_s7 + $0x124] sm:$0xf]  ;;  %v11894_v12 = vld [vmem:[%s17918_s7 + $0x574] sm:$0xf]  ;;  %v10017_v43 = vld [vmem:[%s17918_s7 + $0x588] sm:$0xf0] }
 0x122   : > { %v1314_v51 = vmax.f32 %v1285_v48, 0.0  ;;  %3220 = vmatpush.bf16.msra.mxu2 %v9876_v62  ;;  %v9465_v48 = vld [vmem:[%s17918_s7 + $0x138] sm:$0xf0]  ;;  %v11900_v49 = vld [vmem:[%s17918_s7 + $0x5a4] sm:$0xf] }
 0x123   : > { %v1317_v19 = vmax.f32 %v1232_v53, 0.0 }
 0x124   : > { %v1330_v52 = vpack.c.bf16 %v1314_v51, %v1313_v50  ;;  %v9468_v50 = vor.u32 %v11756_v47, %v9465_v48  ;;  %v10041_v51 = vld [vmem:[%s17918_s7 + $0x5b8] sm:$0xf0]  ;;  %v10020_v48 = vor.u32 %v11894_v12, %v10017_v43  ;;  %v11774_v12 = vld [vmem:[%s17918_s7 + $0x1b4] sm:$0xf]  ;;  %v9537_v43 = vld [vmem:[%s17918_s7 + $0x1c8] sm:$0xf0] }
 0x125   : > { %v1259_v54 = vpop.f32.mrf.mxu2  ;;  %v9247_v0 = vld [vmem:[#allocation2 + $0x48] sm:$0xf]  ;;  %v10044_v53 = vor.u32 %v11900_v49, %v10041_v51  ;;  %v11738_v49 = vld [vmem:[%s17918_s7 + $0x94] sm:$0xf] }
 0x126   : > { %1344 = vst [vmem:[#allocation2 + $0x58] sm:$0xff] %v1330_v52  ;;  %v1260_v55 = vadd.f32 %v1259_v54, %v13226_v23  ;;  %v1287_v56 = vpop.f32.mrf.mxu3  ;;  %v1205_v57 = vpop.f32.mrf.mxu0  ;;  %v11701_v23 = vld [vmem:[#allocation2 + $0x4c] sm:$0xf]  ;;  %3221 = vmatpush.bf16.msra.mxu2 %v9852_v25  ;;  %3133 = vmatpush.bf16.msra.mxu0 %v9468_v50  ;;  %v11786_v51 = vld [vmem:[%s17918_s7 + $0x214] sm:$0xf] }
 0x127   : > { %v1233_v58 = vpop.f32.mrf.mxu1  ;;  %3265 = vmatpush.bf16.msra.mxu3 %v10044_v53  ;;  %v9393_v50 = vld [vmem:[%s17918_s7 + $0xa8] sm:$0xf0] }
 0x128   : > { %v1288_v59 = vadd.f32 %v1287_v56, %v1260_v55 }
 0x12a   : > { %v1318_v60 = vmax.f32 %v1288_v59, 0.0 }
 0x12b   : > { %3266 = vmatpush.bf16.msra.mxu3 %v10020_v48  ;;  %v11828_v48 = vld [vmem:[%s17918_s7 + $0x364] sm:$0xf] }
 0x12c   : > { %v1332_v63 = vpack.c.bf16 %v1318_v60, %v1317_v19 }
 0x12d   : > { %v1261_v2 = vpop.f32.mrf.mxu2  ;;  %v11703_v3 = vld [vmem:[#allocation2 + $0x54] sm:$0xf0]  ;;  %v9249_v4 = vld [vmem:[#allocation2 + $0x58] sm:$0xf0] }
 0x12e   : > { %1346 = vst [vmem:[#allocation2 + $0x68] sm:$0xff] %v1332_v63  ;;  %v1289_v5 = vpop.f32.mrf.mxu3  ;;  %v1491_v6 = vpop.f32.mrf.mxu0  ;;  %v13271_v9 = vor.u32 %v11703_v3, %v9247_v0  ;;  %v13273_v10 = vor.u32 %v11701_v23, %v9249_v4  ;;  %v11804_v63 = vld [vmem:[%s17918_s7 + $0x2a4] sm:$0xf]  ;;  %v9657_v0 = vld [vmem:[%s17918_s7 + $0x2b8] sm:$0xf0] }
 0x12f   : > { %v1519_v14 = vpop.f32.mrf.mxu1  ;;  %v9660_v2 = vor.u32 %v11804_v63, %v9657_v0  ;;  %v11750_v23 = vld [vmem:[%s17918_s7 + $0xf4] sm:$0xf]  ;;  %v9441_v4 = vld [vmem:[%s17918_s7 + $0x108] sm:$0xf0] }
 0x130   : > { %17978 = vst [vmem:[#allocation6_spill] sm:$0xff] %v13273_v10  ;;  %v1594_v15 = vpack.c.bf16 %v1519_v14, %v1491_v6  ;;  %3062 = vmatmul.bf16.gmra.mxu2 %v13271_v9  ;;  %3106 = vmatmul.bf16.gmra.mxu3 %v13273_v10  ;;  %v11798_v5 = vld [vmem:[%s17918_s7 + $0x274] sm:$0xf] }
 0x131   : > { %3177 = vmatpush.bf16.msra.mxu1 %v9660_v2  ;;  %v9636_v26 = vor.u32 %v11798_v5, %v9633_v17  ;;  %v9369_v17 = vld [vmem:[%s17918_s7 + $0x78] sm:$0xf0] }
 0x132   : > { %1608 = vst [vmem:[#allocation2 + $0x70] sm:$0xff] %v1594_v15  ;;  %v9444_v15 = vor.u32 %v11750_v23, %v9441_v4  ;;  %v11888_v23 = vld [vmem:[%s17918_s7 + $0x544] sm:$0xf] }
 0x134   : > { %3134 = vmatpush.bf16.msra.mxu0 %v9444_v15 }
 0x135   : > { %v1547_v32 = vpop.f32.mrf.mxu2  ;;  %v9263_v58 = vld [vmem:[#allocation2 + $0x68] sm:$0xf]  ;;  %v11705_v60 = vld [vmem:[#allocation2 + $0x6c] sm:$0xf]  ;;  %3178 = vmatpush.bf16.msra.mxu1 %v9636_v26 }
 0x136   : > { %v1575_v36 = vpop.f32.mrf.mxu3  ;;  %v1493_v37 = vpop.f32.mrf.mxu0 }
 0x137   : > { %v1595_v33 = vpack.c.bf16 %v1575_v36, %v1547_v32  ;;  %v1521_v34 = vpop.f32.mrf.mxu1 }
 0x138   : > { %v1596_v35 = vpack.c.bf16 %v1521_v34, %v1493_v37  ;;  %v11846_v37 = vld [vmem:[%s17918_s7 + $0x3f4] sm:$0xf] }
 0x139   : > { %1609 = vst [vmem:[#allocation2 + $0x78] sm:$0xff] %v1595_v33  ;;  %v11706_v11 = vld [vmem:[#allocation2 + $0x6c] sm:$0xf0]  ;;  %v9257_v40 = vld [vmem:[#allocation2 + $0x70] sm:$0xf0] }
 0x13a   : > { %1610 = vst [vmem:[#allocation2 + $0x80] sm:$0xff] %v1596_v35  ;;  %v13295_v41 = vor.u32 %v11706_v11, %v9255_v38  ;;  %v13297_v42 = vor.u32 %v11704_v39, %v9257_v40  ;;  %v9825_v33 = vld [vmem:[%s17918_s7 + $0x408] sm:$0xf0]  ;;  %v11744_v35 = vld [vmem:[%s17918_s7 + $0xc4] sm:$0xf] }
 0x13b   : > { %v9828_v34 = vor.u32 %v11846_v37, %v9825_v33  ;;  %v9417_v38 = vld [vmem:[%s17918_s7 + $0xd8] sm:$0xf0]  ;;  %v11792_v39 = vld [vmem:[%s17918_s7 + $0x244] sm:$0xf]  ;;  %v9969_v33 = vld [vmem:[%s17918_s7 + $0x528] sm:$0xf0] }
 0x13c   : > { %17979 = vst [vmem:[#allocation7_spill] sm:$0xff] %v13295_v41  ;;  %2979 = vmatmul.bf16.gmra.mxu0 %v13295_v41  ;;  %3023 = vmatmul.bf16.gmra.mxu1 %v13297_v42  ;;  %v9420_v11 = vor.u32 %v11744_v35, %v9417_v38  ;;  %v9609_v40 = vld [vmem:[%s17918_s7 + $0x258] sm:$0xf0]  ;;  %v9345_v35 = vld [vmem:[%s17918_s7 + $0x48] sm:$0xf0] }
 0x13d   : > { %17980 = vst [vmem:[#allocation8_spill] sm:$0xff] %v13297_v42  ;;  %v1549_v52 = vpop.f32.mrf.mxu2  ;;  %3222 = vmatpush.bf16.msra.mxu2 %v9828_v34  ;;  %v9612_v47 = vor.u32 %v11792_v39, %v9609_v40  ;;  %v11726_v34 = vld [vmem:[%s17918_s7 + $0x34] sm:$0xf] }
 0x13e   : > { %v1577_v54 = vpop.f32.mrf.mxu3  ;;  %v1496_v55 = vpop.f32.mrf.mxu0  ;;  %3135 = vmatpush.bf16.msra.mxu0 %v9420_v11  ;;  %v9348_v40 = vor.u32 %v11726_v34, %v9345_v35  ;;  %v9705_v34 = vld [vmem:[%s17918_s7 + $0x318] sm:$0xf0]  ;;  %v11864_v35 = vld [vmem:[%s17918_s7 + $0x484] sm:$0xf] }
 0x13f   : > { %v1597_v56 = vpack.c.bf16 %v1577_v54, %v1549_v52  ;;  %v1524_v57 = vpop.f32.mrf.mxu1  ;;  %3179 = vmatpush.bf16.msra.mxu1 %v9612_v47 }
 0x140   : > { %v1598_v19 = vpack.c.bf16 %v1524_v57, %v1496_v55  ;;  %v11707_v59 = vld [vmem:[#allocation2 + $0x74] sm:$0xf0]  ;;  %v9265_v1 = vld [vmem:[#allocation2 + $0x78] sm:$0xf0]  ;;  %v9396_v55 = vor.u32 %v11738_v49, %v9393_v50  ;;  %v11876_v50 = vld [vmem:[%s17918_s7 + $0x4e4] sm:$0xf] }
 0x141   : > { %1611 = vst [vmem:[#allocation2 + $0x88] sm:$0xff] %v1597_v56  ;;  %v13319_v61 = vor.u32 %v11707_v59, %v9263_v58  ;;  %v13321_v62 = vor.u32 %v11705_v60, %v9265_v1  ;;  %v9271_v28 = vld [vmem:[#allocation2 + $0x80] sm:$0xf]  ;;  %v11708_v29 = vld [vmem:[#allocation2 + $0x84] sm:$0xf] }
 0x142   : > { %1612 = vst [vmem:[#allocation2 + $0x90] sm:$0xff] %v1598_v19  ;;  %v9585_v56 = vld [vmem:[%s17918_s7 + $0x228] sm:$0xf0]  ;;  %v11840_v59 = vld [vmem:[%s17918_s7 + $0x3c4] sm:$0xf]  ;;  %3136 = vmatpush.bf16.msra.mxu0 %v9396_v55 }
 0x143   : > { %3067 = vmatmul.bf16.gmra.mxu2 %v13319_v61  ;;  %3111 = vmatmul.bf16.gmra.mxu3 %v13321_v62  ;;  %v9801_v60 = vld [vmem:[%s17918_s7 + $0x3d8] sm:$0xf0]  ;;  %v9588_v2 = vor.u32 %v11786_v51, %v9585_v56 }
 0x144   : > { %v9753_v49 = vld [vmem:[%s17918_s7 + $0x378] sm:$0xf0] }
 0x145   : > { %v1552_v3 = vpop.f32.mrf.mxu2  ;;  %3180 = vmatpush.bf16.msra.mxu1 %v9588_v2  ;;  %v9945_v55 = vld [vmem:[%s17918_s7 + $0x4f8] sm:$0xf0]  ;;  %v11768_v2 = vld [vmem:[%s17918_s7 + $0x184] sm:$0xf] }
 0x146   : > { %v1580_v6 = vpop.f32.mrf.mxu3  ;;  %v1498_v14 = vpop.f32.mrf.mxu0 }
 0x147   : > { %v1599_v20 = vpack.c.bf16 %v1580_v6, %v1552_v3  ;;  %v1526_v24 = vpop.f32.mrf.mxu1  ;;  %v9804_v3 = vor.u32 %v11840_v59, %v9801_v60  ;;  %v9993_v6 = vld [vmem:[%s17918_s7 + $0x558] sm:$0xf0] }
 0x148   : > { %v1600_v27 = vpack.c.bf16 %v1526_v24, %v1498_v14  ;;  %v9279_v54 = vld [vmem:[#allocation2 + $0x88] sm:$0xf]  ;;  %v11709_v19 = vld [vmem:[#allocation2 + $0x8c] sm:$0xf]  ;;  %v11732_v14 = vld [vmem:[%s17918_s7 + $0x64] sm:$0xf]  ;;  %v9996_v15 = vor.u32 %v11888_v23, %v9993_v6 }
 0x149   : > { %1613 = vst [vmem:[#allocation2 + $0x98] sm:$0xff] %v1599_v20  ;;  %v11710_v30 = vld [vmem:[#allocation2 + $0x8c] sm:$0xf0]  ;;  %v9273_v31 = vld [vmem:[#allocation2 + $0x90] sm:$0xf0]  ;;  %3223 = vmatpush.bf16.msra.mxu2 %v9804_v3  ;;  %v9372_v26 = vor.u32 %v11732_v14, %v9369_v17 }
 0x14a   : > { %1614 = vst [vmem:[#allocation2 + $0xa0] sm:$0xff] %v1600_v27  ;;  %v13343_v32 = vor.u32 %v11710_v30, %v9271_v28  ;;  %v13345_v36 = vor.u32 %v11708_v29, %v9273_v31  ;;  %v11780_v20 = vld [vmem:[%s17918_s7 + $0x1e4] sm:$0xf]  ;;  %v9561_v24 = vld [vmem:[%s17918_s7 + $0x1f8] sm:$0xf0]  ;;  %3267 = vmatpush.bf16.msra.mxu3 %v9996_v15 }
 0x14b   : > { %v9564_v27 = vor.u32 %v11780_v20, %v9561_v24  ;;  %v11834_v28 = vld [vmem:[%s17918_s7 + $0x394] sm:$0xf]  ;;  %v9777_v29 = vld [vmem:[%s17918_s7 + $0x3a8] sm:$0xf0]  ;;  %3137 = vmatpush.bf16.msra.mxu0 %v9372_v26  ;;  %v9513_v3 = vld [vmem:[%s17918_s7 + $0x198] sm:$0xf0] }
 0x14c   : > { %17981 = vst [vmem:[#allocation9_spill] sm:$0xff] %v13345_v36  ;;  %2984 = vmatmul.bf16.gmra.mxu0 %v13343_v32  ;;  %3028 = vmatmul.bf16.gmra.mxu1 %v13345_v36  ;;  %v11882_v30 = vld [vmem:[%s17918_s7 + $0x514] sm:$0xf]  ;;  %v9780_v37 = vor.u32 %v11834_v28, %v9777_v29  ;;  %v9729_v6 = vld [vmem:[%s17918_s7 + $0x348] sm:$0xf0]  ;;  %v9516_v20 = vor.u32 %v11768_v2, %v9513_v3 }
 0x14d   : > { %v1554_v25 = vpop.f32.mrf.mxu2  ;;  %v9972_v11 = vor.u32 %v11882_v30, %v9969_v33  ;;  %3181 = vmatpush.bf16.msra.mxu1 %v9564_v27  ;;  %v11822_v23 = vld [vmem:[%s17918_s7 + $0x334] sm:$0xf]  ;;  %v9921_v15 = vld [vmem:[%s17918_s7 + $0x4c8] sm:$0xf0]  ;;  %v11816_v33 = vld [vmem:[%s17918_s7 + $0x304] sm:$0xf] }
 0x14e   : > { %v1582_v52 = vpop.f32.mrf.mxu3  ;;  %v1501_v53 = vpop.f32.mrf.mxu0  ;;  %3224 = vmatpush.bf16.msra.mxu2 %v9780_v37  ;;  %v11870_v14 = vld [vmem:[%s17918_s7 + $0x4b4] sm:$0xf]  ;;  %v9732_v24 = vor.u32 %v11822_v23, %v9729_v6 }
 0x14f   : > { %v1601_v57 = vpack.c.bf16 %v1582_v52, %v1554_v25  ;;  %v1529_v58 = vpop.f32.mrf.mxu1  ;;  %3268 = vmatpush.bf16.msra.mxu3 %v9972_v11  ;;  %3138 = vmatpush.bf16.msra.mxu0 %v9348_v40  ;;  %v9924_v26 = vor.u32 %v11870_v14, %v9921_v15  ;;  %v9708_v40 = vor.u32 %v11816_v33, %v9705_v34 }
 0x150   : > { %v1602_v1 = vpack.c.bf16 %v1529_v58, %v1501_v53  ;;  %v11711_v63 = vld [vmem:[#allocation2 + $0x94] sm:$0xf0]  ;;  %v9281_v0 = vld [vmem:[#allocation2 + $0x98] sm:$0xf0]  ;;  %v9540_v58 = vor.u32 %v11774_v12, %v9537_v43 }
 0x151   : > { %1615 = vst [vmem:[#allocation2 + $0xa8] sm:$0xff] %v1601_v57  ;;  %v13394_v4 = vor.u32 %v11711_v63, %v9279_v54  ;;  %v13396_v5 = vor.u32 %v11709_v19, %v9281_v0  ;;  %v9287_v52 = vld [vmem:[#allocation2 + $0xa0] sm:$0xf]  ;;  %v11712_v53 = vld [vmem:[#allocation2 + $0xa4] sm:$0xf]  ;;  %v9756_v54 = vor.u32 %v11828_v48, %v9753_v49  ;;  %v9948_v19 = vor.u32 %v11876_v50, %v9945_v55 }
 0x152   : > { %1616 = vst [vmem:[#allocation2 + $0xb0] sm:$0xff] %v1602_v1  ;;  %v11720_v1 = vld [vmem:[%s17918_s7 + $0x4] sm:$0xf]  ;;  %v9321_v63 = vld [vmem:[%s17918_s7 + $0x18] sm:$0xf0]  ;;  %3182 = vmatpush.bf16.msra.mxu1 %v9540_v58 }
 0x153   : > { %3072 = vmatmul.bf16.gmra.mxu2 %v13394_v4  ;;  %3116 = vmatmul.bf16.gmra.mxu3 %v13396_v5  ;;  %v9324_v0 = vor.u32 %v11720_v1, %v9321_v63  ;;  %v9897_v12 = vld [vmem:[%s17918_s7 + $0x498] sm:$0xf0]  ;;  %v13502_v55 = vld [vmem:[%s17919_s8] sm:$0x3f] }
 0x154   : > { %3225 = vmatpush.bf16.msra.mxu2 %v9756_v54  ;;  %3269 = vmatpush.bf16.msra.mxu3 %v9948_v19  ;;  %v13509_v1 = vperm.slane %v13502_v55, 0 }
 0x155   : > { %v1557_v31 = vpop.f32.mrf.mxu2  ;;  %3139 = vmatpush.bf16.msra.mxu0 %v9324_v0 }
 0x156   : > { %v1585_v38 = vpop.f32.mrf.mxu3  ;;  %v1503_v39 = vpop.f32.mrf.mxu0  ;;  %3183 = vmatpush.bf16.msra.mxu1 %v9516_v20 }
 0x157   : > { %v1603_v25 = vpack.c.bf16 %v1585_v38, %v1557_v31  ;;  %v1531_v47 = vpop.f32.mrf.mxu1 }
 0x158   : > { %v1604_v51 = vpack.c.bf16 %v1531_v47, %v1503_v39  ;;  %v9295_v29 = vld [vmem:[#allocation2 + $0xa8] sm:$0xf]  ;;  %v11713_v30 = vld [vmem:[#allocation2 + $0xac] sm:$0xf]  ;;  %3226 = vmatpush.bf16.msra.mxu2 %v9732_v24  ;;  %3270 = vmatpush.bf16.msra.mxu3 %v9924_v26  ;;  %v9900_v47 = vor.u32 %v11864_v35, %v9897_v12 }
 0x159   : > { %1617 = vst [vmem:[#allocation2 + $0xb8] sm:$0xff] %v1603_v25  ;;  %v11714_v56 = vld [vmem:[#allocation2 + $0xac] sm:$0xf0]  ;;  %v9289_v57 = vld [vmem:[#allocation2 + $0xb0] sm:$0xf0] }
 0x15a   : > { %1618 = vst [vmem:[#allocation2 + $0xc0] sm:$0xff] %v1604_v51  ;;  %v13451_v59 = vor.u32 %v11714_v56, %v9287_v52  ;;  %v13453_v60 = vor.u32 %v11712_v53, %v9289_v57 }
 0x15c   : > { %2989 = vmatmul.bf16.gmra.mxu0 %v13451_v59  ;;  %3033 = vmatmul.bf16.gmra.mxu1 %v13453_v60 }
 0x15d   : > { %v1559_v17 = vpop.f32.mrf.mxu2  ;;  %3227 = vmatpush.bf16.msra.mxu2 %v9708_v40  ;;  %3271 = vmatpush.bf16.msra.mxu3 %v9900_v47 }
 0x15e   : > { %v1587_v27 = vpop.f32.mrf.mxu3  ;;  %v1506_v28 = vpop.f32.mrf.mxu0 }
 0x15f   : > { %v1605_v31 = vpack.c.bf16 %v1587_v27, %v1559_v17  ;;  %v1534_v37 = vpop.f32.mrf.mxu1 }
 0x160   : > { %v1606_v38 = vpack.c.bf16 %v1534_v37, %v1506_v28  ;;  %v11715_v39 = vld [vmem:[#allocation2 + $0xb4] sm:$0xf0]  ;;  %v9297_v11 = vld [vmem:[#allocation2 + $0xb8] sm:$0xf0] }
 0x161   : > { %1619 = vst [vmem:[#allocation2 + $0xc8] sm:$0xff] %v1605_v31  ;;  %v13493_v43 = vor.u32 %v11715_v39, %v9295_v29  ;;  %v13495_v25 = vor.u32 %v11713_v30, %v9297_v11  ;;  %v9303_v53 = vld [vmem:[#allocation2 + $0xc0] sm:$0xf]  ;;  %v11716_v54 = vld [vmem:[#allocation2 + $0xc4] sm:$0xf] }
 0x162   : > { %1620 = vst [vmem:[#allocation2 + $0xd0] sm:$0xff] %v1606_v38 }
 0x163   : > { %3077 = vmatmul.bf16.gmra.mxu2 %v13493_v43  ;;  %3121 = vmatmul.bf16.gmra.mxu3 %v13495_v25 }
 0x165   : > { %v1562_v48 = vpop.f32.mrf.mxu2 }
 0x166   : > { %v1590_v49 = vpop.f32.mrf.mxu3  ;;  %v1508_v50 = vpop.f32.mrf.mxu0 }
 0x167   : > { %v1607_v51 = vpack.c.bf16 %v1590_v49, %v1562_v48  ;;  %v1536_v52 = vpop.f32.mrf.mxu1 }
 0x168   : > { %v9311_v6 = vld [vmem:[#allocation2 + $0xc8] sm:$0xf]  ;;  %v11717_v15 = vld [vmem:[#allocation2 + $0xcc] sm:$0xf] }
 0x169   : > { %1621 = vst [vmem:[#allocation2 + $0xd8] sm:$0xff] %v1607_v51  ;;  %v11718_v56 = vld [vmem:[#allocation2 + $0xcc] sm:$0xf0]  ;;  %v9305_v57 = vld [vmem:[#allocation2 + $0xd0] sm:$0xf0] }
 0x16a   : > { %v13504_v58 = vor.u32 %v11718_v56, %v9303_v53  ;;  %v13506_v19 = vor.u32 %v11716_v54, %v9305_v57  ;;  %v9879_v57 = vld [vmem:[%s17918_s7 + $0x458] sm:$0xf] }
 0x16c   : > { %2994 = vmatmul.bf16.gmra.mxu0 %v13504_v58  ;;  %3038 = vmatmul.bf16.gmra.mxu1 %v13506_v19 }
 0x16d   : > { %v1564_v63 = vpop.f32.mrf.mxu2 }
 0x16e   : > { %v1592_v0 = vpop.f32.mrf.mxu3  ;;  %v2965_v2 = vpop.f32.mrf.mxu0  ;;  %v11862_v63 = vld [vmem:[%s17918_s7 + $0x46c] sm:$0xf0] }
 0x16f   : > { %v2966_v3 = vadd.f32 %v2965_v2, %v13509_v1  ;;  %v3009_v23 = vpop.f32.mrf.mxu1  ;;  %v9495_v0 = vld [vmem:[%s17918_s7 + $0x158] sm:$0xf]  ;;  %v9880_v2 = vor.u32 %v11862_v63, %v9879_v57 }
 0x170   : > { %v11719_v14 = vld [vmem:[#allocation2 + $0xd4] sm:$0xf0]  ;;  %v9313_v17 = vld [vmem:[#allocation2 + $0xd8] sm:$0xf0] }
 0x171   : > { %v3010_v20 = vadd.f32 %v3009_v23, %v2966_v3  ;;  %v13514_v24 = vor.u32 %v11719_v14, %v9311_v6  ;;  %v13516_v26 = vor.u32 %v11717_v15, %v9313_v17  ;;  %v11766_v3 = vld [vmem:[%s17918_s7 + $0x16c] sm:$0xf0]  ;;  %v10071_v23 = vld [vmem:[%s17918_s7 + $0x5d8] sm:$0xf]  ;;  %3396 = vmatpush.bf16.msrb.mxu2 %v9880_v2 }
 0x172   : > { %v11910_v6 = vld [vmem:[%s17918_s7 + $0x5ec] sm:$0xf0]  ;;  %v9496_v14 = vor.u32 %v11766_v3, %v9495_v0  ;;  %v9687_v17 = vld [vmem:[%s17918_s7 + $0x2d8] sm:$0xf]  ;;  %v9663_v3 = vld [vmem:[%s17918_s7 + $0x2a8] sm:$0xf] }
 0x173   : > { %3082 = vmatmul.bf16.gmra.mxu2 %v13514_v24  ;;  %3126 = vmatmul.bf16.gmra.mxu3 %v13516_v26  ;;  %v10072_v15 = vor.u32 %v11910_v6, %v10071_v23  ;;  %v11808_v23 = vld [vmem:[%s17918_s7 + $0x2bc] sm:$0xf0] }
 0x174   : > { %3308 = vmatpush.bf16.msrb.mxu0 %v9496_v14  ;;  %v9664_v6 = vor.u32 %v11808_v23, %v9663_v3  ;;  %v11898_v23 = vld [vmem:[%s17918_s7 + $0x58c] sm:$0xf0] }
 0x175   : > { %3440 = vmatpush.bf16.msrb.mxu3 %v10072_v15 }
 0x176   : > { %v2967_v27 = vpop.f32.mrf.mxu0 }
 0x177   : > { %v3011_v28 = vpop.f32.mrf.mxu1  ;;  %v2968_v48 = vadd.f32 %v2967_v27, %v13509_v1 }
 0x179   : > { %v3012_v50 = vadd.f32 %v3011_v28, %v2968_v48  ;;  %v11760_v48 = vld [vmem:[%s17918_s7 + $0x13c] sm:$0xf0] }
 0x17c   : > { %3140 = vmatmul.bf16.vlgmr.msra.gmra.mxu0 %v13218_v16  ;;  %3184 = vmatmul.bf16.vlgmr.msra.gmra.mxu1 %v13221_v22 }
 0x17e   : > { %v2970_v29 = vpop.f32.mrf.mxu0 }
 0x17f   : > { %v2971_v30 = vadd.f32 %v2970_v29, %v13509_v1  ;;  %v3014_v31 = vpop.f32.mrf.mxu1 }
 0x181   : > { %v3015_v37 = vadd.f32 %v3014_v31, %v2971_v30 }
 0x183   : > { %3228 = vmatmul.bf16.vlgmr.msra.gmra.mxu2 %v13241_v7  ;;  %3272 = vmatmul.bf16.vlgmr.msra.gmra.mxu3 %v13243_v8 }
 0x186   : > { %v2972_v33 = vpop.f32.mrf.mxu0 }
 0x187   : > { %v3016_v34 = vpop.f32.mrf.mxu1  ;;  %v2973_v31 = vadd.f32 %v2972_v33, %v13509_v1  ;;  %v9471_v33 = vld [vmem:[%s17918_s7 + $0x128] sm:$0xf] }
 0x18c   : > { %3145 = vmatmul.bf16.gmra.mxu0 %v13231_v21  ;;  %3189 = vmatmul.bf16.gmra.mxu1 %v13234_v45 }
 0x18e   : > { %v2975_v35 = vpop.f32.mrf.mxu0 }
 0x18f   : > { %v2976_v38 = vadd.f32 %v2975_v35, %v13509_v1  ;;  %v3019_v39 = vpop.f32.mrf.mxu1 }
 0x191   : > { %v13528_v11 = vadd.f32 %v3019_v39, %v2976_v38  ;;  %v3017_v38 = vadd.f32 %v3016_v34, %v2973_v31 }
 0x193   : > { %3233 = vmatmul.bf16.gmra.mxu2 %v13257_v44  ;;  %3277 = vmatmul.bf16.gmra.mxu3 %v13259_v46  ;;  %v3053_v40 = vpop.f32.mrf.mxu2  ;;  %v3097_v12 = vpop.f32.mrf.mxu3 }
 0x194   : > { %v3054_v47 = vadd.f32 %v3053_v40, %v3010_v20  ;;  %v11814_v20 = vld [vmem:[%s17918_s7 + $0x2ec] sm:$0xf0] }
 0x195   : > { %v9688_v29 = vor.u32 %v11814_v20, %v9687_v17  ;;  %v9447_v20 = vld [vmem:[%s17918_s7 + $0xf8] sm:$0xf] }
 0x196   : > { %v13533_v49 = vadd.f32 %v3097_v12, %v3054_v47  ;;  %v11856_v47 = vld [vmem:[%s17918_s7 + $0x43c] sm:$0xf0]  ;;  %v2977_v0 = vpop.f32.mrf.mxu0 }
 0x197   : > { %3352 = vmatpush.bf16.msrb.mxu1 %v9688_v29  ;;  %v3021_v2 = vpop.f32.mrf.mxu1  ;;  %v2978_v29 = vadd.f32 %v2977_v0, %v13509_v1 }
 0x198   : > { %17982 = vst [vmem:[#allocation10_spill] sm:$0xff] %v13533_v49 }
 0x19b   : > { %v3055_v51 = vpop.f32.mrf.mxu2  ;;  %v3099_v52 = vpop.f32.mrf.mxu3  ;;  %3353 = vmatpush.bf16.msrb.mxu1 %v9664_v6 }
 0x19c   : > { %v3056_v53 = vadd.f32 %v3055_v51, %v3012_v50  ;;  %3150 = vmatmul.bf16.gmra.mxu0 %v13245_v13  ;;  %3194 = vmatmul.bf16.gmra.mxu1 %v13250_v18  ;;  %v10047_v50 = vld [vmem:[%s17918_s7 + $0x5a8] sm:$0xf]  ;;  %v11904_v51 = vld [vmem:[%s17918_s7 + $0x5bc] sm:$0xf0] }
 0x19d   : > { %v10048_v57 = vor.u32 %v11904_v51, %v10047_v50  ;;  %v11748_v50 = vld [vmem:[%s17918_s7 + $0xdc] sm:$0xf0]  ;;  %v9615_v51 = vld [vmem:[%s17918_s7 + $0x248] sm:$0xf] }
 0x19e   : > { %v13537_v54 = vadd.f32 %v3099_v52, %v3056_v53  ;;  %v9472_v53 = vor.u32 %v11760_v48, %v9471_v33  ;;  %v3022_v33 = vadd.f32 %v3021_v2, %v2978_v29  ;;  %v10023_v2 = vld [vmem:[%s17918_s7 + $0x578] sm:$0xf] }
 0x19f   : > { %3441 = vmatpush.bf16.msrb.mxu3 %v10048_v57 }
 0x1a0   : > { %17983 = vst [vmem:[#allocation11_spill] sm:$0xff] %v13537_v54  ;;  %3309 = vmatpush.bf16.msrb.mxu0 %v9472_v53  ;;  %v11796_v53 = vld [vmem:[%s17918_s7 + $0x25c] sm:$0xf0] }
 0x1a1   : > { %v9616_v3 = vor.u32 %v11796_v53, %v9615_v51  ;;  %v9375_v51 = vld [vmem:[%s17918_s7 + $0x68] sm:$0xf]  ;;  %v11736_v53 = vld [vmem:[%s17918_s7 + $0x7c] sm:$0xf0] }
 0x1a3   : > { %3238 = vmatmul.bf16.gmra.mxu2 %v13271_v9  ;;  %3282 = vmatmul.bf16.gmra.mxu3 %v13273_v10  ;;  %v3058_v27 = vpop.f32.mrf.mxu2  ;;  %v3102_v28 = vpop.f32.mrf.mxu3 }
 0x1a4   : > { %v3059_v30 = vadd.f32 %v3058_v27, %v3015_v37  ;;  %v9855_v37 = vld [vmem:[%s17918_s7 + $0x428] sm:$0xf]  ;;  %v11754_v27 = vld [vmem:[%s17918_s7 + $0x10c] sm:$0xf0] }
 0x1a5   : > { %v9856_v34 = vor.u32 %v11856_v47, %v9855_v37  ;;  %v9448_v31 = vor.u32 %v11754_v27, %v9447_v20  ;;  %v11850_v37 = vld [vmem:[%s17918_s7 + $0x40c] sm:$0xf0]  ;;  %v9423_v47 = vld [vmem:[%s17918_s7 + $0xc8] sm:$0xf]  ;;  %v9399_v20 = vld [vmem:[%s17918_s7 + $0x98] sm:$0xf] }
 0x1a6   : > { %v13568_v35 = vadd.f32 %v3102_v28, %v3059_v30  ;;  %v9639_v28 = vld [vmem:[%s17918_s7 + $0x278] sm:$0xf]  ;;  %v9424_v0 = vor.u32 %v11748_v50, %v9423_v47  ;;  %v11742_v27 = vld [vmem:[%s17918_s7 + $0xac] sm:$0xf0] }
 0x1a7   : > { %3397 = vmatpush.bf16.msrb.mxu2 %v9856_v34  ;;  %3310 = vmatpush.bf16.msrb.mxu0 %v9448_v31  ;;  %v9400_v31 = vor.u32 %v11742_v27, %v9399_v20 }
 0x1a8   : > { %17984 = vst [vmem:[#allocation12_spill] sm:$0xff] %v13568_v35 }
 0x1ab   : > { %v3060_v39 = vpop.f32.mrf.mxu2  ;;  %v3104_v40 = vpop.f32.mrf.mxu3  ;;  %3311 = vmatpush.bf16.msrb.mxu0 %v9424_v0 }
 0x1ac   : > { %v3061_v12 = vadd.f32 %v3060_v39, %v3017_v38  ;;  %3155 = vmatmul.bf16.gmra.mxu0 %v13295_v41  ;;  %3199 = vmatmul.bf16.gmra.mxu1 %v13297_v42 }
 0x1ae   : > { %v13590_v52 = vadd.f32 %v3104_v40, %v3061_v12  ;;  %v9831_v12 = vld [vmem:[%s17918_s7 + $0x3f8] sm:$0xf] }
 0x1af   : > { %v9832_v48 = vor.u32 %v11850_v37, %v9831_v12  ;;  %v9999_v12 = vld [vmem:[%s17918_s7 + $0x548] sm:$0xf]  ;;  %3312 = vmatpush.bf16.msrb.mxu0 %v9400_v31 }
 0x1b0   : > { %17985 = vst [vmem:[#allocation13_spill] sm:$0xff] %v13590_v52 }
 0x1b1   : > { %3398 = vmatpush.bf16.msrb.mxu2 %v9832_v48 }
 0x1b3   : > { %3243 = vmatmul.bf16.gmra.mxu2 %v13319_v61  ;;  %3287 = vmatmul.bf16.gmra.mxu3 %v13321_v62  ;;  %v3063_v14 = vpop.f32.mrf.mxu2  ;;  %v3107_v15 = vpop.f32.mrf.mxu3 }
 0x1b4   : > { %v3064_v17 = vadd.f32 %v3063_v14, %v13528_v11  ;;  %v11802_v11 = vld [vmem:[%s17918_s7 + $0x28c] sm:$0xf0] }
 0x1b5   : > { %v9640_v38 = vor.u32 %v11802_v11, %v9639_v28  ;;  %v9591_v28 = vld [vmem:[%s17918_s7 + $0x218] sm:$0xf]  ;;  %v11790_v11 = vld [vmem:[%s17918_s7 + $0x22c] sm:$0xf0] }
 0x1b6   : > { %v13613_v30 = vadd.f32 %v3107_v15, %v3064_v17  ;;  %v10024_v15 = vor.u32 %v11898_v23, %v10023_v2  ;;  %v11784_v2 = vld [vmem:[%s17918_s7 + $0x1fc] sm:$0xf0] }
 0x1b7   : > { %3354 = vmatpush.bf16.msrb.mxu1 %v9640_v38  ;;  %v9592_v38 = vor.u32 %v11790_v11, %v9591_v28  ;;  %v11886_v28 = vld [vmem:[%s17918_s7 + $0x52c] sm:$0xf0]  ;;  %v9351_v11 = vld [vmem:[%s17918_s7 + $0x38] sm:$0xf] }
 0x1b8   : > { %3442 = vmatpush.bf16.msrb.mxu3 %v10024_v15  ;;  %v11838_v15 = vld [vmem:[%s17918_s7 + $0x3ac] sm:$0xf0] }
 0x1b9   : > { %v2980_v39 = vpop.f32.mrf.mxu0  ;;  %v3024_v40 = vpop.f32.mrf.mxu1 }
 0x1ba   : > { %v2981_v34 = vadd.f32 %v2980_v39, %v13509_v1  ;;  %v9807_v39 = vld [vmem:[%s17918_s7 + $0x3c8] sm:$0xf] }
 0x1bb   : > { %v3065_v57 = vpop.f32.mrf.mxu2  ;;  %v3109_v17 = vpop.f32.mrf.mxu3  ;;  %3355 = vmatpush.bf16.msrb.mxu1 %v9616_v3  ;;  %v9376_v3 = vor.u32 %v11736_v53, %v9375_v51  ;;  %v11832_v51 = vld [vmem:[%s17918_s7 + $0x37c] sm:$0xf0]  ;;  %v9951_v53 = vld [vmem:[%s17918_s7 + $0x4e8] sm:$0xf] }
 0x1bc   : > { %v3025_v6 = vadd.f32 %v3024_v40, %v2981_v34  ;;  %v3066_v14 = vadd.f32 %v3065_v57, %v3022_v33  ;;  %3160 = vmatmul.bf16.gmra.mxu0 %v13343_v32  ;;  %3204 = vmatmul.bf16.gmra.mxu1 %v13345_v36  ;;  %v11844_v40 = vld [vmem:[%s17918_s7 + $0x3dc] sm:$0xf0]  ;;  %v9567_v57 = vld [vmem:[%s17918_s7 + $0x1e8] sm:$0xf] }
 0x1bd   : > { %v9808_v47 = vor.u32 %v11844_v40, %v9807_v39  ;;  %v11892_v33 = vld [vmem:[%s17918_s7 + $0x55c] sm:$0xf0]  ;;  %v9568_v23 = vor.u32 %v11784_v2, %v9567_v57  ;;  %3313 = vmatpush.bf16.msrb.mxu0 %v9376_v3  ;;  %v9543_v39 = vld [vmem:[%s17918_s7 + $0x1b8] sm:$0xf] }
 0x1be   : > { %v13654_v29 = vadd.f32 %v3109_v17, %v3066_v14  ;;  %v10000_v50 = vor.u32 %v11892_v33, %v9999_v12  ;;  %v9783_v14 = vld [vmem:[%s17918_s7 + $0x398] sm:$0xf]  ;;  %v11778_v33 = vld [vmem:[%s17918_s7 + $0x1cc] sm:$0xf0] }
 0x1bf   : > { %3356 = vmatpush.bf16.msrb.mxu1 %v9592_v38  ;;  %3399 = vmatpush.bf16.msrb.mxu2 %v9808_v47  ;;  %v9975_v17 = vld [vmem:[%s17918_s7 + $0x518] sm:$0xf]  ;;  %v9784_v27 = vor.u32 %v11838_v15, %v9783_v14  ;;  %v11730_v38 = vld [vmem:[%s17918_s7 + $0x4c] sm:$0xf0]  ;;  %v9327_v14 = vld [vmem:[%s17918_s7 + $0x8] sm:$0xf] }
 0x1c0   : > { %3443 = vmatpush.bf16.msrb.mxu3 %v10000_v50  ;;  %v9976_v31 = vor.u32 %v11886_v28, %v9975_v17  ;;  %v9352_v47 = vor.u32 %v11730_v38, %v9351_v11  ;;  %v9759_v50 = vld [vmem:[%s17918_s7 + $0x368] sm:$0xf]  ;;  %v11724_v15 = vld [vmem:[%s17918_s7 + $0x1c] sm:$0xf0]  ;;  %v9735_v38 = vld [vmem:[%s17918_s7 + $0x338] sm:$0xf] }
 0x1c1   : > { %v2982_v34 = vpop.f32.mrf.mxu0  ;;  %v3026_v48 = vpop.f32.mrf.mxu1  ;;  %v9760_v57 = vor.u32 %v11832_v51, %v9759_v50  ;;  %v9519_v17 = vld [vmem:[%s17918_s7 + $0x188] sm:$0xf]  ;;  %v9328_v28 = vor.u32 %v11724_v15, %v9327_v14 }
 0x1c2   : > { %v2983_v0 = vadd.f32 %v2982_v34, %v13509_v1  ;;  %3314 = vmatpush.bf16.msrb.mxu0 %v9352_v47 }
 0x1c3   : > { %3248 = vmatmul.bf16.gmra.mxu2 %v13394_v4  ;;  %3292 = vmatmul.bf16.gmra.mxu3 %v13396_v5 }
 0x1c4   : > { %v3027_v20 = vadd.f32 %v3026_v48, %v2983_v0  ;;  %3357 = vmatpush.bf16.msrb.mxu1 %v9568_v23  ;;  %3400 = vmatpush.bf16.msrb.mxu2 %v9784_v27  ;;  %v9544_v48 = vor.u32 %v11778_v33, %v9543_v39  ;;  %v11880_v0 = vld [vmem:[%s17918_s7 + $0x4fc] sm:$0xf0]  ;;  %v11826_v39 = vld [vmem:[%s17918_s7 + $0x34c] sm:$0xf0] }
 0x1c5   : > { %3444 = vmatpush.bf16.msrb.mxu3 %v9976_v31  ;;  %v9952_v23 = vor.u32 %v11880_v0, %v9951_v53  ;;  %v11772_v31 = vld [vmem:[%s17918_s7 + $0x19c] sm:$0xf0]  ;;  %v9736_v47 = vor.u32 %v11826_v39, %v9735_v38  ;;  %v11874_v33 = vld [vmem:[%s17918_s7 + $0x4cc] sm:$0xf0]  ;;  %v9711_v53 = vld [vmem:[%s17918_s7 + $0x308] sm:$0xf] }
 0x1c6   : > { %v3068_v40 = vpop.f32.mrf.mxu2  ;;  %v3112_v12 = vpop.f32.mrf.mxu3  ;;  %v9520_v11 = vor.u32 %v11772_v31, %v9519_v17  ;;  %3315 = vmatpush.bf16.msrb.mxu0 %v9328_v28  ;;  %v9903_v0 = vld [vmem:[%s17918_s7 + $0x488] sm:$0xf] }
 0x1c7   : > { %v3069_v34 = vadd.f32 %v3068_v40, %v3025_v6  ;;  %v9927_v40 = vld [vmem:[%s17918_s7 + $0x4b8] sm:$0xf] }
 0x1c8   : > { %3358 = vmatpush.bf16.msrb.mxu1 %v9544_v48  ;;  %3401 = vmatpush.bf16.msrb.mxu2 %v9760_v57  ;;  %v11820_v57 = vld [vmem:[%s17918_s7 + $0x31c] sm:$0xf0] }
 0x1c9   : > { %v13724_v6 = vadd.f32 %v3112_v12, %v3069_v34  ;;  %v2985_v3 = vpop.f32.mrf.mxu0  ;;  %v3029_v2 = vpop.f32.mrf.mxu1  ;;  %3445 = vmatpush.bf16.msrb.mxu3 %v9952_v23  ;;  %v9928_v34 = vor.u32 %v11874_v33, %v9927_v40 }
 0x1ca   : > { %v2986_v27 = vadd.f32 %v2985_v3, %v13509_v1  ;;  %v9712_v3 = vor.u32 %v11820_v57, %v9711_v53 }
 0x1cc   : > { %v3030_v12 = vadd.f32 %v3029_v2, %v2986_v27  ;;  %3165 = vmatmul.bf16.gmra.mxu0 %v13451_v59  ;;  %3209 = vmatmul.bf16.gmra.mxu1 %v13453_v60  ;;  %v11868_v2 = vld [vmem:[%s17918_s7 + $0x49c] sm:$0xf0] }
 0x1cd   : > { %3359 = vmatpush.bf16.msrb.mxu1 %v9520_v11  ;;  %3402 = vmatpush.bf16.msrb.mxu2 %v9736_v47  ;;  %v9904_v15 = vor.u32 %v11868_v2, %v9903_v0 }
 0x1ce   : > { %v3070_v48 = vpop.f32.mrf.mxu2  ;;  %v3114_v50 = vpop.f32.mrf.mxu3  ;;  %3446 = vmatpush.bf16.msrb.mxu3 %v9928_v34 }
 0x1cf   : > { %v3071_v51 = vadd.f32 %v3070_v48, %v3027_v20 }
 0x1d1   : > { %v13765_v23 = vadd.f32 %v3114_v50, %v3071_v51  ;;  %v2987_v20 = vpop.f32.mrf.mxu0  ;;  %v3031_v14 = vpop.f32.mrf.mxu1  ;;  %3403 = vmatpush.bf16.msrb.mxu2 %v9712_v3 }
 0x1d2   : > { %v2988_v17 = vadd.f32 %v2987_v20, %v13509_v1  ;;  %3447 = vmatpush.bf16.msrb.mxu3 %v9904_v15 }
 0x1d3   : > { %3253 = vmatmul.bf16.gmra.mxu2 %v13493_v43  ;;  %3297 = vmatmul.bf16.gmra.mxu3 %v13495_v25 }
 0x1d4   : > { %v3032_v28 = vadd.f32 %v3031_v14, %v2988_v17 }
 0x1d6   : > { %v3073_v31 = vpop.f32.mrf.mxu2  ;;  %v3117_v11 = vpop.f32.mrf.mxu3 }
 0x1d7   : > { %v3074_v38 = vadd.f32 %v3073_v31, %v3030_v12 }
 0x1d9   : > { %v13772_v39 = vadd.f32 %v3117_v11, %v3074_v38  ;;  %v2990_v40 = vpop.f32.mrf.mxu0  ;;  %v3034_v47 = vpop.f32.mrf.mxu1 }
 0x1da   : > { %v2991_v33 = vadd.f32 %v2990_v40, %v13509_v1 }
 0x1dc   : > { %v3035_v34 = vadd.f32 %v3034_v47, %v2991_v33  ;;  %3170 = vmatmul.bf16.gmra.mxu0 %v13504_v58  ;;  %3214 = vmatmul.bf16.gmra.mxu1 %v13506_v19 }
 0x1de   : > { %v3075_v48 = vpop.f32.mrf.mxu2  ;;  %v3119_v50 = vpop.f32.mrf.mxu3 }
 0x1df   : > { %v3076_v51 = vadd.f32 %v3075_v48, %v3032_v28 }
 0x1e1   : > { %v13777_v53 = vadd.f32 %v3119_v50, %v3076_v51  ;;  %v2992_v57 = vpop.f32.mrf.mxu0  ;;  %v3036_v0 = vpop.f32.mrf.mxu1 }
 0x1e2   : > { %v2993_v12 = vadd.f32 %v2992_v57, %v13509_v1  ;;  %v9665_v57 = vld [vmem:[%s17918_s7 + $0x2c0] sm:$0xf0] }
 0x1e3   : > { %3258 = vmatmul.bf16.gmra.mxu2 %v13514_v24  ;;  %3302 = vmatmul.bf16.gmra.mxu3 %v13516_v26 }
 0x1e4   : > { %v3037_v2 = vadd.f32 %v3036_v0, %v2993_v12 }
 0x1e6   : > { %v3078_v20 = vpop.f32.mrf.mxu2  ;;  %v3122_v14 = vpop.f32.mrf.mxu3 }
 0x1e7   : > { %v3079_v15 = vadd.f32 %v3078_v20, %v3035_v34 }
 0x1e9   : > { %v13784_v17 = vadd.f32 %v3122_v14, %v3079_v15  ;;  %v2995_v28 = vpop.f32.mrf.mxu0  ;;  %v3039_v31 = vpop.f32.mrf.mxu1  ;;  %v13797_v14 = vperm.slane %v13502_v55, 1 }
 0x1ea   : > { %v2996_v11 = vadd.f32 %v2995_v28, %v13509_v1 }
 0x1ec   : > { %v3040_v38 = vadd.f32 %v3039_v31, %v2996_v11  ;;  %3316 = vmatmul.bf16.vlgmr.msrb.gmra.mxu0 %v13218_v16  ;;  %3360 = vmatmul.bf16.vlgmr.msrb.gmra.mxu1 %v13221_v22 }
 0x1ee   : > { %v3080_v40 = vpop.f32.mrf.mxu2  ;;  %v3124_v47 = vpop.f32.mrf.mxu3 }
 0x1ef   : > { %v3081_v33 = vadd.f32 %v3080_v40, %v3037_v2 }
 0x1f1   : > { %v13789_v48 = vadd.f32 %v3124_v47, %v3081_v33  ;;  %v2997_v50 = vpop.f32.mrf.mxu0  ;;  %v3041_v51 = vpop.f32.mrf.mxu1 }
 0x1f2   : > { %v2998_v34 = vadd.f32 %v2997_v50, %v13509_v1 }
 0x1f3   : > { %3404 = vmatmul.bf16.vlgmr.msrb.gmra.mxu2 %v13241_v7  ;;  %3448 = vmatmul.bf16.vlgmr.msrb.gmra.mxu3 %v13243_v8 }
 0x1f4   : > { %v3042_v0 = vadd.f32 %v3041_v51, %v2998_v34 }
 0x1f6   : > { %v3083_v12 = vpop.f32.mrf.mxu2  ;;  %v3127_v20 = vpop.f32.mrf.mxu3 }
 0x1f7   : > { %v3084_v2 = vadd.f32 %v3083_v12, %v3040_v38 }
 0x1f9   : > { %v13799_v15 = vadd.f32 %v3127_v20, %v3084_v2  ;;  %v3141_v28 = vpop.f32.mrf.mxu0  ;;  %v3185_v31 = vpop.f32.mrf.mxu1 }
 0x1fa   : > { %v3142_v1 = vadd.f32 %v3141_v28, %v13797_v14 }
 0x1fc   : > { %v3186_v11 = vadd.f32 %v3185_v31, %v3142_v1  ;;  %3321 = vmatmul.bf16.gmra.mxu0 %v13231_v21  ;;  %3365 = vmatmul.bf16.gmra.mxu1 %v13234_v45 }
 0x1fe   : > { %v3085_v40 = vpop.f32.mrf.mxu2  ;;  %v3129_v47 = vpop.f32.mrf.mxu3 }
 0x1ff   : > { %v3086_v33 = vadd.f32 %v3085_v40, %v3042_v0 }
 0x201   : > { %v13804_v50 = vadd.f32 %v3129_v47, %v3086_v33  ;;  %v3143_v51 = vpop.f32.mrf.mxu0  ;;  %v3187_v55 = vpop.f32.mrf.mxu1  ;;  %v11859_v33 = vld [vmem:[%s17918_s7 + $0x45c] sm:$0xf] }
 0x202   : > { %v3144_v38 = vadd.f32 %v3143_v51, %v13797_v14  ;;  %v9881_v51 = vld [vmem:[%s17918_s7 + $0x470] sm:$0xf0] }
 0x203   : > { %3409 = vmatmul.bf16.gmra.mxu2 %v13257_v44  ;;  %3453 = vmatmul.bf16.gmra.mxu3 %v13259_v46 }
 0x204   : > { %v3188_v12 = vadd.f32 %v3187_v55, %v3144_v38 }
 0x206   : > { %v3229_v20 = vpop.f32.mrf.mxu2  ;;  %v3273_v2 = vpop.f32.mrf.mxu3 }
 0x207   : > { %v3230_v28 = vadd.f32 %v3229_v20, %v3186_v11  ;;  %v9884_v11 = vor.u32 %v11859_v33, %v9881_v51  ;;  %v11763_v33 = vld [vmem:[%s17918_s7 + $0x15c] sm:$0xf] }
 0x208   : > { %v11907_v51 = vld [vmem:[%s17918_s7 + $0x5dc] sm:$0xf] }
 0x209   : > { %v13811_v31 = vadd.f32 %v3273_v2, %v3230_v28  ;;  %v3146_v0 = vpop.f32.mrf.mxu0  ;;  %v3190_v1 = vpop.f32.mrf.mxu1  ;;  %3572 = vmatpush.bf16.msra.mxu2 %v9884_v11 }
 0x20a   : > { %v3147_v40 = vadd.f32 %v3146_v0, %v13797_v14 }
 0x20b   : > { %17986 = vst [vmem:[#allocation14_spill] sm:$0xff] %v13811_v31  ;;  %v9761_v31 = vld [vmem:[%s17918_s7 + $0x380] sm:$0xf0] }
 0x20c   : > { %v3191_v47 = vadd.f32 %v3190_v1, %v3147_v40  ;;  %3326 = vmatmul.bf16.gmra.mxu0 %v13245_v13  ;;  %3370 = vmatmul.bf16.gmra.mxu1 %v13250_v18 }
 0x20e   : > { %v3231_v55 = vpop.f32.mrf.mxu2  ;;  %v3275_v38 = vpop.f32.mrf.mxu3 }
 0x20f   : > { %v3232_v20 = vadd.f32 %v3231_v55, %v3188_v12  ;;  %v9497_v12 = vld [vmem:[%s17918_s7 + $0x170] sm:$0xf0] }
 0x210   : > { %v9500_v55 = vor.u32 %v11763_v33, %v9497_v12 }
 0x211   : > { %v13822_v2 = vadd.f32 %v3275_v38, %v3232_v20  ;;  %v3148_v28 = vpop.f32.mrf.mxu0  ;;  %v3192_v0 = vpop.f32.mrf.mxu1  ;;  %v10073_v38 = vld [vmem:[%s17918_s7 + $0x5f0] sm:$0xf0]  ;;  %v11811_v20 = vld [vmem:[%s17918_s7 + $0x2dc] sm:$0xf] }
 0x212   : > { %v3149_v1 = vadd.f32 %v3148_v28, %v13797_v14  ;;  %v9689_v28 = vld [vmem:[%s17918_s7 + $0x2f0] sm:$0xf0]  ;;  %v10076_v40 = vor.u32 %v11907_v51, %v10073_v38  ;;  %3484 = vmatpush.bf16.msra.mxu0 %v9500_v55  ;;  %v11853_v51 = vld [vmem:[%s17918_s7 + $0x42c] sm:$0xf] }
 0x213   : > { %17987 = vst [vmem:[#allocation15_spill] sm:$0xff] %v13822_v2  ;;  %3414 = vmatmul.bf16.gmra.mxu2 %v13271_v9  ;;  %3458 = vmatmul.bf16.gmra.mxu3 %v13273_v10  ;;  %v9692_v56 = vor.u32 %v11811_v20, %v9689_v28  ;;  %v9329_v2 = vld [vmem:[%s17918_s7 + $0x20] sm:$0xf0] }
 0x214   : > { %v3193_v11 = vadd.f32 %v3192_v0, %v3149_v1  ;;  %3616 = vmatpush.bf16.msra.mxu3 %v10076_v40  ;;  %v10049_v40 = vld [vmem:[%s17918_s7 + $0x5c0] sm:$0xf0] }
 0x215   : > { %3528 = vmatpush.bf16.msra.mxu1 %v9692_v56  ;;  %v11757_v56 = vld [vmem:[%s17918_s7 + $0x12c] sm:$0xf] }
 0x216   : > { %v3234_v63 = vpop.f32.mrf.mxu2  ;;  %v3278_v37 = vpop.f32.mrf.mxu3 }
 0x217   : > { %v3235_v27 = vadd.f32 %v3234_v63, %v3191_v47  ;;  %v9857_v63 = vld [vmem:[%s17918_s7 + $0x440] sm:$0xf0]  ;;  %v11901_v47 = vld [vmem:[%s17918_s7 + $0x5ac] sm:$0xf] }
 0x218   : > { %v10052_v28 = vor.u32 %v11901_v47, %v10049_v40  ;;  %v9449_v47 = vld [vmem:[%s17918_s7 + $0x110] sm:$0xf0] }
 0x219   : > { %v13847_v0 = vadd.f32 %v3278_v37, %v3235_v27  ;;  %v3151_v1 = vpop.f32.mrf.mxu0  ;;  %v3195_v33 = vpop.f32.mrf.mxu1  ;;  %v9860_v37 = vor.u32 %v11853_v51, %v9857_v63  ;;  %v9473_v27 = vld [vmem:[%s17918_s7 + $0x140] sm:$0xf0]  ;;  %v11805_v63 = vld [vmem:[%s17918_s7 + $0x2ac] sm:$0xf] }
 0x21a   : > { %v3152_v12 = vadd.f32 %v3151_v1, %v13797_v14  ;;  %v9476_v20 = vor.u32 %v11757_v56, %v9473_v27  ;;  %3617 = vmatpush.bf16.msra.mxu3 %v10052_v28  ;;  %v9668_v56 = vor.u32 %v11805_v63, %v9665_v57  ;;  %v11751_v27 = vld [vmem:[%s17918_s7 + $0xfc] sm:$0xf] }
 0x21b   : > { %17988 = vst [vmem:[#allocation16_spill] sm:$0xff] %v13847_v0  ;;  %3573 = vmatpush.bf16.msra.mxu2 %v9860_v37  ;;  %v11799_v57 = vld [vmem:[%s17918_s7 + $0x27c] sm:$0xf] }
 0x21c   : > { %v3196_v3 = vadd.f32 %v3195_v33, %v3152_v12  ;;  %3331 = vmatmul.bf16.gmra.mxu0 %v13295_v41  ;;  %3375 = vmatmul.bf16.gmra.mxu1 %v13297_v42  ;;  %v11847_v63 = vld [vmem:[%s17918_s7 + $0x3fc] sm:$0xf] }
 0x21d   : > { %3485 = vmatpush.bf16.msra.mxu0 %v9476_v20  ;;  %3529 = vmatpush.bf16.msra.mxu1 %v9668_v56  ;;  %v9833_v56 = vld [vmem:[%s17918_s7 + $0x410] sm:$0xf0] }
 0x21e   : > { %v3236_v55 = vpop.f32.mrf.mxu2  ;;  %v3280_v38 = vpop.f32.mrf.mxu3 }
 0x21f   : > { %v3237_v1 = vadd.f32 %v3236_v55, %v3193_v11  ;;  %v9377_v11 = vld [vmem:[%s17918_s7 + $0x80] sm:$0xf0] }
 0x221   : > { %v13870_v33 = vadd.f32 %v3280_v38, %v3237_v1  ;;  %v3153_v12 = vpop.f32.mrf.mxu0  ;;  %v3197_v51 = vpop.f32.mrf.mxu1  ;;  %v9452_v38 = vor.u32 %v11751_v27, %v9449_v47  ;;  %v11745_v27 = vld [vmem:[%s17918_s7 + $0xcc] sm:$0xf]  ;;  %v9836_v47 = vor.u32 %v11847_v63, %v9833_v56  ;;  %v11739_v56 = vld [vmem:[%s17918_s7 + $0x9c] sm:$0xf] }
 0x222   : > { %v3154_v34 = vadd.f32 %v3153_v12, %v13797_v14 }
 0x223   : > { %17989 = vst [vmem:[#allocation17_spill] sm:$0xff] %v13870_v33  ;;  %3419 = vmatmul.bf16.gmra.mxu2 %v13319_v61  ;;  %3463 = vmatmul.bf16.gmra.mxu3 %v13321_v62 }
 0x224   : > { %v3198_v37 = vadd.f32 %v3197_v51, %v3154_v34  ;;  %v9641_v34 = vld [vmem:[%s17918_s7 + $0x290] sm:$0xf0]  ;;  %3486 = vmatpush.bf16.msra.mxu0 %v9452_v38  ;;  %3574 = vmatpush.bf16.msra.mxu2 %v9836_v47 }
 0x225   : > { %v9644_v28 = vor.u32 %v11799_v57, %v9641_v34  ;;  %v9425_v57 = vld [vmem:[%s17918_s7 + $0xe0] sm:$0xf0]  ;;  %v9593_v47 = vld [vmem:[%s17918_s7 + $0x230] sm:$0xf0] }
 0x226   : > { %v3239_v40 = vpop.f32.mrf.mxu2  ;;  %v3283_v55 = vpop.f32.mrf.mxu3  ;;  %v9428_v38 = vor.u32 %v11745_v27, %v9425_v57  ;;  %v9401_v27 = vld [vmem:[%s17918_s7 + $0xb0] sm:$0xf0]  ;;  %v11787_v57 = vld [vmem:[%s17918_s7 + $0x21c] sm:$0xf] }
 0x227   : > { %v3240_v20 = vadd.f32 %v3239_v40, %v3196_v3  ;;  %3530 = vmatpush.bf16.msra.mxu1 %v9644_v28  ;;  %v11793_v40 = vld [vmem:[%s17918_s7 + $0x24c] sm:$0xf]  ;;  %v10025_v28 = vld [vmem:[%s17918_s7 + $0x590] sm:$0xf0] }
 0x228   : > { %3487 = vmatpush.bf16.msra.mxu0 %v9428_v38  ;;  %v9596_v38 = vor.u32 %v11787_v57, %v9593_v47  ;;  %v11733_v47 = vld [vmem:[%s17918_s7 + $0x6c] sm:$0xf] }
 0x229   : > { %v13895_v1 = vadd.f32 %v3283_v55, %v3240_v20  ;;  %v3156_v12 = vpop.f32.mrf.mxu0  ;;  %v3200_v51 = vpop.f32.mrf.mxu1  ;;  %v9617_v55 = vld [vmem:[%s17918_s7 + $0x260] sm:$0xf0]  ;;  %v11895_v20 = vld [vmem:[%s17918_s7 + $0x57c] sm:$0xf] }
 0x22a   : > { %v3157_v3 = vadd.f32 %v3156_v12, %v13797_v14  ;;  %v9620_v34 = vor.u32 %v11793_v40, %v9617_v55  ;;  %v10028_v63 = vor.u32 %v11895_v20, %v10025_v28  ;;  %v9404_v40 = vor.u32 %v11739_v56, %v9401_v27  ;;  %v11841_v20 = vld [vmem:[%s17918_s7 + $0x3cc] sm:$0xf]  ;;  %v9809_v28 = vld [vmem:[%s17918_s7 + $0x3e0] sm:$0xf0] }
 0x22b   : > { %v10001_v56 = vld [vmem:[%s17918_s7 + $0x560] sm:$0xf0] }
 0x22c   : > { %v3201_v12 = vadd.f32 %v3200_v51, %v3157_v3  ;;  %3336 = vmatmul.bf16.gmra.mxu0 %v13343_v32  ;;  %3380 = vmatmul.bf16.gmra.mxu1 %v13345_v36 }
 0x22d   : > { %3531 = vmatpush.bf16.msra.mxu1 %v9620_v34  ;;  %3618 = vmatpush.bf16.msra.mxu3 %v10028_v63  ;;  %v11889_v34 = vld [vmem:[%s17918_s7 + $0x54c] sm:$0xf]  ;;  %v9812_v63 = vor.u32 %v11841_v20, %v9809_v28 }
 0x22e   : > { %v3241_v51 = vpop.f32.mrf.mxu2  ;;  %v3285_v3 = vpop.f32.mrf.mxu3  ;;  %3488 = vmatpush.bf16.msra.mxu0 %v9404_v40  ;;  %v11781_v20 = vld [vmem:[%s17918_s7 + $0x1ec] sm:$0xf]  ;;  %v9569_v40 = vld [vmem:[%s17918_s7 + $0x200] sm:$0xf0] }
 0x22f   : > { %v3242_v55 = vadd.f32 %v3241_v51, %v3198_v37  ;;  %v10004_v51 = vor.u32 %v11889_v34, %v10001_v56  ;;  %3575 = vmatpush.bf16.msra.mxu2 %v9812_v63  ;;  %v9572_v34 = vor.u32 %v11781_v20, %v9569_v40  ;;  %v11835_v56 = vld [vmem:[%s17918_s7 + $0x39c] sm:$0xf] }
 0x230   : > { %v11727_v40 = vld [vmem:[%s17918_s7 + $0x3c] sm:$0xf] }
 0x231   : > { %v13948_v27 = vadd.f32 %v3285_v3, %v3242_v55  ;;  %v3158_v37 = vpop.f32.mrf.mxu0  ;;  %v3202_v57 = vpop.f32.mrf.mxu1  ;;  %3532 = vmatpush.bf16.msra.mxu1 %v9596_v38  ;;  %v9380_v3 = vor.u32 %v11733_v47, %v9377_v11  ;;  %v9785_v11 = vld [vmem:[%s17918_s7 + $0x3b0] sm:$0xf0]  ;;  %v11883_v38 = vld [vmem:[%s17918_s7 + $0x51c] sm:$0xf]  ;;  %3619 = vmatpush.bf16.msra.mxu3 %v10004_v51 }
 0x232   : > { %v3159_v28 = vadd.f32 %v3158_v37, %v13797_v14  ;;  %v9788_v37 = vor.u32 %v11835_v56, %v9785_v11  ;;  %v9977_v47 = vld [vmem:[%s17918_s7 + $0x530] sm:$0xf0] }
 0x233   : > { %3424 = vmatmul.bf16.gmra.mxu2 %v13394_v4  ;;  %3468 = vmatmul.bf16.gmra.mxu3 %v13396_v5  ;;  %v9980_v20 = vor.u32 %v11883_v38, %v9977_v47  ;;  %v9353_v55 = vld [vmem:[%s17918_s7 + $0x50] sm:$0xf0]  ;;  %v11829_v47 = vld [vmem:[%s17918_s7 + $0x36c] sm:$0xf] }
 0x234   : > { %v3203_v63 = vadd.f32 %v3202_v57, %v3159_v28  ;;  %3489 = vmatpush.bf16.msra.mxu0 %v9380_v3  ;;  %v11775_v57 = vld [vmem:[%s17918_s7 + $0x1bc] sm:$0xf]  ;;  %3576 = vmatpush.bf16.msra.mxu2 %v9788_v37  ;;  %v9356_v56 = vor.u32 %v11727_v40, %v9353_v55  ;;  %v9545_v3 = vld [vmem:[%s17918_s7 + $0x1d0] sm:$0xf0]  ;;  %v9764_v55 = vor.u32 %v11829_v47, %v9761_v31  ;;  %v9953_v37 = vld [vmem:[%s17918_s7 + $0x500] sm:$0xf0] }
 0x235   : > { %3533 = vmatpush.bf16.msra.mxu1 %v9572_v34  ;;  %v9548_v38 = vor.u32 %v11775_v57, %v9545_v3  ;;  %v11877_v34 = vld [vmem:[%s17918_s7 + $0x4ec] sm:$0xf]  ;;  %3620 = vmatpush.bf16.msra.mxu3 %v9980_v20  ;;  %v11823_v47 = vld [vmem:[%s17918_s7 + $0x33c] sm:$0xf] }
 0x236   : > { %v3244_v51 = vpop.f32.mrf.mxu2  ;;  %v3288_v28 = vpop.f32.mrf.mxu3  ;;  %v11721_v3 = vld [vmem:[%s17918_s7 + $0xc] sm:$0xf] }
 0x237   : > { %v3245_v11 = vadd.f32 %v3244_v51, %v3201_v12  ;;  %v9956_v51 = vor.u32 %v11877_v34, %v9953_v37  ;;  %v11769_v31 = vld [vmem:[%s17918_s7 + $0x18c] sm:$0xf]  ;;  %v9737_v34 = vld [vmem:[%s17918_s7 + $0x350] sm:$0xf0]  ;;  %v11871_v37 = vld [vmem:[%s17918_s7 + $0x4bc] sm:$0xf] }
 0x238   : > { %3490 = vmatpush.bf16.msra.mxu0 %v9356_v56  ;;  %3577 = vmatpush.bf16.msra.mxu2 %v9764_v55  ;;  %v9521_v56 = vld [vmem:[%s17918_s7 + $0x1a0] sm:$0xf0]  ;;  %v9929_v55 = vld [vmem:[%s17918_s7 + $0x4d0] sm:$0xf0] }
 0x239   : > { %v14003_v12 = vadd.f32 %v3288_v28, %v3245_v11  ;;  %v3161_v40 = vpop.f32.mrf.mxu0  ;;  %v3205_v57 = vpop.f32.mrf.mxu1  ;;  %3534 = vmatpush.bf16.msra.mxu1 %v9548_v38  ;;  %v9332_v28 = vor.u32 %v11721_v3, %v9329_v2  ;;  %v9524_v11 = vor.u32 %v11769_v31, %v9521_v56  ;;  %v9740_v2 = vor.u32 %v11823_v47, %v9737_v34  ;;  %v11865_v47 = vld [vmem:[%s17918_s7 + $0x48c] sm:$0xf] }
 0x23a   : > { %v3162_v20 = vadd.f32 %v3161_v40, %v13797_v14  ;;  %3621 = vmatpush.bf16.msra.mxu3 %v9956_v51  ;;  %v9932_v40 = vor.u32 %v11871_v37, %v9929_v55 }
 0x23c   : > { %v3206_v38 = vadd.f32 %v3205_v57, %v3162_v20  ;;  %3341 = vmatmul.bf16.gmra.mxu0 %v13451_v59  ;;  %3385 = vmatmul.bf16.gmra.mxu1 %v13453_v60  ;;  %v11817_v57 = vld [vmem:[%s17918_s7 + $0x30c] sm:$0xf]  ;;  %v9713_v20 = vld [vmem:[%s17918_s7 + $0x320] sm:$0xf0] }
 0x23d   : > { %3491 = vmatpush.bf16.msra.mxu0 %v9332_v28  ;;  %3535 = vmatpush.bf16.msra.mxu1 %v9524_v11  ;;  %v9716_v51 = vor.u32 %v11817_v57, %v9713_v20  ;;  %v9905_v28 = vld [vmem:[%s17918_s7 + $0x4a0] sm:$0xf0] }
 0x23e   : > { %v3246_v3 = vpop.f32.mrf.mxu2  ;;  %v3290_v31 = vpop.f32.mrf.mxu3  ;;  %3578 = vmatpush.bf16.msra.mxu2 %v9740_v2  ;;  %3622 = vmatpush.bf16.msra.mxu3 %v9932_v40  ;;  %v9908_v37 = vor.u32 %v11865_v47, %v9905_v28 }
 0x23f   : > { %v3247_v56 = vadd.f32 %v3246_v3, %v3203_v63 }
 0x241   : > { %v14044_v11 = vadd.f32 %v3290_v31, %v3247_v56  ;;  %v3163_v63 = vpop.f32.mrf.mxu0  ;;  %v3207_v34 = vpop.f32.mrf.mxu1 }
 0x242   : > { %v3164_v2 = vadd.f32 %v3163_v63, %v13797_v14  ;;  %3579 = vmatpush.bf16.msra.mxu2 %v9716_v51  ;;  %3623 = vmatpush.bf16.msra.mxu3 %v9908_v37 }
 0x243   : > { %3429 = vmatmul.bf16.gmra.mxu2 %v13493_v43  ;;  %3473 = vmatmul.bf16.gmra.mxu3 %v13495_v25 }
 0x244   : > { %v3208_v3 = vadd.f32 %v3207_v34, %v3164_v2 }
 0x246   : > { %v3249_v57 = vpop.f32.mrf.mxu2  ;;  %v3293_v20 = vpop.f32.mrf.mxu3 }
 0x247   : > { %v3250_v31 = vadd.f32 %v3249_v57, %v3206_v38 }
 0x249   : > { %v14051_v56 = vadd.f32 %v3293_v20, %v3250_v31  ;;  %v3166_v49 = vpop.f32.mrf.mxu0  ;;  %v3210_v40 = vpop.f32.mrf.mxu1 }
 0x24a   : > { %v3167_v47 = vadd.f32 %v3166_v49, %v13797_v14 }
 0x24c   : > { %v3211_v28 = vadd.f32 %v3210_v40, %v3167_v47  ;;  %3346 = vmatmul.bf16.gmra.mxu0 %v13504_v58  ;;  %3390 = vmatmul.bf16.gmra.mxu1 %v13506_v19 }
 0x24e   : > { %v3251_v51 = vpop.f32.mrf.mxu2  ;;  %v3295_v63 = vpop.f32.mrf.mxu3 }
 0x24f   : > { %v3252_v55 = vadd.f32 %v3251_v51, %v3208_v3 }
 0x251   : > { %v14056_v54 = vadd.f32 %v3295_v63, %v3252_v55  ;;  %v3168_v34 = vpop.f32.mrf.mxu0  ;;  %v3212_v37 = vpop.f32.mrf.mxu1 }
 0x252   : > { %v3169_v38 = vadd.f32 %v3168_v34, %v13797_v14 }
 0x253   : > { %3434 = vmatmul.bf16.gmra.mxu2 %v13514_v24  ;;  %3478 = vmatmul.bf16.gmra.mxu3 %v13516_v26 }
 0x254   : > { %v3213_v49 = vadd.f32 %v3212_v37, %v3169_v38 }
 0x256   : > { %v3254_v57 = vpop.f32.mrf.mxu2  ;;  %v3298_v20 = vpop.f32.mrf.mxu3 }
 0x257   : > { %v3255_v31 = vadd.f32 %v3254_v57, %v3211_v28 }
 0x259   : > { %v14063_v40 = vadd.f32 %v3298_v20, %v3255_v31  ;;  %v3171_v3 = vpop.f32.mrf.mxu0  ;;  %v3215_v55 = vpop.f32.mrf.mxu1 }
 0x25a   : > { %v3172_v47 = vadd.f32 %v3171_v3, %v13797_v14 }
 0x25c   : > { %v3216_v51 = vadd.f32 %v3215_v55, %v3172_v47  ;;  %3492 = vmatmul.bf16.vlgmr.msra.gmra.mxu0 %v13218_v16  ;;  %3536 = vmatmul.bf16.vlgmr.msra.gmra.mxu1 %v13221_v22 }
 0x25e   : > { %v3256_v63 = vpop.f32.mrf.mxu2  ;;  %v3300_v34 = vpop.f32.mrf.mxu3 }
 0x25f   : > { %v3257_v2 = vadd.f32 %v3256_v63, %v3213_v49  ;;  %v14078_v49 = vld [vmem:[%s17919_s8] sm:$0x3f] }
 0x261   : > { %v14068_v0 = vadd.f32 %v3300_v34, %v3257_v2  ;;  %v3173_v37 = vpop.f32.mrf.mxu0  ;;  %v3217_v38 = vpop.f32.mrf.mxu1  ;;  %v14081_v2 = vperm.slane %v14078_v49, 2 }
 0x262   : > { %v3174_v28 = vadd.f32 %v3173_v37, %v13797_v14 }
 0x263   : > { %3580 = vmatmul.bf16.vlgmr.msra.gmra.mxu2 %v13241_v7  ;;  %3624 = vmatmul.bf16.vlgmr.msra.gmra.mxu3 %v13243_v8 }
 0x264   : > { %v3218_v20 = vadd.f32 %v3217_v38, %v3174_v28 }
 0x266   : > { %v3259_v31 = vpop.f32.mrf.mxu2  ;;  %v3303_v3 = vpop.f32.mrf.mxu3 }
 0x267   : > { %v3260_v55 = vadd.f32 %v3259_v31, %v3216_v51 }
 0x269   : > { %v14083_v14 = vadd.f32 %v3303_v3, %v3260_v55  ;;  %v3317_v47 = vpop.f32.mrf.mxu0  ;;  %v3361_v63 = vpop.f32.mrf.mxu1 }
 0x26a   : > { %v3318_v34 = vadd.f32 %v3317_v47, %v14081_v2 }
 0x26c   : > { %v3362_v37 = vadd.f32 %v3361_v63, %v3318_v34  ;;  %3497 = vmatmul.bf16.gmra.mxu0 %v13231_v21  ;;  %3541 = vmatmul.bf16.gmra.mxu1 %v13234_v45 }
 0x26e   : > { %v3261_v38 = vpop.f32.mrf.mxu2  ;;  %v3305_v28 = vpop.f32.mrf.mxu3 }
 0x26f   : > { %v3262_v57 = vadd.f32 %v3261_v38, %v3218_v20  ;;  %v11863_v20 = vld [vmem:[%s17918_s7 + $0x474] sm:$0xf0] }
 0x271   : > { %v14088_v33 = vadd.f32 %v3305_v28, %v3262_v57  ;;  %v3319_v35 = vpop.f32.mrf.mxu0  ;;  %v3363_v52 = vpop.f32.mrf.mxu1  ;;  %v9887_v57 = vld [vmem:[%s17918_s7 + $0x460] sm:$0xf] }
 0x272   : > { %v3320_v51 = vadd.f32 %v3319_v35, %v14081_v2  ;;  %v10079_v35 = vld [vmem:[%s17918_s7 + $0x5e0] sm:$0xf] }
 0x273   : > { %3585 = vmatmul.bf16.gmra.mxu2 %v13257_v44  ;;  %3629 = vmatmul.bf16.gmra.mxu3 %v13259_v46 }
 0x274   : > { %v3364_v3 = vadd.f32 %v3363_v52, %v3320_v51  ;;  %v9888_v52 = vor.u32 %v11863_v20, %v9887_v57  ;;  %v10055_v57 = vld [vmem:[%s17918_s7 + $0x5b0] sm:$0xf] }
 0x276   : > { %v3405_v55 = vpop.f32.mrf.mxu2  ;;  %v3449_v47 = vpop.f32.mrf.mxu3  ;;  %3748 = vmatpush.bf16.msrb.mxu2 %v9888_v52 }
 0x277   : > { %v3406_v63 = vadd.f32 %v3405_v55, %v3362_v37  ;;  %v11911_v37 = vld [vmem:[%s17918_s7 + $0x5f4] sm:$0xf0] }
 0x278   : > { %v10080_v55 = vor.u32 %v11911_v37, %v10079_v35  ;;  %v11905_v35 = vld [vmem:[%s17918_s7 + $0x5c4] sm:$0xf0] }
 0x279   : > { %v14104_v34 = vadd.f32 %v3449_v47, %v3406_v63  ;;  %v3322_v38 = vpop.f32.mrf.mxu0  ;;  %v3366_v28 = vpop.f32.mrf.mxu1  ;;  %v9863_v47 = vld [vmem:[%s17918_s7 + $0x430] sm:$0xf]  ;;  %v11857_v63 = vld [vmem:[%s17918_s7 + $0x444] sm:$0xf0]  ;;  %v10056_v52 = vor.u32 %v11905_v35, %v10055_v57 }
 0x27a   : > { %v3323_v51 = vadd.f32 %v3322_v38, %v14081_v2  ;;  %3792 = vmatpush.bf16.msrb.mxu3 %v10080_v55  ;;  %v9864_v20 = vor.u32 %v11857_v63, %v9863_v47  ;;  %v10031_v55 = vld [vmem:[%s17918_s7 + $0x580] sm:$0xf] }
 0x27b   : > { %17990 = vst [vmem:[#allocation18_spill] sm:$0xff] %v14104_v34 }
 0x27c   : > { %v3367_v31 = vadd.f32 %v3366_v28, %v3323_v51  ;;  %3502 = vmatmul.bf16.gmra.mxu0 %v13245_v13  ;;  %3546 = vmatmul.bf16.gmra.mxu1 %v13250_v18  ;;  %v9839_v51 = vld [vmem:[%s17918_s7 + $0x400] sm:$0xf]  ;;  %v11851_v18 = vld [vmem:[%s17918_s7 + $0x414] sm:$0xf0] }
 0x27d   : > { %3749 = vmatpush.bf16.msrb.mxu2 %v9864_v20  ;;  %v9840_v57 = vor.u32 %v11851_v18, %v9839_v51  ;;  %v11767_v18 = vld [vmem:[%s17918_s7 + $0x174] sm:$0xf0] }
 0x27e   : > { %v3407_v38 = vpop.f32.mrf.mxu2  ;;  %v3451_v28 = vpop.f32.mrf.mxu3  ;;  %3793 = vmatpush.bf16.msrb.mxu3 %v10056_v52  ;;  %v9695_v52 = vld [vmem:[%s17918_s7 + $0x2e0] sm:$0xf] }
 0x27f   : > { %v3408_v37 = vadd.f32 %v3407_v38, %v3364_v3  ;;  %v11899_v3 = vld [vmem:[%s17918_s7 + $0x594] sm:$0xf0] }
 0x280   : > { %v10032_v35 = vor.u32 %v11899_v3, %v10031_v55  ;;  %v11815_v55 = vld [vmem:[%s17918_s7 + $0x2f4] sm:$0xf0]  ;;  %v11845_v3 = vld [vmem:[%s17918_s7 + $0x3e4] sm:$0xf0] }
 0x281   : > { %v14133_v47 = vadd.f32 %v3451_v28, %v3408_v37  ;;  %v3324_v63 = vpop.f32.mrf.mxu0  ;;  %v3368_v13 = vpop.f32.mrf.mxu1  ;;  %v9503_v28 = vld [vmem:[%s17918_s7 + $0x160] sm:$0xf]  ;;  %3750 = vmatpush.bf16.msrb.mxu2 %v9840_v57  ;;  %v9696_v38 = vor.u32 %v11815_v55, %v9695_v52  ;;  %v11839_v52 = vld [vmem:[%s17918_s7 + $0x3b4] sm:$0xf0] }
 0x282   : > { %v3325_v20 = vadd.f32 %v3324_v63, %v14081_v2  ;;  %v9504_v51 = vor.u32 %v11767_v18, %v9503_v28  ;;  %v9815_v63 = vld [vmem:[%s17918_s7 + $0x3d0] sm:$0xf]  ;;  %3794 = vmatpush.bf16.msrb.mxu3 %v10032_v35  ;;  %v9791_v35 = vld [vmem:[%s17918_s7 + $0x3a0] sm:$0xf] }
 0x283   : > { %17991 = vst [vmem:[#allocation19_spill] sm:$0xff] %v14133_v47  ;;  %3590 = vmatmul.bf16.gmra.mxu2 %v13271_v9  ;;  %3634 = vmatmul.bf16.gmra.mxu3 %v13273_v10  ;;  %v9816_v34 = vor.u32 %v11845_v3, %v9815_v63  ;;  %v9983_v55 = vld [vmem:[%s17918_s7 + $0x520] sm:$0xf] }
 0x284   : > { %v3369_v37 = vadd.f32 %v3368_v13, %v3325_v20  ;;  %v10007_v13 = vld [vmem:[%s17918_s7 + $0x550] sm:$0xf]  ;;  %v11893_v20 = vld [vmem:[%s17918_s7 + $0x564] sm:$0xf0]  ;;  %3660 = vmatpush.bf16.msrb.mxu0 %v9504_v51  ;;  %3704 = vmatpush.bf16.msrb.mxu1 %v9696_v38 }
 0x285   : > { %v10008_v18 = vor.u32 %v11893_v20, %v10007_v13  ;;  %3751 = vmatpush.bf16.msrb.mxu2 %v9816_v34  ;;  %v11887_v34 = vld [vmem:[%s17918_s7 + $0x534] sm:$0xf0] }
 0x286   : > { %v3410_v57 = vpop.f32.mrf.mxu2  ;;  %v3454_v28 = vpop.f32.mrf.mxu3  ;;  %v9984_v13 = vor.u32 %v11887_v34, %v9983_v55  ;;  %v11881_v55 = vld [vmem:[%s17918_s7 + $0x504] sm:$0xf0] }
 0x287   : > { %v3411_v47 = vadd.f32 %v3410_v57, %v3367_v31  ;;  %3795 = vmatpush.bf16.msrb.mxu3 %v10008_v18  ;;  %v9792_v31 = vor.u32 %v11839_v52, %v9791_v35  ;;  %v11761_v57 = vld [vmem:[%s17918_s7 + $0x144] sm:$0xf0]  ;;  %v9959_v52 = vld [vmem:[%s17918_s7 + $0x4f0] sm:$0xf] }
 0x288   : > { %v11833_v35 = vld [vmem:[%s17918_s7 + $0x384] sm:$0xf0] }
 0x289   : > { %v14176_v63 = vadd.f32 %v3454_v28, %v3411_v47  ;;  %v3327_v3 = vpop.f32.mrf.mxu0  ;;  %v3371_v51 = vpop.f32.mrf.mxu1  ;;  %v9479_v47 = vld [vmem:[%s17918_s7 + $0x130] sm:$0xf]  ;;  %3752 = vmatpush.bf16.msrb.mxu2 %v9792_v31  ;;  %v9743_v31 = vld [vmem:[%s17918_s7 + $0x340] sm:$0xf] }
 0x28a   : > { %v3328_v38 = vadd.f32 %v3327_v3, %v14081_v2  ;;  %v9767_v28 = vld [vmem:[%s17918_s7 + $0x370] sm:$0xf]  ;;  %v9480_v18 = vor.u32 %v11761_v57, %v9479_v47  ;;  %v9935_v47 = vld [vmem:[%s17918_s7 + $0x4c0] sm:$0xf] }
 0x28b   : > { %17992 = vst [vmem:[#allocation20_spill] sm:$0xff] %v14176_v63  ;;  %3796 = vmatpush.bf16.msrb.mxu3 %v9984_v13  ;;  %v9768_v34 = vor.u32 %v11833_v35, %v9767_v28  ;;  %v11827_v13 = vld [vmem:[%s17918_s7 + $0x354] sm:$0xf0]  ;;  %v11809_v28 = vld [vmem:[%s17918_s7 + $0x2c4] sm:$0xf0] }
 0x28c   : > { %v3372_v20 = vadd.f32 %v3371_v51, %v3328_v38  ;;  %3507 = vmatmul.bf16.gmra.mxu0 %v13295_v41  ;;  %3551 = vmatmul.bf16.gmra.mxu1 %v13297_v42  ;;  %v9960_v38 = vor.u32 %v11881_v55, %v9959_v52  ;;  %v11875_v35 = vld [vmem:[%s17918_s7 + $0x4d4] sm:$0xf0] }
 0x28d   : > { %3661 = vmatpush.bf16.msrb.mxu0 %v9480_v18  ;;  %3753 = vmatpush.bf16.msrb.mxu2 %v9768_v34  ;;  %v9744_v18 = vor.u32 %v11827_v13, %v9743_v31  ;;  %v9936_v55 = vor.u32 %v11875_v35, %v9935_v47  ;;  %v9719_v34 = vld [vmem:[%s17918_s7 + $0x310] sm:$0xf]  ;;  %v9455_v13 = vld [vmem:[%s17918_s7 + $0x100] sm:$0xf]  ;;  %v11755_v47 = vld [vmem:[%s17918_s7 + $0x114] sm:$0xf0] }
 0x28e   : > { %v3412_v3 = vpop.f32.mrf.mxu2  ;;  %v3456_v51 = vpop.f32.mrf.mxu3 }
 0x28f   : > { %v3413_v42 = vadd.f32 %v3412_v3, %v3369_v37  ;;  %3797 = vmatpush.bf16.msrb.mxu3 %v9960_v38  ;;  %v9671_v37 = vld [vmem:[%s17918_s7 + $0x2b0] sm:$0xf]  ;;  %v11821_v38 = vld [vmem:[%s17918_s7 + $0x324] sm:$0xf0]  ;;  %v9889_v3 = vld [vmem:[%s17918_s7 + $0x478] sm:$0xf0] }
 0x290   : > { %v9672_v52 = vor.u32 %v11809_v28, %v9671_v37  ;;  %v9720_v31 = vor.u32 %v11821_v38, %v9719_v34 }
 0x291   : > { %v14211_v57 = vadd.f32 %v3456_v51, %v3413_v42  ;;  %v3329_v41 = vpop.f32.mrf.mxu0  ;;  %v3373_v10 = vpop.f32.mrf.mxu1  ;;  %3754 = vmatpush.bf16.msrb.mxu2 %v9744_v18  ;;  %v9647_v18 = vld [vmem:[%s17918_s7 + $0x280] sm:$0xf] }
 0x292   : > { %v3330_v42 = vadd.f32 %v3329_v41, %v14081_v2  ;;  %3705 = vmatpush.bf16.msrb.mxu1 %v9672_v52  ;;  %v9911_v41 = vld [vmem:[%s17918_s7 + $0x490] sm:$0xf]  ;;  %v11803_v52 = vld [vmem:[%s17918_s7 + $0x294] sm:$0xf0] }
 0x293   : > { %17993 = vst [vmem:[#allocation21_spill] sm:$0xff] %v14211_v57  ;;  %3595 = vmatmul.bf16.gmra.mxu2 %v13319_v61  ;;  %3639 = vmatmul.bf16.gmra.mxu3 %v13321_v62  ;;  %v9648_v38 = vor.u32 %v11803_v52, %v9647_v18  ;;  %v11749_v18 = vld [vmem:[%s17918_s7 + $0xe4] sm:$0xf0]  ;;  %v9865_v52 = vld [vmem:[%s17918_s7 + $0x448] sm:$0xf0] }
 0x294   : > { %v3374_v51 = vadd.f32 %v3373_v10, %v3330_v42  ;;  %3798 = vmatpush.bf16.msrb.mxu3 %v9936_v55  ;;  %v11869_v10 = vld [vmem:[%s17918_s7 + $0x4a4] sm:$0xf0]  ;;  %v9456_v42 = vor.u32 %v11755_v47, %v9455_v13  ;;  %v11860_v55 = vld [vmem:[%s17918_s7 + $0x464] sm:$0xf] }
 0x295   : > { %v9912_v35 = vor.u32 %v11869_v10, %v9911_v41  ;;  %v11908_v41 = vld [vmem:[%s17918_s7 + $0x5e4] sm:$0xf]  ;;  %v10081_v10 = vld [vmem:[%s17918_s7 + $0x5f8] sm:$0xf0]  ;;  %v9892_v13 = vor.u32 %v11860_v55, %v9889_v3  ;;  %3755 = vmatpush.bf16.msrb.mxu2 %v9720_v31  ;;  %v11797_v31 = vld [vmem:[%s17918_s7 + $0x264] sm:$0xf0] }
 0x296   : > { %v3415_v37 = vpop.f32.mrf.mxu2  ;;  %v3459_v28 = vpop.f32.mrf.mxu3  ;;  %3662 = vmatpush.bf16.msrb.mxu0 %v9456_v42  ;;  %v10084_v47 = vor.u32 %v11908_v41, %v10081_v10  ;;  %v9623_v42 = vld [vmem:[%s17918_s7 + $0x250] sm:$0xf]  ;;  %3706 = vmatpush.bf16.msrb.mxu1 %v9648_v38  ;;  %v10057_v38 = vld [vmem:[%s17918_s7 + $0x5c8] sm:$0xf0] }
 0x297   : > { %v3416_v34 = vadd.f32 %v3415_v37, %v3372_v20  ;;  %v9431_v37 = vld [vmem:[%s17918_s7 + $0xd0] sm:$0xf]  ;;  %v9624_v55 = vor.u32 %v11797_v31, %v9623_v42  ;;  %v9841_v31 = vld [vmem:[%s17918_s7 + $0x418] sm:$0xf0] }
 0x298   : > { %3799 = vmatpush.bf16.msrb.mxu3 %v9912_v35  ;;  %v11854_v35 = vld [vmem:[%s17918_s7 + $0x434] sm:$0xf] }
 0x299   : > { %v14263_v63 = vadd.f32 %v3459_v28, %v3416_v34  ;;  %v3332_v57 = vpop.f32.mrf.mxu0  ;;  %v3376_v20 = vpop.f32.mrf.mxu1  ;;  %3924 = vmatpush.bf16.msra.mxu2 %v9892_v13  ;;  %v9432_v28 = vor.u32 %v11749_v18, %v9431_v37  ;;  %v9868_v34 = vor.u32 %v11854_v35, %v9865_v52  ;;  %v9407_v13 = vld [vmem:[%s17918_s7 + $0xa0] sm:$0xf] }
 0x29a   : > { %v3333_v3 = vadd.f32 %v3332_v57, %v14081_v2  ;;  %v11902_v57 = vld [vmem:[%s17918_s7 + $0x5b4] sm:$0xf]  ;;  %v9599_v37 = vld [vmem:[%s17918_s7 + $0x220] sm:$0xf]  ;;  %3707 = vmatpush.bf16.msrb.mxu1 %v9624_v55  ;;  %v11896_v55 = vld [vmem:[%s17918_s7 + $0x584] sm:$0xf] }
 0x29b   : > { %17994 = vst [vmem:[#allocation22_spill] sm:$0xff] %v14263_v63  ;;  %v10060_v10 = vor.u32 %v11902_v57, %v10057_v38  ;;  %3663 = vmatpush.bf16.msrb.mxu0 %v9432_v28  ;;  %v11848_v28 = vld [vmem:[%s17918_s7 + $0x404] sm:$0xf] }
 0x29c   : > { %3968 = vmatpush.bf16.msra.mxu3 %v10084_v47  ;;  %v3377_v41 = vadd.f32 %v3376_v20, %v3333_v3  ;;  %3512 = vmatmul.bf16.gmra.mxu0 %v13343_v32  ;;  %v11743_v47 = vld [vmem:[%s17918_s7 + $0xb4] sm:$0xf0]  ;;  %v9844_v57 = vor.u32 %v11848_v28, %v9841_v31  ;;  %v9817_v28 = vld [vmem:[%s17918_s7 + $0x3e8] sm:$0xf0] }
 0x29d   : > { %3556 = vmatmul.bf16.gmra.mxu1 %v13345_v36  ;;  %3925 = vmatpush.bf16.msra.mxu2 %v9868_v34  ;;  %v9408_v42 = vor.u32 %v11743_v47, %v9407_v13  ;;  %v11791_v3 = vld [vmem:[%s17918_s7 + $0x234] sm:$0xf0]  ;;  %v10033_v34 = vld [vmem:[%s17918_s7 + $0x598] sm:$0xf0] }
 0x29e   : > { %v3417_v18 = vpop.f32.mrf.mxu2  ;;  %v3461_v20 = vpop.f32.mrf.mxu3  ;;  %v9600_v52 = vor.u32 %v11791_v3, %v9599_v37  ;;  %v10036_v38 = vor.u32 %v11896_v55, %v10033_v34  ;;  %v9575_v37 = vld [vmem:[%s17918_s7 + $0x1f0] sm:$0xf]  ;;  %v11842_v3 = vld [vmem:[%s17918_s7 + $0x3d4] sm:$0xf]  ;;  %v10009_v55 = vld [vmem:[%s17918_s7 + $0x568] sm:$0xf0] }
 0x29f   : > { %v3418_v35 = vadd.f32 %v3417_v18, %v3374_v51  ;;  %3664 = vmatpush.bf16.msrb.mxu0 %v9408_v42  ;;  %v9383_v51 = vld [vmem:[%s17918_s7 + $0x70] sm:$0xf]  ;;  %v11785_v42 = vld [vmem:[%s17918_s7 + $0x204] sm:$0xf0] }
 0x2a0   : > { %3969 = vmatpush.bf16.msra.mxu3 %v10060_v10  ;;  %v11737_v10 = vld [vmem:[%s17918_s7 + $0x84] sm:$0xf0]  ;;  %3708 = vmatpush.bf16.msrb.mxu1 %v9600_v52  ;;  %v9820_v52 = vor.u32 %v11842_v3, %v9817_v28 }
 0x2a1   : > { %v14316_v13 = vadd.f32 %v3461_v20, %v3418_v35  ;;  %v3334_v47 = vpop.f32.mrf.mxu0  ;;  %v3378_v36 = vpop.f32.mrf.mxu1  ;;  %3926 = vmatpush.bf16.msra.mxu2 %v9844_v57  ;;  %v9384_v20 = vor.u32 %v11737_v10, %v9383_v51  ;;  %v9576_v35 = vor.u32 %v11785_v42, %v9575_v37  ;;  %v11890_v57 = vld [vmem:[%s17918_s7 + $0x554] sm:$0xf]  ;;  %v9359_v51 = vld [vmem:[%s17918_s7 + $0x40] sm:$0xf]  ;;  %v11731_v10 = vld [vmem:[%s17918_s7 + $0x54] sm:$0xf0] }
 0x2a2   : > { %v3335_v18 = vadd.f32 %v3334_v47, %v14081_v2  ;;  %v10012_v47 = vor.u32 %v11890_v57, %v10009_v55  ;;  %v9551_v37 = vld [vmem:[%s17918_s7 + $0x1c0] sm:$0xf] }
 0x2a3   : > { %17995 = vst [vmem:[#allocation23_spill] sm:$0xff] %v14316_v13  ;;  %3600 = vmatmul.bf16.gmra.mxu2 %v13394_v4  ;;  %3644 = vmatmul.bf16.gmra.mxu3 %v13396_v5 }
 0x2a4   : > { %v3379_v34 = vadd.f32 %v3378_v36, %v3335_v18  ;;  %3970 = vmatpush.bf16.msra.mxu3 %v10036_v38  ;;  %3665 = vmatpush.bf16.msrb.mxu0 %v9384_v20  ;;  %v9360_v36 = vor.u32 %v11731_v10, %v9359_v51  ;;  %v11779_v38 = vld [vmem:[%s17918_s7 + $0x1d4] sm:$0xf0]  ;;  %v11836_v18 = vld [vmem:[%s17918_s7 + $0x3a4] sm:$0xf]  ;;  %v9793_v20 = vld [vmem:[%s17918_s7 + $0x3b8] sm:$0xf0] }
 0x2a5   : > { %3709 = vmatpush.bf16.msrb.mxu1 %v9576_v35  ;;  %3927 = vmatpush.bf16.msra.mxu2 %v9820_v52  ;;  %v9552_v57 = vor.u32 %v11779_v38, %v9551_v37  ;;  %v9796_v55 = vor.u32 %v11836_v18, %v9793_v20  ;;  %v11884_v35 = vld [vmem:[%s17918_s7 + $0x524] sm:$0xf]  ;;  %v9985_v52 = vld [vmem:[%s17918_s7 + $0x538] sm:$0xf0]  ;;  %v11725_v37 = vld [vmem:[%s17918_s7 + $0x24] sm:$0xf0] }
 0x2a6   : > { %v3420_v42 = vpop.f32.mrf.mxu2  ;;  %v3464_v3 = vpop.f32.mrf.mxu3  ;;  %v9988_v63 = vor.u32 %v11884_v35, %v9985_v52  ;;  %v11830_v38 = vld [vmem:[%s17918_s7 + $0x374] sm:$0xf]  ;;  %v9769_v18 = vld [vmem:[%s17918_s7 + $0x388] sm:$0xf0] }
 0x2a7   : > { %v3421_v28 = vadd.f32 %v3420_v42, %v3377_v41  ;;  %v9335_v41 = vld [vmem:[%s17918_s7 + $0x10] sm:$0xf] }
 0x2a8   : > { %3971 = vmatpush.bf16.msra.mxu3 %v10012_v47  ;;  %3666 = vmatpush.bf16.msrb.mxu0 %v9360_v36  ;;  %v9527_v42 = vld [vmem:[%s17918_s7 + $0x190] sm:$0xf]  ;;  %v11773_v36 = vld [vmem:[%s17918_s7 + $0x1a4] sm:$0xf0] }
 0x2a9   : > { %v14371_v51 = vadd.f32 %v3464_v3, %v3421_v28  ;;  %v3337_v10 = vpop.f32.mrf.mxu0  ;;  %v3381_v31 = vpop.f32.mrf.mxu1  ;;  %3710 = vmatpush.bf16.msrb.mxu1 %v9552_v57  ;;  %3928 = vmatpush.bf16.msra.mxu2 %v9796_v55  ;;  %v9336_v3 = vor.u32 %v11725_v37, %v9335_v41  ;;  %v9528_v20 = vor.u32 %v11773_v36, %v9527_v42  ;;  %v11878_v57 = vld [vmem:[%s17918_s7 + $0x4f4] sm:$0xf]  ;;  %v9961_v55 = vld [vmem:[%s17918_s7 + $0x508] sm:$0xf0]  ;;  %v9745_v41 = vld [vmem:[%s17918_s7 + $0x358] sm:$0xf0] }
 0x2aa   : > { %v3338_v47 = vadd.f32 %v3337_v10, %v14081_v2  ;;  %v9772_v28 = vor.u32 %v11830_v38, %v9769_v18  ;;  %v9964_v52 = vor.u32 %v11878_v57, %v9961_v55  ;;  %v11824_v10 = vld [vmem:[%s17918_s7 + $0x344] sm:$0xf] }
 0x2ac   : > { %v3382_v35 = vadd.f32 %v3381_v31, %v3338_v47  ;;  %3517 = vmatmul.bf16.gmra.mxu0 %v13451_v59  ;;  %3972 = vmatpush.bf16.msra.mxu3 %v9988_v63  ;;  %v9748_v31 = vor.u32 %v11824_v10, %v9745_v41  ;;  %v11872_v47 = vld [vmem:[%s17918_s7 + $0x4c4] sm:$0xf]  ;;  %v9937_v63 = vld [vmem:[%s17918_s7 + $0x4d8] sm:$0xf0] }
 0x2ad   : > { %3561 = vmatmul.bf16.gmra.mxu1 %v13453_v60  ;;  %3667 = vmatpush.bf16.msrb.mxu0 %v9336_v3  ;;  %v9940_v57 = vor.u32 %v11872_v47, %v9937_v63 }
 0x2ae   : > { %v3422_v37 = vpop.f32.mrf.mxu2  ;;  %v3466_v42 = vpop.f32.mrf.mxu3  ;;  %3711 = vmatpush.bf16.msrb.mxu1 %v9528_v20  ;;  %3929 = vmatpush.bf16.msra.mxu2 %v9772_v28  ;;  %v11818_v20 = vld [vmem:[%s17918_s7 + $0x314] sm:$0xf]  ;;  %v9721_v28 = vld [vmem:[%s17918_s7 + $0x328] sm:$0xf0] }
 0x2af   : > { %v3423_v3 = vadd.f32 %v3422_v37, %v3379_v34  ;;  %v9724_v10 = vor.u32 %v11818_v20, %v9721_v28  ;;  %v11866_v34 = vld [vmem:[%s17918_s7 + $0x494] sm:$0xf] }
 0x2b0   : > { %3973 = vmatpush.bf16.msra.mxu3 %v9964_v52  ;;  %v9913_v52 = vld [vmem:[%s17918_s7 + $0x4a8] sm:$0xf0] }
 0x2b1   : > { %v14412_v36 = vadd.f32 %v3466_v42, %v3423_v3  ;;  %v3339_v38 = vpop.f32.mrf.mxu0  ;;  %v3383_v18 = vpop.f32.mrf.mxu1  ;;  %v9916_v42 = vor.u32 %v11866_v34, %v9913_v52 }
 0x2b2   : > { %v3340_v55 = vadd.f32 %v3339_v38, %v14081_v2  ;;  %3930 = vmatpush.bf16.msra.mxu2 %v9748_v31 }
 0x2b3   : > { %3605 = vmatmul.bf16.gmra.mxu2 %v13493_v43  ;;  %3649 = vmatmul.bf16.gmra.mxu3 %v13495_v25 }
 0x2b4   : > { %v3384_v37 = vadd.f32 %v3383_v18, %v3340_v55  ;;  %3974 = vmatpush.bf16.msra.mxu3 %v9940_v57 }
 0x2b6   : > { %v3425_v31 = vpop.f32.mrf.mxu2  ;;  %v3469_v47 = vpop.f32.mrf.mxu3  ;;  %3931 = vmatpush.bf16.msra.mxu2 %v9724_v10 }
 0x2b7   : > { %v3426_v63 = vadd.f32 %v3425_v31, %v3382_v35 }
 0x2b8   : > { %3975 = vmatpush.bf16.msra.mxu3 %v9916_v42 }
 0x2b9   : > { %v14431_v3 = vadd.f32 %v3469_v47, %v3426_v63  ;;  %v3342_v38 = vpop.f32.mrf.mxu0  ;;  %v3386_v20 = vpop.f32.mrf.mxu1 }
 0x2ba   : > { %v3343_v28 = vadd.f32 %v3342_v38, %v14081_v2 }
 0x2bc   : > { %v3387_v13 = vadd.f32 %v3386_v20, %v3343_v28  ;;  %3522 = vmatmul.bf16.gmra.mxu0 %v13504_v58 }
 0x2bd   : > { %3566 = vmatmul.bf16.gmra.mxu1 %v13506_v19 }
 0x2be   : > { %v3427_v41 = vpop.f32.mrf.mxu2  ;;  %v3471_v18 = vpop.f32.mrf.mxu3 }
 0x2bf   : > { %v3428_v57 = vadd.f32 %v3427_v41, %v3384_v37 }
 0x2c1   : > { %v14436_v55 = vadd.f32 %v3471_v18, %v3428_v57  ;;  %v3344_v34 = vpop.f32.mrf.mxu0  ;;  %v3388_v10 = vpop.f32.mrf.mxu1 }
 0x2c2   : > { %v3345_v35 = vadd.f32 %v3344_v34, %v14081_v2 }
 0x2c3   : > { %3610 = vmatmul.bf16.gmra.mxu2 %v13514_v24  ;;  %3654 = vmatmul.bf16.gmra.mxu3 %v13516_v26 }
 0x2c4   : > { %v3389_v42 = vadd.f32 %v3388_v10, %v3345_v35 }
 0x2c6   : > { %v3430_v31 = vpop.f32.mrf.mxu2  ;;  %v3474_v47 = vpop.f32.mrf.mxu3 }
 0x2c7   : > { %v3431_v63 = vadd.f32 %v3430_v31, %v3387_v13 }
 0x2c9   : > { %v14443_v38 = vadd.f32 %v3474_v47, %v3431_v63  ;;  %v3347_v41 = vpop.f32.mrf.mxu0  ;;  %v3391_v37 = vpop.f32.mrf.mxu1  ;;  %v17996_v63 = vpack.c.bf16 %v13804_v50, %v13799_v15 }
 0x2ca   : > { %v3348_v20 = vadd.f32 %v3347_v41, %v14081_v2 }
 0x2cc   : > { %v3392_v28 = vadd.f32 %v3391_v37, %v3348_v20  ;;  %3668 = vmatmul.bf16.vlgmr.msrb.gmra.mxu0 %v13218_v16 }
 0x2cd   : > { %3712 = vmatmul.bf16.vlgmr.msrb.gmra.mxu1 %v13221_v22 }
 0x2ce   : > { %v3432_v18 = vpop.f32.mrf.mxu2  ;;  %v3476_v57 = vpop.f32.mrf.mxu3 }
 0x2cf   : > { %v3433_v34 = vadd.f32 %v3432_v18, %v3389_v42  ;;  %v17997_v42 = vpack.c.bf16 %v14088_v33, %v14083_v14  ;;  %v17998_v18 = vpack.c.bf16 %v13789_v48, %v13784_v17 }
 0x2d1   : > { %v14448_v52 = vadd.f32 %v3476_v57, %v3433_v34  ;;  %v3349_v10 = vpop.f32.mrf.mxu0  ;;  %v3393_v35 = vpop.f32.mrf.mxu1  ;;  %v17999_v57 = vpack.c.bf16 %v14068_v0, %v14063_v40  ;;  %v18002_v40 = vpack.c.bf16 %v13765_v23, %v13724_v6  ;;  %v18004_v6 = vpack.c.bf16 %v13654_v29, %v13613_v30 }
 0x2d2   : > { %v3350_v13 = vadd.f32 %v3349_v10, %v14081_v2  ;;  %v14462_v2 = vperm.slane %v14078_v49, 3  ;;  %v18000_v49 = vpack.c.bf16 %v13777_v53, %v13772_v39  ;;  %v18003_v10 = vpack.c.bf16 %v14044_v11, %v14003_v12 }
 0x2d3   : > { %3756 = vmatmul.bf16.vlgmr.msrb.gmra.mxu2 %v13241_v7  ;;  %3800 = vmatmul.bf16.vlgmr.msrb.gmra.mxu3 %v13243_v8  ;;  %v18005_v23 = vpack.c.bf16 %v13948_v27, %v13895_v1  ;;  %v18013_v1 = vld [vmem:[#allocation11_spill] sm:$0xff]  ;;  %v18014_v27 = vld [vmem:[#allocation10_spill] sm:$0xff] }
 0x2d4   : > { %v3394_v47 = vadd.f32 %v3393_v35, %v3350_v13  ;;  %4512 = vmatpush.bf16.msrb.mxu2 %v17996_v63  ;;  %4556 = vmatpush.bf16.msrb.mxu3 %v17997_v42  ;;  %v18006_v63 = vld [vmem:[#allocation13_spill] sm:$0xff]  ;;  %v18007_v42 = vld [vmem:[#allocation12_spill] sm:$0xff] }
 0x2d6   : > { %v3435_v41 = vpop.f32.mrf.mxu2  ;;  %v3479_v37 = vpop.f32.mrf.mxu3 }
 0x2d7   : > { %v3436_v20 = vadd.f32 %v3435_v41, %v3392_v28  ;;  %v18001_v28 = vpack.c.bf16 %v14056_v54, %v14051_v56  ;;  %v18008_v41 = vpack.c.bf16 %v18006_v63, %v18007_v42 }
 0x2d8   : > { %4513 = vmatpush.bf16.msrb.mxu2 %v17998_v18  ;;  %4557 = vmatpush.bf16.msrb.mxu3 %v17999_v57 }
 0x2d9   : > { %v14470_v15 = vadd.f32 %v3479_v37, %v3436_v20  ;;  %v3493_v50 = vpop.f32.mrf.mxu0  ;;  %v3537_v34 = vpop.f32.mrf.mxu1  ;;  %v18009_v37 = vld [vmem:[#allocation17_spill] sm:$0xff]  ;;  %v18010_v20 = vld [vmem:[#allocation16_spill] sm:$0xff] }
 0x2da   : > { %v3494_v33 = vadd.f32 %v3493_v50, %v14462_v2  ;;  %v18011_v18 = vpack.c.bf16 %v18009_v37, %v18010_v20 }
 0x2dc   : > { %v3538_v14 = vadd.f32 %v3537_v34, %v3494_v33  ;;  %4514 = vmatpush.bf16.msrb.mxu2 %v18000_v49  ;;  %4558 = vmatpush.bf16.msrb.mxu3 %v18001_v28  ;;  %v18015_v33 = vpack.c.bf16 %v18013_v1, %v18014_v27  ;;  %v18017_v49 = vld [vmem:[#allocation14_spill] sm:$0xff] }
 0x2dd   : > { %3673 = vmatmul.bf16.gmra.mxu0 %v13231_v21  ;;  %3717 = vmatmul.bf16.gmra.mxu1 %v13234_v45 }
 0x2de   : > { %v3437_v17 = vpop.f32.mrf.mxu2  ;;  %v3481_v48 = vpop.f32.mrf.mxu3 }
 0x2df   : > { %v3438_v0 = vadd.f32 %v3437_v17, %v3394_v47  ;;  %v18019_v17 = vld [vmem:[#allocation4_spill] sm:$0xff] }
 0x2e0   : > { %4515 = vmatpush.bf16.msrb.mxu2 %v18002_v40  ;;  %4559 = vmatpush.bf16.msrb.mxu3 %v18003_v10 }
 0x2e1   : > { %v14487_v39 = vadd.f32 %v3481_v48, %v3438_v0  ;;  %v3495_v53 = vpop.f32.mrf.mxu0  ;;  %v3539_v54 = vpop.f32.mrf.mxu1  ;;  %v18020_v48 = vld [vmem:[#allocation5_spill] sm:$0xff] }
 0x2e2   : > { %v3496_v56 = vadd.f32 %v3495_v53, %v14462_v2 }
 0x2e3   : > { %3761 = vmatmul.bf16.gmra.mxu2 %v13257_v44  ;;  %3805 = vmatmul.bf16.gmra.mxu3 %v13259_v46 }
 0x2e4   : > { %v3540_v13 = vadd.f32 %v3539_v54, %v3496_v56  ;;  %4516 = vmatpush.bf16.msrb.mxu2 %v18004_v6  ;;  %4560 = vmatpush.bf16.msrb.mxu3 %v18005_v23 }
 0x2e6   : > { %v3581_v12 = vpop.f32.mrf.mxu2  ;;  %v3625_v11 = vpop.f32.mrf.mxu3 }
 0x2e7   : > { %v3582_v47 = vadd.f32 %v3581_v12, %v3538_v14  ;;  %v18016_v14 = vld [vmem:[#allocation15_spill] sm:$0xff]  ;;  %v18022_v12 = vld [vmem:[#allocation6_spill] sm:$0xff] }
 0x2e8   : > { %4517 = vmatpush.bf16.msrb.mxu2 %v18008_v41  ;;  %4561 = vmatpush.bf16.msrb.mxu3 %v18011_v18  ;;  %v18018_v28 = vpack.c.bf16 %v18016_v14, %v18017_v49  ;;  %v9697_v41 = vld [vmem:[%s17918_s7 + $0x2f8] sm:$0xf0]  ;;  %v11758_v14 = vld [vmem:[%s17918_s7 + $0x134] sm:$0xf]  ;;  %v9481_v49 = vld [vmem:[%s17918_s7 + $0x148] sm:$0xf0] }
 0x2e9   : > { %v14506_v57 = vadd.f32 %v3625_v11, %v3582_v47  ;;  %v3498_v50 = vpop.f32.mrf.mxu0  ;;  %v3542_v30 = vpop.f32.mrf.mxu1  ;;  %v11764_v11 = vld [vmem:[%s17918_s7 + $0x164] sm:$0xf] }
 0x2ea   : > { %v3499_v29 = vadd.f32 %v3498_v50, %v14462_v2  ;;  %v11812_v47 = vld [vmem:[%s17918_s7 + $0x2e4] sm:$0xf] }
 0x2eb   : > { %18012 = vst [vmem:[#allocation13_spill] sm:$0xff] %v14506_v57  ;;  %v9700_v37 = vor.u32 %v11812_v47, %v9697_v41  ;;  %v9673_v47 = vld [vmem:[%s17918_s7 + $0x2c8] sm:$0xf0] }
 0x2ec   : > { %v3543_v34 = vadd.f32 %v3542_v30, %v3499_v29  ;;  %4518 = vmatpush.bf16.msrb.mxu2 %v18015_v33  ;;  %4562 = vmatpush.bf16.msrb.mxu3 %v18018_v28  ;;  %v18024_v28 = vld [vmem:[#allocation7_spill] sm:$0xff] }
 0x2ed   : > { %3678 = vmatmul.bf16.gmra.mxu0 %v18019_v17  ;;  %3722 = vmatmul.bf16.gmra.mxu1 %v18020_v48 }
 0x2ee   : > { %v3583_v0 = vpop.f32.mrf.mxu2  ;;  %v3627_v40 = vpop.f32.mrf.mxu3  ;;  %3880 = vmatpush.bf16.msra.mxu1 %v9700_v37 }
 0x2ef   : > { %v3584_v10 = vadd.f32 %v3583_v0, %v3540_v13  ;;  %v9505_v13 = vld [vmem:[%s17918_s7 + $0x178] sm:$0xf0]  ;;  %v18025_v0 = vld [vmem:[#allocation8_spill] sm:$0xff] }
 0x2f0   : > { %v9508_v42 = vor.u32 %v11764_v11, %v9505_v13  ;;  %v11806_v13 = vld [vmem:[%s17918_s7 + $0x2b4] sm:$0xf] }
 0x2f1   : > { %v14517_v53 = vadd.f32 %v3627_v40, %v3584_v10  ;;  %v3500_v54 = vpop.f32.mrf.mxu0  ;;  %v3544_v56 = vpop.f32.mrf.mxu1  ;;  %v9676_v41 = vor.u32 %v11806_v13, %v9673_v47  ;;  %v11794_v13 = vld [vmem:[%s17918_s7 + $0x254] sm:$0xf] }
 0x2f2   : > { %v3501_v6 = vadd.f32 %v3500_v54, %v14462_v2  ;;  %3836 = vmatpush.bf16.msra.mxu0 %v9508_v42 }
 0x2f3   : > { %18021 = vst [vmem:[#allocation12_spill] sm:$0xff] %v14517_v53  ;;  %3766 = vmatmul.bf16.gmra.mxu2 %v13271_v9  ;;  %3810 = vmatmul.bf16.gmra.mxu3 %v18022_v12 }
 0x2f4   : > { %v3545_v63 = vadd.f32 %v3544_v56, %v3501_v6  ;;  %3881 = vmatpush.bf16.msra.mxu1 %v9676_v41 }
 0x2f6   : > { %v3586_v20 = vpop.f32.mrf.mxu2  ;;  %v3630_v18 = vpop.f32.mrf.mxu3 }
 0x2f7   : > { %v3587_v50 = vadd.f32 %v3586_v20, %v3543_v34  ;;  %v9484_v34 = vor.u32 %v11758_v14, %v9481_v49  ;;  %v11752_v20 = vld [vmem:[%s17918_s7 + $0x104] sm:$0xf]  ;;  %v9649_v14 = vld [vmem:[%s17918_s7 + $0x298] sm:$0xf0] }
 0x2f9   : > { %v14536_v30 = vadd.f32 %v3630_v18, %v3587_v50  ;;  %v3503_v29 = vpop.f32.mrf.mxu0  ;;  %v3547_v1 = vpop.f32.mrf.mxu1  ;;  %3837 = vmatpush.bf16.msra.mxu0 %v9484_v34  ;;  %v9457_v18 = vld [vmem:[%s17918_s7 + $0x118] sm:$0xf0]  ;;  %v11800_v50 = vld [vmem:[%s17918_s7 + $0x284] sm:$0xf] }
 0x2fa   : > { %v3504_v27 = vadd.f32 %v3503_v29, %v14462_v2  ;;  %v9652_v34 = vor.u32 %v11800_v50, %v9649_v14  ;;  %v11740_v50 = vld [vmem:[%s17918_s7 + $0xa4] sm:$0xf] }
 0x2fb   : > { %18023 = vst [vmem:[#allocation17_spill] sm:$0xff] %v14536_v30 }
 0x2fc   : > { %v3548_v33 = vadd.f32 %v3547_v1, %v3504_v27  ;;  %v9460_v27 = vor.u32 %v11752_v20, %v9457_v18  ;;  %3882 = vmatpush.bf16.msra.mxu1 %v9652_v34  ;;  %v18028_v18 = vld [vmem:[#allocation9_spill] sm:$0xff]  ;;  %v9601_v34 = vld [vmem:[%s17918_s7 + $0x238] sm:$0xf0] }
 0x2fd   : > { %3683 = vmatmul.bf16.gmra.mxu0 %v18024_v28  ;;  %3727 = vmatmul.bf16.gmra.mxu1 %v18025_v0 }
 0x2fe   : > { %v3588_v40 = vpop.f32.mrf.mxu2  ;;  %v3632_v10 = vpop.f32.mrf.mxu3  ;;  %3838 = vmatpush.bf16.msra.mxu0 %v9460_v27 }
 0x2ff   : > { %v3589_v54 = vadd.f32 %v3588_v40, %v3545_v63 }
 0x301   : > { %v14547_v56 = vadd.f32 %v3632_v10, %v3589_v54  ;;  %v3505_v6 = vpop.f32.mrf.mxu0  ;;  %v3549_v11 = vpop.f32.mrf.mxu1 }
 0x302   : > { %v3506_v42 = vadd.f32 %v3505_v6, %v14462_v2  ;;  %v11746_v6 = vld [vmem:[%s17918_s7 + $0xd4] sm:$0xf] }
 0x303   : > { %18026 = vst [vmem:[#allocation16_spill] sm:$0xff] %v14547_v56  ;;  %3771 = vmatmul.bf16.gmra.mxu2 %v13319_v61  ;;  %3815 = vmatmul.bf16.gmra.mxu3 %v13321_v62 }
 0x304   : > { %v3550_v63 = vadd.f32 %v3549_v11, %v3506_v42  ;;  %v9433_v11 = vld [vmem:[%s17918_s7 + $0xe8] sm:$0xf0] }
 0x305   : > { %v9436_v47 = vor.u32 %v11746_v6, %v9433_v11  ;;  %v9625_v42 = vld [vmem:[%s17918_s7 + $0x268] sm:$0xf0] }
 0x306   : > { %v3591_v29 = vpop.f32.mrf.mxu2  ;;  %v3635_v1 = vpop.f32.mrf.mxu3  ;;  %v9628_v41 = vor.u32 %v11794_v13, %v9625_v42  ;;  %v11782_v42 = vld [vmem:[%s17918_s7 + $0x1f4] sm:$0xf] }
 0x307   : > { %v3592_v49 = vadd.f32 %v3591_v29, %v3548_v33  ;;  %3839 = vmatpush.bf16.msra.mxu0 %v9436_v47  ;;  %v9409_v29 = vld [vmem:[%s17918_s7 + $0xb8] sm:$0xf0]  ;;  %v9385_v47 = vld [vmem:[%s17918_s7 + $0x88] sm:$0xf0] }
 0x308   : > { %3883 = vmatpush.bf16.msra.mxu1 %v9628_v41 }
 0x309   : > { %v14572_v40 = vadd.f32 %v3635_v1, %v3592_v49  ;;  %v3508_v10 = vpop.f32.mrf.mxu0  ;;  %v3552_v54 = vpop.f32.mrf.mxu1  ;;  %v11788_v1 = vld [vmem:[%s17918_s7 + $0x224] sm:$0xf]  ;;  %v9412_v49 = vor.u32 %v11740_v50, %v9409_v29  ;;  %v9577_v50 = vld [vmem:[%s17918_s7 + $0x208] sm:$0xf0] }
 0x30a   : > { %v3509_v33 = vadd.f32 %v3508_v10, %v14462_v2 }
 0x30b   : > { %18027 = vst [vmem:[#allocation11_spill] sm:$0xff] %v14572_v40  ;;  %3840 = vmatpush.bf16.msra.mxu0 %v9412_v49  ;;  %v9361_v49 = vld [vmem:[%s17918_s7 + $0x58] sm:$0xf0] }
 0x30c   : > { %v3553_v20 = vadd.f32 %v3552_v54, %v3509_v33  ;;  %v9604_v54 = vor.u32 %v11788_v1, %v9601_v34  ;;  %v11734_v33 = vld [vmem:[%s17918_s7 + $0x74] sm:$0xf]  ;;  %v9580_v1 = vor.u32 %v11782_v42, %v9577_v50  ;;  %v11776_v34 = vld [vmem:[%s17918_s7 + $0x1c4] sm:$0xf] }
 0x30d   : > { %3688 = vmatmul.bf16.gmra.mxu0 %v13343_v32  ;;  %3732 = vmatmul.bf16.gmra.mxu1 %v18028_v18  ;;  %v9388_v41 = vor.u32 %v11734_v33, %v9385_v47  ;;  %v11722_v50 = vld [vmem:[%s17918_s7 + $0x14] sm:$0xf] }
 0x30e   : > { %v3593_v27 = vpop.f32.mrf.mxu2  ;;  %v3637_v14 = vpop.f32.mrf.mxu3  ;;  %3884 = vmatpush.bf16.msra.mxu1 %v9604_v54 }
 0x30f   : > { %v3594_v10 = vadd.f32 %v3593_v27, %v3550_v63  ;;  %3841 = vmatpush.bf16.msra.mxu0 %v9388_v41 }
 0x311   : > { %v14601_v6 = vadd.f32 %v3637_v14, %v3594_v10  ;;  %v3510_v11 = vpop.f32.mrf.mxu0  ;;  %v3554_v13 = vpop.f32.mrf.mxu1  ;;  %v11728_v14 = vld [vmem:[%s17918_s7 + $0x44] sm:$0xf] }
 0x312   : > { %v3511_v63 = vadd.f32 %v3510_v11, %v14462_v2  ;;  %3885 = vmatpush.bf16.msra.mxu1 %v9580_v1  ;;  %v9364_v11 = vor.u32 %v11728_v14, %v9361_v49  ;;  %v9337_v1 = vld [vmem:[%s17918_s7 + $0x28] sm:$0xf0]  ;;  %v11770_v14 = vld [vmem:[%s17918_s7 + $0x194] sm:$0xf] }
 0x313   : > { %18029 = vst [vmem:[#allocation10_spill] sm:$0xff] %v14601_v6  ;;  %3776 = vmatmul.bf16.gmra.mxu2 %v13394_v4  ;;  %3820 = vmatmul.bf16.gmra.mxu3 %v13396_v5  ;;  %v9340_v49 = vor.u32 %v11722_v50, %v9337_v1 }
 0x314   : > { %v3555_v27 = vadd.f32 %v3554_v13, %v3511_v63  ;;  %v9553_v13 = vld [vmem:[%s17918_s7 + $0x1d8] sm:$0xf0]  ;;  %3842 = vmatpush.bf16.msra.mxu0 %v9364_v11 }
 0x315   : > { %v9556_v47 = vor.u32 %v11776_v34, %v9553_v13  ;;  %v9529_v34 = vld [vmem:[%s17918_s7 + $0x1a8] sm:$0xf0] }
 0x316   : > { %v3596_v10 = vpop.f32.mrf.mxu2  ;;  %v3640_v54 = vpop.f32.mrf.mxu3 }
 0x317   : > { %v3597_v33 = vadd.f32 %v3596_v10, %v3553_v20  ;;  %3886 = vmatpush.bf16.msra.mxu1 %v9556_v47  ;;  %v9532_v10 = vor.u32 %v11770_v14, %v9529_v34 }
 0x318   : > { %3843 = vmatpush.bf16.msra.mxu0 %v9340_v49 }
 0x319   : > { %v14632_v42 = vadd.f32 %v3640_v54, %v3597_v33  ;;  %v3513_v63 = vpop.f32.mrf.mxu0 }
 0x31a   : > { %v3557_v41 = vpop.f32.mrf.mxu1  ;;  %v3514_v20 = vadd.f32 %v3513_v63, %v14462_v2 }
 0x31b   : > { %18030 = vst [vmem:[#allocation15_spill] sm:$0xff] %v14632_v42  ;;  %3887 = vmatpush.bf16.msra.mxu1 %v9532_v10 }
 0x31c   : > { %v3558_v54 = vadd.f32 %v3557_v41, %v3514_v20 }
 0x31d   : > { %3693 = vmatmul.bf16.gmra.mxu0 %v13451_v59  ;;  %3737 = vmatmul.bf16.gmra.mxu1 %v13453_v60 }
 0x31e   : > { %v3598_v11 = vpop.f32.mrf.mxu2  ;;  %v3642_v13 = vpop.f32.mrf.mxu3 }
 0x31f   : > { %v3599_v33 = vadd.f32 %v3598_v11, %v3555_v27 }
 0x321   : > { %v14649_v29 = vadd.f32 %v3642_v13, %v3599_v33  ;;  %v3515_v63 = vpop.f32.mrf.mxu0 }
 0x322   : > { %v3559_v47 = vpop.f32.mrf.mxu1  ;;  %v3516_v50 = vadd.f32 %v3515_v63, %v14462_v2 }
 0x323   : > { %18031 = vst [vmem:[#allocation14_spill] sm:$0xff] %v14649_v29  ;;  %3781 = vmatmul.bf16.gmra.mxu2 %v13493_v43  ;;  %3825 = vmatmul.bf16.gmra.mxu3 %v13495_v25 }
 0x324   : > { %v3560_v41 = vadd.f32 %v3559_v47, %v3516_v50 }
 0x326   : > { %v3601_v14 = vpop.f32.mrf.mxu2  ;;  %v3645_v20 = vpop.f32.mrf.mxu3 }
 0x327   : > { %v3602_v49 = vadd.f32 %v3601_v14, %v3558_v54 }
 0x329   : > { %v14656_v34 = vadd.f32 %v3645_v20, %v3602_v49  ;;  %v3518_v27 = vpop.f32.mrf.mxu0 }
 0x32a   : > { %v3562_v10 = vpop.f32.mrf.mxu1  ;;  %v3519_v11 = vadd.f32 %v3518_v27, %v14462_v2 }
 0x32b   : > { %18032 = vst [vmem:[#allocation4_spill] sm:$0xff] %v14656_v34 }
 0x32c   : > { %v3563_v13 = vadd.f32 %v3562_v10, %v3519_v11 }
 0x32d   : > { %3698 = vmatmul.bf16.gmra.mxu0 %v13504_v58  ;;  %3742 = vmatmul.bf16.gmra.mxu1 %v13506_v19 }
 0x32e   : > { %v3603_v33 = vpop.f32.mrf.mxu2  ;;  %v3647_v63 = vpop.f32.mrf.mxu3 }
 0x32f   : > { %v3604_v1 = vadd.f32 %v3603_v33, %v3560_v41 }
 0x331   : > { %v14661_v37 = vadd.f32 %v3647_v63, %v3604_v1  ;;  %v3520_v47 = vpop.f32.mrf.mxu0 }
 0x332   : > { %v3564_v50 = vpop.f32.mrf.mxu1  ;;  %v3521_v54 = vadd.f32 %v3520_v47, %v14462_v2 }
 0x333   : > { %18033 = vst [vmem:[#allocation5_spill] sm:$0xff] %v14661_v37  ;;  %3786 = vmatmul.bf16.gmra.mxu2 %v13514_v24  ;;  %3830 = vmatmul.bf16.gmra.mxu3 %v13516_v26 }
 0x334   : > { %v3565_v20 = vadd.f32 %v3564_v50, %v3521_v54 }
 0x336   : > { %v3606_v49 = vpop.f32.mrf.mxu2  ;;  %v3650_v27 = vpop.f32.mrf.mxu3 }
 0x337   : > { %v3607_v10 = vadd.f32 %v3606_v49, %v3563_v13 }
 0x339   : > { %v14668_v11 = vadd.f32 %v3650_v27, %v3607_v10  ;;  %v3523_v41 = vpop.f32.mrf.mxu0 }
 0x33a   : > { %v3567_v1 = vpop.f32.mrf.mxu1  ;;  %v3524_v33 = vadd.f32 %v3523_v41, %v14462_v2 }
 0x33b   : > { %18034 = vst [vmem:[#allocation6_spill] sm:$0xff] %v14668_v11 }
 0x33c   : > { %v3568_v63 = vadd.f32 %v3567_v1, %v3524_v33 }
 0x33d   : > { %3844 = vmatmul.bf16.vlgmr.msra.gmra.mxu0 %v13218_v16  ;;  %3888 = vmatmul.bf16.vlgmr.msra.gmra.mxu1 %v13221_v22  ;;  %v14683_v22 = vld [vmem:[%s17919_s8] sm:$0x3f] }
 0x33e   : > { %v3608_v47 = vpop.f32.mrf.mxu2  ;;  %v3652_v14 = vpop.f32.mrf.mxu3 }
 0x33f   : > { %v3609_v23 = vadd.f32 %v3608_v47, %v3565_v20 }
 0x341   : > { %v14673_v35 = vadd.f32 %v3652_v14, %v3609_v23  ;;  %v3525_v50 = vpop.f32.mrf.mxu0  ;;  %v14686_v23 = vperm.slane %v14683_v22, 4 }
 0x342   : > { %v3569_v54 = vpop.f32.mrf.mxu1  ;;  %v3526_v13 = vadd.f32 %v3525_v50, %v14462_v2 }
 0x343   : > { %18035 = vst [vmem:[#allocation7_spill] sm:$0xff] %v14673_v35  ;;  %3932 = vmatmul.bf16.vlgmr.msra.gmra.mxu2 %v13241_v7  ;;  %3976 = vmatmul.bf16.vlgmr.msra.gmra.mxu3 %v13243_v8 }
 0x344   : > { %v3570_v27 = vadd.f32 %v3569_v54, %v3526_v13 }
 0x346   : > { %v3611_v16 = vpop.f32.mrf.mxu2  ;;  %v3655_v10 = vpop.f32.mrf.mxu3 }
 0x347   : > { %v3612_v14 = vadd.f32 %v3611_v16, %v3568_v63 }
 0x349   : > { %v14688_v2 = vadd.f32 %v3655_v10, %v3612_v14  ;;  %v3669_v20 = vpop.f32.mrf.mxu0 }
 0x34a   : > { %v3713_v41 = vpop.f32.mrf.mxu1  ;;  %v3670_v7 = vadd.f32 %v3669_v20, %v14686_v23 }
 0x34b   : > { %18036 = vst [vmem:[#allocation8_spill] sm:$0xff] %v14688_v2 }
 0x34c   : > { %v3714_v1 = vadd.f32 %v3713_v41, %v3670_v7 }
 0x34d   : > { %3849 = vmatmul.bf16.gmra.mxu0 %v13231_v21  ;;  %3893 = vmatmul.bf16.gmra.mxu1 %v13234_v45 }
 0x34e   : > { %v3613_v8 = vpop.f32.mrf.mxu2  ;;  %v3657_v33 = vpop.f32.mrf.mxu3 }
 0x34f   : > { %v3614_v47 = vadd.f32 %v3613_v8, %v3570_v27 }
 0x351   : > { %v14693_v50 = vadd.f32 %v3657_v33, %v3614_v47  ;;  %v3671_v54 = vpop.f32.mrf.mxu0 }
 0x352   : > { %v3715_v13 = vpop.f32.mrf.mxu1  ;;  %v3672_v63 = vadd.f32 %v3671_v54, %v14686_v23 }
 0x353   : > { %18037 = vst [vmem:[#allocation9_spill] sm:$0xff] %v14693_v50  ;;  %3937 = vmatmul.bf16.gmra.mxu2 %v13257_v44  ;;  %3981 = vmatmul.bf16.gmra.mxu3 %v13259_v46 }
 0x354   : > { %v3716_v10 = vadd.f32 %v3715_v13, %v3672_v63 }
 0x356   : > { %v3757_v21 = vpop.f32.mrf.mxu2  ;;  %v3801_v14 = vpop.f32.mrf.mxu3 }
 0x357   : > { %v3758_v45 = vadd.f32 %v3757_v21, %v3714_v1 }
 0x359   : > { %v14700_v20 = vadd.f32 %v3801_v14, %v3758_v45 }
 0x35a   : > { %v3674_v27 = vpop.f32.mrf.mxu0  ;;  %v3718_v41 = vpop.f32.mrf.mxu1 }
 0x35b   : > { %v3675_v7 = vadd.f32 %v3674_v27, %v14686_v23 }
 0x35d   : > { %v3719_v8 = vadd.f32 %v3718_v41, %v3675_v7  ;;  %3854 = vmatmul.bf16.gmra.mxu0 %v18019_v17  ;;  %3898 = vmatmul.bf16.gmra.mxu1 %v18020_v48 }
 0x35e   : > { %v3759_v33 = vpop.f32.mrf.mxu2  ;;  %v3803_v47 = vpop.f32.mrf.mxu3 }
 0x35f   : > { %v3760_v44 = vadd.f32 %v3759_v33, %v3716_v10 }
 0x361   : > { %v14705_v54 = vadd.f32 %v3803_v47, %v3760_v44 }
 0x362   : > { %v3676_v46 = vpop.f32.mrf.mxu0  ;;  %v3720_v13 = vpop.f32.mrf.mxu1 }
 0x363   : > { %v3677_v63 = vadd.f32 %v3676_v46, %v14686_v23  ;;  %3942 = vmatmul.bf16.gmra.mxu2 %v13271_v9  ;;  %3986 = vmatmul.bf16.gmra.mxu3 %v18022_v12 }
 0x365   : > { %v3721_v21 = vadd.f32 %v3720_v13, %v3677_v63 }
 0x366   : > { %v3762_v17 = vpop.f32.mrf.mxu2  ;;  %v3806_v14 = vpop.f32.mrf.mxu3 }
 0x367   : > { %v3763_v48 = vadd.f32 %v3762_v17, %v3719_v8  ;;  %v14764_v8 = vperm.slane %v14683_v22, 5 }
 0x369   : > { %v14712_v45 = vadd.f32 %v3806_v14, %v3763_v48 }
 0x36a   : > { %v3679_v10 = vpop.f32.mrf.mxu0  ;;  %v3723_v27 = vpop.f32.mrf.mxu1 }
 0x36b   : > { %v3680_v41 = vadd.f32 %v3679_v10, %v14686_v23 }
 0x36d   : > { %v3724_v7 = vadd.f32 %v3723_v27, %v3680_v41  ;;  %3859 = vmatmul.bf16.gmra.mxu0 %v18024_v28  ;;  %3903 = vmatmul.bf16.gmra.mxu1 %v18025_v0 }
 0x36e   : > { %v3764_v33 = vpop.f32.mrf.mxu2  ;;  %v3808_v47 = vpop.f32.mrf.mxu3 }
 0x36f   : > { %v3765_v9 = vadd.f32 %v3764_v33, %v3721_v21 }
 0x371   : > { %v14717_v44 = vadd.f32 %v3808_v47, %v3765_v9 }
 0x372   : > { %v14719_v12 = vpop.f32.mrf.mxu0  ;;  %v14721_v46 = vpop.f32.mrf.mxu1 }
 0x373   : > { %3947 = vmatmul.bf16.gmra.mxu2 %v13319_v61  ;;  %3991 = vmatmul.bf16.gmra.mxu3 %v13321_v62 }
 0x376   : > { %v3767_v13 = vpop.f32.mrf.mxu2  ;;  %v3811_v28 = vpop.f32.mrf.mxu3 }
 0x377   : > { %v3768_v63 = vadd.f32 %v3767_v13, %v3724_v7 }
 0x379   : > { %v14727_v0 = vadd.f32 %v3811_v28, %v3768_v63 }
 0x37a   : > { %v3684_v17 = vpop.f32.mrf.mxu0  ;;  %v3728_v21 = vpop.f32.mrf.mxu1 }
 0x37b   : > { %v3685_v14 = vadd.f32 %v3684_v17, %v14686_v23 }
 0x37d   : > { %v3729_v48 = vadd.f32 %v3728_v21, %v3685_v14  ;;  %3864 = vmatmul.bf16.gmra.mxu0 %v13343_v32  ;;  %3908 = vmatmul.bf16.gmra.mxu1 %v18028_v18 }
 0x37e   : > { %v14732_v10 = vpop.f32.mrf.mxu2  ;;  %v14734_v27 = vpop.f32.mrf.mxu3 }
 0x382   : > { %v14736_v61 = vpop.f32.mrf.mxu0  ;;  %v14738_v62 = vpop.f32.mrf.mxu1 }
 0x383   : > { %3952 = vmatmul.bf16.gmra.mxu2 %v13394_v4  ;;  %3996 = vmatmul.bf16.gmra.mxu3 %v13396_v5 }
 0x386   : > { %v3772_v41 = vpop.f32.mrf.mxu2  ;;  %v3816_v7 = vpop.f32.mrf.mxu3 }
 0x387   : > { %v3773_v33 = vadd.f32 %v3772_v41, %v3729_v48 }
 0x389   : > { %v14742_v47 = vadd.f32 %v3816_v7, %v3773_v33 }
 0x38a   : > { %v3689_v32 = vpop.f32.mrf.mxu0  ;;  %v14744_v9 = vpop.f32.mrf.mxu1 }
 0x38d   : > { %3869 = vmatmul.bf16.gmra.mxu0 %v13451_v59  ;;  %3913 = vmatmul.bf16.gmra.mxu1 %v13453_v60 }
 0x38e   : > { %v14748_v18 = vpop.f32.mrf.mxu2  ;;  %v14750_v13 = vpop.f32.mrf.mxu3 }
 0x392   : > { %v3691_v28 = vpop.f32.mrf.mxu0  ;;  %v3735_v4 = vpop.f32.mrf.mxu1 }
 0x393   : > { %3957 = vmatmul.bf16.gmra.mxu2 %v13493_v43  ;;  %4001 = vmatmul.bf16.gmra.mxu3 %v13495_v25 }
 0x396   : > { %v14754_v5 = vpop.f32.mrf.mxu2  ;;  %v14756_v63 = vpop.f32.mrf.mxu3 }
 0x39a   : > { %v3694_v17 = vpop.f32.mrf.mxu0  ;;  %v3738_v21 = vpop.f32.mrf.mxu1 }
 0x39b   : > { %v3695_v6 = vadd.f32 %v3694_v17, %v14686_v23 }
 0x39d   : > { %3874 = vmatmul.bf16.gmra.mxu0 %v13504_v58  ;;  %3918 = vmatmul.bf16.gmra.mxu1 %v13506_v19 }
 0x39e   : > { %v3779_v59 = vpop.f32.mrf.mxu2  ;;  %v3823_v60 = vpop.f32.mrf.mxu3 }
 0x3a2   : > { %v3696_v14 = vpop.f32.mrf.mxu0  ;;  %v3740_v48 = vpop.f32.mrf.mxu1 }
 0x3a3   : > { %3962 = vmatmul.bf16.gmra.mxu2 %v13514_v24  ;;  %4006 = vmatmul.bf16.gmra.mxu3 %v13516_v26  ;;  %v3697_v35 = vadd.f32 %v3696_v14, %v14686_v23  ;;  %v3692_v14 = vadd.f32 %v3691_v28, %v14686_v23 }
 0x3a5   : > { %v3741_v30 = vadd.f32 %v3740_v48, %v3697_v35  ;;  %v3736_v35 = vadd.f32 %v3735_v4, %v3692_v14 }
 0x3a6   : > { %v3782_v43 = vpop.f32.mrf.mxu2  ;;  %v3826_v25 = vpop.f32.mrf.mxu3 }
 0x3aa   : > { %v3699_v41 = vpop.f32.mrf.mxu0  ;;  %v3743_v7 = vpop.f32.mrf.mxu1 }
 0x3ab   : > { %v3700_v19 = vadd.f32 %v3699_v41, %v14686_v23 }
 0x3ad   : > { %v3744_v26 = vadd.f32 %v3743_v7, %v3700_v19  ;;  %v3739_v7 = vadd.f32 %v3738_v21, %v3695_v6  ;;  %v3687_v21 = vadd.f32 %v14736_v61, %v14686_v23 }
 0x3ae   : > { %v3784_v33 = vpop.f32.mrf.mxu2  ;;  %v3828_v16 = vpop.f32.mrf.mxu3 }
 0x3af   : > { %v3785_v19 = vadd.f32 %v3784_v33, %v3741_v30  ;;  %v3780_v30 = vadd.f32 %v3779_v59, %v3736_v35 }
 0x3b1   : > { %v3824_v4 = vadd.f32 %v3823_v60, %v3780_v30  ;;  %v18041_v30 = vpack.c.bf16 %v14705_v54, %v14700_v20  ;;  %v18045_v20 = vld [vmem:[#allocation21_spill] sm:$0xff]  ;;  %v18046_v54 = vld [vmem:[#allocation20_spill] sm:$0xff] }
 0x3b2   : > { %v3701_v49 = vpop.f32.mrf.mxu0  ;;  %v3745_v31 = vpop.f32.mrf.mxu1 }
 0x3b3   : > { %v3702_v2 = vadd.f32 %v3701_v49, %v14686_v23 }
 0x3b5   : > { %v3746_v34 = vadd.f32 %v3745_v31, %v3702_v2  ;;  %v3783_v31 = vadd.f32 %v3782_v43, %v3739_v7  ;;  %v3731_v43 = vadd.f32 %v14738_v62, %v3687_v21 }
 0x3b6   : > { %v3787_v1 = vpop.f32.mrf.mxu2  ;;  %v3831_v58 = vpop.f32.mrf.mxu3 }
 0x3b7   : > { %v3788_v37 = vadd.f32 %v3787_v1, %v3744_v26  ;;  %v3829_v1 = vadd.f32 %v3828_v16, %v3785_v19  ;;  %v3775_v33 = vadd.f32 %v14748_v18, %v3731_v43 }
 0x3b9   : > { %v3832_v22 = vadd.f32 %v3831_v58, %v3788_v37  ;;  %v3827_v37 = vadd.f32 %v3826_v25, %v3783_v31 }
 0x3ba   : > { %v3845_v24 = vpop.f32.mrf.mxu0  ;;  %v3889_v50 = vpop.f32.mrf.mxu1 }
 0x3bb   : > { %v3846_v11 = vadd.f32 %v3845_v24, %v14764_v8 }
 0x3bd   : > { %v3890_v42 = vadd.f32 %v3889_v50, %v3846_v11  ;;  %v3690_v50 = vadd.f32 %v3689_v32, %v14686_v23 }
 0x3be   : > { %v3789_v29 = vpop.f32.mrf.mxu2  ;;  %v3833_v40 = vpop.f32.mrf.mxu3 }
 0x3bf   : > { %v3790_v41 = vadd.f32 %v3789_v29, %v3746_v34  ;;  %v3734_v6 = vadd.f32 %v14744_v9, %v3690_v50 }
 0x3c1   : > { %v3834_v56 = vadd.f32 %v3833_v40, %v3790_v41  ;;  %v3778_v48 = vadd.f32 %v14754_v5, %v3734_v6  ;;  %v3682_v5 = vadd.f32 %v14719_v12, %v14686_v23  ;;  %v3819_v41 = vadd.f32 %v14750_v13, %v3775_v33 }
 0x3c2   : > { %v14770_v57 = vpop.f32.mrf.mxu0  ;;  %v14772_v49 = vpop.f32.mrf.mxu1 }
 0x3c3   : > { %v4052_v24 = vpack.c.bf16 %v3834_v56, %v3832_v22  ;;  %v4050_v56 = vpack.c.bf16 %v3829_v1, %v3827_v37  ;;  %v3822_v9 = vadd.f32 %v14756_v63, %v3778_v48  ;;  %v3726_v62 = vadd.f32 %v14721_v46, %v3682_v5 }
 0x3c4   : > { %v4046_v18 = vpack.c.bf16 %v3819_v41, %v14742_v47 }
 0x3c5   : > { %4059 = vmatpush.bf16.xpose.msrb.mxu0 %v4052_v24  ;;  %v4048_v61 = vpack.c.bf16 %v3824_v4, %v3822_v9  ;;  %v3770_v19 = vadd.f32 %v14732_v10, %v3726_v62 }
 0x3c6   : > { %v3933_v11 = vpop.f32.mrf.mxu2  ;;  %v3977_v2 = vpop.f32.mrf.mxu3 }
 0x3c7   : > { %v3934_v29 = vadd.f32 %v3933_v11, %v3890_v42  ;;  %v3814_v13 = vadd.f32 %v14734_v27, %v3770_v19  ;;  %v18040_v27 = vpack.c.bf16 %v14717_v44, %v14712_v45  ;;  %v18042_v45 = vld [vmem:[#allocation19_spill] sm:$0xff]  ;;  %v18043_v44 = vld [vmem:[#allocation18_spill] sm:$0xff] }
 0x3c8   : > { %v18044_v43 = vpack.c.bf16 %v18042_v45, %v18043_v44  ;;  %v18051_v45 = vpack.c.bf16 %v14412_v36, %v14371_v51 }
 0x3c9   : > { %v14776_v40 = vadd.f32 %v3977_v2, %v3934_v29  ;;  %v4044_v11 = vpack.c.bf16 %v3814_v13, %v14727_v0 }
 0x3ca   : > { %v3850_v34 = vpop.f32.mrf.mxu0  ;;  %v3894_v17 = vpop.f32.mrf.mxu1 }
 0x3cb   : > { %18038 = vst [vmem:[#allocation24_spill] sm:$0xff] %v14776_v40  ;;  %v3851_v28 = vadd.f32 %v3850_v34, %v14764_v8 }
 0x3cd   : > { %v3895_v32 = vadd.f32 %v3894_v17, %v3851_v28  ;;  %4060 = vmatpush.bf16.xpose.msrb.mxu0 %v4050_v56 }
 0x3ce   : > { %v14783_v42 = vpop.f32.mrf.mxu2  ;;  %v14785_v16 = vpop.f32.mrf.mxu3 }
 0x3cf   : > { %18039 = vst [vmem:[#allocation25_spill] sm:$0xff] %v14785_v16 }
 0x3d2   : > { %v14789_v59 = vpop.f32.mrf.mxu0  ;;  %v14791_v25 = vpop.f32.mrf.mxu1 }
 0x3d5   : > { %4061 = vmatpush.bf16.xpose.msrb.mxu0 %v4048_v61 }
 0x3d6   : > { %v3938_v58 = vpop.f32.mrf.mxu2  ;;  %v3982_v26 = vpop.f32.mrf.mxu3 }
 0x3d7   : > { %v3939_v60 = vadd.f32 %v3938_v58, %v3895_v32 }
 0x3d9   : > { %v14798_v22 = vadd.f32 %v3982_v26, %v3939_v60  ;;  %v18047_v60 = vpack.c.bf16 %v18045_v20, %v18046_v54 }
 0x3da   : > { %v3855_v63 = vpop.f32.mrf.mxu0  ;;  %v3899_v7 = vpop.f32.mrf.mxu1 }
 0x3db   : > { %v3856_v24 = vadd.f32 %v3855_v63, %v14764_v8 }
 0x3dd   : > { %v3900_v14 = vadd.f32 %v3899_v7, %v3856_v24  ;;  %4062 = vmatpush.bf16.xpose.msrb.mxu0 %v4046_v18 }
 0x3de   : > { %v14803_v23 = vpop.f32.mrf.mxu2  ;;  %v14805_v12 = vpop.f32.mrf.mxu3 }
 0x3e2   : > { %v14808_v31 = vpop.f32.mrf.mxu0  ;;  %v14810_v46 = vpop.f32.mrf.mxu1 }
 0x3e5   : > { %4063 = vmatpush.bf16.xpose.msrb.mxu0 %v4044_v11  ;;  %v18048_v11 = vld [vmem:[#allocation23_spill] sm:$0xff] }
 0x3e6   : > { %v3943_v10 = vpop.f32.mrf.mxu2  ;;  %v3987_v2 = vpop.f32.mrf.mxu3 }
 0x3e7   : > { %v3944_v47 = vadd.f32 %v3943_v10, %v3900_v14  ;;  %v18049_v10 = vld [vmem:[#allocation22_spill] sm:$0xff] }
 0x3e9   : > { %v14813_v50 = vadd.f32 %v3987_v2, %v3944_v47  ;;  %v18050_v2 = vpack.c.bf16 %v18048_v11, %v18049_v10 }
 0x3ea   : > { %v3860_v1 = vpop.f32.mrf.mxu0  ;;  %v3904_v29 = vpop.f32.mrf.mxu1 }
 0x3eb   : > { %v3861_v35 = vadd.f32 %v3860_v1, %v14764_v8 }
 0x3ed   : > { %v3905_v37 = vadd.f32 %v3904_v29, %v3861_v35  ;;  %4064 = vmatpush.bf16.xpose.msrb.mxu0 %v18040_v27 }
 0x3ee   : > { %v14819_v34 = vpop.f32.mrf.mxu2  ;;  %v14821_v17 = vpop.f32.mrf.mxu3 }
 0x3f2   : > { %v3862_v0 = vpop.f32.mrf.mxu0  ;;  %v14823_v6 = vpop.f32.mrf.mxu1 }
 0x3f5   : > { %4065 = vmatpush.bf16.xpose.msrb.mxu0 %v18041_v30 }
 0x3f6   : > { %v3948_v56 = vpop.f32.mrf.mxu2  ;;  %v3992_v28 = vpop.f32.mrf.mxu3 }
 0x3f7   : > { %v3949_v21 = vadd.f32 %v3948_v56, %v3905_v37 }
 0x3f9   : > { %v14828_v48 = vadd.f32 %v3992_v28, %v3949_v21 }
 0x3fa   : > { %v3865_v32 = vpop.f32.mrf.mxu0  ;;  %v3909_v4 = vpop.f32.mrf.mxu1 }
 0x3fb   : > { %v3866_v51 = vadd.f32 %v3865_v32, %v14764_v8 }
 0x3fc   : > { %4066 = vmatmul.bf16.vlgmr.msrb.gmra.mxu0 %v18044_v43 }
 0x3fe   : > { %v3950_v9 = vpop.f32.mrf.mxu2  ;;  %v3994_v33 = vpop.f32.mrf.mxu3 }
 0x402   : > { %v3867_v61 = vpop.f32.mrf.mxu0  ;;  %v3911_v5 = vpop.f32.mrf.mxu1 }
 0x406   : > { %v3953_v58 = vpop.f32.mrf.mxu2  ;;  %v3997_v26 = vpop.f32.mrf.mxu3 }
 0x40a   : > { %v3870_v41 = vpop.f32.mrf.mxu0  ;;  %v3914_v62 = vpop.f32.mrf.mxu1 }
 0x40c   : > { %4071 = vmatmul.bf16.gmra.mxu0 %v18047_v60  ;;  %v3871_v60 = vadd.f32 %v3870_v41, %v14764_v8 }
 0x40e   : > { %v3955_v63 = vpop.f32.mrf.mxu2  ;;  %v3999_v7 = vpop.f32.mrf.mxu3  ;;  %v3915_v40 = vadd.f32 %v3914_v62, %v3871_v60  ;;  %v3863_v62 = vadd.f32 %v3862_v0, %v14764_v8  ;;  %v18053_v0 = vpack.c.bf16 %v14448_v52, %v14443_v38 }
 0x412   : > { %v3872_v19 = vpop.f32.mrf.mxu0  ;;  %v3916_v14 = vpop.f32.mrf.mxu1 }
 0x413   : > { %v3873_v44 = vadd.f32 %v3872_v19, %v14764_v8 }
 0x416   : > { %v3958_v18 = vpop.f32.mrf.mxu2  ;;  %v4002_v24 = vpop.f32.mrf.mxu3 }
 0x417   : > { %v3959_v16 = vadd.f32 %v3958_v18, %v3915_v40  ;;  %v3907_v40 = vadd.f32 %v14823_v6, %v3863_v62  ;;  %v3853_v6 = vadd.f32 %v14789_v59, %v14764_v8 }
 0x419   : > { %v3951_v18 = vadd.f32 %v3950_v9, %v3907_v40 }
 0x41a   : > { %v3875_v13 = vpop.f32.mrf.mxu0  ;;  %v3919_v29 = vpop.f32.mrf.mxu1 }
 0x41b   : > { %v3876_v30 = vadd.f32 %v3875_v13, %v14764_v8 }
 0x41c   : > { %4076 = vmatmul.bf16.gmra.mxu0 %v18050_v2  ;;  %v3917_v2 = vadd.f32 %v3916_v14, %v3873_v44  ;;  %v18052_v14 = vpack.c.bf16 %v14436_v55, %v14431_v3  ;;  %v18073_v44 = vld [vmem:[#allocation6_spill] sm:$0xff] }
 0x41d   : > { %v3920_v28 = vadd.f32 %v3919_v29, %v3876_v30  ;;  %v3868_v30 = vadd.f32 %v3867_v61, %v14764_v8 }
 0x41e   : > { %v3960_v47 = vpop.f32.mrf.mxu2  ;;  %v4004_v1 = vpop.f32.mrf.mxu3 }
 0x41f   : > { %v3912_v19 = vadd.f32 %v3911_v5, %v3868_v30 }
 0x422   : > { %v3877_v35 = vpop.f32.mrf.mxu0  ;;  %v3921_v21 = vpop.f32.mrf.mxu1 }
 0x423   : > { %v3878_v56 = vadd.f32 %v3877_v35, %v14764_v8  ;;  %v3961_v35 = vadd.f32 %v3960_v47, %v3917_v2  ;;  %v14902_v2 = vld [vmem:[%s17914_s3] ss:$0 sm:$0xff] }
 0x425   : > { %v3922_v43 = vadd.f32 %v3921_v21, %v3878_v56  ;;  %v4005_v36 = vadd.f32 %v4004_v1, %v3961_v35  ;;  %v3910_v56 = vadd.f32 %v3909_v4, %v3866_v51  ;;  %v3995_v4 = vadd.f32 %v3994_v33, %v3951_v18  ;;  %v18069_v1 = vld [vmem:[#allocation5_spill] sm:$0xff] }
 0x426   : > { %v3963_v37 = vpop.f32.mrf.mxu2  ;;  %v4007_v27 = vpop.f32.mrf.mxu3 }
 0x427   : > { %v3964_v20 = vadd.f32 %v3963_v37, %v3920_v28  ;;  %v4003_v37 = vadd.f32 %v4002_v24, %v3959_v16  ;;  %v3956_v28 = vadd.f32 %v3955_v63, %v3912_v19  ;;  %v3954_v47 = vadd.f32 %v3953_v58, %v3910_v56 }
 0x428   : > { %v3858_v16 = vadd.f32 %v14808_v31, %v14764_v8  ;;  %v4047_v55 = vpack.c.bf16 %v3995_v4, %v14828_v48  ;;  %v3897_v31 = vadd.f32 %v14791_v25, %v3853_v6  ;;  %v18055_v25 = vld [vmem:[#allocation25_spill] sm:$0xff] }
 0x429   : > { %v4008_v53 = vadd.f32 %v4007_v27, %v3964_v20  ;;  %v4051_v41 = vpack.c.bf16 %v4005_v36, %v4003_v37  ;;  %v3998_v61 = vadd.f32 %v3997_v26, %v3954_v47  ;;  %v18070_v27 = vld [vmem:[#allocation4_spill] sm:$0xff]  ;;  %v18075_v20 = vld [vmem:[#allocation9_spill] sm:$0xff] }
 0x42a   : > { %v3902_v5 = vadd.f32 %v14810_v46, %v3858_v16  ;;  %v3941_v33 = vadd.f32 %v14803_v23, %v3897_v31  ;;  %v18071_v21 = vpack.c.bf16 %v18069_v1, %v18070_v27 }
 0x42c   : > { %4081 = vmatmul.bf16.gmra.mxu0 %v18051_v45  ;;  %v3946_v3 = vadd.f32 %v14819_v34, %v3902_v5  ;;  %v3848_v34 = vadd.f32 %v14770_v57, %v14764_v8  ;;  %v3985_v48 = vadd.f32 %v14805_v12, %v3941_v33  ;;  %v18057_v57 = vld [vmem:[#allocation12_spill] sm:$0xff]  ;;  %v18058_v8 = vld [vmem:[#allocation13_spill] sm:$0xff]  ;;  %v18072_v45 = vld [vmem:[#allocation7_spill] sm:$0xff] }
 0x42d   : > { %v18059_v26 = vpack.c.bf16 %v18057_v57, %v18058_v8  ;;  %v18060_v12 = vld [vmem:[#allocation16_spill] sm:$0xff] }
 0x42e   : > { %v3965_v54 = vpop.f32.mrf.mxu2  ;;  %v4009_v10 = vpop.f32.mrf.mxu3  ;;  %v3990_v9 = vadd.f32 %v14821_v17, %v3946_v3  ;;  %v3892_v52 = vadd.f32 %v14772_v49, %v3848_v34  ;;  %v4043_v59 = vpack.c.bf16 %v3985_v48, %v14798_v22  ;;  %v18054_v17 = vpack.c.bf16 %v14487_v39, %v14470_v15  ;;  %v18061_v49 = vld [vmem:[#allocation17_spill] sm:$0xff]  ;;  %v18064_v22 = vld [vmem:[#allocation11_spill] sm:$0xff]  ;;  %v18066_v15 = vld [vmem:[#allocation14_spill] sm:$0xff] }
 0x42f   : > { %v3966_v11 = vadd.f32 %v3965_v54, %v3922_v43  ;;  %v18062_v63 = vpack.c.bf16 %v18060_v12, %v18061_v49  ;;  %v18067_v39 = vld [vmem:[#allocation15_spill] sm:$0xff]  ;;  %v18074_v43 = vpack.c.bf16 %v18072_v45, %v18073_v44  ;;  %v18076_v54 = vld [vmem:[#allocation8_spill] sm:$0xff] }
 0x430   : > { %v4045_v46 = vpack.c.bf16 %v3990_v9, %v14813_v50  ;;  %v3936_v38 = vadd.f32 %v14783_v42, %v3892_v52  ;;  %v18056_v50 = vld [vmem:[#allocation24_spill] sm:$0xff]  ;;  %v18063_v42 = vld [vmem:[#allocation10_spill] sm:$0xff]  ;;  %v18068_v24 = vpack.c.bf16 %v18066_v15, %v18067_v39  ;;  %v18077_v60 = vpack.c.bf16 %v18075_v20, %v18076_v54 }
 0x431   : > { %v4010_v13 = vadd.f32 %v4009_v10, %v3966_v11 }
 0x432   : > { %v3980_v23 = vadd.f32 %v18055_v25, %v3936_v38 }
 0x433   : > { %v4053_v29 = vpack.c.bf16 %v4010_v13, %v4008_v53  ;;  %v4000_v53 = vadd.f32 %v3999_v7, %v3956_v28  ;;  %v18065_v7 = vpack.c.bf16 %v18063_v42, %v18064_v22 }
 0x434   : > { %v4041_v58 = vpack.c.bf16 %v3980_v23, %v18056_v50 }
 0x435   : > { %4103 = vmatpush.bf16.xpose.msrb.mxu1 %v4053_v29  ;;  %v4049_v32 = vpack.c.bf16 %v4000_v53, %v3998_v61 }
 0x43c   : > { %4086 = vmatmul.bf16.gmra.mxu0 %v18052_v14 }
 0x43d   : > { %4104 = vmatpush.bf16.xpose.msrb.mxu1 %v4051_v41 }
 0x445   : > { %4105 = vmatpush.bf16.xpose.msrb.mxu1 %v4049_v32 }
 0x44c   : > { %4091 = vmatmul.bf16.gmra.mxu0 %v18053_v0 }
 0x44d   : > { %4106 = vmatpush.bf16.xpose.msrb.mxu1 %v4047_v55 }
 0x455   : > { %4107 = vmatpush.bf16.xpose.msrb.mxu1 %v4045_v46 }
 0x45c   : > { %4096 = vmatmul.bf16.gmra.mxu0 %v18054_v17 }
 0x45d   : > { %4108 = vmatpush.bf16.xpose.msrb.mxu1 %v4043_v59 }
 0x465   : > { %4109 = vmatpush.bf16.xpose.msrb.mxu1 %v4041_v58 }
 0x46c   : > { %4110 = vmatmul.bf16.vlgmr.msrb.gmra.mxu1 %v18059_v26 }
 0x479   : > { %v4067_v11 = vpop.f32.mrf.mxu0 }
 0x47a   : > { %v4068_v13 = vadd.f32 %v14902_v2, %v4067_v11 }
 0x47c   : > { %4115 = vmatmul.bf16.gmra.mxu1 %v18062_v63 }
 0x481   : > { %v4069_v10 = vpop.f32.mrf.mxu0 }
 0x482   : > { %v4070_v36 = vadd.f32 %v14902_v2, %v4069_v10 }
 0x489   : > { %v4072_v35 = vpop.f32.mrf.mxu0 }
 0x48a   : > { %v4073_v41 = vadd.f32 %v14902_v2, %v4072_v35 }
 0x48c   : > { %4120 = vmatmul.bf16.gmra.mxu1 %v18065_v7 }
 0x491   : > { %v4074_v56 = vpop.f32.mrf.mxu0 }
 0x492   : > { %v4075_v40 = vadd.f32 %v14902_v2, %v4074_v56 }
 0x499   : > { %v4077_v53 = vpop.f32.mrf.mxu0 }
 0x49a   : > { %v4078_v4 = vadd.f32 %v14902_v2, %v4077_v53 }
 0x49c   : > { %4125 = vmatmul.bf16.gmra.mxu1 %v18068_v24 }
 0x4a1   : > { %v4079_v16 = vpop.f32.mrf.mxu0 }
 0x4a2   : > { %v4080_v0 = vadd.f32 %v14902_v2, %v4079_v16 }
 0x4a9   : > { %v4082_v6 = vpop.f32.mrf.mxu0 }
 0x4aa   : > { %v4083_v46 = vadd.f32 %v14902_v2, %v4082_v6 }
 0x4ac   : > { %4130 = vmatmul.bf16.gmra.mxu1 %v18071_v21 }
 0x4b1   : > { %v4084_v52 = vpop.f32.mrf.mxu0 }
 0x4b2   : > { %v4085_v59 = vadd.f32 %v14902_v2, %v4084_v52 }
 0x4b9   : > { %v4087_v50 = vpop.f32.mrf.mxu0 }
 0x4ba   : > { %v4088_v58 = vadd.f32 %v14902_v2, %v4087_v50 }
 0x4bc   : > { %4135 = vmatmul.bf16.gmra.mxu1 %v18074_v43 }
 0x4c1   : > { %v4089_v63 = vpop.f32.mrf.mxu0 }
 0x4c2   : > { %v4090_v21 = vadd.f32 %v14902_v2, %v4089_v63 }
 0x4c9   : > { %v4092_v27 = vpop.f32.mrf.mxu0 }
 0x4cc   : > { %4140 = vmatmul.bf16.gmra.mxu1 %v18077_v60 }
 0x4d1   : > { %v4094_v35 = vpop.f32.mrf.mxu0 }
 0x4e9   : > { %v4111_v29 = vpop.f32.mrf.mxu1 }
 0x4ea   : > { %v4112_v30 = vadd.f32 %v4111_v29, %v4068_v13  ;;  %v4093_v13 = vadd.f32 %v14902_v2, %v4092_v27 }
 0x4ec   : > { %v4147_v51 = vsel %vm4146_vm2, %v4112_v30, -inf }
 0x4ed   : > { %4148 = vmax.xlane.f32.xlu0 %v4147_v51 }
 0x4f1   : > { %v4113_v19 = vpop.f32.mrf.mxu1 }
 0x4f2   : > { %v4114_v37 = vadd.f32 %v4113_v19, %v4070_v36 }
 0x4f4   : > { %v4150_v28 = vsel %vm4146_vm2, %v4114_v37, -inf }
 0x4f5   : > { %4151 = vmax.xlane.f32.xlu0 %v4150_v28 }
 0x4f9   : > { %v4116_v14 = vpop.f32.mrf.mxu1 }
 0x4fa   : > { %v4117_v62 = vadd.f32 %v4116_v14, %v4073_v41  ;;  %v4095_v41 = vadd.f32 %v14902_v2, %v4094_v35 }
 0x4fc   : > { %v4153_v47 = vsel %vm4146_vm2, %v4117_v62, -inf }
 0x4fd   : > { %4154 = vmax.xlane.f32.xlu1 %v4153_v47  ;;  %v4097_v47 = vpop.f32.mrf.mxu0 }
 0x501   : > { %v4118_v61 = vpop.f32.mrf.mxu1 }
 0x502   : > { %v14911_v18 = vadd.f32 %v4118_v61, %v4075_v40 }
 0x504   : > { %v4156_v32 = vsel %vm4146_vm2, %v14911_v18, -inf }
 0x505   : > { %4157 = vmax.xlane.f32.xlu1 %v4156_v32  ;;  %v4099_v6 = vpop.f32.mrf.mxu0 }
 0x506   : > { %v4100_v52 = vadd.f32 %v14902_v2, %v4099_v6 }
 0x509   : > { %v4121_v5 = vpop.f32.mrf.mxu1 }
 0x50a   : > { %v14916_v3 = vadd.f32 %v4121_v5, %v4078_v4  ;;  %v4098_v4 = vadd.f32 %v14902_v2, %v4097_v47 }
 0x50c   : > { %v4159_v55 = vsel %vm4146_vm2, %v14916_v3, -inf }
 0x50d   : > { %4160 = vmax.xlane.f32.xlu2 %v4159_v55 }
 0x511   : > { %v4123_v9 = vpop.f32.mrf.mxu1 }
 0x512   : > { %v14921_v31 = vadd.f32 %v4123_v9, %v4080_v0 }
 0x514   : > { %v4162_v33 = vsel %vm4146_vm2, %v14921_v31, -inf }
 0x515   : > { %4163 = vmax.xlane.f32.xlu2 %v4162_v33 }
 0x519   : > { %v4126_v34 = vpop.f32.mrf.mxu1 }
 0x51a   : > { %v14926_v48 = vadd.f32 %v4126_v34, %v4083_v46 }
 0x51c   : > { %v4165_v38 = vsel %vm4146_vm2, %v14926_v48, -inf }
 0x51d   : > { %4166 = vmax.xlane.f32.xlu0 %v4165_v38 }
 0x521   : > { %v4128_v17 = vpop.f32.mrf.mxu1 }
 0x522   : > { %v14931_v25 = vadd.f32 %v4128_v17, %v4085_v59 }
 0x524   : > { %v4168_v23 = vsel %vm4146_vm2, %v14931_v25, -inf }
 0x525   : > { %4169 = vmax.xlane.f32.xlu1 %v4168_v23 }
 0x529   : > { %v4131_v57 = vpop.f32.mrf.mxu1 }
 0x52a   : > { %v14936_v8 = vadd.f32 %v4131_v57, %v4088_v58 }
 0x52c   : > { %v4171_v26 = vsel %vm4146_vm2, %v14936_v8, -inf }
 0x52d   : > { %4172 = vmax.xlane.f32.xlu1 %v4171_v26 }
 0x531   : > { %v4133_v22 = vpop.f32.mrf.mxu1 }
 0x532   : > { %v14945_v44 = vadd.f32 %v4133_v22, %v4090_v21 }
 0x534   : > { %v4174_v11 = vsel %vm4146_vm2, %v14945_v44, -inf }
 0x539   : > { %v4136_v45 = vpop.f32.mrf.mxu1 }
 0x53a   : > { %v14954_v29 = vadd.f32 %v4136_v45, %v4093_v13 }
 0x53c   : > { %v4177_v56 = vsel %vm4146_vm2, %v14954_v29, -inf }
 0x541   : > { %v4138_v51 = vpop.f32.mrf.mxu1 }
 0x542   : > { %v14964_v14 = vadd.f32 %v4138_v51, %v4095_v41 }
 0x544   : > { %v4180_v16 = vsel %vm4146_vm2, %v14964_v14, -inf }
 0x549   : > { %v4141_v61 = vpop.f32.mrf.mxu1 }
 0x54a   : > { %v14974_v5 = vadd.f32 %v4141_v61, %v4098_v4 }
 0x54c   : > { %v4183_v46 = vsel %vm4146_vm2, %v14974_v5, -inf }
 0x551   : > { %v4143_v34 = vpop.f32.mrf.mxu1 }
 0x552   : > { %v14984_v38 = vadd.f32 %v4143_v34, %v4100_v52 }
 0x554   : > { %v4186_v50 = vsel %vm4146_vm2, %v14984_v38, -inf }
 0x560   : > { %v4149_v12 = vpop.xlane.xlu0 %4148 }
 0x561   : > { %v4189_v49 = vsub.f32 %v4112_v30, %v4149_v12 }
 0x563   : > { %v4203_v42 = vmul.f32 1.442695, %v4189_v49 }
 0x565   : > { %12303 = vpow2.f32 %v4203_v42 }
 0x568   : > { %v4152_v7 = vpop.xlane.xlu0 %4151 }
 0x569   : > { %v4190_v15 = vsub.f32 %v4114_v37, %v4152_v7 }
 0x56b   : > { %v14940_v39 = vpop.eup %12303  ;;  %v4205_v24 = vmul.f32 1.442695, %v4190_v15 }
 0x56c   : > { %v4231_v1 = vsel %vm4146_vm2, %v14940_v39, 0.0 }
 0x56d   : > { %12305 = vpow2.f32 %v4205_v24  ;;  %4232 = vadd.xlane.f32.xlu2 %v4231_v1 }
 0x570   : > { %v4155_v43 = vpop.xlane.xlu1 %4154 }
 0x571   : > { %v4191_v20 = vsub.f32 %v4117_v62, %v4155_v43 }
 0x573   : > { %v14947_v54 = vpop.eup %12305  ;;  %v4207_v60 = vmul.f32 1.442695, %v4191_v20 }
 0x574   : > { %v4234_v10 = vsel %vm4146_vm2, %v14947_v54, 0.0 }
 0x575   : > { %12307 = vpow2.f32 %v4207_v60  ;;  %4175 = vmax.xlane.f32.xlu2 %v4174_v11  ;;  %4235 = vadd.xlane.f32.xlu0 %v4234_v10 }
 0x578   : > { %v4158_v30 = vpop.xlane.xlu1 %4157 }
 0x579   : > { %v4192_v36 = vsub.f32 %v14911_v18, %v4158_v30 }
 0x57b   : > { %v14957_v19 = vpop.eup %12307  ;;  %v4209_v37 = vmul.f32 1.442695, %v4192_v36 }
 0x57c   : > { %v4237_v28 = vsel %vm4146_vm2, %v14957_v19, 0.0 }
 0x57d   : > { %12309 = vpow2.f32 %v4209_v37  ;;  %4178 = vmax.xlane.f32.xlu2 %v4177_v56  ;;  %4238 = vadd.xlane.f32.xlu0 %v4237_v28 }
 0x580   : > { %v4161_v62 = vpop.xlane.xlu2 %4160 }
 0x581   : > { %v4193_v53 = vsub.f32 %v14916_v3, %v4161_v62 }
 0x583   : > { %v14967_v40 = vpop.eup %12309  ;;  %v4211_v18 = vmul.f32 1.442695, %v4193_v53 }
 0x584   : > { %v4240_v32 = vsel %vm4146_vm2, %v14967_v40, 0.0 }
 0x585   : > { %12311 = vpow2.f32 %v4211_v18  ;;  %4241 = vadd.xlane.f32.xlu1 %v4240_v32  ;;  %4181 = vmax.xlane.f32.xlu0 %v4180_v16 }
 0x588   : > { %v4164_v55 = vpop.xlane.xlu2 %4163 }
 0x589   : > { %v4194_v3 = vsub.f32 %v14921_v31, %v4164_v55 }
 0x58b   : > { %v14977_v0 = vpop.eup %12311  ;;  %v4213_v9 = vmul.f32 1.442695, %v4194_v3 }
 0x58c   : > { %v4243_v33 = vsel %vm4146_vm2, %v14977_v0, 0.0 }
 0x58d   : > { %12313 = vpow2.f32 %v4213_v9  ;;  %4244 = vadd.xlane.f32.xlu1 %v4243_v33  ;;  %4184 = vmax.xlane.f32.xlu0 %v4183_v46 }
 0x590   : > { %v4167_v59 = vpop.xlane.xlu0 %4166 }
 0x591   : > { %v4195_v31 = vsub.f32 %v14926_v48, %v4167_v59 }
 0x593   : > { %v14987_v17 = vpop.eup %12313  ;;  %v4215_v23 = vmul.f32 1.442695, %v4195_v31 }
 0x594   : > { %v4246_v58 = vsel %vm4146_vm2, %v14987_v17, 0.0 }
 0x595   : > { %12315 = vpow2.f32 %v4215_v23  ;;  %4187 = vmax.xlane.f32.xlu1 %v4186_v50  ;;  %4247 = vadd.xlane.f32.xlu2 %v4246_v58 }
 0x598   : > { %v4170_v57 = vpop.xlane.xlu1 %4169 }
 0x599   : > { %v4196_v2 = vsub.f32 %v14931_v25, %v4170_v57 }
 0x59b   : > { %v14994_v26 = vpop.eup %12315  ;;  %v4217_v12 = vmul.f32 1.442695, %v4196_v2 }
 0x59c   : > { %v4249_v48 = vsel %vm4146_vm2, %v14994_v26, 0.0 }
 0x59d   : > { %12317 = vpow2.f32 %v4217_v12  ;;  %4250 = vadd.xlane.f32.xlu2 %v4249_v48 }
 0x5a0   : > { %v4173_v49 = vpop.xlane.xlu1 %4172 }
 0x5a1   : > { %v4197_v63 = vsub.f32 %v14936_v8, %v4173_v49 }
 0x5a3   : > { %v14999_v42 = vpop.eup %12317  ;;  %v4219_v22 = vmul.f32 1.442695, %v4197_v63 }
 0x5a4   : > { %v4252_v7 = vsel %vm4146_vm2, %v14999_v42, 0.0 }
 0x5a5   : > { %12319 = vpow2.f32 %v4219_v22  ;;  %4253 = vadd.xlane.f32.xlu0 %v4252_v7 }
 0x5ab   : > { %v15003_v25 = vpop.eup %12319 }
 0x5ac   : > { %v4255_v15 = vsel %vm4146_vm2, %v15003_v25, 0.0 }
 0x5ad   : > { %4256 = vadd.xlane.f32.xlu1 %v4255_v15 }
 0x5e0   : > { %v4233_v24 = vpop.xlane.xlu2 %4232 }
 0x5e1   : > { %12321 = vrcp.f32 %v4233_v24  ;;  %v4284_v51 = vand.u32 2147483648, %v4233_v24  ;;  %vm4278_vm4 = vweird.f32 %v4233_v24  ;;  %v4282_v37 = vand.u32 2147483647, %v4233_v24 }
 0x5e3   : > { %v4285_v18 = vor.u32 1.1754944e-38, %v4284_v51  ;;  %vm4283_vm7 = vcmp.eq.f32.partialorder %v4282_v37, 8.507059e+37 }
 0x5e7   : > { %v12322_v1 = vpop.eup %12321 }
 0x5e8   : > { %v4274_v27 = vmul.f32 %v12322_v1, %v4233_v24  ;;  %v4176_v21 = vpop.xlane.xlu2 %4175  ;;  %v4236_v8 = vpop.xlane.xlu0 %4235  ;;  %vm4279_vm3 = vweird.f32 %v12322_v1 }
 0x5e9   : > { %v4198_v45 = vsub.f32 %v14945_v44, %v4176_v21  ;;  %12323 = vrcp.f32 %v4236_v8  ;;  %vm15014_vm5 = vmor %vm4278_vm4, %vm4279_vm3  ;;  %v4297_v41 = vand.u32 2147483647, %v4236_v8  ;;  %v4299_v62 = vand.u32 2147483648, %v4236_v8 }
 0x5ea   : > { %v4275_v43 = vsub.f32 1.0, %v4274_v27  ;;  %vm4293_vm8 = vweird.f32 %v4236_v8 }
 0x5eb   : > { %v4221_v20 = vmul.f32 1.442695, %v4198_v45  ;;  %v4300_v55 = vor.u32 1.1754944e-38, %v4299_v62  ;;  %vm4298_vm10 = vcmp.eq.f32.partialorder %v4297_v41, 8.507059e+37 }
 0x5ec   : > { %v4276_v60 = vmul.f32 %v12322_v1, %v4275_v43 }
 0x5ed   : > { %12325 = vpow2.f32 %v4221_v20 }
 0x5ee   : > { %v4277_v10 = vadd.f32 %v12322_v1, %v4276_v60 }
 0x5ef   : > { %v12324_v11 = vpop.eup %12323 }
 0x5f0   : > { %v4289_v13 = vmul.f32 %v12324_v11, %v4236_v8  ;;  %v4179_v35 = vpop.xlane.xlu2 %4178  ;;  %v15008_v30 = vpop.xlane.xlu0 %4238  ;;  %v4281_v53 = vsel %vm15014_vm5, %v12322_v1, %v4277_v10  ;;  %vm4294_vm6 = vweird.f32 %v12324_v11 }
 0x5f1   : > { %v4199_v36 = vsub.f32 %v14954_v29, %v4179_v35  ;;  %12327 = vrcp.f32 %v15008_v30  ;;  %v4286_v4 = vsel %vm4283_vm7, %v4285_v18, %v4281_v53  ;;  %vm4295_vm9 = vmor %vm4293_vm8, %vm4294_vm6  ;;  %v4314_v49 = vand.u32 2147483648, %v15008_v30 }
 0x5f2   : > { %v4290_v44 = vsub.f32 1.0, %v4289_v13  ;;  %v4287_v34 = vmul.f32 %v14940_v39, %v4286_v4  ;;  %vm4308_vm12 = vweird.f32 %v15008_v30  ;;  %v4312_v7 = vand.u32 2147483647, %v15008_v30 }
 0x5f3   : > { %v15012_v56 = vpop.eup %12325  ;;  %v4223_v47 = vmul.f32 1.442695, %v4199_v36  ;;  %v4315_v43 = vor.u32 1.1754944e-38, %v4314_v49 }
 0x5f4   : > { %v4291_v61 = vmul.f32 %v12324_v11, %v4290_v44  ;;  %v4258_v29 = vsel %vm4146_vm2, %v15012_v56, 0.0  ;;  %vm4313_vm0 = vcmp.eq.f32.partialorder %v4312_v7, 8.507059e+37 }
 0x5f5   : > { %12329 = vpow2.f32 %v4223_v47  ;;  %4259 = vadd.xlane.f32.xlu2 %v4258_v29 }
 0x5f6   : > { %v4292_v32 = vadd.f32 %v12324_v11, %v4291_v61 }
 0x5f7   : > { %v12328_v16 = vpop.eup %12327 }
 0x5f8   : > { %v4296_v3 = vsel %vm4295_vm9, %v12324_v11, %v4292_v32  ;;  %v4304_v6 = vmul.f32 %v12328_v16, %v15008_v30  ;;  %v4242_v9 = vpop.xlane.xlu1 %4241  ;;  %v4182_v33 = vpop.xlane.xlu0 %4181  ;;  %vm4309_vm11 = vweird.f32 %v12328_v16 }
 0x5f9   : > { %v4301_v46 = vsel %vm4298_vm10, %v4300_v55, %v4296_v3  ;;  %12331 = vrcp.f32 %v4242_v9  ;;  %v4200_v31 = vsub.f32 %v14964_v14, %v4182_v33  ;;  %vm15041_vm13 = vmor %vm4308_vm12, %vm4309_vm11  ;;  %v4329_v27 = vand.u32 2147483648, %v4242_v9  ;;  %v11930_v3 = vld [vmem:[%s17920_s9 + $0x8c] sm:$0xf0] }
 0x5fa   : > { %v4302_v52 = vmul.f32 %v14947_v54, %v4301_v46  ;;  %v4305_v59 = vsub.f32 1.0, %v4304_v6  ;;  %v4327_v45 = vand.u32 2147483647, %v4242_v9  ;;  %vm4323_vm15 = vweird.f32 %v4242_v9 }
 0x5fb   : > { %v15026_v23 = vpop.eup %12329  ;;  %v4225_v58 = vmul.f32 1.442695, %v4200_v31  ;;  %v4330_v10 = vor.u32 1.1754944e-38, %v4329_v27 }
 0x5fc   : > { %v4483_v50 = vpack.c.bf16 %v4302_v52, %v4287_v34  ;;  %v4306_v57 = vmul.f32 %v12328_v16, %v4305_v59  ;;  %v4261_v2 = vsel %vm4146_vm2, %v15026_v23, 0.0  ;;  %vm4328_vm3 = vcmp.eq.f32.partialorder %v4327_v45, 8.507059e+37 }
 0x5fd   : > { %12333 = vpow2.f32 %v4225_v58  ;;  %4262 = vadd.xlane.f32.xlu0 %v4261_v2 }
 0x5fe   : > { %10085 = vmatmul.msk.bf16.vlgmr.msrb.gmra.mxu2 %vm4146_vm2, %v4483_v50  ;;  %10092 = vmatmul.msk.bf16.vlgmr.msrb.gmra.mxu3 %vm4146_vm2, %v4483_v50  ;;  %v4307_v14 = vadd.f32 %v12328_v16, %v4306_v57 }
 0x5ff   : > { %v12332_v12 = vpop.eup %12331 }
 0x600   : > { %v4319_v39 = vmul.f32 %v12332_v12, %v4242_v9  ;;  %v15032_v54 = vpop.xlane.xlu1 %4244  ;;  %v4185_v48 = vpop.xlane.xlu0 %4184  ;;  %vm4324_vm14 = vweird.f32 %v12332_v12  ;;  %v4311_v8 = vsel %vm15041_vm13, %v12328_v16, %v4307_v14 }
 0x601   : > { %12335 = vrcp.f32 %v15032_v54  ;;  %v4201_v22 = vsub.f32 %v14974_v5, %v4185_v48  ;;  %vm4325_vm1 = vmor %vm4323_vm15, %vm4324_vm14  ;;  %v4316_v51 = vsel %vm4313_vm0, %v4315_v43, %v4311_v8  ;;  %vm4338_vm5 = vweird.f32 %v15032_v54 }
 0x602   : > { %v4320_v63 = vsub.f32 1.0, %v4319_v39  ;;  %v4317_v41 = vmul.f32 %v14957_v19, %v4316_v51  ;;  %v4344_v19 = vand.u32 2147483648, %v15032_v54  ;;  %v4342_v55 = vand.u32 2147483647, %v15032_v54  ;;  %v10213_v51 = vld [vmem:[%s17920_s9 + $0xe0] sm:$0xf] }
 0x603   : > { %v15039_v15 = vpop.eup %12333  ;;  %v4227_v21 = vmul.f32 1.442695, %v4201_v22 }
 0x604   : > { %v4321_v1 = vmul.f32 %v12332_v12, %v4320_v63  ;;  %v4264_v5 = vsel %vm4146_vm2, %v15039_v15, 0.0  ;;  %v4345_v52 = vor.u32 1.1754944e-38, %v4344_v19  ;;  %vm4343_vm9 = vcmp.eq.f32.partialorder %v4342_v55, 8.507059e+37  ;;  %v11966_v19 = vld [vmem:[%s17920_s9 + $0x1ac] sm:$0xf0] }
 0x605   : > { %12337 = vpow2.f32 %v4227_v21  ;;  %4265 = vadd.xlane.f32.xlu1 %v4264_v5  ;;  %v10165_v55 = vld [vmem:[%s17920_s9 + $0x80] sm:$0xf] }
 0x606   : > { %v4322_v20 = vadd.f32 %v12332_v12, %v4321_v1 }
 0x607   : > { %v12336_v60 = vpop.eup %12335 }
 0x608   : > { %v4326_v11 = vsel %vm4325_vm1, %v12332_v12, %v4322_v20  ;;  %v4334_v13 = vmul.f32 %v12336_v60, %v15032_v54  ;;  %v4188_v35 = vpop.xlane.xlu1 %4187  ;;  %v4248_v30 = vpop.xlane.xlu2 %4247  ;;  %vm4339_vm4 = vweird.f32 %v12336_v60 }
 0x609   : > { %v4202_v36 = vsub.f32 %v14984_v38, %v4188_v35  ;;  %12339 = vrcp.f32 %v4248_v30  ;;  %v4331_v44 = vsel %vm4328_vm3, %v4330_v10, %v4326_v11  ;;  %vm15064_vm6 = vmor %vm4338_vm5, %vm4339_vm4  ;;  %v4359_v9 = vand.u32 2147483648, %v4248_v30 }
 0x60a   : > { %v4335_v37 = vsub.f32 1.0, %v4334_v13  ;;  %v4332_v62 = vmul.f32 %v14967_v40, %v4331_v44  ;;  %v4357_v34 = vand.u32 2147483647, %v4248_v30  ;;  %vm4353_vm8 = vweird.f32 %v4248_v30 }
 0x60b   : > { %v4229_v28 = vmul.f32 1.442695, %v4202_v36  ;;  %v15053_v47 = vpop.eup %12337  ;;  %v4360_v58 = vor.u32 1.1754944e-38, %v4359_v9  ;;  %v11942_v36 = vld [vmem:[%s17920_s9 + $0xec] sm:$0xf0] }
 0x60c   : > { %v4336_v53 = vmul.f32 %v12336_v60, %v4335_v37  ;;  %v4267_v61 = vsel %vm4146_vm2, %v15053_v47, 0.0  ;;  %v4484_v29 = vpack.c.bf16 %v4332_v62, %v4317_v41  ;;  %vm4358_vm11 = vcmp.eq.f32.partialorder %v4357_v34, 8.507059e+37  ;;  %v10341_v37 = vld [vmem:[%s17920_s9 + $0x1e0] sm:$0xf]  ;;  %v11938_v41 = vld [vmem:[%s17920_s9 + $0xcc] sm:$0xf0] }
 0x60d   : > { %12341 = vpow2.f32 %v4229_v28  ;;  %4268 = vadd.xlane.f32.xlu2 %v4267_v61  ;;  %v10197_v28 = vld [vmem:[%s17920_s9 + $0xc0] sm:$0xf]  ;;  %v11970_v61 = vld [vmem:[%s17920_s9 + $0x1cc] sm:$0xf0] }
 0x60e   : > { %10086 = vmatmul.msk.bf16.gmra.mxu2 %vm4146_vm2, %v4484_v29  ;;  %10093 = vmatmul.msk.bf16.gmra.mxu3 %vm4146_vm2, %v4484_v29  ;;  %v4337_v16 = vadd.f32 %v12336_v60, %v4336_v53  ;;  %v10325_v62 = vld [vmem:[%s17920_s9 + $0x1c0] sm:$0xf]  ;;  %v10198_v53 = vor.u32 %v11938_v41, %v10197_v28 }
 0x60f   : > { %v12340_v18 = vpop.eup %12339  ;;  %v10326_v29 = vor.u32 %v11970_v61, %v10325_v62 }
 0x610   : > { %v4349_v38 = vmul.f32 %v12340_v18, %v4248_v30  ;;  %v4251_v32 = vpop.xlane.xlu2 %4250  ;;  %vm4354_vm7 = vweird.f32 %v12340_v18  ;;  %v4341_v46 = vsel %vm15064_vm6, %v12336_v60, %v4337_v16 }
 0x611   : > { %12343 = vrcp.f32 %v4251_v32  ;;  %vm4355_vm10 = vmor %vm4353_vm8, %vm4354_vm7  ;;  %v4346_v12 = vsel %vm4343_vm9, %v4345_v52, %v4341_v46  ;;  %v4374_v1 = vand.u32 2147483648, %v4251_v32  ;;  %vm4368_vm13 = vweird.f32 %v4251_v32  ;;  %v11962_v46 = vld [vmem:[%s17920_s9 + $0x18c] sm:$0xf0]  ;;  %v10149_v52 = vld [vmem:[%s17920_s9 + $0x60] sm:$0xf] }
 0x612   : > { %v4350_v40 = vsub.f32 1.0, %v4349_v38  ;;  %v4347_v48 = vmul.f32 %v14977_v0, %v4346_v12  ;;  %v4372_v27 = vand.u32 2147483647, %v4251_v32  ;;  %v11934_v38 = vld [vmem:[%s17920_s9 + $0xac] sm:$0xf0] }
 0x613   : > { %v15060_v4 = vpop.eup %12341  ;;  %v4375_v5 = vor.u32 1.1754944e-38, %v4374_v1  ;;  %v11922_v12 = vld [vmem:[%s17920_s9 + $0x4c] sm:$0xf0] }
 0x614   : > { %v4351_v6 = vmul.f32 %v12340_v18, %v4350_v40  ;;  %v4270_v33 = vsel %vm4146_vm2, %v15060_v4, 0.0  ;;  %vm4373_vm0 = vcmp.eq.f32.partialorder %v4372_v27, 8.507059e+37  ;;  %v11950_v27 = vld [vmem:[%s17920_s9 + $0x12c] sm:$0xf0] }
 0x615   : > { %4271 = vadd.xlane.f32.xlu0 %v4270_v33  ;;  %v10166_v33 = vor.u32 %v11930_v3, %v10165_v55 }
 0x616   : > { %v4352_v59 = vadd.f32 %v12340_v18, %v4351_v6  ;;  %v10293_v6 = vld [vmem:[%s17920_s9 + $0x180] sm:$0xf] }
 0x617   : > { %v12344_v31 = vpop.eup %12343  ;;  %v10294_v34 = vor.u32 %v11962_v46, %v10293_v6  ;;  %v10183_v46 = vld [vmem:[%s17920_s9 + $0xb0] sm:$0xf0] }
 0x618   : > { %v4356_v50 = vsel %vm4355_vm10, %v12340_v18, %v4352_v59  ;;  %v4364_v57 = vmul.f32 %v12344_v31, %v4251_v32  ;;  %v4254_v2 = vpop.xlane.xlu0 %4253  ;;  %vm4369_vm12 = vweird.f32 %v12344_v31  ;;  %v10181_v18 = vld [vmem:[%s17920_s9 + $0xa0] sm:$0xf]  ;;  %v11926_v59 = vld [vmem:[%s17920_s9 + $0x6c] sm:$0xf0] }
 0x619   : > { %12345 = vrcp.f32 %v4254_v2  ;;  %v4361_v54 = vsel %vm4358_vm11, %v4360_v58, %v4356_v50  ;;  %vm4370_vm14 = vmor %vm4368_vm13, %vm4369_vm12  ;;  %v4389_v8 = vand.u32 2147483648, %v4254_v2  ;;  %vm4383_vm1 = vweird.f32 %v4254_v2  ;;  %v10309_v32 = vld [vmem:[%s17920_s9 + $0x1a0] sm:$0xf]  ;;  %v11958_v58 = vld [vmem:[%s17920_s9 + $0x16c] sm:$0xf0] }
 0x61a   : > { %v4365_v39 = vsub.f32 1.0, %v4364_v57  ;;  %v4362_v14 = vmul.f32 %v14987_v17, %v4361_v54  ;;  %v4387_v17 = vand.u32 2147483647, %v4254_v2  ;;  %v10182_v16 = vor.u32 %v11934_v38, %v10181_v18  ;;  %v11968_v18 = vld [vmem:[%s17920_s9 + $0x1c4] sm:$0xf] }
 0x61b   : > { %v4390_v20 = vor.u32 1.1754944e-38, %v4389_v8  ;;  %v10310_v40 = vor.u32 %v11966_v19, %v10309_v32  ;;  %v10150_v50 = vor.u32 %v11926_v59, %v10149_v52  ;;  %v10247_v38 = vld [vmem:[%s17920_s9 + $0x130] sm:$0xf0] }
 0x61c   : > { %v4366_v49 = vmul.f32 %v12344_v31, %v4365_v39  ;;  %v4485_v63 = vpack.c.bf16 %v4362_v14, %v4347_v48  ;;  %vm4388_vm4 = vcmp.eq.f32.partialorder %v4387_v17, 8.507059e+37  ;;  %v10261_v39 = vld [vmem:[%s17920_s9 + $0x140] sm:$0xf]  ;;  %v11954_v48 = vld [vmem:[%s17920_s9 + $0x14c] sm:$0xf0] }
 0x61d   : > { %v10229_v17 = vld [vmem:[%s17920_s9 + $0x100] sm:$0xf] }
 0x61e   : > { %10087 = vmatmul.msk.bf16.gmra.mxu2 %vm4146_vm2, %v4485_v63  ;;  %10094 = vmatmul.msk.bf16.gmra.mxu3 %vm4146_vm2, %v4485_v63  ;;  %v4367_v7 = vadd.f32 %v12344_v31, %v4366_v49  ;;  %v10262_v49 = vor.u32 %v11954_v48, %v10261_v39  ;;  %v10117_v63 = vld [vmem:[%s17920_s9 + $0x20] sm:$0xf]  ;;  %v11928_v48 = vld [vmem:[%s17920_s9 + $0x84] sm:$0xf] }
 0x61f   : > { %v12346_v22 = vpop.eup %12345 }
 0x620   : > { %v4379_v24 = vmul.f32 %v12346_v22, %v4254_v2  ;;  %v4371_v45 = vsel %vm4370_vm14, %v12344_v31, %v4367_v7  ;;  %vm4384_vm15 = vweird.f32 %v12346_v22  ;;  %v15125_v9 = vpop.xlane.xlu1 %4256  ;;  %v10277_v31 = vld [vmem:[%s17920_s9 + $0x160] sm:$0xf] }
 0x621   : > { %vm4385_vm3 = vmor %vm4383_vm1, %vm4384_vm15  ;;  %v4376_v60 = vsel %vm4373_vm0, %v4375_v5, %v4371_v45  ;;  %12347 = vrcp.f32 %v15125_v9  ;;  %v10278_v57 = vor.u32 %v11958_v58, %v10277_v31  ;;  %v10133_v2 = vld [vmem:[%s17920_s9 + $0x40] sm:$0xf]  ;;  %v4402_v41 = vand.u32 2147483647, %v15125_v9  ;;  %v10311_v31 = vld [vmem:[%s17920_s9 + $0x1b0] sm:$0xf0] }
 0x622   : > { %v4380_v21 = vsub.f32 1.0, %v4379_v24  ;;  %v4377_v13 = vmul.f32 %v14994_v26, %v4376_v60  ;;  %v10214_v26 = vor.u32 %v11942_v36, %v10213_v51  ;;  %v10134_v54 = vor.u32 %v11922_v12, %v10133_v2  ;;  %v10245_v7 = vld [vmem:[%s17920_s9 + $0x120] sm:$0xf]  ;;  %v10343_v36 = vld [vmem:[%s17920_s9 + $0x1f0] sm:$0xf0] }
 0x623   : > { %v10101_v45 = vld [vmem:[%s17920_s9] sm:$0xf]  ;;  %vm4398_vm6 = vweird.f32 %v15125_v9  ;;  %vm4403_vm10 = vcmp.eq.f32.partialorder %v4402_v41, 8.507059e+37 }
 0x624   : > { %v4381_v0 = vmul.f32 %v12346_v22, %v4380_v21  ;;  %5007 = vmatpush.bf16.msra.mxu0 %v10214_v26  ;;  %v10246_v21 = vor.u32 %v11950_v27, %v10245_v7  ;;  %v11960_v7 = vld [vmem:[%s17920_s9 + $0x184] sm:$0xf] }
 0x626   : > { %v4382_v43 = vadd.f32 %v12346_v22, %v4381_v0  ;;  %v11914_v0 = vld [vmem:[%s17920_s9 + $0xc] sm:$0xf0] }
 0x627   : > { %v15155_v14 = vpop.eup %12347 }
 0x628   : > { %v4386_v11 = vsel %vm4385_vm3, %v12346_v22, %v4382_v43  ;;  %5008 = vmatpush.bf16.msra.mxu0 %v10198_v53  ;;  %v11918_v22 = vld [vmem:[%s17920_s9 + $0x2c] sm:$0xf0]  ;;  %v4394_v24 = vmul.f32 %v15155_v14, %v15125_v9  ;;  %vm4399_vm5 = vweird.f32 %v15155_v14  ;;  %v11936_v53 = vld [vmem:[%s17920_s9 + $0xc4] sm:$0xf] }
 0x629   : > { %v4391_v10 = vsel %vm4388_vm4, %v4390_v20, %v4386_v11  ;;  %v10118_v1 = vor.u32 %v11918_v22, %v10117_v63  ;;  %v11946_v43 = vld [vmem:[%s17920_s9 + $0x10c] sm:$0xf0]  ;;  %v10102_v20 = vor.u32 %v11914_v0, %v10101_v45  ;;  %vm15213_vm7 = vmor %vm4398_vm6, %vm4399_vm5  ;;  %v10167_v22 = vld [vmem:[%s17920_s9 + $0x90] sm:$0xf0] }
 0x62a   : > { %v4392_v35 = vmul.f32 %v14999_v42, %v4391_v10  ;;  %v11974_v42 = vld [vmem:[%s17920_s9 + $0x1ec] sm:$0xf0]  ;;  %v4395_v5 = vsub.f32 1.0, %v4394_v24  ;;  %v10230_v60 = vor.u32 %v11946_v43, %v10229_v17  ;;  %v11940_v10 = vld [vmem:[%s17920_s9 + $0xe4] sm:$0xf]  ;;  %v10170_v24 = vor.u32 %v11928_v48, %v10167_v22 }
 0x62b   : > { %v10342_v44 = vor.u32 %v11974_v42, %v10341_v37  ;;  %v11956_v45 = vld [vmem:[%s17920_s9 + $0x164] sm:$0xf]  ;;  %v10279_v17 = vld [vmem:[%s17920_s9 + $0x170] sm:$0xf0] }
 0x62c   : > { %v4486_v30 = vpack.c.bf16 %v4392_v35, %v4377_v13  ;;  %5009 = vmatpush.bf16.msra.mxu0 %v10182_v16  ;;  %v4396_v11 = vmul.f32 %v15155_v14, %v4395_v5  ;;  %v10215_v13 = vld [vmem:[%s17920_s9 + $0xf0] sm:$0xf0]  ;;  %v11972_v35 = vld [vmem:[%s17920_s9 + $0x1e4] sm:$0xf]  ;;  %v10282_v43 = vor.u32 %v11956_v45, %v10279_v17 }
 0x62d   : > { %5051 = vmatpush.bf16.msra.mxu1 %v10342_v44  ;;  %v10218_v51 = vor.u32 %v11940_v10, %v10215_v13  ;;  %v10346_v26 = vor.u32 %v11972_v35, %v10343_v36  ;;  %v4404_v44 = vand.u32 2147483648, %v15125_v9  ;;  %v11944_v48 = vld [vmem:[%s17920_s9 + $0x104] sm:$0xf]  ;;  %v10231_v22 = vld [vmem:[%s17920_s9 + $0x110] sm:$0xf0] }
 0x62e   : > { %10088 = vmatmul.msk.bf16.gmra.mxu2 %vm4146_vm2, %v4486_v30  ;;  %10095 = vmatmul.msk.bf16.gmra.mxu3 %vm4146_vm2, %v4486_v30  ;;  %v4397_v42 = vadd.f32 %v15155_v14, %v4396_v11 }
 0x62f   : > { %5095 = vmatpush.bf16.msra.mxu2 %v10218_v51  ;;  %5139 = vmatpush.bf16.msra.mxu3 %v10346_v26  ;;  %v4405_v3 = vor.u32 1.1754944e-38, %v4404_v44  ;;  %v11952_v26 = vld [vmem:[%s17920_s9 + $0x144] sm:$0xf] }
 0x630   : > { %5010 = vmatpush.bf16.msra.mxu0 %v10166_v33  ;;  %v4401_v55 = vsel %vm15213_vm7, %v15155_v14, %v4397_v42  ;;  %v11932_v33 = vld [vmem:[%s17920_s9 + $0xa4] sm:$0xf] }
 0x631   : > { %5052 = vmatpush.bf16.msra.mxu1 %v10326_v29  ;;  %v10199_v29 = vld [vmem:[%s17920_s9 + $0xd0] sm:$0xf0]  ;;  %v10186_v59 = vor.u32 %v11932_v33, %v10183_v46 }
 0x632   : > { %v10202_v19 = vor.u32 %v11936_v53, %v10199_v29  ;;  %v10119_v29 = vld [vmem:[%s17920_s9 + $0x30] sm:$0xf0] }
 0x634   : > { %5011 = vmatpush.bf16.msra.mxu0 %v10150_v50  ;;  %5096 = vmatpush.bf16.msra.mxu2 %v10202_v19 }
 0x635   : > { %5053 = vmatpush.bf16.msra.mxu1 %v10310_v40  ;;  %v10327_v40 = vld [vmem:[%s17920_s9 + $0x1d0] sm:$0xf0] }
 0x636   : > { %v10330_v6 = vor.u32 %v11968_v18, %v10327_v40  ;;  %v11948_v18 = vld [vmem:[%s17920_s9 + $0x124] sm:$0xf] }
 0x637   : > { %v10250_v46 = vor.u32 %v11948_v18, %v10247_v38 }
 0x638   : > { %5012 = vmatpush.bf16.msra.mxu0 %v10134_v54  ;;  %5140 = vmatpush.bf16.msra.mxu3 %v10330_v6  ;;  %v10351_v6 = vld [vmem:[%s17920_s9 + $0x1f8] sm:$0xf0] }
 0x639   : > { %5054 = vmatpush.bf16.msra.mxu1 %v10294_v34  ;;  %v11964_v34 = vld [vmem:[%s17920_s9 + $0x1a4] sm:$0xf]  ;;  %5097 = vmatpush.bf16.msra.mxu2 %v10186_v59 }
 0x63a   : > { %v10314_v2 = vor.u32 %v11964_v34, %v10311_v31 }
 0x63c   : > { %5013 = vmatpush.bf16.msra.mxu0 %v10118_v1  ;;  %5141 = vmatpush.bf16.msra.mxu3 %v10314_v2  ;;  %v10295_v1 = vld [vmem:[%s17920_s9 + $0x190] sm:$0xf0] }
 0x63d   : > { %5055 = vmatpush.bf16.msra.mxu1 %v10278_v57  ;;  %v4406_v57 = vsel %vm4403_vm10, %v4405_v3, %v4401_v55  ;;  %5098 = vmatpush.bf16.msra.mxu2 %v10170_v24  ;;  %v10234_v24 = vor.u32 %v11944_v48, %v10231_v22 }
 0x640   : > { %5014 = vmatpush.bf16.msra.mxu0 %v10102_v20 }
 0x641   : > { %5056 = vmatpush.bf16.msra.mxu1 %v10262_v49  ;;  %v4407_v49 = vmul.f32 %v15003_v25, %v4406_v57  ;;  %v11912_v57 = vld [vmem:[%s17920_s9 + $0x4] sm:$0xf] }
 0x645   : > { %5057 = vmatpush.bf16.msra.mxu1 %v10246_v21  ;;  %v10298_v21 = vor.u32 %v11960_v7, %v10295_v1 }
 0x647   : > { %5142 = vmatpush.bf16.msra.mxu3 %v10298_v21 }
 0x649   : > { %5058 = vmatpush.bf16.msra.mxu1 %v10230_v60 }
 0x64b   : > { %5143 = vmatpush.bf16.msra.mxu3 %v10282_v43 }
 0x668   : > { %v4260_v8 = vpop.xlane.xlu2 %4259 }
 0x669   : > { %12349 = vrcp.f32 %v4260_v8  ;;  %v4419_v61 = vand.u32 2147483648, %v4260_v8  ;;  %v4417_v16 = vand.u32 2147483647, %v4260_v8  ;;  %vm4413_vm9 = vweird.f32 %v4260_v8 }
 0x66b   : > { %v4420_v52 = vor.u32 1.1754944e-38, %v4419_v61  ;;  %vm4418_vm12 = vcmp.eq.f32.partialorder %v4417_v16, 8.507059e+37 }
 0x66f   : > { %v12350_v30 = vpop.eup %12349 }
 0x670   : > { %v4409_v37 = vmul.f32 %v12350_v30, %v4260_v8  ;;  %v15199_v28 = vpop.xlane.xlu0 %4262  ;;  %vm4414_vm8 = vweird.f32 %v12350_v30  ;;  %v10151_v8 = vld [vmem:[%s17920_s9 + $0x70] sm:$0xf0] }
 0x671   : > { %12351 = vrcp.f32 %v15199_v28  ;;  %vm4415_vm11 = vmor %vm4413_vm9, %vm4414_vm8  ;;  %v4432_v13 = vand.u32 2147483647, %v15199_v28  ;;  %vm4428_vm14 = vweird.f32 %v15199_v28  ;;  %v4434_v51 = vand.u32 2147483648, %v15199_v28 }
 0x672   : > { %v4410_v62 = vsub.f32 1.0, %v4409_v37  ;;  %v10135_v37 = vld [vmem:[%s17920_s9 + $0x50] sm:$0xf0] }
 0x673   : > { %v4435_v40 = vor.u32 1.1754944e-38, %v4434_v51  ;;  %vm4433_vm3 = vcmp.eq.f32.partialorder %v4432_v13, 8.507059e+37 }
 0x674   : > { %v4411_v32 = vmul.f32 %v12350_v30, %v4410_v62  ;;  %v11916_v62 = vld [vmem:[%s17920_s9 + $0x24] sm:$0xf] }
 0x675   : > { %v10122_v19 = vor.u32 %v11916_v62, %v10119_v29 }
 0x676   : > { %v4412_v9 = vadd.f32 %v12350_v30, %v4411_v32 }
 0x677   : > { %v15235_v50 = vpop.eup %12351 }
 0x678   : > { %v4416_v58 = vsel %vm4415_vm11, %v12350_v30, %v4412_v9  ;;  %v4424_v12 = vmul.f32 %v15235_v50, %v15199_v28  ;;  %v15239_v39 = vpop.xlane.xlu1 %4265  ;;  %vm4429_vm13 = vweird.f32 %v15235_v50  ;;  %v11920_v30 = vld [vmem:[%s17920_s9 + $0x44] sm:$0xf]  ;;  %v10263_v28 = vld [vmem:[%s17920_s9 + $0x150] sm:$0xf0] }
 0x679   : > { %v4421_v54 = vsel %vm4418_vm12, %v4420_v52, %v4416_v58  ;;  %12353 = vrcp.f32 %v15239_v39  ;;  %vm15291_vm15 = vmor %vm4428_vm14, %vm4429_vm13  ;;  %v4449_v44 = vand.u32 2147483648, %v15239_v39  ;;  %v10138_v41 = vor.u32 %v11920_v30, %v10135_v37 }
 0x67a   : > { %v4425_v14 = vsub.f32 1.0, %v4424_v12  ;;  %v4422_v63 = vmul.f32 %v15012_v56, %v4421_v54  ;;  %v11924_v56 = vld [vmem:[%s17920_s9 + $0x64] sm:$0xf]  ;;  %v10266_v61 = vor.u32 %v11952_v26, %v10263_v28  ;;  %v4447_v16 = vand.u32 2147483647, %v15239_v39 }
 0x67b   : > { %v10154_v0 = vor.u32 %v11924_v56, %v10151_v8  ;;  %vm4443_vm1 = vweird.f32 %v15239_v39  ;;  %v4450_v9 = vor.u32 1.1754944e-38, %v4449_v44  ;;  %v10103_v54 = vld [vmem:[%s17920_s9 + $0x10] sm:$0xf0] }
 0x67c   : > { %v4487_v27 = vpack.c.bf16 %v4422_v63, %v4407_v49  ;;  %v4426_v25 = vmul.f32 %v15235_v50, %v4425_v14  ;;  %5144 = vmatpush.bf16.msra.mxu3 %v10266_v61  ;;  %vm4448_vm5 = vcmp.eq.f32.partialorder %v4447_v16, 8.507059e+37  ;;  %v10106_v63 = vor.u32 %v11912_v57, %v10103_v54  ;;  %v10207_v57 = vld [vmem:[%s17920_s9 + $0xd8] sm:$0xf0] }
 0x67d   : > { %5099 = vmatpush.bf16.msra.mxu2 %v10154_v0  ;;  %v10335_v54 = vld [vmem:[%s17920_s9 + $0x1d8] sm:$0xf0] }
 0x67e   : > { %10089 = vmatmul.msk.bf16.gmra.mxu2 %vm4146_vm2, %v4487_v27  ;;  %10096 = vmatmul.msk.bf16.gmra.mxu3 %vm4146_vm2, %v4487_v27  ;;  %v4427_v10 = vadd.f32 %v15235_v50, %v4426_v25 }
 0x67f   : > { %v12354_v5 = vpop.eup %12353 }
 0x680   : > { %v4439_v20 = vmul.f32 %v12354_v5, %v15239_v39  ;;  %v15273_v60 = vpop.xlane.xlu2 %4268  ;;  %vm4444_vm0 = vweird.f32 %v12354_v5  ;;  %v4431_v32 = vsel %vm15291_vm15, %v15235_v50, %v4427_v10  ;;  %5145 = vmatpush.bf16.msra.mxu3 %v10250_v46  ;;  %v11943_v46 = vld [vmem:[%s17920_s9 + $0xf4] sm:$0xf0] }
 0x681   : > { %v4520_v11 = vpop.f32.mrf.mxu2  ;;  %12355 = vrcp.f32 %v15273_v60  ;;  %v4564_v35 = vpop.f32.mrf.mxu3  ;;  %5100 = vmatpush.bf16.msra.mxu2 %v10138_v41  ;;  %vm15316_vm4 = vmor %vm4443_vm1, %vm4444_vm0  ;;  %v4436_v31 = vsel %vm4433_vm3, %v4435_v40, %v4431_v32  ;;  %vm4458_vm7 = vweird.f32 %v15273_v60  ;;  %v10223_v40 = vld [vmem:[%s17920_s9 + $0xf8] sm:$0xf0] }
 0x682   : > { %v4440_v36 = vsub.f32 1.0, %v4439_v20  ;;  %v4437_v14 = vmul.f32 %v15026_v23, %v4436_v31  ;;  %v4464_v23 = vand.u32 2147483648, %v15273_v60 }
 0x684   : > { %v4441_v53 = vmul.f32 %v12354_v5, %v4440_v36  ;;  %5146 = vmatpush.bf16.msra.mxu3 %v10234_v24  ;;  %v4465_v20 = vor.u32 1.1754944e-38, %v4464_v23  ;;  %v11965_v23 = vld [vmem:[%s17920_s9 + $0x1ac] sm:$0xf] }
 0x685   : > { %5101 = vmatpush.bf16.msra.mxu2 %v10122_v19  ;;  %v11941_v19 = vld [vmem:[%s17920_s9 + $0xec] sm:$0xf] }
 0x686   : > { %v4442_v55 = vadd.f32 %v12354_v5, %v4441_v53 }
 0x687   : > { %v12356_v3 = vpop.eup %12355 }
 0x688   : > { %v4272_v33 = vpop.xlane.xlu0 %4271  ;;  %v4446_v34 = vsel %vm15316_vm4, %v12354_v5, %v4442_v55  ;;  %v4454_v52 = vmul.f32 %v12356_v3, %v15273_v60  ;;  %vm4459_vm6 = vweird.f32 %v12356_v3  ;;  %v11973_v55 = vld [vmem:[%s17920_s9 + $0x1ec] sm:$0xf] }
 0x689   : > { %12357 = vrcp.f32 %v4272_v33  ;;  %v4522_v59 = vpop.f32.mrf.mxu2  ;;  %v4566_v58 = vpop.f32.mrf.mxu3  ;;  %v4451_v39 = vsel %vm4448_vm5, %v4450_v9, %v4446_v34  ;;  %5102 = vmatpush.bf16.msra.mxu2 %v10106_v63  ;;  %vm4460_vm8 = vmor %vm4458_vm7, %vm4459_vm6  ;;  %v4479_v0 = vand.u32 2147483648, %v4272_v33  ;;  %v4477_v43 = vand.u32 2147483647, %v4272_v33  ;;  %v10349_v34 = vld [vmem:[%s17920_s9 + $0x1e8] sm:$0xf] }
 0x68a   : > { %v15323_v50 = vpack.c.bf16 %v4522_v59, %v4520_v11  ;;  %v4455_v2 = vsub.f32 1.0, %v4454_v52  ;;  %v15328_v12 = vpack.c.bf16 %v4566_v58, %v4564_v35  ;;  %v4452_v49 = vmul.f32 %v15039_v15, %v4451_v39  ;;  %v11975_v59 = vld [vmem:[%s17920_s9 + $0x1f4] sm:$0xf0]  ;;  %v11937_v58 = vld [vmem:[%s17920_s9 + $0xcc] sm:$0xf] }
 0x68b   : > { %v4462_v15 = vand.u32 2147483647, %v15273_v60  ;;  %vm4473_vm11 = vweird.f32 %v4272_v33  ;;  %v4480_v10 = vor.u32 1.1754944e-38, %v4479_v0  ;;  %vm4478_vm13 = vcmp.eq.f32.partialorder %v4477_v43, 8.507059e+37  ;;  %v10333_v63 = vld [vmem:[%s17920_s9 + $0x1c8] sm:$0xf] }
 0x68c   : > { %5015 = vmatmul.bf16.vlgmr.msra.gmra.mxu0 %v15323_v50  ;;  %v4456_v7 = vmul.f32 %v12356_v3, %v4455_v2  ;;  %5059 = vmatmul.bf16.vlgmr.msra.gmra.mxu1 %v15328_v12  ;;  %v4488_v1 = vpack.c.bf16 %v4452_v49, %v4437_v14  ;;  %v10354_v9 = vor.u32 %v11973_v55, %v10351_v6  ;;  %v11969_v2 = vld [vmem:[%s17920_s9 + $0x1cc] sm:$0xf]  ;;  %v10205_v14 = vld [vmem:[%s17920_s9 + $0xc8] sm:$0xf]  ;;  %v11939_v49 = vld [vmem:[%s17920_s9 + $0xd4] sm:$0xf0] }
 0x68d   : > { %vm4463_vm10 = vcmp.eq.f32.partialorder %v4462_v15, 8.507059e+37  ;;  %v10350_v31 = vor.u32 %v11975_v59, %v10349_v34  ;;  %v10210_v39 = vor.u32 %v11937_v58, %v10207_v57  ;;  %v10338_v48 = vor.u32 %v11969_v2, %v10335_v54  ;;  %v11967_v43 = vld [vmem:[%s17920_s9 + $0x1b4] sm:$0xf0]  ;;  %v11925_v55 = vld [vmem:[%s17920_s9 + $0x6c] sm:$0xf] }
 0x68e   : > { %v4457_v21 = vadd.f32 %v12356_v3, %v4456_v7  ;;  %10090 = vmatmul.msk.bf16.gmra.mxu2 %vm4146_vm2, %v4488_v1  ;;  %10097 = vmatmul.msk.bf16.gmra.mxu3 %vm4146_vm2, %v4488_v1  ;;  %v10206_v22 = vor.u32 %v11939_v49, %v10205_v14  ;;  %v11971_v7 = vld [vmem:[%s17920_s9 + $0x1d4] sm:$0xf0]  ;;  %v10141_v59 = vld [vmem:[%s17920_s9 + $0x48] sm:$0xf]  ;;  %v11921_v2 = vld [vmem:[%s17920_s9 + $0x4c] sm:$0xf] }
 0x68f   : > { %v12358_v27 = vpop.eup %12357  ;;  %5315 = vmatpush.bf16.msrb.mxu3 %v10354_v9  ;;  %5227 = vmatpush.bf16.msrb.mxu1 %v10350_v31  ;;  %v10334_v24 = vor.u32 %v11971_v7, %v10333_v63  ;;  %v11923_v31 = vld [vmem:[%s17920_s9 + $0x54] sm:$0xf0]  ;;  %v10269_v58 = vld [vmem:[%s17920_s9 + $0x148] sm:$0xf]  ;;  %v11953_v63 = vld [vmem:[%s17920_s9 + $0x14c] sm:$0xf] }
 0x690   : > { %v4469_v25 = vmul.f32 %v12358_v27, %v4272_v33  ;;  %v4461_v17 = vsel %vm4460_vm8, %v12356_v3, %v4457_v21  ;;  %vm4474_vm9 = vweird.f32 %v12358_v27  ;;  %v10226_v3 = vor.u32 %v11941_v19, %v10223_v40  ;;  %v10221_v33 = vld [vmem:[%s17920_s9 + $0xe8] sm:$0xf]  ;;  %v11933_v21 = vld [vmem:[%s17920_s9 + $0xac] sm:$0xf]  ;;  %v11959_v40 = vld [vmem:[%s17920_s9 + $0x174] sm:$0xf0] }
 0x691   : > { %v4525_v8 = vpop.f32.mrf.mxu2  ;;  %v4569_v45 = vpop.f32.mrf.mxu3  ;;  %vm4475_vm12 = vmor %vm4473_vm11, %vm4474_vm9  ;;  %v4466_v13 = vsel %vm4463_vm10, %v4465_v20, %v4461_v17  ;;  %v10222_v52 = vor.u32 %v11943_v46, %v10221_v33  ;;  %v10285_v19 = vld [vmem:[%s17920_s9 + $0x168] sm:$0xf]  ;;  %v11957_v33 = vld [vmem:[%s17920_s9 + $0x16c] sm:$0xf]  ;;  %v10142_v14 = vor.u32 %v11923_v31, %v10141_v59  ;;  %vm8721_vm6 = vcmask 1040384  }
 0x692   : > { %v4470_v56 = vsub.f32 1.0, %v4469_v25  ;;  %v4467_v36 = vmul.f32 %v15053_v47, %v4466_v13  ;;  %5271 = vmatpush.bf16.msrb.mxu2 %v10226_v3  ;;  %v10191_v25 = vld [vmem:[%s17920_s9 + $0xb8] sm:$0xf0]  ;;  %v10301_v13 = vld [vmem:[%s17920_s9 + $0x188] sm:$0xf]  ;;  %v10286_v9 = vor.u32 %v11959_v40, %v10285_v19 }
 0x693   : > { %5183 = vmatpush.bf16.msrb.mxu0 %v10222_v52  ;;  %5316 = vmatpush.bf16.msrb.mxu3 %v10338_v48  ;;  %v10194_v15 = vor.u32 %v11933_v21, %v10191_v25  ;;  %v10159_v3 = vld [vmem:[%s17920_s9 + $0x78] sm:$0xf0]  ;;  %v11955_v57 = vld [vmem:[%s17920_s9 + $0x154] sm:$0xf0]  ;;  %v10253_v21 = vld [vmem:[%s17920_s9 + $0x128] sm:$0xf] }
 0x694   : > { %v4471_v5 = vmul.f32 %v12358_v27, %v4470_v56  ;;  %5228 = vmatpush.bf16.msrb.mxu1 %v10334_v24  ;;  %v10319_v56 = vld [vmem:[%s17920_s9 + $0x1b8] sm:$0xf0]  ;;  %v10162_v34 = vor.u32 %v11925_v55, %v10159_v3  ;;  %v10270_v49 = vor.u32 %v11955_v57, %v10269_v58  ;;  %v11951_v25 = vld [vmem:[%s17920_s9 + $0x134] sm:$0xf0]  ;;  %v15589_v3 = vld [vmem:[%s17921_s10] sm:$0xf] }
 0x695   : > { %v10322_v0 = vor.u32 %v11965_v23, %v10319_v56  ;;  %v10287_v46 = vld [vmem:[%s17920_s9 + $0x178] sm:$0xf0]  ;;  %v11917_v23 = vld [vmem:[%s17920_s9 + $0x2c] sm:$0xf]  ;;  %v15604_v31 = vperm.slane %v15589_v3, 1  ;;  %v1622_v57 = vld [vmem:[#allocation2] sm:$0xff] }
 0x696   : > { %v4472_v11 = vadd.f32 %v12358_v27, %v4471_v5  ;;  %5272 = vmatpush.bf16.msrb.mxu2 %v10210_v39  ;;  %v10317_v5 = vld [vmem:[%s17920_s9 + $0x1a8] sm:$0xf]  ;;  %v10290_v52 = vor.u32 %v11957_v33, %v10287_v46  ;;  %v10143_v39 = vld [vmem:[%s17920_s9 + $0x58] sm:$0xf0]  ;;  %v15592_v33 = vperm.slane %v15589_v3, 0 }
 0x697   : > { %5184 = vmatpush.bf16.msrb.mxu0 %v10206_v22  ;;  %v10318_v20 = vor.u32 %v11967_v43, %v10317_v5  ;;  %5317 = vmatpush.bf16.msrb.mxu3 %v10322_v0  ;;  %v10271_v22 = vld [vmem:[%s17920_s9 + $0x158] sm:$0xf0]  ;;  %v10146_v7 = vor.u32 %v11921_v2, %v10143_v39  ;;  %v10109_v43 = vld [vmem:[%s17920_s9 + $0x8] sm:$0xf] }
 0x698   : > { %v4476_v35 = vsel %vm4475_vm12, %v12358_v27, %v4472_v11  ;;  %v10173_v11 = vld [vmem:[%s17920_s9 + $0x88] sm:$0xf]  ;;  %v10274_v24 = vor.u32 %v11953_v63, %v10271_v22  ;;  %v10255_v0 = vld [vmem:[%s17920_s9 + $0x138] sm:$0xf0]  ;;  %v5360_v63 = vunpack.c.h.bf16 %v1622_v57 }
 0x699   : > { %v4481_v30 = vsel %vm4478_vm13, %v4480_v10, %v4476_v35  ;;  %v4527_v60 = vpop.f32.mrf.mxu2  ;;  %v4571_v51 = vpop.f32.mrf.mxu3  ;;  %v11931_v10 = vld [vmem:[%s17920_s9 + $0x94] sm:$0xf0]  ;;  %5229 = vmatpush.bf16.msrb.mxu1 %v10318_v20 }
 0x69a   : > { %v4482_v37 = vmul.f32 %v15060_v4, %v4481_v30  ;;  %v15350_v26 = vpack.c.bf16 %v4527_v60, %v4525_v8  ;;  %v15352_v42 = vpack.c.bf16 %v4571_v51, %v4569_v45  ;;  %v10189_v8 = vld [vmem:[%s17920_s9 + $0xa8] sm:$0xf]  ;;  %v11935_v45 = vld [vmem:[%s17920_s9 + $0xb4] sm:$0xf0]  ;;  %5273 = vmatpush.bf16.msrb.mxu2 %v10194_v15  ;;  %v11929_v51 = vld [vmem:[%s17920_s9 + $0x8c] sm:$0xf] }
 0x69b   : > { %v10190_v17 = vor.u32 %v11935_v45, %v10189_v8  ;;  %v11963_v60 = vld [vmem:[%s17920_s9 + $0x194] sm:$0xf0]  ;;  %v10127_v15 = vld [vmem:[%s17920_s9 + $0x38] sm:$0xf0]  ;;  %v10254_v8 = vor.u32 %v11951_v25, %v10253_v21  ;;  %v11949_v45 = vld [vmem:[%s17920_s9 + $0x12c] sm:$0xf] }
 0x69c   : > { %v4489_v44 = vpack.c.bf16 %v4482_v37, %v4467_v36  ;;  %5020 = vmatmul.bf16.gmra.mxu0 %v15350_v26  ;;  %5064 = vmatmul.bf16.gmra.mxu1 %v15352_v42  ;;  %v10175_v36 = vld [vmem:[%s17920_s9 + $0x98] sm:$0xf0]  ;;  %v10258_v5 = vor.u32 %v11949_v45, %v10255_v0  ;;  %v11915_v20 = vld [vmem:[%s17920_s9 + $0x14] sm:$0xf0]  ;;  %v1624_v21 = vld [vmem:[#allocation2 + $0x10] sm:$0xff] }
 0x69d   : > { %5185 = vmatpush.bf16.msrb.mxu0 %v10190_v17  ;;  %v10130_v17 = vor.u32 %v11917_v23, %v10127_v15  ;;  %v5363_v45 = vunpack.c.l.bf16 %v1624_v21 }
 0x69e   : > { %10091 = vmatmul.msk.bf16.gmra.mxu2 %vm4146_vm2, %v4489_v44  ;;  %10098 = vmatmul.msk.bf16.gmra.mxu3 %vm4146_vm2, %v4489_v44  ;;  %vm8597_vm2 = vcmask 523264  }
 0x6a1   : > { %v4530_v41 = vpop.f32.mrf.mxu2  ;;  %v4574_v28 = vpop.f32.mrf.mxu3 }
 0x6a9   : > { %v4532_v62 = vpop.f32.mrf.mxu2  ;;  %v4576_v53 = vpop.f32.mrf.mxu3 }
 0x6aa   : > { %v15358_v47 = vpack.c.bf16 %v4532_v62, %v4530_v41  ;;  %v15360_v4 = vpack.c.bf16 %v4576_v53, %v4574_v28  ;;  %v10174_v41 = vor.u32 %v11931_v10, %v10173_v11  ;;  %v10302_v28 = vor.u32 %v11963_v60, %v10301_v13  ;;  %v11961_v62 = vld [vmem:[%s17920_s9 + $0x18c] sm:$0xf]  ;;  %v10303_v53 = vld [vmem:[%s17920_s9 + $0x198] sm:$0xf0]  ;;  %v10237_v11 = vld [vmem:[%s17920_s9 + $0x108] sm:$0xf] }
 0x6ab   : > { %v11947_v10 = vld [vmem:[%s17920_s9 + $0x114] sm:$0xf0]  ;;  %v11913_v13 = vld [vmem:[%s17920_s9 + $0xc] sm:$0xf] }
 0x6ac   : > { %5025 = vmatmul.bf16.gmra.mxu0 %v15358_v47  ;;  %5069 = vmatmul.bf16.gmra.mxu1 %v15360_v4 }
 0x6ad   : > { %5186 = vmatpush.bf16.msrb.mxu0 %v10174_v41  ;;  %5230 = vmatpush.bf16.msrb.mxu1 %v10302_v28  ;;  %v10239_v41 = vld [vmem:[%s17920_s9 + $0x118] sm:$0xf0] }
 0x6ae   : > { %5103 = vmatmul.bf16.vlgmr.msra.gmra.mxu2 %v15323_v50  ;;  %5147 = vmatmul.bf16.vlgmr.msra.gmra.mxu3 %v15328_v12 }
 0x6b1   : > { %v4535_v61 = vpop.f32.mrf.mxu2  ;;  %v4579_v29 = vpop.f32.mrf.mxu3  ;;  %5231 = vmatpush.bf16.msrb.mxu1 %v10286_v9 }
 0x6b5   : > { %5232 = vmatpush.bf16.msrb.mxu1 %v10270_v49 }
 0x6b9   : > { %v4537_v18 = vpop.f32.mrf.mxu2  ;;  %v4581_v38 = vpop.f32.mrf.mxu3  ;;  %5233 = vmatpush.bf16.msrb.mxu1 %v10254_v8 }
 0x6ba   : > { %v15366_v32 = vpack.c.bf16 %v4537_v18, %v4535_v61  ;;  %v15368_v16 = vpack.c.bf16 %v4581_v38, %v4579_v29  ;;  %v10178_v61 = vor.u32 %v11929_v51, %v10175_v36  ;;  %v10306_v29 = vor.u32 %v11961_v62, %v10303_v53  ;;  %v10157_v18 = vld [vmem:[%s17920_s9 + $0x68] sm:$0xf]  ;;  %v11927_v38 = vld [vmem:[%s17920_s9 + $0x74] sm:$0xf0]  ;;  %v11945_v36 = vld [vmem:[%s17920_s9 + $0x10c] sm:$0xf] }
 0x6bb   : > { %v10158_v6 = vor.u32 %v11927_v38, %v10157_v18  ;;  %v10110_v51 = vor.u32 %v11915_v20, %v10109_v43  ;;  %v10238_v53 = vor.u32 %v11947_v10, %v10237_v11 }
 0x6bc   : > { %5030 = vmatmul.bf16.gmra.mxu0 %v15366_v32  ;;  %5074 = vmatmul.bf16.gmra.mxu1 %v15368_v16 }
 0x6bd   : > { %5274 = vmatpush.bf16.msrb.mxu2 %v10178_v61  ;;  %5318 = vmatpush.bf16.msrb.mxu3 %v10306_v29  ;;  %v10242_v29 = vor.u32 %v11945_v36, %v10239_v41 }
 0x6be   : > { %5108 = vmatmul.bf16.gmra.mxu2 %v15350_v26  ;;  %5152 = vmatmul.bf16.gmra.mxu3 %v15352_v42 }
 0x6bf   : > { %5187 = vmatpush.bf16.msrb.mxu0 %v10158_v6  ;;  %5234 = vmatpush.bf16.msrb.mxu1 %v10238_v53 }
 0x6c1   : > { %5275 = vmatpush.bf16.msrb.mxu2 %v10162_v34  ;;  %5319 = vmatpush.bf16.msrb.mxu3 %v10290_v52 }
 0x6c3   : > { %5188 = vmatpush.bf16.msrb.mxu0 %v10142_v14  ;;  %v5359_v14 = vunpack.c.l.bf16 %v1622_v57 }
 0x6c5   : > { %5276 = vmatpush.bf16.msrb.mxu2 %v10146_v7  ;;  %5320 = vmatpush.bf16.msrb.mxu3 %v10274_v24 }
 0x6c9   : > { %5277 = vmatpush.bf16.msrb.mxu2 %v10130_v17  ;;  %5321 = vmatpush.bf16.msrb.mxu3 %v10258_v5  ;;  %v5364_v17 = vunpack.c.h.bf16 %v1624_v21 }
 0x6cd   : > { %5322 = vmatpush.bf16.msrb.mxu3 %v10242_v29 }
 0x6ce   : > { %5113 = vmatmul.bf16.gmra.mxu2 %v15358_v47  ;;  %5157 = vmatmul.bf16.gmra.mxu3 %v15360_v4 }
 0x6de   : > { %5118 = vmatmul.bf16.gmra.mxu2 %v15366_v32  ;;  %5162 = vmatmul.bf16.gmra.mxu3 %v15368_v16 }
 0x701   : > { %v4540_v1 = vpop.f32.mrf.mxu2  ;;  %v4584_v27 = vpop.f32.mrf.mxu3 }
 0x709   : > { %v4542_v35 = vpop.f32.mrf.mxu2  ;;  %v4586_v30 = vpop.f32.mrf.mxu3 }
 0x70a   : > { %v15468_v37 = vpack.c.bf16 %v4542_v35, %v4540_v1  ;;  %v15470_v44 = vpack.c.bf16 %v4586_v30, %v4584_v27  ;;  %v10125_v1 = vld [vmem:[%s17920_s9 + $0x28] sm:$0xf]  ;;  %v11919_v27 = vld [vmem:[%s17920_s9 + $0x34] sm:$0xf0]  ;;  %v10111_v35 = vld [vmem:[%s17920_s9 + $0x18] sm:$0xf0]  ;;  %v5016_v18 = vpop.f32.mrf.mxu0  ;;  %v5060_v40 = vpop.f32.mrf.mxu1 }
 0x70b   : > { %v10126_v56 = vor.u32 %v11919_v27, %v10125_v1  ;;  %v10114_v61 = vor.u32 %v11913_v13, %v10111_v35  ;;  %v5017_v59 = vadd.f32 %v5016_v18, %v15592_v33  ;;  %v1626_v13 = vld [vmem:[#allocation2 + $0x20] sm:$0xff] }
 0x70c   : > { %5035 = vmatmul.bf16.gmra.mxu0 %v15468_v37  ;;  %5079 = vmatmul.bf16.gmra.mxu1 %v15470_v44  ;;  %v5367_v36 = vunpack.c.l.bf16 %v1626_v13 }
 0x70d   : > { %5123 = vmatmul.bf16.gmra.mxu2 %v15468_v37  ;;  %5167 = vmatmul.bf16.gmra.mxu3 %v15470_v44 }
 0x70e   : > { %5189 = vmatpush.bf16.msrb.mxu0 %v10126_v56  ;;  %5278 = vmatpush.bf16.msrb.mxu2 %v10114_v61  ;;  %v5368_v61 = vunpack.c.h.bf16 %v1626_v13 }
 0x711   : > { %v4545_v54 = vpop.f32.mrf.mxu2  ;;  %v4589_v48 = vpop.f32.mrf.mxu3 }
 0x712   : > { %5190 = vmatpush.bf16.msrb.mxu0 %v10110_v51  ;;  %v5018_v55 = vpop.f32.mrf.mxu0  ;;  %v5062_v52 = vpop.f32.mrf.mxu1 }
 0x713   : > { %v5019_v7 = vadd.f32 %v5018_v55, %v15592_v33 }
 0x715   : > { %v5063_v15 = vadd.f32 %v5062_v52, %v5019_v7 }
 0x717   : > { %v5419_v5 = vadd.f32 %v5363_v45, %v5063_v15 }
 0x719   : > { %v4547_v30 = vpop.f32.mrf.mxu2  ;;  %v4591_v60 = vpop.f32.mrf.mxu3 }
 0x71a   : > { %v15578_v28 = vpack.c.bf16 %v4547_v30, %v4545_v54  ;;  %v15580_v62 = vpack.c.bf16 %v4591_v60, %v4589_v48  ;;  %v5021_v58 = vpop.f32.mrf.mxu0  ;;  %v5061_v54 = vadd.f32 %v5060_v40, %v5017_v59  ;;  %v5065_v24 = vpop.f32.mrf.mxu1 }
 0x71b   : > { %v5022_v43 = vadd.f32 %v5021_v58, %v15592_v33 }
 0x71c   : > { %5040 = vmatmul.bf16.gmra.mxu0 %v15578_v28  ;;  %5084 = vmatmul.bf16.gmra.mxu1 %v15580_v62  ;;  %v5415_v22 = vadd.f32 %v5359_v14, %v5061_v54  ;;  %v1630_v14 = vld [vmem:[#allocation2 + $0x40] sm:$0xff] }
 0x71d   : > { %5128 = vmatmul.bf16.gmra.mxu2 %v15578_v28  ;;  %5172 = vmatmul.bf16.gmra.mxu3 %v15580_v62  ;;  %v5066_v60 = vadd.f32 %v5065_v24, %v5022_v43  ;;  %v5375_v24 = vunpack.c.l.bf16 %v1630_v14 }
 0x721   : > { %v4550_v38 = vpop.f32.mrf.mxu2  ;;  %v4594_v19 = vpop.f32.mrf.mxu3 }
 0x722   : > { %v5023_v56 = vpop.f32.mrf.mxu0  ;;  %v5067_v11 = vpop.f32.mrf.mxu1 }
 0x729   : > { %v4552_v6 = vpop.f32.mrf.mxu2  ;;  %v4596_v9 = vpop.f32.mrf.mxu3 }
 0x72a   : > { %v15594_v46 = vpack.c.bf16 %v4552_v6, %v4550_v38  ;;  %v15596_v34 = vpack.c.bf16 %v4596_v9, %v4594_v19  ;;  %v5026_v41 = vpop.f32.mrf.mxu0  ;;  %v1628_v38 = vld [vmem:[#allocation2 + $0x30] sm:$0xff]  ;;  %v5070_v9 = vpop.f32.mrf.mxu1 }
 0x72b   : > { %v5371_v52 = vunpack.c.l.bf16 %v1628_v38  ;;  %v5372_v58 = vunpack.c.h.bf16 %v1628_v38 }
 0x72c   : > { %5045 = vmatmul.bf16.gmra.mxu0 %v15594_v46  ;;  %5089 = vmatmul.bf16.gmra.mxu1 %v15596_v34 }
 0x72d   : > { %5133 = vmatmul.bf16.gmra.mxu2 %v15594_v46  ;;  %5177 = vmatmul.bf16.gmra.mxu3 %v15596_v34 }
 0x731   : > { %v5104_v2 = vpop.f32.mrf.mxu2  ;;  %v5148_v39 = vpop.f32.mrf.mxu3 }
 0x732   : > { %v5105_v48 = vadd.f32 %v5104_v2, %v15604_v31  ;;  %v5027_v2 = vadd.f32 %v5026_v41, %v15592_v33  ;;  %v5072_v21 = vpop.f32.mrf.mxu1 }
 0x734   : > { %v5149_v49 = vadd.f32 %v5148_v39, %v5105_v48  ;;  %v5028_v39 = vpop.f32.mrf.mxu0 }
 0x736   : > { %v5416_v1 = vadd.f32 %v5360_v63, %v5149_v49 }
 0x738   : > { %v5471_v27 = vpack.c.bf16 %v5416_v1, %v5415_v22  ;;  %v5071_v22 = vadd.f32 %v5070_v9, %v5027_v2 }
 0x739   : > { %v5106_v25 = vpop.f32.mrf.mxu2  ;;  %v5150_v23 = vpop.f32.mrf.mxu3 }
 0x73a   : > { %5499 = vst [vmem:[#allocation2] sm:$0xff] %v5471_v27  ;;  %v5107_v8 = vadd.f32 %v5106_v25, %v15604_v31  ;;  %v5376_v27 = vunpack.c.h.bf16 %v1630_v14  ;;  %v12190_v14 = vld [vmem:[%s17923_s12 + $0x1ec] sm:$0xf0] }
 0x73c   : > { %v5151_v0 = vadd.f32 %v5150_v23, %v5107_v8  ;;  %5191 = vmatmul.bf16.vlgmr.msrb.gmra.mxu0 %v15323_v50  ;;  %5235 = vmatmul.bf16.vlgmr.msrb.gmra.mxu1 %v15328_v12  ;;  %v5031_v23 = vpop.f32.mrf.mxu0 }
 0x73d   : > { %5279 = vmatmul.bf16.vlgmr.msrb.gmra.mxu2 %v15323_v50  ;;  %5323 = vmatmul.bf16.vlgmr.msrb.gmra.mxu3 %v15328_v12  ;;  %v5423_v50 = vadd.f32 %v5367_v36, %v5066_v60  ;;  %v5024_v12 = vadd.f32 %v5023_v56, %v15592_v33  ;;  %v1632_v56 = vld [vmem:[#allocation2 + $0x50] sm:$0xff]  ;;  %v1634_v60 = vld [vmem:[#allocation2 + $0x60] sm:$0xff] }
 0x73e   : > { %v5420_v20 = vadd.f32 %v5364_v17, %v5151_v0 }
 0x73f   : > { %v5068_v55 = vadd.f32 %v5067_v11, %v5024_v12 }
 0x740   : > { %v5473_v10 = vpack.c.bf16 %v5420_v20, %v5419_v5  ;;  %v5379_v5 = vunpack.c.l.bf16 %v1632_v56  ;;  %v5380_v20 = vunpack.c.h.bf16 %v1632_v56 }
 0x741   : > { %v5109_v35 = vpop.f32.mrf.mxu2  ;;  %v5153_v30 = vpop.f32.mrf.mxu3  ;;  %v5427_v57 = vadd.f32 %v5371_v52, %v5068_v55 }
 0x742   : > { %5501 = vst [vmem:[#allocation2 + $0x10] sm:$0xff] %v5473_v10  ;;  %v5110_v51 = vadd.f32 %v5109_v35, %v15604_v31  ;;  %v5032_v10 = vadd.f32 %v5031_v23, %v15592_v33  ;;  %v5075_v35 = vpop.f32.mrf.mxu1 }
 0x744   : > { %v5154_v53 = vadd.f32 %v5153_v30, %v5110_v51  ;;  %v5076_v41 = vadd.f32 %v5075_v35, %v5032_v10  ;;  %v10581_v10 = vld [vmem:[%s17923_s12 + $0x160] sm:$0xf]  ;;  %v12174_v35 = vld [vmem:[%s17923_s12 + $0x16c] sm:$0xf0] }
 0x746   : > { %v5424_v29 = vadd.f32 %v5368_v61, %v5154_v53  ;;  %v5033_v61 = vpop.f32.mrf.mxu0 }
 0x748   : > { %v5475_v18 = vpack.c.bf16 %v5424_v29, %v5423_v50  ;;  %v5383_v50 = vunpack.c.l.bf16 %v1634_v60  ;;  %v5384_v29 = vunpack.c.h.bf16 %v1634_v60  ;;  %v10437_v60 = vld [vmem:[%s17923_s12 + $0x40] sm:$0xf] }
 0x749   : > { %v5111_v19 = vpop.f32.mrf.mxu2  ;;  %v5155_v40 = vpop.f32.mrf.mxu3 }
 0x74a   : > { %5503 = vst [vmem:[#allocation2 + $0x20] sm:$0xff] %v5475_v18  ;;  %v5112_v6 = vadd.f32 %v5111_v19, %v15604_v31  ;;  %v1636_v19 = vld [vmem:[#allocation2 + $0x70] sm:$0xff] }
 0x74b   : > { %v5387_v2 = vunpack.c.l.bf16 %v1636_v19 }
 0x74c   : > { %v5156_v59 = vadd.f32 %v5155_v40, %v5112_v6  ;;  %5196 = vmatmul.bf16.gmra.mxu0 %v15350_v26  ;;  %5240 = vmatmul.bf16.gmra.mxu1 %v15352_v42  ;;  %v5077_v40 = vpop.f32.mrf.mxu1 }
 0x74d   : > { %5284 = vmatmul.bf16.gmra.mxu2 %v15350_v26  ;;  %5328 = vmatmul.bf16.gmra.mxu3 %v15352_v42  ;;  %v5431_v26 = vadd.f32 %v5375_v24, %v5071_v22  ;;  %v5029_v42 = vadd.f32 %v5028_v39, %v15592_v33  ;;  %v12154_v24 = vld [vmem:[%s17923_s12 + $0xcc] sm:$0xf0] }
 0x74e   : > { %v5428_v54 = vadd.f32 %v5372_v58, %v5156_v59  ;;  %v10517_v59 = vld [vmem:[%s17923_s12 + $0xe0] sm:$0xf]  ;;  %v12158_v58 = vld [vmem:[%s17923_s12 + $0xec] sm:$0xf0] }
 0x74f   : > { %v5073_v0 = vadd.f32 %v5072_v21, %v5029_v42  ;;  %v12150_v42 = vld [vmem:[%s17923_s12 + $0xac] sm:$0xf0] }
 0x750   : > { %v5477_v48 = vpack.c.bf16 %v5428_v54, %v5427_v57  ;;  %v10645_v57 = vld [vmem:[%s17923_s12 + $0x1e0] sm:$0xf]  ;;  %v5388_v54 = vunpack.c.h.bf16 %v1636_v19 }
 0x751   : > { %v5114_v49 = vpop.f32.mrf.mxu2  ;;  %v5158_v63 = vpop.f32.mrf.mxu3  ;;  %v5435_v11 = vadd.f32 %v5379_v5, %v5073_v0  ;;  %v10597_v0 = vld [vmem:[%s17923_s12 + $0x180] sm:$0xf]  ;;  %v12178_v5 = vld [vmem:[%s17923_s12 + $0x18c] sm:$0xf0] }
 0x752   : > { %5505 = vst [vmem:[#allocation2 + $0x30] sm:$0xff] %v5477_v48  ;;  %v5115_v7 = vadd.f32 %v5114_v49, %v15604_v31  ;;  %v10518_v48 = vor.u32 %v12158_v58, %v10517_v59  ;;  %v10646_v49 = vor.u32 %v12190_v14, %v10645_v57  ;;  %v1638_v59 = vld [vmem:[#allocation2 + $0x80] sm:$0xff] }
 0x753   : > { %v5391_v14 = vunpack.c.l.bf16 %v1638_v59 }
 0x754   : > { %v5159_v1 = vadd.f32 %v5158_v63, %v5115_v7  ;;  %6525 = vmatpush.bf16.msra.mxu0 %v10518_v48  ;;  %6553 = vmatpush.bf16.msra.mxu1 %v10646_v49  ;;  %v10501_v7 = vld [vmem:[%s17923_s12 + $0xc0] sm:$0xf] }
 0x756   : > { %v5432_v25 = vadd.f32 %v5376_v27, %v5159_v1  ;;  %v10629_v1 = vld [vmem:[%s17923_s12 + $0x1c0] sm:$0xf]  ;;  %v10502_v27 = vor.u32 %v12154_v24, %v10501_v7 }
 0x758   : > { %v5479_v15 = vpack.c.bf16 %v5432_v25, %v5431_v26  ;;  %6526 = vmatpush.bf16.msra.mxu0 %v10502_v27  ;;  %v10485_v26 = vld [vmem:[%s17923_s12 + $0xa0] sm:$0xf] }
 0x759   : > { %v5116_v8 = vpop.f32.mrf.mxu2  ;;  %v5160_v45 = vpop.f32.mrf.mxu3  ;;  %v10613_v25 = vld [vmem:[%s17923_s12 + $0x1a0] sm:$0xf]  ;;  %v10486_v23 = vor.u32 %v12150_v42, %v10485_v26 }
 0x75a   : > { %5507 = vst [vmem:[#allocation2 + $0x40] sm:$0xff] %v5479_v15  ;;  %v5117_v17 = vadd.f32 %v5116_v8, %v15604_v31  ;;  %v12182_v15 = vld [vmem:[%s17923_s12 + $0x1ac] sm:$0xf0]  ;;  %v10469_v8 = vld [vmem:[%s17923_s12 + $0x80] sm:$0xf] }
 0x75b   : > { %v10614_v56 = vor.u32 %v12182_v15, %v10613_v25 }
 0x75c   : > { %v5161_v43 = vadd.f32 %v5160_v45, %v5117_v17  ;;  %5201 = vmatmul.bf16.gmra.mxu0 %v15358_v47  ;;  %5245 = vmatmul.bf16.gmra.mxu1 %v15360_v4  ;;  %v12146_v45 = vld [vmem:[%s17923_s12 + $0x8c] sm:$0xf0] }
 0x75d   : > { %5289 = vmatmul.bf16.gmra.mxu2 %v15358_v47  ;;  %5333 = vmatmul.bf16.gmra.mxu3 %v15360_v4  ;;  %v5439_v47 = vadd.f32 %v5383_v50, %v5076_v41  ;;  %v5034_v4 = vadd.f32 %v5033_v61, %v15592_v33  ;;  %v10470_v17 = vor.u32 %v12146_v45, %v10469_v8  ;;  %v12134_v61 = vld [vmem:[%s17923_s12 + $0x2c] sm:$0xf0]  ;;  %v10549_v50 = vld [vmem:[%s17923_s12 + $0x120] sm:$0xf] }
 0x75e   : > { %v5436_v13 = vadd.f32 %v5380_v20, %v5161_v43  ;;  %6527 = vmatpush.bf16.msra.mxu0 %v10486_v23  ;;  %v10598_v43 = vor.u32 %v12178_v5, %v10597_v0  ;;  %v10453_v20 = vld [vmem:[%s17923_s12 + $0x60] sm:$0xf] }
 0x75f   : > { %v5078_v6 = vadd.f32 %v5077_v40, %v5034_v4  ;;  %v10405_v4 = vld [vmem:[%s17923_s12] sm:$0xf] }
 0x760   : > { %v5481_v30 = vpack.c.bf16 %v5436_v13, %v5435_v11  ;;  %v12142_v11 = vld [vmem:[%s17923_s12 + $0x6c] sm:$0xf0]  ;;  %v1642_v0 = vld [vmem:[#allocation2 + $0xa0] sm:$0xff] }
 0x761   : > { %v5119_v51 = vpop.f32.mrf.mxu2  ;;  %v5163_v36 = vpop.f32.mrf.mxu3  ;;  %v5443_v63 = vadd.f32 %v5387_v2, %v5078_v6  ;;  %v10454_v13 = vor.u32 %v12142_v11, %v10453_v20  ;;  %v12162_v6 = vld [vmem:[%s17923_s12 + $0x10c] sm:$0xf0] }
 0x762   : > { %5509 = vst [vmem:[#allocation2 + $0x50] sm:$0xff] %v5481_v30  ;;  %v5120_v53 = vadd.f32 %v5119_v51, %v15604_v31  ;;  %6528 = vmatpush.bf16.msra.mxu0 %v10470_v17  ;;  %v10582_v30 = vor.u32 %v12174_v35, %v10581_v10  ;;  %v12138_v51 = vld [vmem:[%s17923_s12 + $0x4c] sm:$0xf0] }
 0x763   : > { %v10438_v41 = vor.u32 %v12138_v51, %v10437_v60 }
 0x764   : > { %v5164_v12 = vadd.f32 %v5163_v36, %v5120_v53  ;;  %v10565_v36 = vld [vmem:[%s17923_s12 + $0x140] sm:$0xf] }
 0x765   : > { %v10421_v53 = vld [vmem:[%s17923_s12 + $0x20] sm:$0xf] }
 0x766   : > { %v5440_v18 = vadd.f32 %v5384_v29, %v5164_v12  ;;  %6529 = vmatpush.bf16.msra.mxu0 %v10454_v13  ;;  %v10422_v12 = vor.u32 %v12134_v61, %v10421_v53  ;;  %v12166_v29 = vld [vmem:[%s17923_s12 + $0x12c] sm:$0xf0]  ;;  %v5399_v13 = vunpack.c.l.bf16 %v1642_v0 }
 0x768   : > { %v5483_v38 = vpack.c.bf16 %v5440_v18, %v5439_v47  ;;  %v10550_v47 = vor.u32 %v12166_v29, %v10549_v50  ;;  %v12130_v18 = vld [vmem:[%s17923_s12 + $0xc] sm:$0xf0] }
 0x769   : > { %v5121_v55 = vpop.f32.mrf.mxu2  ;;  %v5165_v52 = vpop.f32.mrf.mxu3 }
 0x76a   : > { %5511 = vst [vmem:[#allocation2 + $0x60] sm:$0xff] %v5483_v38  ;;  %v5122_v9 = vadd.f32 %v5121_v55, %v15604_v31  ;;  %6530 = vmatpush.bf16.msra.mxu0 %v10438_v41  ;;  %v10533_v38 = vld [vmem:[%s17923_s12 + $0x100] sm:$0xf]  ;;  %v10406_v55 = vor.u32 %v12130_v18, %v10405_v4 }
 0x76c   : > { %v5166_v39 = vadd.f32 %v5165_v52, %v5122_v9  ;;  %5206 = vmatmul.bf16.gmra.mxu0 %v15366_v32  ;;  %5250 = vmatmul.bf16.gmra.mxu1 %v15368_v16  ;;  %v10534_v9 = vor.u32 %v12162_v6, %v10533_v38  ;;  %v12156_v6 = vld [vmem:[%s17923_s12 + $0xe4] sm:$0xf] }
 0x76d   : > { %5294 = vmatmul.bf16.gmra.mxu2 %v15366_v32  ;;  %5338 = vmatmul.bf16.gmra.mxu3 %v15368_v16  ;;  %v12186_v16 = vld [vmem:[%s17923_s12 + $0x1cc] sm:$0xf0] }
 0x76e   : > { %v5444_v22 = vadd.f32 %v5388_v54, %v5166_v39  ;;  %v10630_v21 = vor.u32 %v12186_v16, %v10629_v1  ;;  %6531 = vmatpush.bf16.msra.mxu0 %v10422_v12 }
 0x770   : > { %v5485_v32 = vpack.c.bf16 %v5444_v22, %v5443_v63  ;;  %6554 = vmatpush.bf16.msra.mxu1 %v10630_v21  ;;  %v5392_v63 = vunpack.c.h.bf16 %v1638_v59 }
 0x772   : > { %5513 = vst [vmem:[#allocation2 + $0x70] sm:$0xff] %v5485_v32  ;;  %6532 = vmatpush.bf16.msra.mxu0 %v10406_v55  ;;  %v1640_v32 = vld [vmem:[#allocation2 + $0x90] sm:$0xff] }
 0x773   : > { %v5395_v42 = vunpack.c.l.bf16 %v1640_v32  ;;  %v5396_v23 = vunpack.c.h.bf16 %v1640_v32  ;;  %v10631_v32 = vld [vmem:[%s17923_s12 + $0x1d0] sm:$0xf0] }
 0x774   : > { %6555 = vmatpush.bf16.msra.mxu1 %v10614_v56 }
 0x778   : > { %6556 = vmatpush.bf16.msra.mxu1 %v10598_v43 }
 0x779   : > { %v11988_v4 = vld [vmem:[#allocation2 + $0x74] sm:$0xf] }
 0x77c   : > { %5211 = vmatmul.bf16.gmra.mxu0 %v15468_v37  ;;  %5255 = vmatmul.bf16.gmra.mxu1 %v15470_v44 }
 0x77d   : > { %5299 = vmatmul.bf16.gmra.mxu2 %v15468_v37  ;;  %5343 = vmatmul.bf16.gmra.mxu3 %v15470_v44  ;;  %v12170_v37 = vld [vmem:[%s17923_s12 + $0x14c] sm:$0xf0] }
 0x77e   : > { %6557 = vmatpush.bf16.msra.mxu1 %v10582_v30  ;;  %v10566_v44 = vor.u32 %v12170_v37, %v10565_v36  ;;  %v5400_v30 = vunpack.c.h.bf16 %v1642_v0  ;;  %v1644_v37 = vld [vmem:[#allocation2 + $0xb0] sm:$0xff] }
 0x77f   : > { %v5404_v55 = vunpack.c.h.bf16 %v1644_v37 }
 0x782   : > { %6558 = vmatpush.bf16.msra.mxu1 %v10566_v44 }
 0x786   : > { %6559 = vmatpush.bf16.msra.mxu1 %v10550_v47  ;;  %v10357_v47 = vld [vmem:[#allocation2 + $0x70] sm:$0xf] }
 0x789   : > { %v5036_v19 = vpop.f32.mrf.mxu0  ;;  %v5080_v40 = vpop.f32.mrf.mxu1 }
 0x78a   : > { %6560 = vmatpush.bf16.msra.mxu1 %v10534_v9  ;;  %v5037_v52 = vadd.f32 %v5036_v19, %v15592_v33  ;;  %v5403_v19 = vunpack.c.l.bf16 %v1644_v37  ;;  %v10519_v9 = vld [vmem:[%s17923_s12 + $0xf0] sm:$0xf0] }
 0x78b   : > { %v10522_v59 = vor.u32 %v12156_v6, %v10519_v9  ;;  %v10455_v6 = vld [vmem:[%s17923_s12 + $0x70] sm:$0xf0]  ;;  %v12172_v9 = vld [vmem:[%s17923_s12 + $0x164] sm:$0xf] }
 0x78c   : > { %5216 = vmatmul.bf16.gmra.mxu0 %v15578_v28  ;;  %5260 = vmatmul.bf16.gmra.mxu1 %v15580_v62  ;;  %v5081_v2 = vadd.f32 %v5080_v40, %v5037_v52  ;;  %v12188_v52 = vld [vmem:[%s17923_s12 + $0x1e4] sm:$0xf] }
 0x78d   : > { %5304 = vmatmul.bf16.gmra.mxu2 %v15578_v28  ;;  %5348 = vmatmul.bf16.gmra.mxu3 %v15580_v62 }
 0x78e   : > { %v5447_v22 = vadd.f32 %v5391_v14, %v5081_v2  ;;  %6637 = vmatpush.bf16.msrb.mxu0 %v10522_v59  ;;  %v12152_v14 = vld [vmem:[%s17923_s12 + $0xc4] sm:$0xf] }
 0x790   : > { %v5124_v58 = vpop.f32.mrf.mxu2  ;;  %v5168_v57 = vpop.f32.mrf.mxu3 }
 0x791   : > { %v5125_v39 = vadd.f32 %v5124_v58, %v15604_v31  ;;  %v5038_v54 = vpop.f32.mrf.mxu0  ;;  %v5082_v48 = vpop.f32.mrf.mxu1  ;;  %v10647_v58 = vld [vmem:[%s17923_s12 + $0x1f0] sm:$0xf0] }
 0x792   : > { %v5039_v24 = vadd.f32 %v5038_v54, %v15592_v33  ;;  %v10650_v54 = vor.u32 %v12188_v52, %v10647_v58  ;;  %v15831_v58 = vperm.slane %v15589_v3, 3 }
 0x793   : > { %v5169_v49 = vadd.f32 %v5168_v57, %v5125_v39 }
 0x794   : > { %v5083_v62 = vadd.f32 %v5082_v48, %v5039_v24  ;;  %6665 = vmatpush.bf16.msrb.mxu1 %v10650_v54 }
 0x795   : > { %v5448_v7 = vadd.f32 %v5392_v63, %v5169_v49  ;;  %v10503_v49 = vld [vmem:[%s17923_s12 + $0xd0] sm:$0xf0]  ;;  %v12184_v63 = vld [vmem:[%s17923_s12 + $0x1c4] sm:$0xf] }
 0x796   : > { %v5451_v15 = vadd.f32 %v5395_v42, %v5083_v62 }
 0x797   : > { %v5487_v1 = vpack.c.bf16 %v5448_v7, %v5447_v22  ;;  %v1646_v22 = vld [vmem:[#allocation2 + $0xc0] sm:$0xff] }
 0x798   : > { %v5126_v28 = vpop.f32.mrf.mxu2  ;;  %v5170_v27 = vpop.f32.mrf.mxu3 }
 0x799   : > { %5515 = vst [vmem:[#allocation2 + $0x80] sm:$0xff] %v5487_v1  ;;  %v5127_v16 = vadd.f32 %v5126_v28, %v15604_v31  ;;  %v5041_v21 = vpop.f32.mrf.mxu0  ;;  %v5085_v26 = vpop.f32.mrf.mxu1  ;;  %v10506_v1 = vor.u32 %v12152_v14, %v10503_v49 }
 0x79a   : > { %v5042_v8 = vadd.f32 %v5041_v21, %v15592_v33  ;;  %v10634_v21 = vor.u32 %v12184_v63, %v10631_v32  ;;  %v12222_v32 = vld [vmem:[%s17923_s12 + $0x2ec] sm:$0xf0] }
 0x79b   : > { %v5171_v25 = vadd.f32 %v5170_v27, %v5127_v16  ;;  %6638 = vmatpush.bf16.msrb.mxu0 %v10506_v1  ;;  %v10773_v1 = vld [vmem:[%s17923_s12 + $0x2e0] sm:$0xf] }
 0x79c   : > { %5221 = vmatmul.bf16.gmra.mxu0 %v15594_v46  ;;  %5265 = vmatmul.bf16.gmra.mxu1 %v15596_v34  ;;  %v5086_v43 = vadd.f32 %v5085_v26, %v5042_v8  ;;  %v5407_v26 = vunpack.c.l.bf16 %v1646_v22 }
 0x79d   : > { %v5452_v56 = vadd.f32 %v5396_v23, %v5171_v25  ;;  %5309 = vmatmul.bf16.gmra.mxu2 %v15594_v46  ;;  %5353 = vmatmul.bf16.gmra.mxu3 %v15596_v34  ;;  %v5408_v25 = vunpack.c.h.bf16 %v1646_v22  ;;  %v12148_v23 = vld [vmem:[%s17923_s12 + $0xa4] sm:$0xf] }
 0x79e   : > { %v5455_v60 = vadd.f32 %v5399_v13, %v5086_v43  ;;  %6666 = vmatpush.bf16.msrb.mxu1 %v10634_v21  ;;  %v12144_v13 = vld [vmem:[%s17923_s12 + $0x84] sm:$0xf]  ;;  %v10439_v21 = vld [vmem:[%s17923_s12 + $0x50] sm:$0xf0] }
 0x79f   : > { %v5489_v45 = vpack.c.bf16 %v5452_v56, %v5451_v15  ;;  %v10487_v15 = vld [vmem:[%s17923_s12 + $0xb0] sm:$0xf0]  ;;  %v12180_v56 = vld [vmem:[%s17923_s12 + $0x1a4] sm:$0xf] }
 0x7a0   : > { %v5129_v17 = vpop.f32.mrf.mxu2  ;;  %v5173_v5 = vpop.f32.mrf.mxu3  ;;  %v11990_v41 = vld [vmem:[#allocation2 + $0x7c] sm:$0xf0]  ;;  %v10359_v34 = vld [vmem:[#allocation2 + $0x80] sm:$0xf0]  ;;  %v10490_v8 = vor.u32 %v12148_v23, %v10487_v15 }
 0x7a1   : > { %5517 = vst [vmem:[#allocation2 + $0x90] sm:$0xff] %v5489_v45  ;;  %v5130_v20 = vadd.f32 %v5129_v17, %v15604_v31  ;;  %v5043_v11 = vpop.f32.mrf.mxu0  ;;  %v5087_v10 = vpop.f32.mrf.mxu1  ;;  %v15753_v18 = vor.u32 %v11990_v41, %v10357_v47  ;;  %v15755_v38 = vor.u32 %v11988_v4, %v10359_v34  ;;  %v10615_v45 = vld [vmem:[%s17923_s12 + $0x1b0] sm:$0xf0]  ;;  %v12136_v22 = vld [vmem:[%s17923_s12 + $0x44] sm:$0xf] }
 0x7a2   : > { %v5044_v36 = vadd.f32 %v5043_v11, %v15592_v33  ;;  %v10618_v43 = vor.u32 %v12180_v56, %v10615_v45  ;;  %6639 = vmatpush.bf16.msrb.mxu0 %v10490_v8  ;;  %v10599_v41 = vld [vmem:[%s17923_s12 + $0x190] sm:$0xf0]  ;;  %v10442_v23 = vor.u32 %v12136_v22, %v10439_v21  ;;  %v12168_v15 = vld [vmem:[%s17923_s12 + $0x144] sm:$0xf] }
 0x7a3   : > { %v5174_v35 = vadd.f32 %v5173_v5, %v5130_v20  ;;  %v10567_v56 = vld [vmem:[%s17923_s12 + $0x150] sm:$0xf0] }
 0x7a4   : > { %v5088_v61 = vadd.f32 %v5087_v10, %v5044_v36  ;;  %6667 = vmatpush.bf16.msrb.mxu1 %v10618_v43  ;;  %v15808_v36 = vperm.slane %v15589_v3, 2  ;;  %v10570_v45 = vor.u32 %v12168_v15, %v10567_v56 }
 0x7a5   : > { %v5456_v51 = vadd.f32 %v5400_v30, %v5174_v35  ;;  %v10471_v35 = vld [vmem:[%s17923_s12 + $0x90] sm:$0xf0]  ;;  %v12176_v30 = vld [vmem:[%s17923_s12 + $0x184] sm:$0xf] }
 0x7a6   : > { %v5459_v57 = vadd.f32 %v5403_v19, %v5088_v61 }
 0x7a7   : > { %v5491_v46 = vpack.c.bf16 %v5456_v51, %v5455_v60  ;;  %v1648_v60 = vld [vmem:[#allocation2 + $0xd0] sm:$0xff] }
 0x7a8   : > { %v5131_v44 = vpop.f32.mrf.mxu2  ;;  %v5175_v53 = vpop.f32.mrf.mxu3  ;;  %v10373_v61 = vld [vmem:[#allocation2 + $0x90] sm:$0xf]  ;;  %v5411_v4 = vunpack.c.l.bf16 %v1648_v60 }
 0x7a9   : > { %5519 = vst [vmem:[#allocation2 + $0xa0] sm:$0xff] %v5491_v46  ;;  %v5132_v50 = vadd.f32 %v5131_v44, %v15604_v31  ;;  %v5046_v12 = vpop.f32.mrf.mxu0  ;;  %v5090_v29 = vpop.f32.mrf.mxu1  ;;  %v10474_v46 = vor.u32 %v12144_v13, %v10471_v35  ;;  %v1625_v13 = vld [vmem:[#allocation2 + $0x18] sm:$0xff] }
 0x7aa   : > { %v5047_v39 = vadd.f32 %v5046_v12, %v15592_v33  ;;  %v10602_v12 = vor.u32 %v12176_v30, %v10599_v41 }
 0x7ab   : > { %v5176_v40 = vadd.f32 %v5175_v53, %v5132_v50  ;;  %v11992_v50 = vld [vmem:[#allocation2 + $0x94] sm:$0xf]  ;;  %6640 = vmatpush.bf16.msrb.mxu0 %v10474_v46 }
 0x7ac   : > { %6533 = vmatmul.bf16.vlgmr.msra.gmra.mxu0 %v15753_v18  ;;  %6561 = vmatmul.bf16.vlgmr.msra.gmra.mxu1 %v15755_v38  ;;  %v5091_v28 = vadd.f32 %v5090_v29, %v5047_v39 }
 0x7ad   : > { %v5460_v2 = vadd.f32 %v5404_v55, %v5176_v40  ;;  %v5412_v40 = vunpack.c.h.bf16 %v1648_v60  ;;  %6668 = vmatpush.bf16.msrb.mxu1 %v10602_v12 }
 0x7ae   : > { %v5463_v0 = vadd.f32 %v5407_v26, %v5091_v28 }
 0x7af   : > { %v5493_v48 = vpack.c.bf16 %v5460_v2, %v5459_v57  ;;  %v10583_v2 = vld [vmem:[%s17923_s12 + $0x170] sm:$0xf0] }
 0x7b0   : > { %v5134_v7 = vpop.f32.mrf.mxu2  ;;  %v5178_v24 = vpop.f32.mrf.mxu3  ;;  %v11994_v20 = vld [vmem:[#allocation2 + $0x9c] sm:$0xf0]  ;;  %v10375_v11 = vld [vmem:[#allocation2 + $0xa0] sm:$0xf0]  ;;  %v10586_v39 = vor.u32 %v12172_v9, %v10583_v2  ;;  %v5365_v9 = vunpack.c.l.bf16 %v1625_v13 }
 0x7b1   : > { %5521 = vst [vmem:[#allocation2 + $0xb0] sm:$0xff] %v5493_v48  ;;  %v5135_v27 = vadd.f32 %v5134_v7, %v15604_v31  ;;  %v5048_v62 = vpop.f32.mrf.mxu0  ;;  %v5092_v16 = vpop.f32.mrf.mxu1  ;;  %v15814_v29 = vor.u32 %v11994_v20, %v10373_v61  ;;  %v15816_v47 = vor.u32 %v11992_v50, %v10375_v11  ;;  %v1623_v48 = vld [vmem:[#allocation2 + $0x8] sm:$0xff] }
 0x7b2   : > { %v5049_v5 = vadd.f32 %v5048_v62, %v15592_v33  ;;  %6669 = vmatpush.bf16.msrb.mxu1 %v10586_v39  ;;  %v5361_v28 = vunpack.c.l.bf16 %v1623_v48  ;;  %v10901_v62 = vld [vmem:[%s17923_s12 + $0x3e0] sm:$0xf] }
 0x7b3   : > { %v5179_v42 = vadd.f32 %v5178_v24, %v5135_v27  ;;  %v10774_v27 = vor.u32 %v12222_v32, %v10773_v1  ;;  %v10757_v1 = vld [vmem:[%s17923_s12 + $0x2c0] sm:$0xf]  ;;  %v12218_v32 = vld [vmem:[%s17923_s12 + $0x2cc] sm:$0xf0] }
 0x7b4   : > { %v5093_v34 = vadd.f32 %v5092_v16, %v5049_v5  ;;  %v12254_v16 = vld [vmem:[%s17923_s12 + $0x3ec] sm:$0xf0]  ;;  %v12164_v5 = vld [vmem:[%s17923_s12 + $0x124] sm:$0xf] }
 0x7b5   : > { %v5464_v17 = vadd.f32 %v5408_v25, %v5179_v42  ;;  %v5362_v42 = vunpack.c.h.bf16 %v1623_v48  ;;  %v10902_v25 = vor.u32 %v12254_v16, %v10901_v62  ;;  %6581 = vmatpush.bf16.msra.mxu2 %v10774_v27  ;;  %v10885_v27 = vld [vmem:[%s17923_s12 + $0x3c0] sm:$0xf]  ;;  %v12250_v62 = vld [vmem:[%s17923_s12 + $0x3cc] sm:$0xf0] }
 0x7b6   : > { %v5467_v52 = vadd.f32 %v5411_v4, %v5093_v34  ;;  %6670 = vmatpush.bf16.msrb.mxu1 %v10570_v45  ;;  %v12128_v34 = vld [vmem:[%s17923_s12 + $0x4] sm:$0xf] }
 0x7b7   : > { %v5495_v10 = vpack.c.bf16 %v5464_v17, %v5463_v0  ;;  %v12132_v0 = vld [vmem:[%s17923_s12 + $0x24] sm:$0xf]  ;;  %v10423_v17 = vld [vmem:[%s17923_s12 + $0x30] sm:$0xf0]  ;;  %6609 = vmatpush.bf16.msra.mxu3 %v10902_v25 }
 0x7b8   : > { %v5136_v33 = vpop.f32.mrf.mxu2  ;;  %v5180_v51 = vpop.f32.mrf.mxu3  ;;  %v10426_v11 = vor.u32 %v12132_v0, %v10423_v17  ;;  %v10389_v60 = vld [vmem:[#allocation2 + $0xb0] sm:$0xf]  ;;  %v11996_v4 = vld [vmem:[#allocation2 + $0xb4] sm:$0xf]  ;;  %v1629_v0 = vld [vmem:[#allocation2 + $0x38] sm:$0xff] }
 0x7b9   : > { %5523 = vst [vmem:[#allocation2 + $0xc0] sm:$0xff] %v5495_v10  ;;  %v5137_v37 = vadd.f32 %v5136_v33, %v15604_v31  ;;  %v5192_v44 = vpop.f32.mrf.mxu0  ;;  %v5236_v53 = vpop.f32.mrf.mxu1  ;;  %v12140_v31 = vld [vmem:[%s17923_s12 + $0x64] sm:$0xf]  ;;  %v10551_v10 = vld [vmem:[%s17923_s12 + $0x130] sm:$0xf0] }
 0x7ba   : > { %v5193_v55 = vadd.f32 %v5192_v44, %v15808_v36  ;;  %v10458_v57 = vor.u32 %v12140_v31, %v10455_v6  ;;  %v10554_v35 = vor.u32 %v12164_v5, %v10551_v10  ;;  %v12160_v44 = vld [vmem:[%s17923_s12 + $0x104] sm:$0xf] }
 0x7bb   : > { %v5181_v19 = vadd.f32 %v5180_v51, %v5137_v37  ;;  %v10407_v37 = vld [vmem:[%s17923_s12 + $0x10] sm:$0xf0] }
 0x7bc   : > { %6538 = vmatmul.bf16.gmra.mxu0 %v15814_v29  ;;  %6566 = vmatmul.bf16.gmra.mxu1 %v15816_v47  ;;  %v5237_v14 = vadd.f32 %v5236_v53, %v5193_v55 }
 0x7bd   : > { %v5468_v59 = vadd.f32 %v5412_v40, %v5181_v19  ;;  %6641 = vmatpush.bf16.msrb.mxu0 %v10458_v57  ;;  %v10410_v19 = vor.u32 %v12128_v34, %v10407_v37  ;;  %v10535_v40 = vld [vmem:[%s17923_s12 + $0x110] sm:$0xf0]  ;;  %6671 = vmatpush.bf16.msrb.mxu1 %v10554_v35  ;;  %v12246_v34 = vld [vmem:[%s17923_s12 + $0x3ac] sm:$0xf0] }
 0x7be   : > { %v5417_v8 = vadd.f32 %v5361_v28, %v5237_v14  ;;  %v10538_v6 = vor.u32 %v12160_v44, %v10535_v40  ;;  %v1627_v14 = vld [vmem:[#allocation2 + $0x28] sm:$0xff]  ;;  %v10758_v28 = vor.u32 %v12218_v32, %v10757_v1  ;;  %v12238_v32 = vld [vmem:[%s17923_s12 + $0x36c] sm:$0xf0] }
 0x7bf   : > { %v15836_v54 = vpack.c.bf16 %v5468_v59, %v5467_v52  ;;  %v5366_v59 = vunpack.c.h.bf16 %v1625_v13  ;;  %v5369_v16 = vunpack.c.l.bf16 %v1627_v14 }
 0x7c0   : > { %v5280_v49 = vpop.f32.mrf.mxu2  ;;  %v5324_v63 = vpop.f32.mrf.mxu3  ;;  %v11998_v33 = vld [vmem:[#allocation2 + $0xbc] sm:$0xf0]  ;;  %v10391_v51 = vld [vmem:[#allocation2 + $0xc0] sm:$0xf0]  ;;  %6582 = vmatpush.bf16.msra.mxu2 %v10758_v28 }
 0x7c1   : > { %5525 = vst [vmem:[#allocation2 + $0xd0] sm:$0xff] %v15836_v54  ;;  %v5281_v3 = vadd.f32 %v5280_v49, %v15831_v58  ;;  %v5194_v7 = vpop.f32.mrf.mxu0  ;;  %v5238_v24 = vpop.f32.mrf.mxu1  ;;  %6642 = vmatpush.bf16.msrb.mxu0 %v10442_v23  ;;  %v15890_v55 = vor.u32 %v11998_v33, %v10389_v60  ;;  %v15892_v31 = vor.u32 %v11996_v4, %v10391_v51  ;;  %v5849_v56 = vunpack.c.l.b16 %v15836_v54  ;;  %v10869_v60 = vld [vmem:[%s17923_s12 + $0x3a0] sm:$0xf] }
 0x7c2   : > { %v5195_v20 = vadd.f32 %v5194_v7, %v15808_v36  ;;  %6672 = vmatpush.bf16.msrb.mxu1 %v10538_v6  ;;  %v5373_v33 = vunpack.c.l.bf16 %v1629_v0  ;;  %v10870_v37 = vor.u32 %v12246_v34, %v10869_v60  ;;  %v10853_v4 = vld [vmem:[%s17923_s12 + $0x380] sm:$0xf]  ;;  %v12242_v6 = vld [vmem:[%s17923_s12 + $0x38c] sm:$0xf0]  ;;  %v10525_v34 = vld [vmem:[%s17923_s12 + $0xe8] sm:$0xf] }
 0x7c3   : > { %v5325_v26 = vadd.f32 %v5324_v63, %v5281_v3  ;;  %v15914_v13 = vpack.c.b16 %v5849_v56, %v5849_v56  ;;  %v1633_v56 = vld [vmem:[#allocation2 + $0x58] sm:$0xff] }
 0x7c4   : > { %v5239_v53 = vadd.f32 %v5238_v24, %v5195_v20 }
 0x7c5   : > { %v5418_v43 = vadd.f32 %v5362_v42, %v5325_v26  ;;  %6643 = vmatpush.bf16.msrb.mxu0 %v10426_v11  ;;  %v5370_v26 = vunpack.c.h.bf16 %v1627_v14  ;;  %v10886_v42 = vor.u32 %v12250_v62, %v10885_v27 }
 0x7c6   : > { %v5421_v57 = vadd.f32 %v5365_v9, %v5239_v53  ;;  %v1631_v9 = vld [vmem:[#allocation2 + $0x48] sm:$0xff] }
 0x7c7   : > { %v5472_v30 = vpack.c.bf16 %v5418_v43, %v5417_v8  ;;  %6610 = vmatpush.bf16.msra.mxu3 %v10886_v42  ;;  %v5850_v8 = vunpack.c.h.b16 %v15836_v54  ;;  %v12214_v54 = vld [vmem:[%s17923_s12 + $0x2ac] sm:$0xf0]  ;;  %v10821_v42 = vld [vmem:[%s17923_s12 + $0x340] sm:$0xf] }
 0x7c8   : > { %v5282_v46 = vpop.f32.mrf.mxu2  ;;  %v5326_v41 = vpop.f32.mrf.mxu3 }
 0x7c9   : > { %5500 = vst [vmem:[#allocation2 + $0x8] sm:$0xff] %v5472_v30  ;;  %v5283_v61 = vadd.f32 %v5282_v46, %v15831_v58  ;;  %v5197_v50 = vpop.f32.mrf.mxu0  ;;  %v5241_v12 = vpop.f32.mrf.mxu1  ;;  %6644 = vmatpush.bf16.msrb.mxu0 %v10410_v19  ;;  %v15916_v35 = vpack.c.b16 %v5850_v8, %v5850_v8  ;;  %v10741_v30 = vld [vmem:[%s17923_s12 + $0x2a0] sm:$0xf]  ;;  %v5374_v46 = vunpack.c.h.bf16 %v1629_v0 }
 0x7ca   : > { %v5198_v39 = vadd.f32 %v5197_v50, %v15808_v36  ;;  %v10725_v50 = vld [vmem:[%s17923_s12 + $0x280] sm:$0xf] }
 0x7cb   : > { %v5327_v52 = vadd.f32 %v5326_v41, %v5283_v61  ;;  %v10742_v41 = vor.u32 %v12214_v54, %v10741_v30  ;;  %6611 = vmatpush.bf16.msra.mxu3 %v10870_v37  ;;  %v10805_v30 = vld [vmem:[%s17923_s12 + $0x320] sm:$0xf]  ;;  %v5381_v54 = vunpack.c.l.bf16 %v1633_v56  ;;  %v12159_v37 = vld [vmem:[%s17923_s12 + $0xf4] sm:$0xf0] }
 0x7cc   : > { %6543 = vmatmul.bf16.gmra.mxu0 %v15890_v55  ;;  %6571 = vmatmul.bf16.gmra.mxu1 %v15892_v31  ;;  %v5242_v22 = vadd.f32 %v5241_v12, %v5198_v39  ;;  %v12210_v12 = vld [vmem:[%s17923_s12 + $0x28c] sm:$0xf0] }
 0x7cd   : > { %v5422_v2 = vadd.f32 %v5366_v59, %v5327_v52  ;;  %6583 = vmatpush.bf16.msra.mxu2 %v10742_v41  ;;  %v10726_v40 = vor.u32 %v12210_v12, %v10725_v50  ;;  %v10526_v12 = vor.u32 %v12159_v37, %v10525_v34 }
 0x7ce   : > { %v5425_v25 = vadd.f32 %v5369_v16, %v5242_v22  ;;  %v10837_v22 = vld [vmem:[%s17923_s12 + $0x360] sm:$0xf] }
 0x7cf   : > { %v5474_v48 = vpack.c.bf16 %v5422_v2, %v5421_v57  ;;  %v10854_v57 = vor.u32 %v12242_v6, %v10853_v4  ;;  %v10838_v28 = vor.u32 %v12238_v32, %v10837_v22  ;;  %v12191_v4 = vld [vmem:[%s17923_s12 + $0x1f4] sm:$0xf0]  ;;  %v12194_v6 = vld [vmem:[%s17923_s12 + $0x20c] sm:$0xf0]  ;;  %6749 = vmatpush.bf16.msra.mxu0 %v10526_v12  ;;  %v10637_v22 = vld [vmem:[%s17923_s12 + $0x1c8] sm:$0xf] }
 0x7d0   : > { %v5285_v49 = vpop.f32.mrf.mxu2  ;;  %v5329_v63 = vpop.f32.mrf.mxu3  ;;  %v10589_v12 = vld [vmem:[%s17923_s12 + $0x168] sm:$0xf] }
 0x7d1   : > { %5502 = vst [vmem:[#allocation2 + $0x18] sm:$0xff] %v5474_v48  ;;  %v5286_v3 = vadd.f32 %v5285_v49, %v15831_v58  ;;  %v5199_v7 = vpop.f32.mrf.mxu0  ;;  %v5243_v24 = vpop.f32.mrf.mxu1  ;;  %6584 = vmatpush.bf16.msra.mxu2 %v10726_v40  ;;  %6612 = vmatpush.bf16.msra.mxu3 %v10854_v57  ;;  %v10709_v49 = vld [vmem:[%s17923_s12 + $0x260] sm:$0xf] }
 0x7d2   : > { %v5200_v15 = vadd.f32 %v5199_v7, %v15808_v36  ;;  %v10661_v40 = vld [vmem:[%s17923_s12 + $0x200] sm:$0xf] }
 0x7d3   : > { %v5330_v21 = vadd.f32 %v5329_v63, %v5286_v3  ;;  %v12206_v63 = vld [vmem:[%s17923_s12 + $0x26c] sm:$0xf0]  ;;  %v5377_v3 = vunpack.c.l.bf16 %v1631_v9  ;;  %v10662_v57 = vor.u32 %v12194_v6, %v10661_v40 }
 0x7d4   : > { %v5244_v43 = vadd.f32 %v5243_v24, %v5200_v15  ;;  %v5378_v24 = vunpack.c.h.bf16 %v1631_v9  ;;  %v10710_v1 = vor.u32 %v12206_v63, %v10709_v49  ;;  %v12234_v15 = vld [vmem:[%s17923_s12 + $0x34c] sm:$0xf0]  ;;  %v10789_v9 = vld [vmem:[%s17923_s12 + $0x300] sm:$0xf]  ;;  %v10509_v49 = vld [vmem:[%s17923_s12 + $0xc8] sm:$0xf] }
 0x7d5   : > { %v5426_v23 = vadd.f32 %v5370_v26, %v5330_v21  ;;  %6613 = vmatpush.bf16.msra.mxu3 %v10838_v28  ;;  %v10693_v21 = vld [vmem:[%s17923_s12 + $0x240] sm:$0xf]  ;;  %v12202_v26 = vld [vmem:[%s17923_s12 + $0x24c] sm:$0xf0]  ;;  %v10822_v0 = vor.u32 %v12234_v15, %v10821_v42  ;;  %v12155_v63 = vld [vmem:[%s17923_s12 + $0xd4] sm:$0xf0] }
 0x7d6   : > { %v5429_v44 = vadd.f32 %v5373_v33, %v5244_v43  ;;  %6585 = vmatpush.bf16.msra.mxu2 %v10710_v1  ;;  %v5382_v33 = vunpack.c.h.bf16 %v1633_v56  ;;  %v10510_v32 = vor.u32 %v12155_v63, %v10509_v49  ;;  %v12187_v28 = vld [vmem:[%s17923_s12 + $0x1d4] sm:$0xf0]  ;;  %v10573_v49 = vld [vmem:[%s17923_s12 + $0x148] sm:$0xf] }
 0x7d7   : > { %v5476_v45 = vpack.c.bf16 %v5426_v23, %v5425_v25  ;;  %v10694_v23 = vor.u32 %v12202_v26, %v10693_v21  ;;  %v10493_v26 = vld [vmem:[%s17923_s12 + $0xa8] sm:$0xf]  ;;  %v12151_v42 = vld [vmem:[%s17923_s12 + $0xb4] sm:$0xf0] }
 0x7d8   : > { %v5287_v17 = vpop.f32.mrf.mxu2  ;;  %v5331_v5 = vpop.f32.mrf.mxu3  ;;  %6750 = vmatpush.bf16.msra.mxu0 %v10510_v32 }
 0x7d9   : > { %5504 = vst [vmem:[#allocation2 + $0x28] sm:$0xff] %v5476_v45  ;;  %v5288_v20 = vadd.f32 %v5287_v17, %v15831_v58  ;;  %v5202_v11 = vpop.f32.mrf.mxu0  ;;  %v5246_v10 = vpop.f32.mrf.mxu1  ;;  %6614 = vmatpush.bf16.msra.mxu3 %v10822_v0 }
 0x7da   : > { %v5203_v61 = vadd.f32 %v5202_v11, %v15808_v36  ;;  %6586 = vmatpush.bf16.msra.mxu2 %v10694_v23  ;;  %v10677_v11 = vld [vmem:[%s17923_s12 + $0x220] sm:$0xf] }
 0x7db   : > { %v5332_v51 = vadd.f32 %v5331_v5, %v5288_v20 }
 0x7dc   : > { %6548 = vmatmul.bf16.gmra.mxu0 %v15914_v13  ;;  %6576 = vmatmul.bf16.gmra.mxu1 %v15916_v35  ;;  %v5247_v2 = vadd.f32 %v5246_v10, %v5203_v61  ;;  %v12198_v10 = vld [vmem:[%s17923_s12 + $0x22c] sm:$0xf0] }
 0x7dd   : > { %v5430_v53 = vadd.f32 %v5374_v46, %v5332_v51  ;;  %v10678_v51 = vor.u32 %v12198_v10, %v10677_v11  ;;  %v12230_v46 = vld [vmem:[%s17923_s12 + $0x32c] sm:$0xf0]  ;;  %v10477_v11 = vld [vmem:[%s17923_s12 + $0x88] sm:$0xf]  ;;  %v12147_v10 = vld [vmem:[%s17923_s12 + $0x94] sm:$0xf0] }
 0x7de   : > { %v5433_v27 = vadd.f32 %v5377_v3, %v5247_v2  ;;  %v10806_v41 = vor.u32 %v12230_v46, %v10805_v30  ;;  %v12226_v2 = vld [vmem:[%s17923_s12 + $0x30c] sm:$0xf0]  ;;  %v10605_v30 = vld [vmem:[%s17923_s12 + $0x188] sm:$0xf]  ;;  %v10478_v46 = vor.u32 %v12147_v10, %v10477_v11 }
 0x7df   : > { %v5478_v19 = vpack.c.bf16 %v5430_v53, %v5429_v44  ;;  %v10653_v44 = vld [vmem:[%s17923_s12 + $0x1e8] sm:$0xf]  ;;  %6587 = vmatpush.bf16.msra.mxu2 %v10678_v51 }
 0x7e0   : > { %v5290_v52 = vpop.f32.mrf.mxu2  ;;  %v5334_v59 = vpop.f32.mrf.mxu3  ;;  %6615 = vmatpush.bf16.msra.mxu3 %v10806_v41  ;;  %v12179_v41 = vld [vmem:[%s17923_s12 + $0x194] sm:$0xf0] }
 0x7e1   : > { %5506 = vst [vmem:[#allocation2 + $0x38] sm:$0xff] %v5478_v19  ;;  %v5291_v39 = vadd.f32 %v5290_v52, %v15831_v58  ;;  %v5204_v48 = vpop.f32.mrf.mxu0  ;;  %v5248_v14 = vpop.f32.mrf.mxu1  ;;  %v10654_v19 = vor.u32 %v12191_v4, %v10653_v44  ;;  %v10606_v34 = vor.u32 %v12179_v41, %v10605_v30 }
 0x7e2   : > { %v5205_v16 = vadd.f32 %v5204_v48, %v15808_v36 }
 0x7e3   : > { %v5335_v7 = vadd.f32 %v5334_v59, %v5291_v39  ;;  %v1635_v59 = vld [vmem:[#allocation2 + $0x68] sm:$0xff]  ;;  %6777 = vmatpush.bf16.msra.mxu1 %v10654_v19  ;;  %6588 = vmatpush.bf16.msra.mxu2 %v10662_v57 }
 0x7e4   : > { %v5249_v17 = vadd.f32 %v5248_v14, %v5205_v16  ;;  %v10790_v14 = vor.u32 %v12226_v2, %v10789_v9  ;;  %v5386_v21 = vunpack.c.h.bf16 %v1635_v59  ;;  %v12175_v9 = vld [vmem:[%s17923_s12 + $0x174] sm:$0xf0]  ;;  %v1639_v57 = vld [vmem:[#allocation2 + $0x88] sm:$0xff] }
 0x7e5   : > { %v5434_v62 = vadd.f32 %v5378_v24, %v5335_v7 }
 0x7e6   : > { %v5437_v53 = vadd.f32 %v5381_v54, %v5249_v17  ;;  %6616 = vmatpush.bf16.msra.mxu3 %v10790_v14  ;;  %v12139_v14 = vld [vmem:[%s17923_s12 + $0x54] sm:$0xf0] }
 0x7e7   : > { %v5480_v25 = vpack.c.bf16 %v5434_v62, %v5433_v27  ;;  %v10638_v27 = vor.u32 %v12187_v28, %v10637_v22  ;;  %v5385_v62 = vunpack.c.l.bf16 %v1635_v59  ;;  %v5393_v28 = vunpack.c.l.bf16 %v1639_v57 }
 0x7e8   : > { %v5292_v8 = vpop.f32.mrf.mxu2  ;;  %v5336_v45 = vpop.f32.mrf.mxu3 }
 0x7e9   : > { %5508 = vst [vmem:[#allocation2 + $0x48] sm:$0xff] %v5480_v25  ;;  %v5293_v5 = vadd.f32 %v5292_v8, %v15831_v58  ;;  %v5207_v43 = vpop.f32.mrf.mxu0  ;;  %v5251_v20 = vpop.f32.mrf.mxu1  ;;  %6778 = vmatpush.bf16.msra.mxu1 %v10638_v27  ;;  %v10621_v25 = vld [vmem:[%s17923_s12 + $0x1a8] sm:$0xf]  ;;  %v10494_v8 = vor.u32 %v12151_v42, %v10493_v26 }
 0x7ea   : > { %v5208_v50 = vadd.f32 %v5207_v43, %v15808_v36  ;;  %v10557_v26 = vld [vmem:[%s17923_s12 + $0x128] sm:$0xf] }
 0x7eb   : > { %v5337_v60 = vadd.f32 %v5336_v45, %v5293_v5  ;;  %v12183_v45 = vld [vmem:[%s17923_s12 + $0x1b4] sm:$0xf0]  ;;  %6751 = vmatpush.bf16.msra.mxu0 %v10494_v8 }
 0x7ec   : > { %6645 = vmatmul.bf16.vlgmr.msrb.gmra.mxu0 %v15753_v18  ;;  %6673 = vmatmul.bf16.vlgmr.msrb.gmra.mxu1 %v15755_v38  ;;  %v5252_v3 = vadd.f32 %v5251_v20, %v5208_v50  ;;  %v10622_v0 = vor.u32 %v12183_v45, %v10621_v25  ;;  %v1637_v5 = vld [vmem:[#allocation2 + $0x78] sm:$0xff] }
 0x7ed   : > { %v5438_v61 = vadd.f32 %v5382_v33, %v5337_v60  ;;  %v5389_v37 = vunpack.c.l.bf16 %v1637_v5  ;;  %v12143_v50 = vld [vmem:[%s17923_s12 + $0x74] sm:$0xf0] }
 0x7ee   : > { %v5441_v23 = vadd.f32 %v5385_v62, %v5252_v3  ;;  %6779 = vmatpush.bf16.msra.mxu1 %v10622_v0  ;;  %v5394_v62 = vunpack.c.h.bf16 %v1639_v57  ;;  %v1641_v0 = vld [vmem:[#allocation2 + $0x98] sm:$0xff] }
 0x7ef   : > { %v5482_v52 = vpack.c.bf16 %v5438_v61, %v5437_v53  ;;  %v5390_v53 = vunpack.c.h.bf16 %v1637_v5  ;;  %6752 = vmatpush.bf16.msra.mxu0 %v10478_v46  ;;  %v10461_v61 = vld [vmem:[%s17923_s12 + $0x68] sm:$0xf]  ;;  %v5397_v46 = vunpack.c.l.bf16 %v1641_v0 }
 0x7f0   : > { %v5295_v39 = vpop.f32.mrf.mxu2  ;;  %v5339_v48 = vpop.f32.mrf.mxu3  ;;  %v10462_v6 = vor.u32 %v12143_v50, %v10461_v61 }
 0x7f1   : > { %5510 = vst [vmem:[#allocation2 + $0x58] sm:$0xff] %v5482_v52  ;;  %v5296_v7 = vadd.f32 %v5295_v39, %v15831_v58  ;;  %v5209_v24 = vpop.f32.mrf.mxu0  ;;  %v5253_v1 = vpop.f32.mrf.mxu1  ;;  %v10590_v52 = vor.u32 %v12175_v9, %v10589_v12  ;;  %v1643_v12 = vld [vmem:[#allocation2 + $0xa8] sm:$0xff] }
 0x7f2   : > { %v5210_v56 = vadd.f32 %v5209_v24, %v15808_v36  ;;  %6780 = vmatpush.bf16.msra.mxu1 %v10606_v34  ;;  %v5398_v34 = vunpack.c.h.bf16 %v1641_v0 }
 0x7f3   : > { %v5340_v16 = vadd.f32 %v5339_v48, %v5296_v7  ;;  %6753 = vmatpush.bf16.msra.mxu0 %v10462_v6  ;;  %v10445_v48 = vld [vmem:[%s17923_s12 + $0x48] sm:$0xf] }
 0x7f4   : > { %v5254_v54 = vadd.f32 %v5253_v1, %v5210_v56  ;;  %v10446_v24 = vor.u32 %v12139_v14, %v10445_v48  ;;  %v12171_v1 = vld [vmem:[%s17923_s12 + $0x154] sm:$0xf0] }
 0x7f5   : > { %v5442_v15 = vadd.f32 %v5386_v21, %v5340_v16  ;;  %v10574_v32 = vor.u32 %v12171_v1, %v10573_v49  ;;  %v10429_v16 = vld [vmem:[%s17923_s12 + $0x28] sm:$0xf]  ;;  %v12135_v21 = vld [vmem:[%s17923_s12 + $0x34] sm:$0xf0]  ;;  %v12220_v49 = vld [vmem:[%s17923_s12 + $0x2e4] sm:$0xf] }
 0x7f6   : > { %v5445_v4 = vadd.f32 %v5389_v37, %v5254_v54  ;;  %6781 = vmatpush.bf16.msra.mxu1 %v10590_v52  ;;  %v12167_v56 = vld [vmem:[%s17923_s12 + $0x134] sm:$0xf0] }
 0x7f7   : > { %v5484_v17 = vpack.c.bf16 %v5442_v15, %v5441_v23  ;;  %6754 = vmatpush.bf16.msra.mxu0 %v10446_v24  ;;  %v10430_v15 = vor.u32 %v12135_v21, %v10429_v16  ;;  %v10558_v8 = vor.u32 %v12167_v56, %v10557_v26  ;;  %v12131_v54 = vld [vmem:[%s17923_s12 + $0x14] sm:$0xf0]  ;;  %v5402_v24 = vunpack.c.h.bf16 %v1643_v12  ;;  %v12248_v16 = vld [vmem:[%s17923_s12 + $0x3c4] sm:$0xf]  ;;  %v10887_v21 = vld [vmem:[%s17923_s12 + $0x3d0] sm:$0xf0] }
 0x7f8   : > { %v5297_v43 = vpop.f32.mrf.mxu2  ;;  %v5341_v20 = vpop.f32.mrf.mxu3 }
 0x7f9   : > { %5512 = vst [vmem:[#allocation2 + $0x68] sm:$0xff] %v5484_v17  ;;  %v5298_v60 = vadd.f32 %v5297_v43, %v15831_v58  ;;  %v5212_v33 = vpop.f32.mrf.mxu0  ;;  %v5256_v51 = vpop.f32.mrf.mxu1  ;;  %v10413_v43 = vld [vmem:[%s17923_s12 + $0x8] sm:$0xf] }
 0x7fa   : > { %v5213_v40 = vadd.f32 %v5212_v33, %v15808_v36  ;;  %6782 = vmatpush.bf16.msra.mxu1 %v10574_v32  ;;  %v10414_v33 = vor.u32 %v12131_v54, %v10413_v43  ;;  %v10903_v32 = vld [vmem:[%s17923_s12 + $0x3f0] sm:$0xf0] }
 0x7fb   : > { %v5342_v44 = vadd.f32 %v5341_v20, %v5298_v60  ;;  %6755 = vmatpush.bf16.msra.mxu0 %v10430_v15  ;;  %v10541_v60 = vld [vmem:[%s17923_s12 + $0x108] sm:$0xf]  ;;  %v10890_v15 = vor.u32 %v12248_v16, %v10887_v21 }
 0x7fc   : > { %6650 = vmatmul.bf16.gmra.mxu0 %v15814_v29  ;;  %6678 = vmatmul.bf16.gmra.mxu1 %v15816_v47  ;;  %v5257_v63 = vadd.f32 %v5256_v51, %v5213_v40  ;;  %v12163_v51 = vld [vmem:[%s17923_s12 + $0x114] sm:$0xf0] }
 0x7fd   : > { %v5446_v19 = vadd.f32 %v5390_v53, %v5342_v44  ;;  %v10542_v37 = vor.u32 %v12163_v51, %v10541_v60 }
 0x7fe   : > { %v5449_v42 = vadd.f32 %v5393_v28, %v5257_v63  ;;  %6783 = vmatpush.bf16.msra.mxu1 %v10558_v8  ;;  %v10775_v63 = vld [vmem:[%s17923_s12 + $0x2f0] sm:$0xf0]  ;;  %v12216_v28 = vld [vmem:[%s17923_s12 + $0x2c4] sm:$0xf]  ;;  %v1645_v8 = vld [vmem:[#allocation2 + $0xb8] sm:$0xff] }
 0x7ff   : > { %v5486_v59 = vpack.c.bf16 %v5446_v19, %v5445_v4  ;;  %6756 = vmatpush.bf16.msra.mxu0 %v10414_v33  ;;  %v10778_v1 = vor.u32 %v12220_v49, %v10775_v63  ;;  %v5405_v54 = vunpack.c.l.bf16 %v1645_v8  ;;  %v5406_v33 = vunpack.c.h.bf16 %v1645_v8 }
 0x800   : > { %v5300_v2 = vpop.f32.mrf.mxu2  ;;  %v5344_v39 = vpop.f32.mrf.mxu3 }
 0x801   : > { %5514 = vst [vmem:[#allocation2 + $0x78] sm:$0xff] %v5486_v59  ;;  %v5301_v22 = vadd.f32 %v5300_v2, %v15831_v58  ;;  %v5214_v3 = vpop.f32.mrf.mxu0  ;;  %v5258_v7 = vpop.f32.mrf.mxu1  ;;  %6693 = vmatpush.bf16.msrb.mxu2 %v10778_v1  ;;  %v12204_v1 = vld [vmem:[%s17923_s12 + $0x264] sm:$0xf] }
 0x802   : > { %v5215_v23 = vadd.f32 %v5214_v3, %v15808_v36  ;;  %6784 = vmatpush.bf16.msra.mxu1 %v10542_v37  ;;  %v5401_v3 = vunpack.c.l.bf16 %v1643_v12  ;;  %v12208_v37 = vld [vmem:[%s17923_s12 + $0x284] sm:$0xf] }
 0x803   : > { %v5345_v27 = vadd.f32 %v5344_v39, %v5301_v22  ;;  %v12252_v22 = vld [vmem:[%s17923_s12 + $0x3e4] sm:$0xf] }
 0x804   : > { %v5259_v20 = vadd.f32 %v5258_v7, %v5215_v23 }
 0x805   : > { %v5450_v25 = vadd.f32 %v5394_v62, %v5345_v27  ;;  %v10759_v27 = vld [vmem:[%s17923_s12 + $0x2d0] sm:$0xf0]  ;;  %v10906_v62 = vor.u32 %v12252_v22, %v10903_v32 }
 0x806   : > { %v5453_v44 = vadd.f32 %v5397_v46, %v5259_v20  ;;  %v10762_v23 = vor.u32 %v12216_v28, %v10759_v27  ;;  %v10871_v46 = vld [vmem:[%s17923_s12 + $0x3b0] sm:$0xf0]  ;;  %v12236_v28 = vld [vmem:[%s17923_s12 + $0x364] sm:$0xf] }
 0x807   : > { %v5488_v45 = vpack.c.bf16 %v5450_v25, %v5449_v42  ;;  %6721 = vmatpush.bf16.msrb.mxu3 %v10906_v62  ;;  %v10711_v32 = vld [vmem:[%s17923_s12 + $0x270] sm:$0xf0] }
 0x808   : > { %v5302_v17 = vpop.f32.mrf.mxu2  ;;  %v5346_v5 = vpop.f32.mrf.mxu3  ;;  %v10365_v4 = vld [vmem:[#allocation2 + $0x78] sm:$0xf]  ;;  %v11989_v9 = vld [vmem:[#allocation2 + $0x7c] sm:$0xf]  ;;  %6694 = vmatpush.bf16.msrb.mxu2 %v10762_v23  ;;  %v10714_v21 = vor.u32 %v12204_v1, %v10711_v32 }
 0x809   : > { %5516 = vst [vmem:[#allocation2 + $0x88] sm:$0xff] %v5488_v45  ;;  %v5303_v11 = vadd.f32 %v5302_v17, %v15831_v58  ;;  %v5217_v10 = vpop.f32.mrf.mxu0  ;;  %v5261_v30 = vpop.f32.mrf.mxu1 }
 0x80a   : > { %v5218_v61 = vadd.f32 %v5217_v10, %v15808_v36  ;;  %v10743_v10 = vld [vmem:[%s17923_s12 + $0x2b0] sm:$0xf0] }
 0x80b   : > { %v5347_v41 = vadd.f32 %v5346_v5, %v5303_v11  ;;  %6722 = vmatpush.bf16.msrb.mxu3 %v10890_v15  ;;  %v12212_v11 = vld [vmem:[%s17923_s12 + $0x2a4] sm:$0xf] }
 0x80c   : > { %6655 = vmatmul.bf16.gmra.mxu0 %v15890_v55  ;;  %6683 = vmatmul.bf16.gmra.mxu1 %v15892_v31  ;;  %v5262_v59 = vadd.f32 %v5261_v30, %v5218_v61  ;;  %v12244_v30 = vld [vmem:[%s17923_s12 + $0x3a4] sm:$0xf]  ;;  %v10746_v51 = vor.u32 %v12212_v11, %v10743_v10 }
 0x80d   : > { %v5454_v53 = vadd.f32 %v5398_v34, %v5347_v41  ;;  %v10874_v34 = vor.u32 %v12244_v30, %v10871_v46  ;;  %v12232_v15 = vld [vmem:[%s17923_s12 + $0x344] sm:$0xf]  ;;  %v10679_v46 = vld [vmem:[%s17923_s12 + $0x230] sm:$0xf0] }
 0x80e   : > { %v5457_v26 = vadd.f32 %v5401_v3, %v5262_v59  ;;  %6695 = vmatpush.bf16.msrb.mxu2 %v10746_v51 }
 0x80f   : > { %v5490_v50 = vpack.c.bf16 %v5454_v53, %v5453_v44  ;;  %v10727_v44 = vld [vmem:[%s17923_s12 + $0x290] sm:$0xf0]  ;;  %v12240_v53 = vld [vmem:[%s17923_s12 + $0x384] sm:$0xf]  ;;  %6723 = vmatpush.bf16.msrb.mxu3 %v10874_v34 }
 0x810   : > { %v5305_v19 = vpop.f32.mrf.mxu2  ;;  %v5349_v40 = vpop.f32.mrf.mxu3  ;;  %v11991_v6 = vld [vmem:[#allocation2 + $0x84] sm:$0xf0]  ;;  %v10367_v52 = vld [vmem:[#allocation2 + $0x88] sm:$0xf0]  ;;  %v10730_v12 = vor.u32 %v12208_v37, %v10727_v44 }
 0x811   : > { %5518 = vst [vmem:[#allocation2 + $0x98] sm:$0xff] %v5490_v50  ;;  %v5306_v57 = vadd.f32 %v5305_v19, %v15831_v58  ;;  %v5219_v2 = vpop.f32.mrf.mxu0  ;;  %v5263_v39 = vpop.f32.mrf.mxu1  ;;  %v16108_v48 = vor.u32 %v11991_v6, %v10365_v4  ;;  %v16110_v14 = vor.u32 %v11989_v9, %v10367_v52  ;;  %v10855_v4 = vld [vmem:[%s17923_s12 + $0x390] sm:$0xf0]  ;;  %v1647_v6 = vld [vmem:[#allocation2 + $0xc8] sm:$0xff] }
 0x812   : > { %v5220_v25 = vadd.f32 %v5219_v2, %v15808_v36  ;;  %v10858_v19 = vor.u32 %v12240_v53, %v10855_v4  ;;  %6696 = vmatpush.bf16.msrb.mxu2 %v10730_v12  ;;  %v5409_v27 = vunpack.c.l.bf16 %v1647_v6  ;;  %v5410_v16 = vunpack.c.h.bf16 %v1647_v6  ;;  %v10807_v53 = vld [vmem:[%s17923_s12 + $0x330] sm:$0xf0]  ;;  %v10527_v12 = vld [vmem:[%s17923_s12 + $0xf8] sm:$0xf0]  ;;  %v12189_v4 = vld [vmem:[%s17923_s12 + $0x1ec] sm:$0xf] }
 0x813   : > { %v5350_v7 = vadd.f32 %v5349_v40, %v5306_v57  ;;  %6589 = vmatmul.bf16.vlgmr.msra.gmra.mxu2 %v16108_v48  ;;  %6617 = vmatmul.bf16.vlgmr.msra.gmra.mxu3 %v16110_v14 }
 0x814   : > { %v5264_v17 = vadd.f32 %v5263_v39, %v5220_v25  ;;  %6724 = vmatpush.bf16.msrb.mxu3 %v10858_v19  ;;  %v10695_v25 = vld [vmem:[%s17923_s12 + $0x250] sm:$0xf0] }
 0x815   : > { %v5458_v42 = vadd.f32 %v5402_v24, %v5350_v7 }
 0x816   : > { %v5461_v61 = vadd.f32 %v5405_v54, %v5264_v17  ;;  %6697 = vmatpush.bf16.msrb.mxu2 %v10714_v21 }
 0x817   : > { %v5492_v56 = vpack.c.bf16 %v5458_v42, %v5457_v26  ;;  %v10839_v26 = vld [vmem:[%s17923_s12 + $0x370] sm:$0xf0]  ;;  %v12200_v42 = vld [vmem:[%s17923_s12 + $0x244] sm:$0xf] }
 0x818   : > { %v5307_v45 = vpop.f32.mrf.mxu2  ;;  %v5351_v0 = vpop.f32.mrf.mxu3  ;;  %v10381_v9 = vld [vmem:[#allocation2 + $0x98] sm:$0xf]  ;;  %v11993_v39 = vld [vmem:[#allocation2 + $0x9c] sm:$0xf]  ;;  %v10842_v23 = vor.u32 %v12236_v28, %v10839_v26  ;;  %v10698_v17 = vor.u32 %v12200_v42, %v10695_v25  ;;  %v12185_v25 = vld [vmem:[%s17923_s12 + $0x1cc] sm:$0xf] }
 0x819   : > { %5520 = vst [vmem:[#allocation2 + $0xa8] sm:$0xff] %v5492_v56  ;;  %v5308_v5 = vadd.f32 %v5307_v45, %v15831_v58  ;;  %v5222_v43 = vpop.f32.mrf.mxu0  ;;  %v5266_v20 = vpop.f32.mrf.mxu1  ;;  %v10823_v56 = vld [vmem:[%s17923_s12 + $0x350] sm:$0xf0]  ;;  %v10511_v42 = vld [vmem:[%s17923_s12 + $0xd8] sm:$0xf0] }
 0x81a   : > { %v5223_v41 = vadd.f32 %v5222_v43, %v15808_v36  ;;  %6725 = vmatpush.bf16.msrb.mxu3 %v10842_v23  ;;  %6698 = vmatpush.bf16.msrb.mxu2 %v10698_v17  ;;  %v12181_v17 = vld [vmem:[%s17923_s12 + $0x1ac] sm:$0xf] }
 0x81b   : > { %v5352_v60 = vadd.f32 %v5351_v0, %v5308_v5  ;;  %v10826_v5 = vor.u32 %v12232_v15, %v10823_v56  ;;  %v10639_v56 = vld [vmem:[%s17923_s12 + $0x1d8] sm:$0xf0] }
 0x81c   : > { %6660 = vmatmul.bf16.gmra.mxu0 %v15914_v13  ;;  %6688 = vmatmul.bf16.gmra.mxu1 %v15916_v35  ;;  %v5267_v52 = vadd.f32 %v5266_v20, %v5223_v41  ;;  %v1649_v20 = vld [vmem:[#allocation2 + $0xd8] sm:$0xff]  ;;  %v12228_v41 = vld [vmem:[%s17923_s12 + $0x324] sm:$0xf] }
 0x81d   : > { %v5462_v50 = vadd.f32 %v5406_v33, %v5352_v60  ;;  %v5414_v37 = vunpack.c.h.bf16 %v1649_v20 }
 0x81e   : > { %v5465_v8 = vadd.f32 %v5409_v27, %v5267_v52  ;;  %6726 = vmatpush.bf16.msrb.mxu3 %v10826_v5  ;;  %v12192_v52 = vld [vmem:[%s17923_s12 + $0x204] sm:$0xf]  ;;  %v12153_v27 = vld [vmem:[%s17923_s12 + $0xcc] sm:$0xf] }
 0x81f   : > { %v5494_v40 = vpack.c.bf16 %v5462_v50, %v5461_v61  ;;  %v10810_v61 = vor.u32 %v12228_v41, %v10807_v53  ;;  %v12157_v50 = vld [vmem:[%s17923_s12 + $0xec] sm:$0xf]  ;;  %v10514_v15 = vor.u32 %v12153_v27, %v10511_v42 }
 0x820   : > { %v5310_v59 = vpop.f32.mrf.mxu2  ;;  %v5354_v57 = vpop.f32.mrf.mxu3  ;;  %v11995_v2 = vld [vmem:[#allocation2 + $0xa4] sm:$0xf0]  ;;  %v10383_v49 = vld [vmem:[#allocation2 + $0xa8] sm:$0xf0]  ;;  %v10530_v6 = vor.u32 %v12157_v50, %v10527_v12  ;;  %v10591_v50 = vld [vmem:[%s17923_s12 + $0x178] sm:$0xf0] }
 0x821   : > { %5522 = vst [vmem:[#allocation2 + $0xb8] sm:$0xff] %v5494_v40  ;;  %v5311_v63 = vadd.f32 %v5310_v59, %v15831_v58  ;;  %v5224_v22 = vpop.f32.mrf.mxu0  ;;  %v5268_v3 = vpop.f32.mrf.mxu1  ;;  %v16168_v7 = vor.u32 %v11995_v2, %v10381_v9  ;;  %v16170_v24 = vor.u32 %v11993_v39, %v10383_v49  ;;  %v10655_v9 = vld [vmem:[%s17923_s12 + $0x1f8] sm:$0xf0]  ;;  %v10663_v59 = vld [vmem:[%s17923_s12 + $0x210] sm:$0xf0] }
 0x822   : > { %v5225_v0 = vadd.f32 %v5224_v22, %v15808_v36  ;;  %v12196_v36 = vld [vmem:[%s17923_s12 + $0x224] sm:$0xf]  ;;  %6727 = vmatpush.bf16.msrb.mxu3 %v10810_v61  ;;  %v10666_v2 = vor.u32 %v12192_v52, %v10663_v59  ;;  %v10791_v49 = vld [vmem:[%s17923_s12 + $0x310] sm:$0xf0]  ;;  %6861 = vmatpush.bf16.msrb.mxu0 %v10530_v6  ;;  %v12129_v27 = vld [vmem:[%s17923_s12 + $0xc] sm:$0xf] }
 0x823   : > { %v5355_v62 = vadd.f32 %v5354_v57, %v5311_v63  ;;  %6594 = vmatmul.bf16.gmra.mxu2 %v16168_v7  ;;  %6622 = vmatmul.bf16.gmra.mxu3 %v16170_v24  ;;  %v10682_v44 = vor.u32 %v12196_v36, %v10679_v46  ;;  %v10658_v57 = vor.u32 %v12189_v4, %v10655_v9  ;;  %v12224_v39 = vld [vmem:[%s17923_s12 + $0x304] sm:$0xf]  ;;  %v10607_v36 = vld [vmem:[%s17923_s12 + $0x198] sm:$0xf0]  ;;  %v12137_v4 = vld [vmem:[%s17923_s12 + $0x4c] sm:$0xf] }
 0x824   : > { %v5269_v10 = vadd.f32 %v5268_v3, %v5225_v0  ;;  %v10794_v1 = vor.u32 %v12224_v39, %v10791_v49  ;;  %v10495_v0 = vld [vmem:[%s17923_s12 + $0xb8] sm:$0xf0] }
 0x825   : > { %v5466_v45 = vadd.f32 %v5410_v16, %v5355_v62  ;;  %6699 = vmatpush.bf16.msrb.mxu2 %v10682_v44  ;;  %6889 = vmatpush.bf16.msrb.mxu1 %v10658_v57 }
 0x826   : > { %6728 = vmatpush.bf16.msrb.mxu3 %v10794_v1  ;;  %6862 = vmatpush.bf16.msrb.mxu0 %v10514_v15  ;;  %v10559_v1 = vld [vmem:[%s17923_s12 + $0x138] sm:$0xf0] }
 0x827   : > { %v5496_v43 = vpack.c.bf16 %v5466_v45, %v5465_v8  ;;  %v10642_v8 = vor.u32 %v12185_v25, %v10639_v56  ;;  %v12149_v45 = vld [vmem:[%s17923_s12 + $0xac] sm:$0xf]  ;;  %v10543_v56 = vld [vmem:[%s17923_s12 + $0x118] sm:$0xf0] }
 0x828   : > { %v5312_v11 = vpop.f32.mrf.mxu2  ;;  %v5356_v33 = vpop.f32.mrf.mxu3  ;;  %v10397_v22 = vld [vmem:[#allocation2 + $0xb8] sm:$0xf]  ;;  %v11997_v3 = vld [vmem:[#allocation2 + $0xbc] sm:$0xf]  ;;  %v10498_v5 = vor.u32 %v12149_v45, %v10495_v0 }
 0x829   : > { %5524 = vst [vmem:[#allocation2 + $0xc8] sm:$0xff] %v5496_v43  ;;  %v5313_v30 = vadd.f32 %v5312_v11, %v15831_v58  ;;  %v6534_v54 = vpop.f32.mrf.mxu0  ;;  %v6562_v60 = vpop.f32.mrf.mxu1  ;;  %v5413_v58 = vunpack.c.l.bf16 %v1649_v20  ;;  %6700 = vmatpush.bf16.msrb.mxu2 %v10666_v2  ;;  %v10623_v43 = vld [vmem:[%s17923_s12 + $0x1b8] sm:$0xf0]  ;;  %6890 = vmatpush.bf16.msrb.mxu1 %v10642_v8  ;;  %v12145_v11 = vld [vmem:[%s17923_s12 + $0x8c] sm:$0xf] }
 0x82a   : > { %v16200_v51 = vadd.f32 %v6562_v60, %v6534_v54  ;;  %v10626_v20 = vor.u32 %v12181_v17, %v10623_v43  ;;  %6863 = vmatpush.bf16.msrb.mxu0 %v10498_v5  ;;  %v10575_v2 = vld [vmem:[%s17923_s12 + $0x158] sm:$0xf0]  ;;  %v10781_v43 = vld [vmem:[%s17923_s12 + $0x2e8] sm:$0xf] }
 0x82b   : > { %v5357_v34 = vadd.f32 %v5356_v33, %v5313_v30  ;;  %v5469_v19 = vadd.f32 %v5413_v58, %v5269_v10  ;;  %v10479_v10 = vld [vmem:[%s17923_s12 + $0x98] sm:$0xf0]  ;;  %v12177_v30 = vld [vmem:[%s17923_s12 + $0x18c] sm:$0xf] }
 0x82c   : > { %6757 = vmatmul.bf16.vlgmr.msra.gmra.mxu0 %v15753_v18  ;;  %6785 = vmatmul.bf16.vlgmr.msra.gmra.mxu1 %v15755_v38  ;;  %v10482_v33 = vor.u32 %v12145_v11, %v10479_v10  ;;  %v10610_v41 = vor.u32 %v12177_v30, %v10607_v36  ;;  %v12141_v58 = vld [vmem:[%s17923_s12 + $0x6c] sm:$0xf]  ;;  %v10909_v11 = vld [vmem:[%s17923_s12 + $0x3e8] sm:$0xf]  ;;  %v12255_v30 = vld [vmem:[%s17923_s12 + $0x3f4] sm:$0xf0] }
 0x82d   : > { %v5470_v40 = vadd.f32 %v5414_v37, %v5357_v34  ;;  %6891 = vmatpush.bf16.msrb.mxu1 %v10626_v20  ;;  %v10463_v34 = vld [vmem:[%s17923_s12 + $0x78] sm:$0xf0]  ;;  %v12173_v37 = vld [vmem:[%s17923_s12 + $0x16c] sm:$0xf]  ;;  %v12223_v20 = vld [vmem:[%s17923_s12 + $0x2f4] sm:$0xf0] }
 0x82e   : > { %6864 = vmatpush.bf16.msrb.mxu0 %v10482_v33  ;;  %v10466_v61 = vor.u32 %v12141_v58, %v10463_v34  ;;  %v10594_v12 = vor.u32 %v12173_v37, %v10591_v50  ;;  %v10782_v10 = vor.u32 %v12223_v20, %v10781_v43  ;;  %v10910_v33 = vor.u32 %v12255_v30, %v10909_v11  ;;  %v10893_v36 = vld [vmem:[%s17923_s12 + $0x3c8] sm:$0xf]  ;;  %v12215_v50 = vld [vmem:[%s17923_s12 + $0x2b4] sm:$0xf0] }
 0x82f   : > { %v5498_v63 = vpack.c.bf16 %v5470_v40, %v5469_v19  ;;  %v10447_v19 = vld [vmem:[%s17923_s12 + $0x58] sm:$0xf0]  ;;  %v12169_v40 = vld [vmem:[%s17923_s12 + $0x14c] sm:$0xf]  ;;  %v10685_v11 = vld [vmem:[%s17923_s12 + $0x228] sm:$0xf] }
 0x830   : > { %v11999_v32 = vld [vmem:[#allocation2 + $0xc4] sm:$0xf0]  ;;  %v10399_v28 = vld [vmem:[#allocation2 + $0xc8] sm:$0xf0]  ;;  %v10450_v57 = vor.u32 %v12137_v4, %v10447_v19  ;;  %v10578_v49 = vor.u32 %v12169_v40, %v10575_v2  ;;  %6805 = vmatpush.bf16.msra.mxu2 %v10782_v10  ;;  %6833 = vmatpush.bf16.msra.mxu3 %v10910_v33  ;;  %v12247_v19 = vld [vmem:[%s17923_s12 + $0x3b4] sm:$0xf0] }
 0x831   : > { %5526 = vst [vmem:[#allocation2 + $0xd8] sm:$0xff] %v5498_v63  ;;  %v6536_v62 = vpop.f32.mrf.mxu0  ;;  %v6564_v16 = vpop.f32.mrf.mxu1  ;;  %v16243_v21 = vor.u32 %v11999_v32, %v10397_v22  ;;  %v16245_v26 = vor.u32 %v11997_v3, %v10399_v28  ;;  %v5851_v44 = vunpack.c.l.b16 %v5498_v63  ;;  %v5852_v53 = vunpack.c.h.b16 %v5498_v63  ;;  %6892 = vmatpush.bf16.msrb.mxu1 %v10610_v41  ;;  %v12133_v63 = vld [vmem:[%s17923_s12 + $0x2c] sm:$0xf]  ;;  %v10431_v22 = vld [vmem:[%s17923_s12 + $0x38] sm:$0xf0] }
 0x832   : > { %v16253_v23 = vadd.f32 %v6564_v16, %v6536_v62  ;;  %6865 = vmatpush.bf16.msrb.mxu0 %v10466_v61  ;;  %v12165_v3 = vld [vmem:[%s17923_s12 + $0x12c] sm:$0xf]  ;;  %v10434_v32 = vor.u32 %v12133_v63, %v10431_v22  ;;  %v10415_v62 = vld [vmem:[%s17923_s12 + $0x18] sm:$0xf0]  ;;  %v12251_v41 = vld [vmem:[%s17923_s12 + $0x3d4] sm:$0xf0] }
 0x833   : > { %6599 = vmatmul.bf16.gmra.mxu2 %v16243_v21  ;;  %6627 = vmatmul.bf16.gmra.mxu3 %v16245_v26  ;;  %v16309_v52 = vpack.c.b16 %v5851_v44, %v5851_v44  ;;  %v16311_v59 = vpack.c.b16 %v5852_v53, %v5852_v53  ;;  %v10562_v28 = vor.u32 %v12165_v3, %v10559_v1  ;;  %v12161_v16 = vld [vmem:[%s17923_s12 + $0x10c] sm:$0xf]  ;;  %v10749_v61 = vld [vmem:[%s17923_s12 + $0x2a8] sm:$0xf]  ;;  %v12199_v10 = vld [vmem:[%s17923_s12 + $0x234] sm:$0xf0] }
 0x834   : > { %v10418_v15 = vor.u32 %v12129_v27, %v10415_v62  ;;  %v10546_v45 = vor.u32 %v12161_v16, %v10543_v56  ;;  %v10894_v34 = vor.u32 %v12251_v41, %v10893_v36  ;;  %v10750_v4 = vor.u32 %v12215_v50, %v10749_v61  ;;  %v10717_v1 = vld [vmem:[%s17923_s12 + $0x268] sm:$0xf]  ;;  %v12239_v62 = vld [vmem:[%s17923_s12 + $0x374] sm:$0xf0]  ;;  %v11077_v36 = vld [vmem:[%s17922_s11 + $0xe0] sm:$0xf] }
 0x835   : > { %6893 = vmatpush.bf16.msrb.mxu1 %v10594_v12  ;;  %v10877_v12 = vld [vmem:[%s17923_s12 + $0x3a8] sm:$0xf]  ;;  %v12235_v56 = vld [vmem:[%s17923_s12 + $0x354] sm:$0xf0]  ;;  %v12030_v41 = vld [vmem:[%s17922_s11 + $0xec] sm:$0xf0] }
 0x836   : > { %6866 = vmatpush.bf16.msrb.mxu0 %v10450_v57  ;;  %6834 = vmatpush.bf16.msra.mxu3 %v10894_v34  ;;  %v10878_v40 = vor.u32 %v12247_v19, %v10877_v12  ;;  %v10861_v57 = vld [vmem:[%s17923_s12 + $0x388] sm:$0xf]  ;;  %v11078_v34 = vor.u32 %v12030_v41, %v11077_v36  ;;  %v12227_v12 = vld [vmem:[%s17923_s12 + $0x314] sm:$0xf0]  ;;  %v11061_v19 = vld [vmem:[%s17922_s11 + $0xc0] sm:$0xf] }
 0x837   : > { %v10701_v16 = vld [vmem:[%s17923_s12 + $0x248] sm:$0xf]  ;;  %v11125_v36 = vld [vmem:[%s17922_s11 + $0x140] sm:$0xf] }
 0x838   : > { %v10813_v30 = vld [vmem:[%s17923_s12 + $0x328] sm:$0xf] }
 0x839   : > { %v6539_v54 = vpop.f32.mrf.mxu0  ;;  %v6567_v60 = vpop.f32.mrf.mxu1  ;;  %6894 = vmatpush.bf16.msrb.mxu1 %v10578_v49  ;;  %v12243_v49 = vld [vmem:[%s17923_s12 + $0x394] sm:$0xf0]  ;;  %v10797_v50 = vld [vmem:[%s17923_s12 + $0x308] sm:$0xf] }
 0x83a   : > { %v16284_v46 = vadd.f32 %v6567_v60, %v6539_v54  ;;  %6867 = vmatpush.bf16.msrb.mxu0 %v10434_v32  ;;  %v10765_v54 = vld [vmem:[%s17923_s12 + $0x2c8] sm:$0xf]  ;;  %v12219_v60 = vld [vmem:[%s17923_s12 + $0x2d4] sm:$0xf0]  ;;  %6835 = vmatpush.bf16.msra.mxu3 %v10878_v40  ;;  %v10862_v63 = vor.u32 %v12243_v49, %v10861_v57  ;;  %v12026_v40 = vld [vmem:[%s17922_s11 + $0xcc] sm:$0xf0] }
 0x83b   : > { %v10766_v58 = vor.u32 %v12219_v60, %v10765_v54  ;;  %v12207_v32 = vld [vmem:[%s17923_s12 + $0x274] sm:$0xf0]  ;;  %v10686_v54 = vor.u32 %v12199_v10, %v10685_v11  ;;  %v12058_v49 = vld [vmem:[%s17922_s11 + $0x1cc] sm:$0xf0]  ;;  %v11013_v11 = vld [vmem:[%s17922_s11 + $0x60] sm:$0xf] }
 0x83c   : > { %6762 = vmatmul.bf16.gmra.mxu0 %v15814_v29  ;;  %6790 = vmatmul.bf16.gmra.mxu1 %v15816_v47  ;;  %v10718_v27 = vor.u32 %v12207_v32, %v10717_v1  ;;  %v12231_v60 = vld [vmem:[%s17923_s12 + $0x334] sm:$0xf0]  ;;  %v12022_v1 = vld [vmem:[%s17922_s11 + $0xac] sm:$0xf0]  ;;  %v11173_v32 = vld [vmem:[%s17922_s11 + $0x1a0] sm:$0xf] }
 0x83d   : > { %6895 = vmatpush.bf16.msrb.mxu1 %v10562_v28  ;;  %6806 = vmatpush.bf16.msra.mxu2 %v10766_v58  ;;  %v10845_v28 = vld [vmem:[%s17923_s12 + $0x368] sm:$0xf]  ;;  %v10814_v33 = vor.u32 %v12231_v60, %v10813_v30  ;;  %v11205_v58 = vld [vmem:[%s17922_s11 + $0x1e0] sm:$0xf]  ;;  %v12014_v10 = vld [vmem:[%s17922_s11 + $0x6c] sm:$0xf0] }
 0x83e   : > { %6868 = vmatpush.bf16.msrb.mxu0 %v10418_v15  ;;  %6836 = vmatpush.bf16.msra.mxu3 %v10862_v63  ;;  %v10829_v15 = vld [vmem:[%s17923_s12 + $0x348] sm:$0xf]  ;;  %v11141_v30 = vld [vmem:[%s17922_s11 + $0x160] sm:$0xf] }
 0x83f   : > { %v10997_v60 = vld [vmem:[%s17922_s11 + $0x40] sm:$0xf] }
 0x841   : > { %v6541_v6 = vpop.f32.mrf.mxu0  ;;  %v6569_v9 = vpop.f32.mrf.mxu1  ;;  %6896 = vmatpush.bf16.msrb.mxu1 %v10546_v45  ;;  %6807 = vmatpush.bf16.msra.mxu2 %v10750_v4  ;;  %v10798_v4 = vor.u32 %v12227_v12, %v10797_v50  ;;  %v11109_v50 = vld [vmem:[%s17922_s11 + $0x120] sm:$0xf] }
 0x842   : > { %v16316_v39 = vadd.f32 %v6569_v9, %v6541_v6  ;;  %v10733_v6 = vld [vmem:[%s17923_s12 + $0x288] sm:$0xf]  ;;  %v12211_v9 = vld [vmem:[%s17923_s12 + $0x294] sm:$0xf0]  ;;  %7687 = vmatpush.bf16.msra.mxu0 %v11078_v34 }
 0x843   : > { %6604 = vmatmul.bf16.gmra.mxu2 %v16309_v52  ;;  %6632 = vmatmul.bf16.gmra.mxu3 %v16311_v59  ;;  %v10734_v2 = vor.u32 %v12211_v9, %v10733_v6  ;;  %v11189_v6 = vld [vmem:[%s17922_s11 + $0x1c0] sm:$0xf] }
 0x845   : > { %6808 = vmatpush.bf16.msra.mxu2 %v10734_v2  ;;  %v11062_v2 = vor.u32 %v12026_v40, %v11061_v19  ;;  %v10965_v40 = vld [vmem:[%s17922_s11] sm:$0xf] }
 0x847   : > { %7688 = vmatpush.bf16.msra.mxu0 %v11062_v2 }
 0x849   : > { %v6544_v42 = vpop.f32.mrf.mxu0  ;;  %v6572_v25 = vpop.f32.mrf.mxu1  ;;  %6809 = vmatpush.bf16.msra.mxu2 %v10718_v27  ;;  %v12054_v27 = vld [vmem:[%s17922_s11 + $0x1ac] sm:$0xf0] }
 0x84a   : > { %v16344_v8 = vadd.f32 %v6572_v25, %v6544_v42  ;;  %v12203_v42 = vld [vmem:[%s17923_s12 + $0x254] sm:$0xf0]  ;;  %v10846_v25 = vor.u32 %v12239_v62, %v10845_v28  ;;  %v11174_v62 = vor.u32 %v12054_v27, %v11173_v32 }
 0x84b   : > { %v10702_v45 = vor.u32 %v12203_v42, %v10701_v16  ;;  %v11029_v16 = vld [vmem:[%s17922_s11 + $0x80] sm:$0xf]  ;;  %v12018_v42 = vld [vmem:[%s17922_s11 + $0x8c] sm:$0xf0] }
 0x84c   : > { %6767 = vmatmul.bf16.gmra.mxu0 %v15890_v55  ;;  %6795 = vmatmul.bf16.gmra.mxu1 %v15892_v31 }
 0x84d   : > { %6837 = vmatpush.bf16.msra.mxu3 %v10846_v25  ;;  %6810 = vmatpush.bf16.msra.mxu2 %v10702_v45  ;;  %v11157_v25 = vld [vmem:[%s17922_s11 + $0x180] sm:$0xf]  ;;  %v11030_v45 = vor.u32 %v12018_v42, %v11029_v16  ;;  %v10783_v16 = vld [vmem:[%s17923_s12 + $0x2f8] sm:$0xf0] }
 0x84e   : > { %v10911_v42 = vld [vmem:[%s17923_s12 + $0x3f8] sm:$0xf0] }
 0x851   : > { %v6546_v0 = vpop.f32.mrf.mxu0  ;;  %v6574_v17 = vpop.f32.mrf.mxu1  ;;  %6811 = vmatpush.bf16.msra.mxu2 %v10686_v54  ;;  %v11014_v54 = vor.u32 %v12014_v10, %v11013_v11 }
 0x852   : > { %v16348_v5 = vadd.f32 %v6574_v17, %v6546_v0  ;;  %v10830_v0 = vor.u32 %v12235_v56, %v10829_v15 }
 0x853   : > { %6701 = vmatmul.bf16.vlgmr.msrb.gmra.mxu2 %v16108_v48  ;;  %6729 = vmatmul.bf16.vlgmr.msrb.gmra.mxu3 %v16110_v14 }
 0x854   : > { %6838 = vmatpush.bf16.msra.mxu3 %v10830_v0  ;;  %v12050_v0 = vld [vmem:[%s17922_s11 + $0x18c] sm:$0xf0] }
 0x858   : > { %6839 = vmatpush.bf16.msra.mxu3 %v10814_v33  ;;  %v12010_v33 = vld [vmem:[%s17922_s11 + $0x4c] sm:$0xf0] }
 0x859   : > { %v6549_v37 = vpop.f32.mrf.mxu0  ;;  %v6577_v44 = vpop.f32.mrf.mxu1  ;;  %v10998_v34 = vor.u32 %v12010_v33, %v10997_v60 }
 0x85a   : > { %v16376_v53 = vadd.f32 %v6577_v44, %v6549_v37  ;;  %v12195_v37 = vld [vmem:[%s17923_s12 + $0x214] sm:$0xf0] }
 0x85c   : > { %6772 = vmatmul.bf16.gmra.mxu0 %v15914_v13  ;;  %6800 = vmatmul.bf16.gmra.mxu1 %v15916_v35 }
 0x85d   : > { %6840 = vmatpush.bf16.msra.mxu3 %v10798_v4  ;;  %v12038_v4 = vld [vmem:[%s17922_s11 + $0x12c] sm:$0xf0] }
 0x85e   : > { %v11110_v19 = vor.u32 %v12038_v4, %v11109_v50  ;;  %v10735_v50 = vld [vmem:[%s17923_s12 + $0x298] sm:$0xf0] }
 0x85f   : > { %v10863_v4 = vld [vmem:[%s17923_s12 + $0x398] sm:$0xf0] }
 0x861   : > { %v6551_v22 = vpop.f32.mrf.mxu0  ;;  %v6579_v3 = vpop.f32.mrf.mxu1 }
 0x862   : > { %v11190_v22 = vor.u32 %v12058_v49, %v11189_v6  ;;  %v11045_v3 = vld [vmem:[%s17922_s11 + $0xa0] sm:$0xf]  ;;  %v12002_v6 = vld [vmem:[%s17922_s11 + $0xc] sm:$0xf0] }
 0x863   : > { %6706 = vmatmul.bf16.gmra.mxu2 %v16168_v7  ;;  %6734 = vmatmul.bf16.gmra.mxu3 %v16170_v24  ;;  %v11046_v28 = vor.u32 %v12022_v1, %v11045_v3  ;;  %v10966_v49 = vor.u32 %v12002_v6, %v10965_v40 }
 0x865   : > { %7689 = vmatpush.bf16.msra.mxu0 %v11046_v28 }
 0x869   : > { %v6646_v17 = vpop.f32.mrf.mxu0  ;;  %v6674_v43 = vpop.f32.mrf.mxu1  ;;  %7690 = vmatpush.bf16.msra.mxu0 %v11030_v45  ;;  %v12217_v45 = vld [vmem:[%s17923_s12 + $0x2cc] sm:$0xf] }
 0x86a   : > { %v16430_v20 = vadd.f32 %v6674_v43, %v6646_v17  ;;  %v11158_v43 = vor.u32 %v12050_v0, %v11157_v25  ;;  %v10767_v0 = vld [vmem:[%s17923_s12 + $0x2d8] sm:$0xf0] }
 0x86b   : > { %v10770_v10 = vor.u32 %v12217_v45, %v10767_v0 }
 0x86c   : > { %6869 = vmatmul.bf16.vlgmr.msrb.gmra.mxu0 %v15753_v18  ;;  %6897 = vmatmul.bf16.vlgmr.msrb.gmra.mxu1 %v15755_v38  ;;  %v12062_v18 = vld [vmem:[%s17922_s11 + $0x1ec] sm:$0xf0]  ;;  %v10669_v38 = vld [vmem:[%s17923_s12 + $0x208] sm:$0xf] }
 0x86d   : > { %v11206_v44 = vor.u32 %v12062_v18, %v11205_v58  ;;  %v10670_v61 = vor.u32 %v12195_v37, %v10669_v38  ;;  %7691 = vmatpush.bf16.msra.mxu0 %v11014_v54  ;;  %v12042_v18 = vld [vmem:[%s17922_s11 + $0x14c] sm:$0xf0] }
 0x86e   : > { %v11126_v37 = vor.u32 %v12042_v18, %v11125_v36  ;;  %v12213_v36 = vld [vmem:[%s17923_s12 + $0x2ac] sm:$0xf] }
 0x86f   : > { %7715 = vmatpush.bf16.msra.mxu1 %v11206_v44  ;;  %6812 = vmatpush.bf16.msra.mxu2 %v10670_v61  ;;  %v10981_v44 = vld [vmem:[%s17922_s11 + $0x20] sm:$0xf]  ;;  %v12006_v61 = vld [vmem:[%s17922_s11 + $0x2c] sm:$0xf0] }
 0x870   : > { %v10982_v12 = vor.u32 %v12006_v61, %v10981_v44  ;;  %v12209_v61 = vld [vmem:[%s17923_s12 + $0x28c] sm:$0xf] }
 0x871   : > { %v6648_v9 = vpop.f32.mrf.mxu0  ;;  %v6676_v57 = vpop.f32.mrf.mxu1  ;;  %7692 = vmatpush.bf16.msra.mxu0 %v10998_v34  ;;  %v10879_v34 = vld [vmem:[%s17923_s12 + $0x3b8] sm:$0xf0] }
 0x872   : > { %v16482_v63 = vadd.f32 %v6676_v57, %v6648_v9  ;;  %v11093_v9 = vld [vmem:[%s17922_s11 + $0x100] sm:$0xf] }
 0x873   : > { %6711 = vmatmul.bf16.gmra.mxu2 %v16243_v21  ;;  %6739 = vmatmul.bf16.gmra.mxu3 %v16245_v26 }
 0x874   : > { %7716 = vmatpush.bf16.msra.mxu1 %v11190_v22  ;;  %v12034_v22 = vld [vmem:[%s17922_s11 + $0x10c] sm:$0xf0] }
 0x875   : > { %7693 = vmatpush.bf16.msra.mxu0 %v10982_v12  ;;  %v11094_v1 = vor.u32 %v12034_v22, %v11093_v9  ;;  %v12241_v12 = vld [vmem:[%s17923_s12 + $0x38c] sm:$0xf]  ;;  %v10847_v22 = vld [vmem:[%s17923_s12 + $0x378] sm:$0xf0] }
 0x878   : > { %7717 = vmatpush.bf16.msra.mxu1 %v11174_v62  ;;  %v12221_v62 = vld [vmem:[%s17923_s12 + $0x2ec] sm:$0xf] }
 0x879   : > { %v6651_v15 = vpop.f32.mrf.mxu0  ;;  %v6679_v56 = vpop.f32.mrf.mxu1  ;;  %7694 = vmatpush.bf16.msra.mxu0 %v10966_v49 }
 0x87a   : > { %v16510_v17 = vadd.f32 %v6679_v56, %v6651_v15 }
 0x87c   : > { %6874 = vmatmul.bf16.gmra.mxu0 %v15814_v29  ;;  %6902 = vmatmul.bf16.gmra.mxu1 %v15816_v47  ;;  %v12046_v29 = vld [vmem:[%s17922_s11 + $0x16c] sm:$0xf0] }
 0x87d   : > { %7718 = vmatpush.bf16.msra.mxu1 %v11158_v43  ;;  %v11142_v47 = vor.u32 %v12046_v29, %v11141_v30  ;;  %v12249_v43 = vld [vmem:[%s17923_s12 + $0x3cc] sm:$0xf]  ;;  %v10895_v30 = vld [vmem:[%s17923_s12 + $0x3d8] sm:$0xf0] }
 0x87e   : > { %v10898_v54 = vor.u32 %v12249_v43, %v10895_v30  ;;  %v11976_v30 = vld [vmem:[#allocation2 + $0x4] sm:$0xf] }
 0x881   : > { %v6653_v41 = vpop.f32.mrf.mxu0  ;;  %v6681_v58 = vpop.f32.mrf.mxu1  ;;  %7719 = vmatpush.bf16.msra.mxu1 %v11142_v47 }
 0x882   : > { %v16538_v38 = vadd.f32 %v6681_v58, %v6653_v41  ;;  %v12245_v41 = vld [vmem:[%s17923_s12 + $0x3ac] sm:$0xf] }
 0x883   : > { %6716 = vmatmul.bf16.gmra.mxu2 %v16309_v52  ;;  %6744 = vmatmul.bf16.gmra.mxu3 %v16311_v59  ;;  %v10882_v18 = vor.u32 %v12245_v41, %v10879_v34 }
 0x885   : > { %7720 = vmatpush.bf16.msra.mxu1 %v11126_v37 }
 0x889   : > { %v6656_v57 = vpop.f32.mrf.mxu0  ;;  %v6684_v2 = vpop.f32.mrf.mxu1  ;;  %7721 = vmatpush.bf16.msra.mxu1 %v11110_v19  ;;  %v10866_v19 = vor.u32 %v12241_v12, %v10863_v4  ;;  %v12193_v4 = vld [vmem:[%s17923_s12 + $0x20c] sm:$0xf] }
 0x88a   : > { %v16566_v3 = vadd.f32 %v6684_v2, %v6656_v57  ;;  %v12205_v57 = vld [vmem:[%s17923_s12 + $0x26c] sm:$0xf] }
 0x88b   : > { %v12237_v2 = vld [vmem:[%s17923_s12 + $0x36c] sm:$0xf] }
 0x88c   : > { %6879 = vmatmul.bf16.gmra.mxu0 %v15890_v55  ;;  %6907 = vmatmul.bf16.gmra.mxu1 %v15892_v31  ;;  %v12253_v55 = vld [vmem:[%s17923_s12 + $0x3ec] sm:$0xf]  ;;  %v10786_v31 = vor.u32 %v12221_v62, %v10783_v16  ;;  %v10703_v16 = vld [vmem:[%s17923_s12 + $0x258] sm:$0xf0] }
 0x88d   : > { %7722 = vmatpush.bf16.msra.mxu1 %v11094_v1  ;;  %v10914_v25 = vor.u32 %v12253_v55, %v10911_v42  ;;  %v10850_v1 = vor.u32 %v12237_v2, %v10847_v22  ;;  %v12201_v62 = vld [vmem:[%s17923_s12 + $0x24c] sm:$0xf]  ;;  %v11978_v42 = vld [vmem:[#allocation2 + $0xc] sm:$0xf0]  ;;  %v11063_v22 = vld [vmem:[%s17922_s11 + $0xd0] sm:$0xf0] }
 0x88e   : > { %6917 = vmatpush.bf16.msrb.mxu2 %v10786_v31  ;;  %v12233_v55 = vld [vmem:[%s17923_s12 + $0x34c] sm:$0xf] }
 0x88f   : > { %6945 = vmatpush.bf16.msrb.mxu3 %v10914_v25  ;;  %v10919_v25 = vld [vmem:[#allocation2 + $0x10] sm:$0xf0] }
 0x891   : > { %v6658_v32 = vpop.f32.mrf.mxu0  ;;  %v6686_v28 = vpop.f32.mrf.mxu1 }
 0x892   : > { %v16570_v27 = vadd.f32 %v6686_v28, %v6658_v32  ;;  %6918 = vmatpush.bf16.msrb.mxu2 %v10770_v10  ;;  %v10917_v10 = vld [vmem:[#allocation2] sm:$0xf] }
 0x893   : > { %6813 = vmatmul.bf16.vlgmr.msra.gmra.mxu2 %v16108_v48  ;;  %6841 = vmatmul.bf16.vlgmr.msra.gmra.mxu3 %v16110_v14 }
 0x894   : > { %6946 = vmatpush.bf16.msrb.mxu3 %v10898_v54 }
 0x896   : > { %v6590_v15 = vpop.f32.mrf.mxu2  ;;  %v6618_v56 = vpop.f32.mrf.mxu3 }
 0x897   : > { %v6591_v11 = vadd.f32 %v6590_v15, %v16200_v51  ;;  %v10751_v51 = vld [vmem:[%s17923_s12 + $0x2b8] sm:$0xf0]  ;;  %v10706_v15 = vor.u32 %v12201_v62, %v10703_v16  ;;  %v11191_v16 = vld [vmem:[%s17922_s11 + $0x1d0] sm:$0xf0] }
 0x898   : > { %v10754_v58 = vor.u32 %v12213_v36, %v10751_v51  ;;  %6947 = vmatpush.bf16.msrb.mxu3 %v10882_v18  ;;  %v10687_v36 = vld [vmem:[%s17923_s12 + $0x238] sm:$0xf0]  ;;  %v12229_v51 = vld [vmem:[%s17923_s12 + $0x32c] sm:$0xf]  ;;  %v12028_v18 = vld [vmem:[%s17922_s11 + $0xe4] sm:$0xf] }
 0x899   : > { %v16599_v29 = vadd.f32 %v6618_v56, %v6591_v11  ;;  %v6661_v47 = vpop.f32.mrf.mxu0  ;;  %v6689_v60 = vpop.f32.mrf.mxu1  ;;  %v10831_v56 = vld [vmem:[%s17923_s12 + $0x358] sm:$0xf0] }
 0x89a   : > { %v16601_v33 = vadd.f32 %v6689_v60, %v6661_v47  ;;  %6919 = vmatpush.bf16.msrb.mxu2 %v10754_v58  ;;  %v10834_v45 = vor.u32 %v12233_v55, %v10831_v56  ;;  %v16663_v47 = vor.u32 %v11978_v42, %v10917_v10  ;;  %v12197_v60 = vld [vmem:[%s17923_s12 + $0x22c] sm:$0xf]  ;;  %v10815_v58 = vld [vmem:[%s17923_s12 + $0x338] sm:$0xf0]  ;;  %v12020_v42 = vld [vmem:[%s17922_s11 + $0xa4] sm:$0xf] }
 0x89b   : > { %v10690_v41 = vor.u32 %v12197_v60, %v10687_v36  ;;  %v10818_v34 = vor.u32 %v12229_v51, %v10815_v58  ;;  %v11982_v60 = vld [vmem:[#allocation2 + $0x2c] sm:$0xf0]  ;;  %v10935_v36 = vld [vmem:[#allocation2 + $0x30] sm:$0xf0]  ;;  %v12016_v51 = vld [vmem:[%s17922_s11 + $0x84] sm:$0xf] }
 0x89c   : > { %6884 = vmatmul.bf16.gmra.mxu0 %v15914_v13  ;;  %6912 = vmatmul.bf16.gmra.mxu1 %v15916_v35  ;;  %v10738_v35 = vor.u32 %v12209_v61, %v10735_v50  ;;  %v11207_v50 = vld [vmem:[%s17922_s11 + $0x1f0] sm:$0xf0]  ;;  %v12048_v58 = vld [vmem:[%s17922_s11 + $0x184] sm:$0xf] }
 0x89d   : > { %6948 = vmatpush.bf16.msrb.mxu3 %v10866_v19  ;;  %v10671_v19 = vld [vmem:[%s17923_s12 + $0x218] sm:$0xf0] }
 0x89e   : > { %v6592_v37 = vpop.f32.mrf.mxu2  ;;  %v6620_v44 = vpop.f32.mrf.mxu3  ;;  %6920 = vmatpush.bf16.msrb.mxu2 %v10738_v35 }
 0x89f   : > { %v6593_v13 = vadd.f32 %v6592_v37, %v16253_v23  ;;  %v10719_v23 = vld [vmem:[%s17923_s12 + $0x278] sm:$0xf0]  ;;  %v11079_v37 = vld [vmem:[%s17922_s11 + $0xf0] sm:$0xf0] }
 0x8a0   : > { %v10722_v49 = vor.u32 %v12205_v57, %v10719_v23  ;;  %v11082_v61 = vor.u32 %v12028_v18, %v11079_v37  ;;  %v10674_v57 = vor.u32 %v12193_v4, %v10671_v19  ;;  %v10799_v23 = vld [vmem:[%s17923_s12 + $0x318] sm:$0xf0]  ;;  %v10933_v37 = vld [vmem:[#allocation2 + $0x20] sm:$0xf]  ;;  %v12012_v19 = vld [vmem:[%s17922_s11 + $0x64] sm:$0xf] }
 0x8a1   : > { %v16630_v40 = vadd.f32 %v6620_v44, %v6593_v13  ;;  %v6663_v6 = vpop.f32.mrf.mxu0  ;;  %v6691_v9 = vpop.f32.mrf.mxu1  ;;  %6949 = vmatpush.bf16.msrb.mxu3 %v10850_v1  ;;  %v12060_v44 = vld [vmem:[%s17922_s11 + $0x1e4] sm:$0xf] }
 0x8a2   : > { %6921 = vmatpush.bf16.msrb.mxu2 %v10722_v49  ;;  %v11210_v35 = vor.u32 %v12060_v44, %v11207_v50  ;;  %v12225_v6 = vld [vmem:[%s17923_s12 + $0x30c] sm:$0xf]  ;;  %7799 = vmatpush.bf16.msrb.mxu0 %v11082_v61  ;;  %v12024_v49 = vld [vmem:[%s17922_s11 + $0xc4] sm:$0xf]  ;;  %v11159_v50 = vld [vmem:[%s17922_s11 + $0x190] sm:$0xf0] }
 0x8a3   : > { %6818 = vmatmul.bf16.gmra.mxu2 %v16168_v7  ;;  %6846 = vmatmul.bf16.gmra.mxu3 %v16170_v24  ;;  %v10802_v2 = vor.u32 %v12225_v6, %v10799_v23  ;;  %v11066_v62 = vor.u32 %v12024_v49, %v11063_v22  ;;  %v11980_v44 = vld [vmem:[#allocation2 + $0x24] sm:$0xf]  ;;  %v11162_v4 = vor.u32 %v12048_v58, %v11159_v50  ;;  %v11015_v6 = vld [vmem:[%s17922_s11 + $0x70] sm:$0xf0]  ;;  %v11986_v58 = vld [vmem:[#allocation2 + $0x4c] sm:$0xf0] }
 0x8a4   : > { %7827 = vmatpush.bf16.msrb.mxu1 %v11210_v35  ;;  %v16755_v35 = vor.u32 %v11980_v44, %v10935_v36  ;;  %v11143_v23 = vld [vmem:[%s17922_s11 + $0x170] sm:$0xf0]  ;;  %v12032_v44 = vld [vmem:[%s17922_s11 + $0x104] sm:$0xf] }
 0x8a5   : > { %6950 = vmatpush.bf16.msrb.mxu3 %v10834_v45  ;;  %v11175_v45 = vld [vmem:[%s17922_s11 + $0x1b0] sm:$0xf0] }
 0x8a6   : > { %v6595_v32 = vpop.f32.mrf.mxu2  ;;  %v6623_v28 = vpop.f32.mrf.mxu3  ;;  %6922 = vmatpush.bf16.msrb.mxu2 %v10706_v15  ;;  %7800 = vmatpush.bf16.msrb.mxu0 %v11066_v62  ;;  %v12052_v15 = vld [vmem:[%s17922_s11 + $0x1a4] sm:$0xf] }
 0x8a7   : > { %v6596_v31 = vadd.f32 %v6595_v32, %v16284_v46  ;;  %v16665_v46 = vor.u32 %v11976_v30, %v10919_v25  ;;  %v11047_v25 = vld [vmem:[%s17922_s11 + $0xb0] sm:$0xf0]  ;;  %v11178_v10 = vor.u32 %v12052_v15, %v11175_v45  ;;  %v12040_v62 = vld [vmem:[%s17922_s11 + $0x144] sm:$0xf] }
 0x8a8   : > { %v11050_v56 = vor.u32 %v12020_v42, %v11047_v25  ;;  %v12004_v45 = vld [vmem:[%s17922_s11 + $0x24] sm:$0xf] }
 0x8a9   : > { %v16659_v0 = vadd.f32 %v6623_v28, %v6596_v31  ;;  %v6758_v43 = vpop.f32.mrf.mxu0  ;;  %v6786_v11 = vpop.f32.mrf.mxu1  ;;  %6951 = vmatpush.bf16.msrb.mxu3 %v10818_v34 }
 0x8aa   : > { %v16661_v54 = vadd.f32 %v6786_v11, %v6758_v43  ;;  %6923 = vmatpush.bf16.msrb.mxu2 %v10690_v41  ;;  %7801 = vmatpush.bf16.msrb.mxu0 %v11050_v56  ;;  %v11031_v41 = vld [vmem:[%s17922_s11 + $0x90] sm:$0xf0] }
 0x8ab   : > { %v11034_v61 = vor.u32 %v12016_v51, %v11031_v41 }
 0x8ac   : > { %7695 = vmatmul.bf16.vlgmr.msra.gmra.mxu0 %v16663_v47  ;;  %7723 = vmatmul.bf16.vlgmr.msra.gmra.mxu1 %v16665_v46 }
 0x8ad   : > { %6952 = vmatpush.bf16.msrb.mxu3 %v10802_v2 }
 0x8ae   : > { %v6597_v12 = vpop.f32.mrf.mxu2  ;;  %v6625_v13 = vpop.f32.mrf.mxu3  ;;  %6924 = vmatpush.bf16.msrb.mxu2 %v10674_v57  ;;  %7802 = vmatpush.bf16.msrb.mxu0 %v11034_v61  ;;  %v11018_v57 = vor.u32 %v12012_v19, %v11015_v6  ;;  %v10949_v19 = vld [vmem:[#allocation2 + $0x40] sm:$0xf] }
 0x8af   : > { %v6598_v9 = vadd.f32 %v6597_v12, %v16316_v39  ;;  %v12056_v39 = vld [vmem:[%s17922_s11 + $0x1c4] sm:$0xf] }
 0x8b0   : > { %v11194_v31 = vor.u32 %v12056_v39, %v11191_v16 }
 0x8b1   : > { %v16715_v1 = vadd.f32 %v6625_v13, %v6598_v9  ;;  %v6760_v32 = vpop.f32.mrf.mxu0  ;;  %v6788_v28 = vpop.f32.mrf.mxu1  ;;  %v16753_v13 = vor.u32 %v11982_v60, %v10933_v37  ;;  %v12044_v9 = vld [vmem:[%s17922_s11 + $0x164] sm:$0xf]  ;;  %v10967_v37 = vld [vmem:[%s17922_s11 + $0x10] sm:$0xf0] }
 0x8b2   : > { %v16720_v55 = vadd.f32 %v6788_v28, %v6760_v32  ;;  %7828 = vmatpush.bf16.msrb.mxu1 %v11194_v31  ;;  %v11146_v22 = vor.u32 %v12044_v9, %v11143_v23  ;;  %v12008_v32 = vld [vmem:[%s17922_s11 + $0x44] sm:$0xf]  ;;  %v10999_v28 = vld [vmem:[%s17922_s11 + $0x50] sm:$0xf0]  ;;  %7803 = vmatpush.bf16.msrb.mxu0 %v11018_v57  ;;  %v16819_v23 = vor.u32 %v11986_v58, %v10949_v19  ;;  %v12122_v58 = vld [vmem:[%s17922_s11 + $0x3cc] sm:$0xf0] }
 0x8b3   : > { %6823 = vmatmul.bf16.gmra.mxu2 %v16243_v21  ;;  %6851 = vmatmul.bf16.gmra.mxu3 %v16245_v26  ;;  %v11002_v25 = vor.u32 %v12008_v32, %v10999_v28  ;;  %v11095_v9 = vld [vmem:[%s17922_s11 + $0x110] sm:$0xf0] }
 0x8b6   : > { %v6600_v43 = vpop.f32.mrf.mxu2  ;;  %v6628_v11 = vpop.f32.mrf.mxu3  ;;  %7829 = vmatpush.bf16.msrb.mxu1 %v11178_v10  ;;  %7804 = vmatpush.bf16.msrb.mxu0 %v11002_v25  ;;  %v11461_v25 = vld [vmem:[%s17922_s11 + $0x3e0] sm:$0xf] }
 0x8b7   : > { %v6601_v30 = vadd.f32 %v6600_v43, %v16344_v8  ;;  %v10983_v43 = vld [vmem:[%s17922_s11 + $0x30] sm:$0xf0] }
 0x8b8   : > { %v10986_v10 = vor.u32 %v12004_v45, %v10983_v43  ;;  %v12126_v45 = vld [vmem:[%s17922_s11 + $0x3ec] sm:$0xf0] }
 0x8b9   : > { %v16746_v34 = vadd.f32 %v6628_v11, %v6601_v30  ;;  %v6763_v18 = vpop.f32.mrf.mxu0  ;;  %v6791_v8 = vpop.f32.mrf.mxu1  ;;  %v12036_v11 = vld [vmem:[%s17922_s11 + $0x124] sm:$0xf]  ;;  %v11111_v30 = vld [vmem:[%s17922_s11 + $0x130] sm:$0xf0]  ;;  %v11462_v43 = vor.u32 %v12126_v45, %v11461_v25 }
 0x8ba   : > { %v16751_v12 = vadd.f32 %v6791_v8, %v6763_v18  ;;  %7830 = vmatpush.bf16.msrb.mxu1 %v11162_v4  ;;  %v11114_v51 = vor.u32 %v12036_v11, %v11111_v30  ;;  %v10951_v18 = vld [vmem:[#allocation2 + $0x50] sm:$0xf0]  ;;  %v12000_v8 = vld [vmem:[%s17922_s11 + $0x4] sm:$0xf]  ;;  %7805 = vmatpush.bf16.msrb.mxu0 %v10986_v10 }
 0x8bb   : > { %v10970_v6 = vor.u32 %v12000_v8, %v10967_v37  ;;  %7771 = vmatpush.bf16.msra.mxu3 %v11462_v43 }
 0x8bc   : > { %7700 = vmatmul.bf16.gmra.mxu0 %v16753_v13  ;;  %7728 = vmatmul.bf16.gmra.mxu1 %v16755_v35 }
 0x8be   : > { %v6602_v2 = vpop.f32.mrf.mxu2  ;;  %v6630_v49 = vpop.f32.mrf.mxu3  ;;  %7831 = vmatpush.bf16.msrb.mxu1 %v11146_v22  ;;  %7806 = vmatpush.bf16.msrb.mxu0 %v10970_v6  ;;  %v11429_v6 = vld [vmem:[%s17922_s11 + $0x3a0] sm:$0xf] }
 0x8bf   : > { %v6603_v39 = vadd.f32 %v6602_v2, %v16348_v5  ;;  %v11127_v5 = vld [vmem:[%s17922_s11 + $0x150] sm:$0xf0] }
 0x8c0   : > { %v11130_v56 = vor.u32 %v12040_v62, %v11127_v5  ;;  %v5539_v5 = vld [vmem:[#allocation2 + $0x60] sm:$0xff] }
 0x8c1   : > { %v16781_v16 = vadd.f32 %v6630_v49, %v6603_v39  ;;  %v6765_v31 = vpop.f32.mrf.mxu0  ;;  %v6793_v42 = vpop.f32.mrf.mxu1  ;;  %v11098_v49 = vor.u32 %v12032_v44, %v11095_v9  ;;  %v7011_v30 = vunpack.c.l.b16 %v5539_v5 }
 0x8c2   : > { %v16786_v15 = vadd.f32 %v6793_v42, %v6765_v31  ;;  %7832 = vmatpush.bf16.msrb.mxu1 %v11130_v56  ;;  %v11333_v31 = vld [vmem:[%s17922_s11 + $0x2e0] sm:$0xf]  ;;  %v12094_v42 = vld [vmem:[%s17922_s11 + $0x2ec] sm:$0xf0] }
 0x8c3   : > { %6828 = vmatmul.bf16.gmra.mxu2 %v16309_v52  ;;  %6856 = vmatmul.bf16.gmra.mxu3 %v16311_v59  ;;  %v11334_v56 = vor.u32 %v12094_v42, %v11333_v31  ;;  %v12082_v31 = vld [vmem:[%s17922_s11 + $0x28c] sm:$0xf0]  ;;  %v11413_v42 = vld [vmem:[%s17922_s11 + $0x380] sm:$0xf] }
 0x8c5   : > { %7743 = vmatpush.bf16.msra.mxu2 %v11334_v56  ;;  %v12114_v56 = vld [vmem:[%s17922_s11 + $0x38c] sm:$0xf0] }
 0x8c6   : > { %v6605_v60 = vpop.f32.mrf.mxu2  ;;  %v6633_v36 = vpop.f32.mrf.mxu3  ;;  %7833 = vmatpush.bf16.msrb.mxu1 %v11114_v51  ;;  %v11414_v45 = vor.u32 %v12114_v56, %v11413_v42  ;;  %v11085_v42 = vld [vmem:[%s17922_s11 + $0xe8] sm:$0xf] }
 0x8c7   : > { %v6606_v41 = vadd.f32 %v6605_v60, %v16376_v53  ;;  %v11984_v53 = vld [vmem:[#allocation2 + $0x44] sm:$0xf]  ;;  %v7012_v60 = vunpack.c.h.b16 %v5539_v5 }
 0x8c8   : > { %v16821_v2 = vor.u32 %v11984_v53, %v10951_v18  ;;  %v12086_v53 = vld [vmem:[%s17922_s11 + $0x2ac] sm:$0xf0] }
 0x8c9   : > { %v16812_v61 = vadd.f32 %v6633_v36, %v6606_v41  ;;  %v6768_v50 = vpop.f32.mrf.mxu0  ;;  %v6796_v4 = vpop.f32.mrf.mxu1  ;;  %v11317_v36 = vld [vmem:[%s17922_s11 + $0x2c0] sm:$0xf]  ;;  %v16860_v19 = vpack.c.b16 %v7012_v60, %v7012_v60 }
 0x8ca   : > { %v16817_v57 = vadd.f32 %v6796_v4, %v6768_v50  ;;  %7834 = vmatpush.bf16.msrb.mxu1 %v11098_v49  ;;  %v16858_v4 = vpack.c.b16 %v7011_v30, %v7011_v30  ;;  %v12118_v49 = vld [vmem:[%s17922_s11 + $0x3ac] sm:$0xf0]  ;;  %v11269_v30 = vld [vmem:[%s17922_s11 + $0x260] sm:$0xf] }
 0x8cb   : > { %v11397_v60 = vld [vmem:[%s17922_s11 + $0x360] sm:$0xf] }
 0x8cc   : > { %7705 = vmatmul.bf16.gmra.mxu0 %v16819_v23  ;;  %7733 = vmatmul.bf16.gmra.mxu1 %v16821_v2 }
 0x8ce   : > { %v6607_v22 = vpop.f32.mrf.mxu2  ;;  %v6635_v39 = vpop.f32.mrf.mxu3 }
 0x8cf   : > { %v11430_v22 = vor.u32 %v12118_v49, %v11429_v6 }
 0x8d1   : > { %v6770_v32 = vpop.f32.mrf.mxu0  ;;  %v6798_v28 = vpop.f32.mrf.mxu1 }
 0x8d2   : > { %v16825_v62 = vadd.f32 %v6798_v28, %v6770_v32  ;;  %v11285_v28 = vld [vmem:[%s17922_s11 + $0x280] sm:$0xf] }
 0x8d3   : > { %6925 = vmatmul.bf16.vlgmr.msrb.gmra.mxu2 %v16108_v48  ;;  %6953 = vmatmul.bf16.vlgmr.msrb.gmra.mxu3 %v16110_v14  ;;  %v12090_v48 = vld [vmem:[%s17922_s11 + $0x2cc] sm:$0xf0]  ;;  %v11445_v14 = vld [vmem:[%s17922_s11 + $0x3c0] sm:$0xf]  ;;  %v11286_v5 = vor.u32 %v12082_v31, %v11285_v28 }
 0x8d4   : > { %v11318_v41 = vor.u32 %v12090_v48, %v11317_v36  ;;  %v11446_v18 = vor.u32 %v12122_v58, %v11445_v14  ;;  %v12110_v48 = vld [vmem:[%s17922_s11 + $0x36c] sm:$0xf0]  ;;  %v11253_v58 = vld [vmem:[%s17922_s11 + $0x240] sm:$0xf] }
 0x8d5   : > { %v11398_v14 = vor.u32 %v12110_v48, %v11397_v60  ;;  %v12102_v28 = vld [vmem:[%s17922_s11 + $0x32c] sm:$0xf0] }
 0x8d6   : > { %v6702_v11 = vpop.f32.mrf.mxu2  ;;  %v6730_v10 = vpop.f32.mrf.mxu3  ;;  %7744 = vmatpush.bf16.msra.mxu2 %v11318_v41  ;;  %7772 = vmatpush.bf16.msra.mxu3 %v11446_v18  ;;  %v12066_v60 = vld [vmem:[%s17922_s11 + $0x20c] sm:$0xf0] }
 0x8d7   : > { %v6703_v51 = vadd.f32 %v6702_v11, %v16430_v20  ;;  %v11301_v20 = vld [vmem:[%s17922_s11 + $0x2a0] sm:$0xf] }
 0x8d8   : > { %v11302_v9 = vor.u32 %v12086_v53, %v11301_v20 }
 0x8d9   : > { %v16854_v8 = vadd.f32 %v6730_v10, %v6703_v51  ;;  %v6773_v37 = vpop.f32.mrf.mxu0  ;;  %v6801_v44 = vpop.f32.mrf.mxu1 }
 0x8da   : > { %v16856_v50 = vadd.f32 %v6801_v44, %v6773_v37  ;;  %7745 = vmatpush.bf16.msra.mxu2 %v11302_v9  ;;  %7773 = vmatpush.bf16.msra.mxu3 %v11430_v22  ;;  %v12106_v44 = vld [vmem:[%s17922_s11 + $0x34c] sm:$0xf0]  ;;  %v11237_v22 = vld [vmem:[%s17922_s11 + $0x220] sm:$0xf] }
 0x8dc   : > { %7710 = vmatmul.bf16.gmra.mxu0 %v16858_v4  ;;  %7738 = vmatmul.bf16.gmra.mxu1 %v16860_v19 }
 0x8de   : > { %v6704_v39 = vpop.f32.mrf.mxu2  ;;  %v6732_v32 = vpop.f32.mrf.mxu3  ;;  %7746 = vmatpush.bf16.msra.mxu2 %v11286_v5  ;;  %7774 = vmatpush.bf16.msra.mxu3 %v11414_v45  ;;  %v11213_v5 = vld [vmem:[%s17922_s11 + $0x1e8] sm:$0xf]  ;;  %v12063_v45 = vld [vmem:[%s17922_s11 + $0x1f4] sm:$0xf0] }
 0x8df   : > { %v6705_v25 = vadd.f32 %v6704_v39, %v16482_v63  ;;  %v12078_v63 = vld [vmem:[%s17922_s11 + $0x26c] sm:$0xf0]  ;;  %v11365_v39 = vld [vmem:[%s17922_s11 + $0x320] sm:$0xf] }
 0x8e0   : > { %v11270_v36 = vor.u32 %v12078_v63, %v11269_v30  ;;  %v11366_v31 = vor.u32 %v12102_v28, %v11365_v39  ;;  %v11214_v30 = vor.u32 %v12063_v45, %v11213_v5  ;;  %v11221_v63 = vld [vmem:[%s17922_s11 + $0x200] sm:$0xf]  ;;  %v11181_v39 = vld [vmem:[%s17922_s11 + $0x1a8] sm:$0xf]  ;;  %v12019_v5 = vld [vmem:[%s17922_s11 + $0x94] sm:$0xf0] }
 0x8e1   : > { %v16889_v43 = vadd.f32 %v6732_v32, %v6705_v25  ;;  %v6775_v11 = vpop.f32.mrf.mxu0  ;;  %v6803_v10 = vpop.f32.mrf.mxu1  ;;  %v12031_v25 = vld [vmem:[%s17922_s11 + $0xf4] sm:$0xf0] }
 0x8e2   : > { %7747 = vmatpush.bf16.msra.mxu2 %v11270_v36  ;;  %7775 = vmatpush.bf16.msra.mxu3 %v11398_v14  ;;  %v11086_v56 = vor.u32 %v12031_v25, %v11085_v42  ;;  %v11349_v36 = vld [vmem:[%s17922_s11 + $0x300] sm:$0xf]  ;;  %v11222_v14 = vor.u32 %v12066_v60, %v11221_v63  ;;  %v11037_v25 = vld [vmem:[%s17922_s11 + $0x88] sm:$0xf] }
 0x8e3   : > { %6930 = vmatmul.bf16.gmra.mxu2 %v16168_v7  ;;  %6958 = vmatmul.bf16.gmra.mxu3 %v16170_v24  ;;  %v12074_v7 = vld [vmem:[%s17922_s11 + $0x24c] sm:$0xf0]  ;;  %v11381_v24 = vld [vmem:[%s17922_s11 + $0x340] sm:$0xf] }
 0x8e4   : > { %v11254_v37 = vor.u32 %v12074_v7, %v11253_v58  ;;  %v11382_v20 = vor.u32 %v12106_v44, %v11381_v24  ;;  %7911 = vmatpush.bf16.msra.mxu0 %v11086_v56  ;;  %7939 = vmatpush.bf16.msra.mxu1 %v11214_v30  ;;  %v11069_v58 = vld [vmem:[%s17922_s11 + $0xc8] sm:$0xf]  ;;  %v12027_v7 = vld [vmem:[%s17922_s11 + $0xd4] sm:$0xf0]  ;;  %v11038_v30 = vor.u32 %v12019_v5, %v11037_v25 }
 0x8e5   : > { %v11070_v44 = vor.u32 %v12027_v7, %v11069_v58  ;;  %v11165_v56 = vld [vmem:[%s17922_s11 + $0x188] sm:$0xf] }
 0x8e6   : > { %v6707_v51 = vpop.f32.mrf.mxu2  ;;  %v6735_v41 = vpop.f32.mrf.mxu3  ;;  %7748 = vmatpush.bf16.msra.mxu2 %v11254_v37  ;;  %7776 = vmatpush.bf16.msra.mxu3 %v11382_v20  ;;  %v12059_v20 = vld [vmem:[%s17922_s11 + $0x1d4] sm:$0xf0] }
 0x8e7   : > { %v6708_v18 = vadd.f32 %v6707_v51, %v16510_v17  ;;  %v12070_v17 = vld [vmem:[%s17922_s11 + $0x22c] sm:$0xf0] }
 0x8e8   : > { %v11238_v32 = vor.u32 %v12070_v17, %v11237_v22  ;;  %v12098_v51 = vld [vmem:[%s17922_s11 + $0x30c] sm:$0xf0]  ;;  %7912 = vmatpush.bf16.msra.mxu0 %v11070_v44  ;;  %v11053_v22 = vld [vmem:[%s17922_s11 + $0xa8] sm:$0xf]  ;;  %v12023_v17 = vld [vmem:[%s17922_s11 + $0xb4] sm:$0xf0] }
 0x8e9   : > { %v16918_v53 = vadd.f32 %v6735_v41, %v6708_v18  ;;  %v6870_v6 = vpop.f32.mrf.mxu0  ;;  %v6898_v9 = vpop.f32.mrf.mxu1  ;;  %v11350_v41 = vor.u32 %v12098_v51, %v11349_v36  ;;  %v11021_v36 = vld [vmem:[%s17922_s11 + $0x68] sm:$0xf]  ;;  %v12011_v44 = vld [vmem:[%s17922_s11 + $0x54] sm:$0xf0] }
 0x8ea   : > { %v16920_v49 = vadd.f32 %v6898_v9, %v6870_v6  ;;  %7749 = vmatpush.bf16.msra.mxu2 %v11238_v32  ;;  %7777 = vmatpush.bf16.msra.mxu3 %v11366_v31  ;;  %v11054_v32 = vor.u32 %v12023_v17, %v11053_v22 }
 0x8ec   : > { %7807 = vmatmul.bf16.vlgmr.msrb.gmra.mxu0 %v16663_v47  ;;  %7835 = vmatmul.bf16.vlgmr.msrb.gmra.mxu1 %v16665_v46 }
 0x8ed   : > { %7913 = vmatpush.bf16.msra.mxu0 %v11054_v32 }
 0x8ee   : > { %v6709_v11 = vpop.f32.mrf.mxu2  ;;  %v6737_v10 = vpop.f32.mrf.mxu3  ;;  %7750 = vmatpush.bf16.msra.mxu2 %v11222_v14  ;;  %7778 = vmatpush.bf16.msra.mxu3 %v11350_v41  ;;  %v11149_v14 = vld [vmem:[%s17922_s11 + $0x168] sm:$0xf]  ;;  %v12047_v41 = vld [vmem:[%s17922_s11 + $0x174] sm:$0xf0] }
 0x8ef   : > { %v6710_v48 = vadd.f32 %v6709_v11, %v16538_v38  ;;  %v11197_v38 = vld [vmem:[%s17922_s11 + $0x1c8] sm:$0xf] }
 0x8f0   : > { %v11198_v9 = vor.u32 %v12059_v20, %v11197_v38  ;;  %v11150_v38 = vor.u32 %v12047_v41, %v11149_v14  ;;  %v11133_v20 = vld [vmem:[%s17922_s11 + $0x148] sm:$0xf] }
 0x8f1   : > { %v16970_v24 = vadd.f32 %v6737_v10, %v6710_v48  ;;  %v6872_v18 = vpop.f32.mrf.mxu0  ;;  %v6900_v37 = vpop.f32.mrf.mxu1  ;;  %v12015_v48 = vld [vmem:[%s17922_s11 + $0x74] sm:$0xf0]  ;;  %7914 = vmatpush.bf16.msra.mxu0 %v11038_v30  ;;  %v11101_v30 = vld [vmem:[%s17922_s11 + $0x108] sm:$0xf] }
 0x8f2   : > { %v16975_v6 = vadd.f32 %v6900_v37, %v6872_v18  ;;  %7940 = vmatpush.bf16.msra.mxu1 %v11198_v9  ;;  %v11022_v51 = vor.u32 %v12015_v48, %v11021_v36  ;;  %v11005_v37 = vld [vmem:[%s17922_s11 + $0x48] sm:$0xf] }
 0x8f3   : > { %6935 = vmatmul.bf16.gmra.mxu2 %v16243_v21  ;;  %6963 = vmatmul.bf16.gmra.mxu3 %v16245_v26  ;;  %v12055_v21 = vld [vmem:[%s17922_s11 + $0x1b4] sm:$0xf0] }
 0x8f4   : > { %v11182_v31 = vor.u32 %v12055_v21, %v11181_v39  ;;  %v11006_v39 = vor.u32 %v12011_v44, %v11005_v37  ;;  %v11977_v37 = vld [vmem:[#allocation2 + $0xc] sm:$0xf] }
 0x8f5   : > { %7915 = vmatpush.bf16.msra.mxu0 %v11022_v51 }
 0x8f6   : > { %v6712_v26 = vpop.f32.mrf.mxu2  ;;  %v6740_v28 = vpop.f32.mrf.mxu3  ;;  %7941 = vmatpush.bf16.msra.mxu1 %v11182_v31  ;;  %v11117_v31 = vld [vmem:[%s17922_s11 + $0x128] sm:$0xf] }
 0x8f7   : > { %v6713_v42 = vadd.f32 %v6712_v26, %v16566_v3  ;;  %v12051_v3 = vld [vmem:[%s17922_s11 + $0x194] sm:$0xf0]  ;;  %v10989_v26 = vld [vmem:[%s17922_s11 + $0x28] sm:$0xf] }
 0x8f8   : > { %v11166_v60 = vor.u32 %v12051_v3, %v11165_v56 }
 0x8f9   : > { %v17001_v45 = vadd.f32 %v6740_v28, %v6713_v42  ;;  %v6875_v11 = vpop.f32.mrf.mxu0  ;;  %v6903_v10 = vpop.f32.mrf.mxu1  ;;  %v12007_v28 = vld [vmem:[%s17922_s11 + $0x34] sm:$0xf0]  ;;  %7916 = vmatpush.bf16.msra.mxu0 %v11006_v39 }
 0x8fa   : > { %v17006_v63 = vadd.f32 %v6903_v10, %v6875_v11  ;;  %7942 = vmatpush.bf16.msra.mxu1 %v11166_v60  ;;  %v10990_v42 = vor.u32 %v12007_v28, %v10989_v26  ;;  %v10973_v11 = vld [vmem:[%s17922_s11 + $0x8] sm:$0xf]  ;;  %v12003_v10 = vld [vmem:[%s17922_s11 + $0x14] sm:$0xf0]  ;;  %v12124_v26 = vld [vmem:[%s17922_s11 + $0x3e4] sm:$0xf] }
 0x8fb   : > { %v10974_v48 = vor.u32 %v12003_v10, %v10973_v11  ;;  %v12120_v11 = vld [vmem:[%s17922_s11 + $0x3c4] sm:$0xf] }
 0x8fc   : > { %7812 = vmatmul.bf16.gmra.mxu0 %v16753_v13  ;;  %7840 = vmatmul.bf16.gmra.mxu1 %v16755_v35 }
 0x8fd   : > { %7917 = vmatpush.bf16.msra.mxu0 %v10990_v42 }
 0x8fe   : > { %v6714_v58 = vpop.f32.mrf.mxu2  ;;  %v6742_v7 = vpop.f32.mrf.mxu3  ;;  %7943 = vmatpush.bf16.msra.mxu1 %v11150_v38  ;;  %v10927_v38 = vld [vmem:[#allocation2 + $0x18] sm:$0xf0] }
 0x8ff   : > { %v6715_v18 = vadd.f32 %v6714_v58, %v16570_v27  ;;  %v12043_v27 = vld [vmem:[%s17922_s11 + $0x154] sm:$0xf0] }
 0x900   : > { %v11134_v21 = vor.u32 %v12043_v27, %v11133_v20  ;;  %v12092_v27 = vld [vmem:[%s17922_s11 + $0x2e4] sm:$0xf] }
 0x901   : > { %v17032_v9 = vadd.f32 %v6742_v7, %v6715_v18  ;;  %v6877_v22 = vpop.f32.mrf.mxu0  ;;  %v6905_v17 = vpop.f32.mrf.mxu1  ;;  %7918 = vmatpush.bf16.msra.mxu0 %v10974_v48  ;;  %v11979_v7 = vld [vmem:[#allocation2 + $0x14] sm:$0xf0]  ;;  %v10925_v18 = vld [vmem:[#allocation2 + $0x8] sm:$0xf] }
 0x902   : > { %v17037_v32 = vadd.f32 %v6905_v17, %v6877_v22  ;;  %7944 = vmatpush.bf16.msra.mxu1 %v11134_v21  ;;  %v17072_v22 = vor.u32 %v11979_v7, %v10925_v18  ;;  %v17074_v17 = vor.u32 %v11977_v37, %v10927_v38  ;;  %v11335_v21 = vld [vmem:[%s17922_s11 + $0x2f0] sm:$0xf0] }
 0x903   : > { %6940 = vmatmul.bf16.gmra.mxu2 %v16309_v52  ;;  %6968 = vmatmul.bf16.gmra.mxu3 %v16311_v59  ;;  %v12039_v52 = vld [vmem:[%s17922_s11 + $0x134] sm:$0xf0]  ;;  %v11338_v28 = vor.u32 %v12092_v27, %v11335_v21  ;;  %v11431_v38 = vld [vmem:[%s17922_s11 + $0x3b0] sm:$0xf0]  ;;  %v10943_v27 = vld [vmem:[#allocation2 + $0x38] sm:$0xf0] }
 0x904   : > { %v11118_v5 = vor.u32 %v12039_v52, %v11117_v31  ;;  %v11463_v31 = vld [vmem:[%s17922_s11 + $0x3f0] sm:$0xf0] }
 0x905   : > { %v11466_v42 = vor.u32 %v12124_v26, %v11463_v31  ;;  %7855 = vmatpush.bf16.msrb.mxu2 %v11338_v28  ;;  %v12080_v26 = vld [vmem:[%s17922_s11 + $0x284] sm:$0xf]  ;;  %v11287_v28 = vld [vmem:[%s17922_s11 + $0x290] sm:$0xf0] }
 0x906   : > { %v6717_v59 = vpop.f32.mrf.mxu2  ;;  %v6745_v25 = vpop.f32.mrf.mxu3  ;;  %7945 = vmatpush.bf16.msra.mxu1 %v11118_v5  ;;  %v12088_v5 = vld [vmem:[%s17922_s11 + $0x2c4] sm:$0xf] }
 0x907   : > { %v6718_v56 = vadd.f32 %v6717_v59, %v16601_v33  ;;  %v12035_v33 = vld [vmem:[%s17922_s11 + $0x114] sm:$0xf0]  ;;  %7883 = vmatpush.bf16.msrb.mxu3 %v11466_v42  ;;  %v12112_v31 = vld [vmem:[%s17922_s11 + $0x384] sm:$0xf]  ;;  %v10941_v42 = vld [vmem:[#allocation2 + $0x28] sm:$0xf] }
 0x908   : > { %v11102_v51 = vor.u32 %v12035_v33, %v11101_v30  ;;  %v11447_v30 = vld [vmem:[%s17922_s11 + $0x3d0] sm:$0xf0] }
 0x909   : > { %v17063_v3 = vadd.f32 %v6745_v25, %v6718_v56  ;;  %v6880_v60 = vpop.f32.mrf.mxu0  ;;  %v6908_v36 = vpop.f32.mrf.mxu1  ;;  %v11319_v56 = vld [vmem:[%s17922_s11 + $0x2d0] sm:$0xf0]  ;;  %v11450_v48 = vor.u32 %v12120_v11, %v11447_v30 }
 0x90a   : > { %v17068_v14 = vadd.f32 %v6908_v36, %v6880_v60  ;;  %7946 = vmatpush.bf16.msra.mxu1 %v11102_v51  ;;  %v11322_v10 = vor.u32 %v12088_v5, %v11319_v56  ;;  %v12084_v51 = vld [vmem:[%s17922_s11 + $0x2a4] sm:$0xf] }
 0x90b   : > { %7884 = vmatpush.bf16.msrb.mxu3 %v11450_v48  ;;  %v12108_v48 = vld [vmem:[%s17922_s11 + $0x364] sm:$0xf] }
 0x90c   : > { %7817 = vmatmul.bf16.gmra.mxu0 %v16819_v23  ;;  %7845 = vmatmul.bf16.gmra.mxu1 %v16821_v2 }
 0x90d   : > { %7856 = vmatpush.bf16.msrb.mxu2 %v11322_v10 }
 0x90e   : > { %v6719_v41 = vpop.f32.mrf.mxu2  ;;  %v6747_v58 = vpop.f32.mrf.mxu3 }
 0x90f   : > { %v11303_v41 = vld [vmem:[%s17922_s11 + $0x2b0] sm:$0xf0]  ;;  %v12116_v58 = vld [vmem:[%s17922_s11 + $0x3a4] sm:$0xf] }
 0x910   : > { %v11306_v7 = vor.u32 %v12084_v51, %v11303_v41  ;;  %v11434_v18 = vor.u32 %v12116_v58, %v11431_v38  ;;  %v11399_v41 = vld [vmem:[%s17922_s11 + $0x370] sm:$0xf0] }
 0x911   : > { %v6882_v44 = vpop.f32.mrf.mxu0  ;;  %v6910_v20 = vpop.f32.mrf.mxu1  ;;  %v11402_v58 = vor.u32 %v12108_v48, %v11399_v41  ;;  %v12029_v48 = vld [vmem:[%s17922_s11 + $0xec] sm:$0xf] }
 0x912   : > { %v17076_v39 = vadd.f32 %v6910_v20, %v6882_v44  ;;  %v11983_v20 = vld [vmem:[#allocation2 + $0x34] sm:$0xf0]  ;;  %7857 = vmatpush.bf16.msrb.mxu2 %v11306_v7  ;;  %7885 = vmatpush.bf16.msrb.mxu3 %v11434_v18  ;;  %v12061_v41 = vld [vmem:[%s17922_s11 + $0x1ec] sm:$0xf] }
 0x913   : > { %7751 = vmatmul.bf16.vlgmr.msra.gmra.mxu2 %v17072_v22  ;;  %7779 = vmatmul.bf16.vlgmr.msra.gmra.mxu3 %v17074_v17  ;;  %v17138_v11 = vor.u32 %v11983_v20, %v10941_v42  ;;  %v12104_v20 = vld [vmem:[%s17922_s11 + $0x344] sm:$0xf] }
 0x916   : > { %v6814_v52 = vpop.f32.mrf.mxu2  ;;  %v6842_v59 = vpop.f32.mrf.mxu3 }
 0x917   : > { %v6815_v25 = vadd.f32 %v6814_v52, %v16661_v54  ;;  %v11981_v52 = vld [vmem:[#allocation2 + $0x2c] sm:$0xf] }
 0x918   : > { %v17140_v10 = vor.u32 %v11981_v52, %v10943_v27  ;;  %v12068_v52 = vld [vmem:[%s17922_s11 + $0x224] sm:$0xf] }
 0x919   : > { %v17105_v60 = vadd.f32 %v6842_v59, %v6815_v25  ;;  %v6885_v54 = vpop.f32.mrf.mxu0  ;;  %v6913_v36 = vpop.f32.mrf.mxu1  ;;  %v11290_v59 = vor.u32 %v12080_v26, %v11287_v28 }
 0x91a   : > { %v17107_v33 = vadd.f32 %v6913_v36, %v6885_v54  ;;  %v12076_v54 = vld [vmem:[%s17922_s11 + $0x264] sm:$0xf]  ;;  %v11271_v36 = vld [vmem:[%s17922_s11 + $0x270] sm:$0xf0] }
 0x91b   : > { %7858 = vmatpush.bf16.msrb.mxu2 %v11290_v59  ;;  %v11274_v51 = vor.u32 %v12076_v54, %v11271_v36  ;;  %v11239_v59 = vld [vmem:[%s17922_s11 + $0x230] sm:$0xf0] }
 0x91c   : > { %7822 = vmatmul.bf16.gmra.mxu0 %v16858_v4  ;;  %7850 = vmatmul.bf16.gmra.mxu1 %v16860_v19  ;;  %v11367_v54 = vld [vmem:[%s17922_s11 + $0x330] sm:$0xf0] }
 0x91e   : > { %v6816_v37 = vpop.f32.mrf.mxu2  ;;  %v6844_v44 = vpop.f32.mrf.mxu3 }
 0x91f   : > { %v6817_v21 = vadd.f32 %v6816_v37, %v16720_v55  ;;  %v11415_v55 = vld [vmem:[%s17922_s11 + $0x390] sm:$0xf0]  ;;  %7859 = vmatpush.bf16.msrb.mxu2 %v11274_v51  ;;  %v12072_v37 = vld [vmem:[%s17922_s11 + $0x244] sm:$0xf]  ;;  %v11087_v51 = vld [vmem:[%s17922_s11 + $0xf8] sm:$0xf0] }
 0x920   : > { %v11418_v30 = vor.u32 %v12112_v31, %v11415_v55  ;;  %v12100_v55 = vld [vmem:[%s17922_s11 + $0x324] sm:$0xf] }
 0x921   : > { %v17136_v25 = vadd.f32 %v6844_v44, %v6817_v21  ;;  %v6887_v5 = vpop.f32.mrf.mxu0  ;;  %v6915_v56 = vpop.f32.mrf.mxu1  ;;  %v11255_v44 = vld [vmem:[%s17922_s11 + $0x250] sm:$0xf0]  ;;  %v11370_v36 = vor.u32 %v12100_v55, %v11367_v54 }
 0x922   : > { %7886 = vmatpush.bf16.msrb.mxu3 %v11418_v30  ;;  %v11258_v27 = vor.u32 %v12072_v37, %v11255_v44  ;;  %v11383_v21 = vld [vmem:[%s17922_s11 + $0x350] sm:$0xf0]  ;;  %v10959_v56 = vld [vmem:[#allocation2 + $0x58] sm:$0xf0]  ;;  %v11242_v30 = vor.u32 %v12068_v52, %v11239_v59  ;;  %v12064_v37 = vld [vmem:[%s17922_s11 + $0x204] sm:$0xf] }
 0x923   : > { %7756 = vmatmul.bf16.gmra.mxu2 %v17138_v11  ;;  %7784 = vmatmul.bf16.gmra.mxu3 %v17140_v10  ;;  %v11386_v31 = vor.u32 %v12104_v20, %v11383_v21  ;;  %v11223_v44 = vld [vmem:[%s17922_s11 + $0x210] sm:$0xf0]  ;;  %v11985_v52 = vld [vmem:[#allocation2 + $0x4c] sm:$0xf] }
 0x924   : > { %7860 = vmatpush.bf16.msrb.mxu2 %v11258_v27  ;;  %v10957_v27 = vld [vmem:[#allocation2 + $0x48] sm:$0xf] }
 0x926   : > { %v6819_v7 = vpop.f32.mrf.mxu2  ;;  %v6847_v38 = vpop.f32.mrf.mxu3  ;;  %7887 = vmatpush.bf16.msrb.mxu3 %v11402_v58 }
 0x927   : > { %v6820_v18 = vadd.f32 %v6819_v7, %v16751_v12 }
 0x928   : > { %7861 = vmatpush.bf16.msrb.mxu2 %v11242_v30 }
 0x929   : > { %v17169_v26 = vadd.f32 %v6847_v38, %v6820_v18  ;;  %v7696_v12 = vpop.f32.mrf.mxu0  ;;  %v7724_v28 = vpop.f32.mrf.mxu1  ;;  %v11090_v38 = vor.u32 %v12029_v48, %v11087_v51  ;;  %v11215_v18 = vld [vmem:[%s17922_s11 + $0x1f8] sm:$0xf0]  ;;  %v12025_v48 = vld [vmem:[%s17922_s11 + $0xcc] sm:$0xf] }
 0x92a   : > { %v7697_v42 = vadd.f32 %v7696_v12, %v16599_v29  ;;  %v11987_v29 = vld [vmem:[#allocation2 + $0x54] sm:$0xf0]  ;;  %7888 = vmatpush.bf16.msrb.mxu3 %v11386_v31  ;;  %v11218_v21 = vor.u32 %v12061_v41, %v11215_v18  ;;  %v11226_v12 = vor.u32 %v12064_v37, %v11223_v44  ;;  %v11351_v31 = vld [vmem:[%s17922_s11 + $0x310] sm:$0xf0]  ;;  %v12057_v51 = vld [vmem:[%s17922_s11 + $0x1cc] sm:$0xf] }
 0x92b   : > { %8023 = vmatpush.bf16.msrb.mxu0 %v11090_v38  ;;  %v11055_v38 = vld [vmem:[%s17922_s11 + $0xb8] sm:$0xf0]  ;;  %v12053_v18 = vld [vmem:[%s17922_s11 + $0x1ac] sm:$0xf] }
 0x92c   : > { %v17181_v5 = vadd.f32 %v7724_v28, %v7697_v42  ;;  %7919 = vmatmul.bf16.vlgmr.msra.gmra.mxu0 %v16663_v47  ;;  %7947 = vmatmul.bf16.vlgmr.msra.gmra.mxu1 %v16665_v46  ;;  %v12096_v28 = vld [vmem:[%s17922_s11 + $0x304] sm:$0xf]  ;;  %v17213_v42 = vor.u32 %v11987_v29, %v10957_v27  ;;  %v11071_v29 = vld [vmem:[%s17922_s11 + $0xd8] sm:$0xf0] }
 0x92d   : > { %8051 = vmatpush.bf16.msrb.mxu1 %v11218_v21  ;;  %v11354_v54 = vor.u32 %v12096_v28, %v11351_v31  ;;  %7862 = vmatpush.bf16.msrb.mxu2 %v11226_v12  ;;  %v11183_v27 = vld [vmem:[%s17922_s11 + $0x1b8] sm:$0xf0] }
 0x92e   : > { %v6821_v58 = vpop.f32.mrf.mxu2  ;;  %v6849_v7 = vpop.f32.mrf.mxu3  ;;  %7889 = vmatpush.bf16.msrb.mxu3 %v11370_v36  ;;  %v11199_v36 = vld [vmem:[%s17922_s11 + $0x1d8] sm:$0xf0]  ;;  %v11186_v12 = vor.u32 %v12053_v18, %v11183_v27 }
 0x92f   : > { %v6822_v20 = vadd.f32 %v6821_v58, %v16786_v15  ;;  %v17217_v15 = vor.u32 %v11985_v52, %v10959_v56  ;;  %v11074_v56 = vor.u32 %v12025_v48, %v11071_v29  ;;  %v11202_v58 = vor.u32 %v12057_v51, %v11199_v36  ;;  %v5540_v48 = vld [vmem:[#allocation2 + $0x68] sm:$0xff]  ;;  %v11167_v51 = vld [vmem:[%s17922_s11 + $0x198] sm:$0xf0] }
 0x930   : > { %v7013_v36 = vunpack.c.l.b16 %v5540_v48 }
 0x931   : > { %v17215_v59 = vadd.f32 %v6849_v7, %v6822_v20  ;;  %v7698_v55 = vpop.f32.mrf.mxu0  ;;  %v7726_v30 = vpop.f32.mrf.mxu1  ;;  %8024 = vmatpush.bf16.msrb.mxu0 %v11074_v56  ;;  %8052 = vmatpush.bf16.msrb.mxu1 %v11202_v58  ;;  %v7014_v58 = vunpack.c.h.b16 %v5540_v48 }
 0x932   : > { %v7699_v41 = vadd.f32 %v7698_v55, %v16630_v40  ;;  %7890 = vmatpush.bf16.msrb.mxu3 %v11354_v54  ;;  %v12021_v40 = vld [vmem:[%s17922_s11 + $0xac] sm:$0xf] }
 0x933   : > { %7761 = vmatmul.bf16.gmra.mxu2 %v17213_v42  ;;  %7789 = vmatmul.bf16.gmra.mxu3 %v17217_v15  ;;  %v11058_v20 = vor.u32 %v12021_v40, %v11055_v38  ;;  %v12017_v55 = vld [vmem:[%s17922_s11 + $0x8c] sm:$0xf]  ;;  %v11023_v40 = vld [vmem:[%s17922_s11 + $0x78] sm:$0xf0] }
 0x934   : > { %v17234_v7 = vadd.f32 %v7726_v30, %v7699_v41  ;;  %v11039_v30 = vld [vmem:[%s17922_s11 + $0x98] sm:$0xf0]  ;;  %v12049_v54 = vld [vmem:[%s17922_s11 + $0x18c] sm:$0xf] }
 0x935   : > { %8025 = vmatpush.bf16.msrb.mxu0 %v11058_v20  ;;  %8053 = vmatpush.bf16.msrb.mxu1 %v11186_v12  ;;  %v11042_v29 = vor.u32 %v12017_v55, %v11039_v30  ;;  %v11170_v41 = vor.u32 %v12049_v54, %v11167_v51  ;;  %v12045_v38 = vld [vmem:[%s17922_s11 + $0x16c] sm:$0xf]  ;;  %v11151_v20 = vld [vmem:[%s17922_s11 + $0x178] sm:$0xf0]  ;;  %v17283_v55 = vpack.c.b16 %v7013_v36, %v7013_v36 }
 0x936   : > { %v6824_v37 = vpop.f32.mrf.mxu2  ;;  %v6852_v44 = vpop.f32.mrf.mxu3  ;;  %v17285_v30 = vpack.c.b16 %v7014_v58, %v7014_v58  ;;  %v12009_v54 = vld [vmem:[%s17922_s11 + $0x4c] sm:$0xf]  ;;  %v11135_v51 = vld [vmem:[%s17922_s11 + $0x158] sm:$0xf0] }
 0x937   : > { %v6825_v21 = vadd.f32 %v6824_v37, %v16817_v57  ;;  %v12005_v58 = vld [vmem:[%s17922_s11 + $0x2c] sm:$0xf] }
 0x939   : > { %v17249_v28 = vadd.f32 %v6852_v44, %v6825_v21  ;;  %v7701_v31 = vpop.f32.mrf.mxu0  ;;  %v7729_v52 = vpop.f32.mrf.mxu1  ;;  %8026 = vmatpush.bf16.msrb.mxu0 %v11042_v29  ;;  %8054 = vmatpush.bf16.msrb.mxu1 %v11170_v41  ;;  %v11154_v21 = vor.u32 %v12045_v38, %v11151_v20 }
 0x93a   : > { %v7702_v57 = vadd.f32 %v7701_v31, %v16659_v0  ;;  %v12013_v0 = vld [vmem:[%s17922_s11 + $0x6c] sm:$0xf] }
 0x93b   : > { %v11026_v44 = vor.u32 %v12013_v0, %v11023_v40  ;;  %v12037_v0 = vld [vmem:[%s17922_s11 + $0x12c] sm:$0xf] }
 0x93c   : > { %v17264_v56 = vadd.f32 %v7729_v52, %v7702_v57  ;;  %7924 = vmatmul.bf16.gmra.mxu0 %v16753_v13  ;;  %7952 = vmatmul.bf16.gmra.mxu1 %v16755_v35  ;;  %v11007_v57 = vld [vmem:[%s17922_s11 + $0x58] sm:$0xf0] }
 0x93d   : > { %8027 = vmatpush.bf16.msrb.mxu0 %v11026_v44  ;;  %8055 = vmatpush.bf16.msrb.mxu1 %v11154_v21  ;;  %v11010_v29 = vor.u32 %v12009_v54, %v11007_v57  ;;  %v10975_v54 = vld [vmem:[%s17922_s11 + $0x18] sm:$0xf0]  ;;  %v12033_v57 = vld [vmem:[%s17922_s11 + $0x10c] sm:$0xf] }
 0x93e   : > { %v6826_v18 = vpop.f32.mrf.mxu2  ;;  %v6854_v37 = vpop.f32.mrf.mxu3 }
 0x93f   : > { %v6827_v27 = vadd.f32 %v6826_v18, %v16825_v62  ;;  %v12041_v62 = vld [vmem:[%s17922_s11 + $0x14c] sm:$0xf] }
 0x940   : > { %v11138_v41 = vor.u32 %v12041_v62, %v11135_v51 }
 0x941   : > { %v17281_v12 = vadd.f32 %v6854_v37, %v6827_v27  ;;  %v7703_v31 = vpop.f32.mrf.mxu0  ;;  %v7731_v52 = vpop.f32.mrf.mxu1  ;;  %8028 = vmatpush.bf16.msrb.mxu0 %v11010_v29  ;;  %v11119_v37 = vld [vmem:[%s17922_s11 + $0x138] sm:$0xf0] }
 0x942   : > { %v7704_v48 = vadd.f32 %v7703_v31, %v16715_v1  ;;  %8056 = vmatpush.bf16.msrb.mxu1 %v11138_v41  ;;  %v10991_v1 = vld [vmem:[%s17922_s11 + $0x38] sm:$0xf0]  ;;  %v11122_v20 = vor.u32 %v12037_v0, %v11119_v37 }
 0x943   : > { %7766 = vmatmul.bf16.gmra.mxu2 %v17283_v55  ;;  %7794 = vmatmul.bf16.gmra.mxu3 %v17285_v30  ;;  %v10994_v18 = vor.u32 %v12005_v58, %v10991_v1 }
 0x944   : > { %v17302_v36 = vadd.f32 %v7731_v52, %v7704_v48  ;;  %v12001_v52 = vld [vmem:[%s17922_s11 + $0xc] sm:$0xf]  ;;  %v11103_v48 = vld [vmem:[%s17922_s11 + $0x118] sm:$0xf0] }
 0x945   : > { %8029 = vmatpush.bf16.msrb.mxu0 %v10994_v18  ;;  %v10978_v62 = vor.u32 %v12001_v52, %v10975_v54  ;;  %v11106_v29 = vor.u32 %v12033_v57, %v11103_v48  ;;  %v11469_v18 = vld [vmem:[%s17922_s11 + $0x3e8] sm:$0xf]  ;;  %v12091_v57 = vld [vmem:[%s17922_s11 + $0x2d4] sm:$0xf0] }
 0x946   : > { %v6829_v40 = vpop.f32.mrf.mxu2  ;;  %v6857_v38 = vpop.f32.mrf.mxu3  ;;  %8057 = vmatpush.bf16.msrb.mxu1 %v11122_v20  ;;  %v11325_v54 = vld [vmem:[%s17922_s11 + $0x2c8] sm:$0xf]  ;;  %v12123_v48 = vld [vmem:[%s17922_s11 + $0x3d4] sm:$0xf0] }
 0x947   : > { %v6830_v44 = vadd.f32 %v6829_v40, %v16856_v50  ;;  %v11341_v40 = vld [vmem:[%s17922_s11 + $0x2e8] sm:$0xf] }
 0x949   : > { %v17317_v27 = vadd.f32 %v6857_v38, %v6830_v44  ;;  %v7706_v21 = vpop.f32.mrf.mxu0  ;;  %v7734_v31 = vpop.f32.mrf.mxu1  ;;  %8030 = vmatpush.bf16.msrb.mxu0 %v10978_v62  ;;  %v12095_v38 = vld [vmem:[%s17922_s11 + $0x2f4] sm:$0xf0]  ;;  %v11326_v62 = vor.u32 %v12091_v57, %v11325_v54  ;;  %v11421_v54 = vld [vmem:[%s17922_s11 + $0x388] sm:$0xf] }
 0x94a   : > { %v7707_v50 = vadd.f32 %v7706_v21, %v16746_v34  ;;  %8058 = vmatpush.bf16.msrb.mxu1 %v11106_v29  ;;  %v11342_v44 = vor.u32 %v12095_v38, %v11341_v40  ;;  %v11437_v40 = vld [vmem:[%s17922_s11 + $0x3a8] sm:$0xf] }
 0x94c   : > { %v17332_v51 = vadd.f32 %v7734_v31, %v7707_v50  ;;  %7929 = vmatmul.bf16.gmra.mxu0 %v16819_v23  ;;  %7957 = vmatmul.bf16.gmra.mxu1 %v16821_v2  ;;  %v11453_v50 = vld [vmem:[%s17922_s11 + $0x3c8] sm:$0xf] }
 0x94d   : > { %7967 = vmatpush.bf16.msra.mxu2 %v11342_v44 }
 0x94e   : > { %v6831_v41 = vpop.f32.mrf.mxu2  ;;  %v6859_v58 = vpop.f32.mrf.mxu3 }
 0x94f   : > { %v11454_v58 = vor.u32 %v12123_v48, %v11453_v50  ;;  %v12115_v50 = vld [vmem:[%s17922_s11 + $0x394] sm:$0xf0] }
 0x951   : > { %v7708_v1 = vpop.f32.mrf.mxu0  ;;  %v7736_v0 = vpop.f32.mrf.mxu1  ;;  %7968 = vmatpush.bf16.msra.mxu2 %v11326_v62 }
 0x952   : > { %v7709_v34 = vadd.f32 %v7708_v1, %v16781_v16  ;;  %v12127_v16 = vld [vmem:[%s17922_s11 + $0x3f4] sm:$0xf0] }
 0x953   : > { %7863 = vmatmul.bf16.vlgmr.msrb.gmra.mxu2 %v17072_v22  ;;  %7891 = vmatmul.bf16.vlgmr.msrb.gmra.mxu3 %v17074_v17  ;;  %v11470_v20 = vor.u32 %v12127_v16, %v11469_v18  ;;  %v12119_v18 = vld [vmem:[%s17922_s11 + $0x3b4] sm:$0xf0] }
 0x954   : > { %v17348_v37 = vadd.f32 %v7736_v0, %v7709_v34  ;;  %v11309_v0 = vld [vmem:[%s17922_s11 + $0x2a8] sm:$0xf]  ;;  %v12087_v34 = vld [vmem:[%s17922_s11 + $0x2b4] sm:$0xf0]  ;;  %v11438_v44 = vor.u32 %v12119_v18, %v11437_v40 }
 0x955   : > { %7995 = vmatpush.bf16.msra.mxu3 %v11470_v20 }
 0x956   : > { %v6926_v21 = vpop.f32.mrf.mxu2  ;;  %v6954_v31 = vpop.f32.mrf.mxu3 }
 0x957   : > { %v6927_v52 = vadd.f32 %v6926_v21, %v16920_v49 }
 0x959   : > { %v17366_v29 = vadd.f32 %v6954_v31, %v6927_v52  ;;  %v7711_v49 = vpop.f32.mrf.mxu0  ;;  %v7739_v41 = vpop.f32.mrf.mxu1  ;;  %7996 = vmatpush.bf16.msra.mxu3 %v11454_v58  ;;  %v11293_v31 = vld [vmem:[%s17922_s11 + $0x288] sm:$0xf]  ;;  %v12083_v52 = vld [vmem:[%s17922_s11 + $0x294] sm:$0xf0] }
 0x95a   : > { %v7712_v1 = vadd.f32 %v7711_v49, %v16812_v61  ;;  %v11310_v61 = vor.u32 %v12087_v34, %v11309_v0  ;;  %v11294_v57 = vor.u32 %v12083_v52, %v11293_v31  ;;  %v11422_v49 = vor.u32 %v12115_v50, %v11421_v54  ;;  %v12079_v58 = vld [vmem:[%s17922_s11 + $0x274] sm:$0xf0] }
 0x95b   : > { %v12111_v34 = vld [vmem:[%s17922_s11 + $0x374] sm:$0xf0] }
 0x95c   : > { %v17378_v38 = vadd.f32 %v7739_v41, %v7712_v1  ;;  %7934 = vmatmul.bf16.gmra.mxu0 %v16858_v4  ;;  %7962 = vmatmul.bf16.gmra.mxu1 %v16860_v19  ;;  %v11277_v41 = vld [vmem:[%s17922_s11 + $0x268] sm:$0xf]  ;;  %v12107_v52 = vld [vmem:[%s17922_s11 + $0x354] sm:$0xf0] }
 0x95d   : > { %7969 = vmatpush.bf16.msra.mxu2 %v11310_v61  ;;  %7997 = vmatpush.bf16.msra.mxu3 %v11438_v44  ;;  %v11405_v1 = vld [vmem:[%s17922_s11 + $0x368] sm:$0xf]  ;;  %v11278_v0 = vor.u32 %v12079_v58, %v11277_v41 }
 0x95e   : > { %v6928_v16 = vpop.f32.mrf.mxu2  ;;  %v6956_v20 = vpop.f32.mrf.mxu3  ;;  %v11406_v40 = vor.u32 %v12111_v34, %v11405_v1  ;;  %v11373_v41 = vld [vmem:[%s17922_s11 + $0x328] sm:$0xf]  ;;  %v12103_v1 = vld [vmem:[%s17922_s11 + $0x334] sm:$0xf0] }
 0x95f   : > { %v6929_v21 = vadd.f32 %v6928_v16, %v16975_v6  ;;  %v11261_v16 = vld [vmem:[%s17922_s11 + $0x248] sm:$0xf] }
 0x961   : > { %v17398_v62 = vadd.f32 %v6956_v20, %v6929_v21  ;;  %v7713_v6 = vpop.f32.mrf.mxu0  ;;  %v7741_v48 = vpop.f32.mrf.mxu1  ;;  %7970 = vmatpush.bf16.msra.mxu2 %v11294_v57  ;;  %7998 = vmatpush.bf16.msra.mxu3 %v11422_v49  ;;  %v12075_v20 = vld [vmem:[%s17922_s11 + $0x254] sm:$0xf0]  ;;  %v11389_v21 = vld [vmem:[%s17922_s11 + $0x348] sm:$0xf] }
 0x962   : > { %v11262_v31 = vor.u32 %v12075_v20, %v11261_v16  ;;  %v11390_v50 = vor.u32 %v12107_v52, %v11389_v21  ;;  %v11245_v48 = vld [vmem:[%s17922_s11 + $0x228] sm:$0xf]  ;;  %v12071_v49 = vld [vmem:[%s17922_s11 + $0x234] sm:$0xf0] }
 0x963   : > { %7868 = vmatmul.bf16.gmra.mxu2 %v17138_v11  ;;  %7896 = vmatmul.bf16.gmra.mxu3 %v17140_v10  ;;  %v11357_v16 = vld [vmem:[%s17922_s11 + $0x308] sm:$0xf]  ;;  %v12099_v20 = vld [vmem:[%s17922_s11 + $0x314] sm:$0xf0] }
 0x965   : > { %7971 = vmatpush.bf16.msra.mxu2 %v11278_v0  ;;  %7999 = vmatpush.bf16.msra.mxu3 %v11406_v40  ;;  %v11374_v0 = vor.u32 %v12103_v1, %v11373_v41 }
 0x966   : > { %v6931_v61 = vpop.f32.mrf.mxu2  ;;  %v6959_v18 = vpop.f32.mrf.mxu3 }
 0x967   : > { %v6932_v44 = vadd.f32 %v6931_v61, %v17006_v63  ;;  %v12263_v61 = vld [vmem:[%s17924_s13 + $0x38] sm:$0xff] }
 0x968   : > { %8467 = vmatpush.bf16.msra.mxu0 %v12263_v61  ;;  %v12259_v61 = vld [vmem:[%s17924_s13 + $0x18] sm:$0xff] }
 0x969   : > { %v17427_v54 = vadd.f32 %v6959_v18, %v6932_v44  ;;  %v7808_v63 = vpop.f32.mrf.mxu0  ;;  %v7836_v57 = vpop.f32.mrf.mxu1  ;;  %7972 = vmatpush.bf16.msra.mxu2 %v11262_v31  ;;  %8000 = vmatpush.bf16.msra.mxu3 %v11390_v50 }
 0x96a   : > { %v7809_v6 = vadd.f32 %v7808_v63, %v16854_v8  ;;  %v11246_v8 = vor.u32 %v12071_v49, %v11245_v48  ;;  %v11358_v63 = vor.u32 %v12099_v20, %v11357_v16  ;;  %v12261_v48 = vld [vmem:[%s17924_s13 + $0x28] sm:$0xff] }
 0x96b   : > { %v12257_v16 = vld [vmem:[%s17924_s13 + $0x8] sm:$0xff] }
 0x96c   : > { %v17439_v58 = vadd.f32 %v7836_v57, %v7809_v6  ;;  %8031 = vmatmul.bf16.vlgmr.msrb.gmra.mxu0 %v16663_v47  ;;  %8059 = vmatmul.bf16.vlgmr.msrb.gmra.mxu1 %v16665_v46  ;;  %v11229_v47 = vld [vmem:[%s17922_s11 + $0x208] sm:$0xf]  ;;  %v12067_v46 = vld [vmem:[%s17922_s11 + $0x214] sm:$0xf0] }
 0x96d   : > { %7973 = vmatpush.bf16.msra.mxu2 %v11246_v8  ;;  %v11230_v44 = vor.u32 %v12067_v46, %v11229_v47  ;;  %8001 = vmatpush.bf16.msra.mxu3 %v11374_v0  ;;  %v12260_v0 = vld [vmem:[%s17924_s13 + $0x20] sm:$0xff] }
 0x96e   : > { %v6933_v34 = vpop.f32.mrf.mxu2  ;;  %v6961_v40 = vpop.f32.mrf.mxu3 }
 0x96f   : > { %v6934_v18 = vadd.f32 %v6933_v34, %v17037_v32  ;;  %v12262_v32 = vld [vmem:[%s17924_s13 + $0x30] sm:$0xff] }
 0x970   : > { %8468 = vmatpush.bf16.msra.mxu0 %v12262_v32 }
 0x971   : > { %v17462_v21 = vadd.f32 %v6961_v40, %v6934_v18  ;;  %v7810_v31 = vpop.f32.mrf.mxu0  ;;  %v17464_v52 = vpop.f32.mrf.mxu1  ;;  %7974 = vmatpush.bf16.msra.mxu2 %v11230_v44  ;;  %8002 = vmatpush.bf16.msra.mxu3 %v11358_v63 }
 0x972   : > { %v17467_v57 = vadd.f32 %v7810_v31, %v16889_v43 }
 0x973   : > { %7873 = vmatmul.bf16.gmra.mxu2 %v17213_v42  ;;  %7901 = vmatmul.bf16.gmra.mxu3 %v17217_v15 }
 0x974   : > { %8469 = vmatpush.bf16.msra.mxu0 %v12261_v48 }
 0x976   : > { %v6936_v50 = vpop.f32.mrf.mxu2  ;;  %v6964_v6 = vpop.f32.mrf.mxu3 }
 0x977   : > { %v6937_v43 = vadd.f32 %v6936_v50, %v17068_v14  ;;  %v12256_v50 = vld [vmem:[%s17924_s13] sm:$0xff] }
 0x978   : > { %8470 = vmatpush.bf16.msra.mxu0 %v12260_v0 }
 0x979   : > { %v17478_v49 = vadd.f32 %v6964_v6, %v6937_v43  ;;  %v7813_v41 = vpop.f32.mrf.mxu0  ;;  %v7841_v8 = vpop.f32.mrf.mxu1 }
 0x97a   : > { %v7814_v1 = vadd.f32 %v7813_v41, %v16918_v53 }
 0x97c   : > { %v17484_v34 = vadd.f32 %v7841_v8, %v7814_v1  ;;  %8036 = vmatmul.bf16.gmra.mxu0 %v16753_v13  ;;  %8064 = vmatmul.bf16.gmra.mxu1 %v16755_v35  ;;  %v12258_v13 = vld [vmem:[%s17924_s13 + $0x10] sm:$0xff] }
 0x97d   : > { %8471 = vmatpush.bf16.msra.mxu0 %v12259_v61 }
 0x97e   : > { %v6938_v40 = vpop.f32.mrf.mxu2  ;;  %v6966_v14 = vpop.f32.mrf.mxu3 }
 0x97f   : > { %v6939_v47 = vadd.f32 %v6938_v40, %v17076_v39 }
 0x981   : > { %v17492_v53 = vadd.f32 %v6966_v14, %v6939_v47  ;;  %v7815_v46 = vpop.f32.mrf.mxu0  ;;  %v17494_v18 = vpop.f32.mrf.mxu1  ;;  %8472 = vmatpush.bf16.msra.mxu0 %v12258_v13  ;;  %v12089_v47 = vld [vmem:[%s17922_s11 + $0x2cc] sm:$0xf] }
 0x982   : > { %v17497_v44 = vadd.f32 %v7815_v46, %v16970_v24  ;;  %v11327_v46 = vld [vmem:[%s17922_s11 + $0x2d8] sm:$0xf0]  ;;  %v12121_v13 = vld [vmem:[%s17922_s11 + $0x3cc] sm:$0xf] }
 0x983   : > { %7878 = vmatmul.bf16.gmra.mxu2 %v17283_v55  ;;  %7906 = vmatmul.bf16.gmra.mxu3 %v17285_v30 }
 0x985   : > { %8473 = vmatpush.bf16.msra.mxu0 %v12257_v16 }
 0x986   : > { %v6941_v35 = vpop.f32.mrf.mxu2  ;;  %v6969_v39 = vpop.f32.mrf.mxu3 }
 0x987   : > { %v6942_v20 = vadd.f32 %v6941_v35, %v17107_v33  ;;  %v11330_v35 = vor.u32 %v12089_v47, %v11327_v46 }
 0x989   : > { %v17508_v31 = vadd.f32 %v6969_v39, %v6942_v20  ;;  %v7818_v24 = vpop.f32.mrf.mxu0  ;;  %v7846_v63 = vpop.f32.mrf.mxu1  ;;  %8474 = vmatpush.bf16.msra.mxu0 %v12256_v50  ;;  %v11455_v39 = vld [vmem:[%s17922_s11 + $0x3d8] sm:$0xf0]  ;;  %v12085_v50 = vld [vmem:[%s17922_s11 + $0x2ac] sm:$0xf] }
 0x98a   : > { %v7819_v32 = vadd.f32 %v7818_v24, %v17001_v45  ;;  %v12125_v45 = vld [vmem:[%s17922_s11 + $0x3ec] sm:$0xf]  ;;  %v11458_v24 = vor.u32 %v12121_v13, %v11455_v39  ;;  %v11279_v39 = vld [vmem:[%s17922_s11 + $0x278] sm:$0xf0] }
 0x98c   : > { %v17514_v6 = vadd.f32 %v7846_v63, %v7819_v32  ;;  %8041 = vmatmul.bf16.gmra.mxu0 %v16819_v23  ;;  %8069 = vmatmul.bf16.gmra.mxu1 %v16821_v2  ;;  %v12093_v23 = vld [vmem:[%s17922_s11 + $0x2ec] sm:$0xf]  ;;  %v11343_v2 = vld [vmem:[%s17922_s11 + $0x2f8] sm:$0xf0] }
 0x98d   : > { %v11346_v1 = vor.u32 %v12093_v23, %v11343_v2  ;;  %v11439_v23 = vld [vmem:[%s17922_s11 + $0x3b8] sm:$0xf0] }
 0x98e   : > { %v6943_v33 = vpop.f32.mrf.mxu2  ;;  %v6971_v48 = vpop.f32.mrf.mxu3 }
 0x98f   : > { %8079 = vmatpush.bf16.msrb.mxu2 %v11346_v1  ;;  %v11311_v33 = vld [vmem:[%s17922_s11 + $0x2b8] sm:$0xf0] }
 0x991   : > { %v7820_v43 = vpop.f32.mrf.mxu0  ;;  %v17518_v41 = vpop.f32.mrf.mxu1 }
 0x992   : > { %v17521_v8 = vadd.f32 %v7820_v43, %v17032_v9  ;;  %v11471_v9 = vld [vmem:[%s17922_s11 + $0x3f8] sm:$0xf0]  ;;  %v11314_v43 = vor.u32 %v12085_v50, %v11311_v33 }
 0x993   : > { %7975 = vmatmul.bf16.vlgmr.msra.gmra.mxu2 %v17072_v22  ;;  %8003 = vmatmul.bf16.vlgmr.msra.gmra.mxu3 %v17074_v17  ;;  %v11474_v0 = vor.u32 %v12125_v45, %v11471_v9 }
 0x994   : > { %8080 = vmatpush.bf16.msrb.mxu2 %v11330_v35  ;;  %v12077_v35 = vld [vmem:[%s17922_s11 + $0x26c] sm:$0xf] }
 0x995   : > { %8107 = vmatpush.bf16.msrb.mxu3 %v11474_v0  ;;  %v12113_v0 = vld [vmem:[%s17922_s11 + $0x38c] sm:$0xf] }
 0x996   : > { %v7752_v40 = vpop.f32.mrf.mxu2  ;;  %v7780_v14 = vpop.f32.mrf.mxu3 }
 0x997   : > { %v7753_v61 = vadd.f32 %v7752_v40, %v17181_v5 }
 0x998   : > { %8081 = vmatpush.bf16.msrb.mxu2 %v11314_v43 }
 0x999   : > { %v7781_v16 = vadd.f32 %v7780_v14, %v7753_v61  ;;  %v7823_v5 = vpop.f32.mrf.mxu0  ;;  %v7851_v20 = vpop.f32.mrf.mxu1  ;;  %8108 = vmatpush.bf16.msrb.mxu3 %v11458_v24  ;;  %v11423_v14 = vld [vmem:[%s17922_s11 + $0x398] sm:$0xf0] }
 0x99a   : > { %v7824_v63 = vadd.f32 %v7823_v5, %v17063_v3  ;;  %v12117_v3 = vld [vmem:[%s17922_s11 + $0x3ac] sm:$0xf]  ;;  %v11426_v46 = vor.u32 %v12113_v0, %v11423_v14 }
 0x99b   : > { %v8135_v32 = vmax.f32 %v7781_v16, 0.0  ;;  %v11442_v2 = vor.u32 %v12117_v3, %v11439_v23  ;;  %v11282_v16 = vor.u32 %v12077_v35, %v11279_v39  ;;  %v12109_v5 = vld [vmem:[%s17922_s11 + $0x36c] sm:$0xf]  ;;  %v11263_v23 = vld [vmem:[%s17922_s11 + $0x258] sm:$0xf0] }
 0x99c   : > { %v17563_v48 = vadd.f32 %v7851_v20, %v7824_v63  ;;  %8046 = vmatmul.bf16.gmra.mxu0 %v16858_v4  ;;  %8074 = vmatmul.bf16.gmra.mxu1 %v16860_v19  ;;  %v12081_v4 = vld [vmem:[%s17922_s11 + $0x28c] sm:$0xf]  ;;  %v11295_v19 = vld [vmem:[%s17922_s11 + $0x298] sm:$0xf0] }
 0x99d   : > { %8163 = vst [vmem:[%s17554_s2] sm:$0xff] %v8135_v32  ;;  %8109 = vmatpush.bf16.msrb.mxu3 %v11442_v2  ;;  %v11298_v40 = vor.u32 %v12081_v4, %v11295_v19  ;;  %v11407_v20 = vld [vmem:[%s17922_s11 + $0x378] sm:$0xf0]  ;;  %v12073_v3 = vld [vmem:[%s17922_s11 + $0x24c] sm:$0xf] }
 0x99e   : > { %v7754_v45 = vpop.f32.mrf.mxu2  ;;  %v7782_v1 = vpop.f32.mrf.mxu3  ;;  %v11410_v63 = vor.u32 %v12109_v5, %v11407_v20  ;;  %v12105_v2 = vld [vmem:[%s17922_s11 + $0x34c] sm:$0xf]  ;;  %v11231_v20 = vld [vmem:[%s17922_s11 + $0x218] sm:$0xf0] }
 0x99f   : > { %v7755_v9 = vadd.f32 %v7754_v45, %v17234_v7  ;;  %8082 = vmatpush.bf16.msrb.mxu2 %v11298_v40  ;;  %v11391_v45 = vld [vmem:[%s17922_s11 + $0x358] sm:$0xf0]  ;;  %v12069_v14 = vld [vmem:[%s17922_s11 + $0x22c] sm:$0xf] }
 0x9a0   : > { %v11394_v19 = vor.u32 %v12105_v2, %v11391_v45  ;;  %v12065_v5 = vld [vmem:[%s17922_s11 + $0x20c] sm:$0xf] }
 0x9a1   : > { %v7783_v7 = vadd.f32 %v7782_v1, %v7755_v9  ;;  %v7825_v61 = vpop.f32.mrf.mxu0  ;;  %v7853_v47 = vpop.f32.mrf.mxu1  ;;  %8110 = vmatpush.bf16.msrb.mxu3 %v11426_v46  ;;  %v11375_v46 = vld [vmem:[%s17922_s11 + $0x338] sm:$0xf0] }
 0x9a3   : > { %v8139_v13 = vmax.f32 %v7783_v7, 0.0  ;;  %7980 = vmatmul.bf16.gmra.mxu2 %v17138_v11  ;;  %8008 = vmatmul.bf16.gmra.mxu3 %v17140_v10  ;;  %v11247_v7 = vld [vmem:[%s17922_s11 + $0x238] sm:$0xf0] }
 0x9a4   : > { %8083 = vmatpush.bf16.msrb.mxu2 %v11282_v16  ;;  %v11250_v47 = vor.u32 %v12069_v14, %v11247_v7 }
 0x9a5   : > { %8167 = vst [vmem:[%s17554_s2 + $0x20] sm:$0xff] %v8139_v13  ;;  %v8191_v24 = vpack.c.bf16 %v8139_v13, %v8135_v32  ;;  %8111 = vmatpush.bf16.msrb.mxu3 %v11410_v63  ;;  %v11266_v32 = vor.u32 %v12073_v3, %v11263_v23  ;;  %v12270_v13 = vld [vmem:[%s17924_s13 + $0x70] sm:$0xff] }
 0x9a6   : > { %v7757_v50 = vpop.f32.mrf.mxu2  ;;  %v7785_v33 = vpop.f32.mrf.mxu3 }
 0x9a7   : > { %v7758_v43 = vadd.f32 %v7757_v50, %v17264_v56  ;;  %v12271_v56 = vld [vmem:[%s17924_s13 + $0x78] sm:$0xff]  ;;  %v11234_v50 = vor.u32 %v12065_v5, %v11231_v20 }
 0x9a8   : > { %8084 = vmatpush.bf16.msrb.mxu2 %v11266_v32  ;;  %8495 = vmatpush.bf16.msra.mxu1 %v12271_v56 }
 0x9a9   : > { %v7786_v1 = vadd.f32 %v7785_v33, %v7758_v43  ;;  %v7920_v9 = vpop.f32.mrf.mxu0  ;;  %v7948_v4 = vpop.f32.mrf.mxu1  ;;  %8112 = vmatpush.bf16.msrb.mxu3 %v11394_v19  ;;  %v11359_v33 = vld [vmem:[%s17922_s11 + $0x318] sm:$0xf0]  ;;  %v12269_v43 = vld [vmem:[%s17924_s13 + $0x68] sm:$0xff] }
 0x9aa   : > { %v7921_v0 = vadd.f32 %v7920_v9, %v17105_v60  ;;  %v12101_v60 = vld [vmem:[%s17922_s11 + $0x32c] sm:$0xf] }
 0x9ab   : > { %v8143_v40 = vmax.f32 %v7786_v1, 0.0  ;;  %v11378_v35 = vor.u32 %v12101_v60, %v11375_v46  ;;  %v12268_v1 = vld [vmem:[%s17924_s13 + $0x60] sm:$0xff] }
 0x9ac   : > { %v17625_v61 = vadd.f32 %v7948_v4, %v7921_v0  ;;  %8475 = vmatmul.bf16.vlgmr.msra.gmra.mxu0 %v8191_v24  ;;  %8085 = vmatpush.bf16.msrb.mxu2 %v11250_v47  ;;  %v12097_v24 = vld [vmem:[%s17922_s11 + $0x30c] sm:$0xf]  ;;  %v12267_v0 = vld [vmem:[%s17924_s13 + $0x58] sm:$0xff] }
 0x9ad   : > { %8171 = vst [vmem:[%s17554_s2 + $0x40] sm:$0xff] %v8143_v40  ;;  %8496 = vmatpush.bf16.msra.mxu1 %v12270_v13  ;;  %8113 = vmatpush.bf16.msrb.mxu3 %v11378_v35  ;;  %v11362_v3 = vor.u32 %v12097_v24, %v11359_v33 }
 0x9ae   : > { %v7759_v39 = vpop.f32.mrf.mxu2  ;;  %v7787_v16 = vpop.f32.mrf.mxu3 }
 0x9af   : > { %v7760_v63 = vadd.f32 %v7759_v39, %v17302_v36 }
 0x9b0   : > { %8086 = vmatpush.bf16.msrb.mxu2 %v11234_v50 }
 0x9b1   : > { %v7788_v23 = vadd.f32 %v7787_v16, %v7760_v63  ;;  %v7922_v2 = vpop.f32.mrf.mxu0  ;;  %v7950_v32 = vpop.f32.mrf.mxu1  ;;  %8497 = vmatpush.bf16.msra.mxu1 %v12269_v43  ;;  %8114 = vmatpush.bf16.msrb.mxu3 %v11362_v3 }
 0x9b2   : > { %v7923_v45 = vadd.f32 %v7922_v2, %v17136_v25 }
 0x9b3   : > { %v8147_v36 = vmax.f32 %v7788_v23, 0.0  ;;  %7985 = vmatmul.bf16.gmra.mxu2 %v17213_v42  ;;  %8013 = vmatmul.bf16.gmra.mxu3 %v17217_v15 }
 0x9b4   : > { %v17656_v56 = vadd.f32 %v7950_v32, %v7923_v45 }
 0x9b5   : > { %8175 = vst [vmem:[%s17554_s2 + $0x60] sm:$0xff] %v8147_v36  ;;  %v8195_v9 = vpack.c.bf16 %v8147_v36, %v8143_v40  ;;  %8498 = vmatpush.bf16.msra.mxu1 %v12268_v1  ;;  %v12266_v40 = vld [vmem:[%s17924_s13 + $0x50] sm:$0xff] }
 0x9b6   : > { %v7762_v4 = vpop.f32.mrf.mxu2  ;;  %v7790_v19 = vpop.f32.mrf.mxu3 }
 0x9b7   : > { %v7763_v25 = vadd.f32 %v7762_v4, %v17332_v51 }
 0x9b9   : > { %v7791_v14 = vadd.f32 %v7790_v19, %v7763_v25  ;;  %v7925_v7 = vpop.f32.mrf.mxu0  ;;  %v7953_v47 = vpop.f32.mrf.mxu1  ;;  %8499 = vmatpush.bf16.msra.mxu1 %v12267_v0 }
 0x9ba   : > { %v7926_v60 = vadd.f32 %v7925_v7, %v17169_v26  ;;  %v12265_v26 = vld [vmem:[%s17924_s13 + $0x48] sm:$0xff] }
 0x9bb   : > { %v8151_v46 = vmax.f32 %v7791_v14, 0.0 }
 0x9bc   : > { %v17667_v13 = vadd.f32 %v7953_v47, %v7926_v60  ;;  %8480 = vmatmul.bf16.gmra.mxu0 %v8195_v9 }
 0x9bd   : > { %8179 = vst [vmem:[%s17554_s2 + $0x80] sm:$0xff] %v8151_v46  ;;  %8500 = vmatpush.bf16.msra.mxu1 %v12266_v40 }
 0x9be   : > { %v7764_v51 = vpop.f32.mrf.mxu2  ;;  %v7792_v35 = vpop.f32.mrf.mxu3 }
 0x9bf   : > { %v7765_v39 = vadd.f32 %v7764_v51, %v17348_v37  ;;  %v12264_v37 = vld [vmem:[%s17924_s13 + $0x40] sm:$0xff] }
 0x9c1   : > { %v7793_v16 = vadd.f32 %v7792_v35, %v7765_v39  ;;  %v7927_v5 = vpop.f32.mrf.mxu0  ;;  %v7955_v20 = vpop.f32.mrf.mxu1  ;;  %8501 = vmatpush.bf16.msra.mxu1 %v12265_v26 }
 0x9c2   : > { %v7928_v24 = vadd.f32 %v7927_v5, %v17215_v59 }
 0x9c3   : > { %v8155_v63 = vmax.f32 %v7793_v16, 0.0  ;;  %7990 = vmatmul.bf16.gmra.mxu2 %v17283_v55  ;;  %8018 = vmatmul.bf16.gmra.mxu3 %v17285_v30 }
 0x9c4   : > { %v17680_v50 = vadd.f32 %v7955_v20, %v7928_v24 }
 0x9c5   : > { %8183 = vst [vmem:[%s17554_s2 + $0xa0] sm:$0xff] %v8155_v63  ;;  %v8199_v33 = vpack.c.bf16 %v8155_v63, %v8151_v46  ;;  %8502 = vmatpush.bf16.msra.mxu1 %v12264_v37 }
 0x9c6   : > { %v7767_v43 = vpop.f32.mrf.mxu2  ;;  %v7795_v3 = vpop.f32.mrf.mxu3 }
 0x9c7   : > { %v7768_v59 = vadd.f32 %v7767_v43, %v17378_v38 }
 0x9c9   : > { %v7796_v23 = vadd.f32 %v7795_v3, %v7768_v59  ;;  %v7930_v2 = vpop.f32.mrf.mxu0  ;;  %v7958_v32 = vpop.f32.mrf.mxu1  ;;  %v12278_v59 = vld [vmem:[%s17924_s13 + $0xb0] sm:$0xff] }
 0x9ca   : > { %v7931_v45 = vadd.f32 %v7930_v2, %v17249_v28 }
 0x9cb   : > { %v8159_v36 = vmax.f32 %v7796_v23, 0.0 }
 0x9cc   : > { %v17688_v1 = vadd.f32 %v7958_v32, %v7931_v45  ;;  %8485 = vmatmul.bf16.gmra.mxu0 %v8199_v33 }
 0x9cd   : > { %8187 = vst [vmem:[%s17554_s2 + $0xc0] sm:$0xff] %v8159_v36  ;;  %v8203_v40 = vpack.c.bf16 %v8159_v36, %v8159_v36 }
 0x9ce   : > { %v7769_v9 = vpop.f32.mrf.mxu2  ;;  %v7797_v4 = vpop.f32.mrf.mxu3 }
 0x9d1   : > { %v7932_v19 = vpop.f32.mrf.mxu0  ;;  %v7960_v25 = vpop.f32.mrf.mxu1 }
 0x9d2   : > { %v7933_v0 = vadd.f32 %v7932_v19, %v17281_v12 }
 0x9d3   : > { %8087 = vmatmul.bf16.vlgmr.msrb.gmra.mxu2 %v17072_v22  ;;  %8115 = vmatmul.bf16.vlgmr.msrb.gmra.mxu3 %v17074_v17  ;;  %v7839_v22 = vadd.f32 %v17464_v52, %v17467_v57  ;;  %v12279_v52 = vld [vmem:[%s17924_s13 + $0xb8] sm:$0xff] }
 0x9d4   : > { %v17694_v38 = vadd.f32 %v7960_v25, %v7933_v0  ;;  %8523 = vmatpush.bf16.msra.mxu2 %v12279_v52 }
 0x9d6   : > { %v7864_v14 = vpop.f32.mrf.mxu2  ;;  %v7892_v28 = vpop.f32.mrf.mxu3 }
 0x9d7   : > { %v7865_v7 = vadd.f32 %v7864_v14, %v17439_v58 }
 0x9d8   : > { %8524 = vmatpush.bf16.msra.mxu2 %v12278_v59 }
 0x9d9   : > { %v7893_v47 = vadd.f32 %v7892_v28, %v7865_v7  ;;  %v7935_v60 = vpop.f32.mrf.mxu0  ;;  %v7963_v46 = vpop.f32.mrf.mxu1 }
 0x9da   : > { %v7936_v51 = vadd.f32 %v7935_v60, %v17317_v27 }
 0x9db   : > { %v8136_v35 = vmax.f32 %v7893_v47, 0.0 }
 0x9dc   : > { %v17698_v12 = vadd.f32 %v7963_v46, %v7936_v51  ;;  %8490 = vmatmul.bf16.gmra.mxu0 %v8203_v40  ;;  %v12274_v40 = vld [vmem:[%s17924_s13 + $0x90] sm:$0xff] }
 0x9dd   : > { %8164 = vst [vmem:[%s17554_s2 + $0x8] sm:$0xff] %v8136_v35 }
 0x9de   : > { %v7866_v17 = vpop.f32.mrf.mxu2  ;;  %v7894_v39 = vpop.f32.mrf.mxu3 }
 0x9df   : > { %v7867_v26 = vadd.f32 %v7866_v17, %v7839_v22 }
 0x9e1   : > { %v7895_v16 = vadd.f32 %v7894_v39, %v7867_v26  ;;  %v7937_v58 = vpop.f32.mrf.mxu0  ;;  %v7965_v5 = vpop.f32.mrf.mxu1 }
 0x9e3   : > { %v8140_v20 = vmax.f32 %v7895_v16, 0.0  ;;  %8092 = vmatmul.bf16.gmra.mxu2 %v17138_v11  ;;  %8120 = vmatmul.bf16.gmra.mxu3 %v17140_v10 }
 0x9e5   : > { %8168 = vst [vmem:[%s17554_s2 + $0x28] sm:$0xff] %v8140_v20  ;;  %v8192_v27 = vpack.c.bf16 %v8140_v20, %v8136_v35 }
 0x9e6   : > { %v7869_v24 = vpop.f32.mrf.mxu2  ;;  %v7897_v63 = vpop.f32.mrf.mxu3 }
 0x9e7   : > { %v7870_v37 = vadd.f32 %v7869_v24, %v17484_v34  ;;  %8503 = vmatmul.bf16.vlgmr.msra.gmra.mxu1 %v8192_v27  ;;  %v7844_v34 = vadd.f32 %v17494_v18, %v17497_v44  ;;  %v12276_v44 = vld [vmem:[%s17924_s13 + $0xa0] sm:$0xff] }
 0x9e9   : > { %v7898_v57 = vadd.f32 %v7897_v63, %v7870_v37  ;;  %v8032_v33 = vpop.f32.mrf.mxu0  ;;  %v8060_v43 = vpop.f32.mrf.mxu1 }
 0x9ea   : > { %v8033_v3 = vadd.f32 %v8032_v33, %v17366_v29  ;;  %v12277_v29 = vld [vmem:[%s17924_s13 + $0xa8] sm:$0xff] }
 0x9eb   : > { %v8144_v11 = vmax.f32 %v7898_v57, 0.0  ;;  %8525 = vmatpush.bf16.msra.mxu2 %v12277_v29 }
 0x9ec   : > { %v17711_v10 = vadd.f32 %v8060_v43, %v8033_v3 }
 0x9ed   : > { %8172 = vst [vmem:[%s17554_s2 + $0x48] sm:$0xff] %v8144_v11 }
 0x9ee   : > { %v7871_v23 = vpop.f32.mrf.mxu2  ;;  %v7899_v2 = vpop.f32.mrf.mxu3 }
 0x9ef   : > { %v7872_v32 = vadd.f32 %v7871_v23, %v7844_v34  ;;  %8526 = vmatpush.bf16.msra.mxu2 %v12276_v44 }
 0x9f1   : > { %v7900_v45 = vadd.f32 %v7899_v2, %v7872_v32  ;;  %v8034_v36 = vpop.f32.mrf.mxu0  ;;  %v8062_v9 = vpop.f32.mrf.mxu1 }
 0x9f2   : > { %v8035_v4 = vadd.f32 %v8034_v36, %v17398_v62 }
 0x9f3   : > { %v8148_v19 = vmax.f32 %v7900_v45, 0.0  ;;  %8097 = vmatmul.bf16.gmra.mxu2 %v17213_v42  ;;  %8125 = vmatmul.bf16.gmra.mxu3 %v17217_v15  ;;  %v12275_v42 = vld [vmem:[%s17924_s13 + $0x98] sm:$0xff] }
 0x9f4   : > { %v17725_v18 = vadd.f32 %v8062_v9, %v8035_v4  ;;  %8527 = vmatpush.bf16.msra.mxu2 %v12275_v42 }
 0x9f5   : > { %8176 = vst [vmem:[%s17554_s2 + $0x68] sm:$0xff] %v8148_v19  ;;  %v8196_v25 = vpack.c.bf16 %v8148_v19, %v8144_v11 }
 0x9f6   : > { %v7874_v0 = vpop.f32.mrf.mxu2  ;;  %v7902_v14 = vpop.f32.mrf.mxu3 }
 0x9f7   : > { %v7875_v62 = vadd.f32 %v7874_v0, %v17514_v6  ;;  %8508 = vmatmul.bf16.gmra.mxu1 %v8196_v25  ;;  %v7849_v6 = vadd.f32 %v17518_v41, %v17521_v8  ;;  %v12272_v8 = vld [vmem:[%s17924_s13 + $0x80] sm:$0xff] }
 0x9f8   : > { %8528 = vmatpush.bf16.msra.mxu2 %v12274_v40 }
 0x9f9   : > { %v7903_v15 = vadd.f32 %v7902_v14, %v7875_v62  ;;  %v8037_v28 = vpop.f32.mrf.mxu0  ;;  %v8065_v7 = vpop.f32.mrf.mxu1 }
 0x9fa   : > { %v8038_v47 = vadd.f32 %v8037_v28, %v17427_v54  ;;  %v12273_v54 = vld [vmem:[%s17924_s13 + $0x88] sm:$0xff] }
 0x9fb   : > { %v8152_v60 = vmax.f32 %v7903_v15, 0.0 }
 0x9fc   : > { %v17736_v46 = vadd.f32 %v8065_v7, %v8038_v47  ;;  %8529 = vmatpush.bf16.msra.mxu2 %v12273_v54  ;;  %v12286_v47 = vld [vmem:[%s17924_s13 + $0xf0] sm:$0xff] }
 0x9fd   : > { %8180 = vst [vmem:[%s17554_s2 + $0x88] sm:$0xff] %v8152_v60 }
 0x9fe   : > { %v7876_v51 = vpop.f32.mrf.mxu2  ;;  %v7904_v35 = vpop.f32.mrf.mxu3 }
 0x9ff   : > { %v7877_v22 = vadd.f32 %v7876_v51, %v7849_v6 }
 0xa00   : > { %8530 = vmatpush.bf16.msra.mxu2 %v12272_v8 }
 0xa01   : > { %v7905_v17 = vadd.f32 %v7904_v35, %v7877_v22  ;;  %v8039_v39 = vpop.f32.mrf.mxu0  ;;  %v8067_v26 = vpop.f32.mrf.mxu1  ;;  %v12284_v22 = vld [vmem:[%s17924_s13 + $0xe0] sm:$0xff] }
 0xa02   : > { %v8040_v16 = vadd.f32 %v8039_v39, %v17462_v21 }
 0xa03   : > { %v8156_v58 = vmax.f32 %v7905_v17, 0.0  ;;  %8102 = vmatmul.bf16.gmra.mxu2 %v17283_v55  ;;  %8130 = vmatmul.bf16.gmra.mxu3 %v17285_v30 }
 0xa04   : > { %v17750_v41 = vadd.f32 %v8067_v26, %v8040_v16 }
 0xa05   : > { %8184 = vst [vmem:[%s17554_s2 + $0xa8] sm:$0xff] %v8156_v58  ;;  %v8200_v5 = vpack.c.bf16 %v8156_v58, %v8152_v60 }
 0xa06   : > { %v7879_v20 = vpop.f32.mrf.mxu2  ;;  %v7907_v27 = vpop.f32.mrf.mxu3 }
 0xa07   : > { %v7880_v21 = vadd.f32 %v7879_v20, %v17563_v48  ;;  %8513 = vmatmul.bf16.gmra.mxu1 %v8200_v5  ;;  %v12282_v20 = vld [vmem:[%s17924_s13 + $0xd0] sm:$0xff] }
 0xa09   : > { %v7908_v24 = vadd.f32 %v7907_v27, %v7880_v21  ;;  %v8042_v63 = vpop.f32.mrf.mxu0  ;;  %v8070_v55 = vpop.f32.mrf.mxu1 }
 0xa0a   : > { %v8043_v30 = vadd.f32 %v8042_v63, %v17478_v49 }
 0xa0b   : > { %v8160_v37 = vmax.f32 %v7908_v24, 0.0  ;;  %v12281_v24 = vld [vmem:[%s17924_s13 + $0xc8] sm:$0xff] }
 0xa0c   : > { %v17758_v52 = vadd.f32 %v8070_v55, %v8043_v30 }
 0xa0d   : > { %8188 = vst [vmem:[%s17554_s2 + $0xc8] sm:$0xff] %v8160_v37  ;;  %v8204_v48 = vpack.c.bf16 %v8160_v37, %v8160_v37  ;;  %v12280_v37 = vld [vmem:[%s17924_s13 + $0xc0] sm:$0xff] }
 0xa0e   : > { %v7881_v57 = vpop.f32.mrf.mxu2  ;;  %v7909_v33 = vpop.f32.mrf.mxu3 }
 0xa11   : > { %v8044_v43 = vpop.f32.mrf.mxu0  ;;  %v8072_v3 = vpop.f32.mrf.mxu1 }
 0xa12   : > { %v8045_v11 = vadd.f32 %v8044_v43, %v17492_v53 }
 0xa14   : > { %v17762_v59 = vadd.f32 %v8072_v3, %v8045_v11 }
 0xa16   : > { %v7976_v34 = vpop.f32.mrf.mxu2  ;;  %v8004_v23 = vpop.f32.mrf.mxu3 }
 0xa17   : > { %v7977_v2 = vadd.f32 %v7976_v34, %v17625_v61  ;;  %8518 = vmatmul.bf16.gmra.mxu1 %v8204_v48 }
 0xa19   : > { %v8005_v49 = vadd.f32 %v8004_v23, %v7977_v2  ;;  %v8047_v29 = vpop.f32.mrf.mxu0  ;;  %v8075_v32 = vpop.f32.mrf.mxu1 }
 0xa1a   : > { %v8048_v45 = vadd.f32 %v8047_v29, %v17508_v31  ;;  %v12287_v31 = vld [vmem:[%s17924_s13 + $0xf8] sm:$0xff] }
 0xa1b   : > { %v8137_v36 = vmax.f32 %v8005_v49, 0.0  ;;  %8551 = vmatpush.bf16.msra.mxu3 %v12287_v31 }
 0xa1c   : > { %v17766_v9 = vadd.f32 %v8075_v32, %v8048_v45 }
 0xa1d   : > { %8165 = vst [vmem:[%s17554_s2 + $0x10] sm:$0xff] %v8137_v36 }
 0xa1e   : > { %v7978_v4 = vpop.f32.mrf.mxu2  ;;  %v8006_v53 = vpop.f32.mrf.mxu3 }
 0xa1f   : > { %v7979_v19 = vadd.f32 %v7978_v4, %v17656_v56  ;;  %8552 = vmatpush.bf16.msra.mxu3 %v12286_v47 }
 0xa21   : > { %v8007_v44 = vadd.f32 %v8006_v53, %v7979_v19  ;;  %v8049_v25 = vpop.f32.mrf.mxu0  ;;  %v8077_v0 = vpop.f32.mrf.mxu1 }
 0xa23   : > { %v8141_v61 = vmax.f32 %v8007_v44, 0.0  ;;  %v12301_v44 = vld [vmem:[%s17925_s14] ss:$0 sm:$0xff] }
 0xa25   : > { %8169 = vst [vmem:[%s17554_s2 + $0x30] sm:$0xff] %v8141_v61  ;;  %v8193_v14 = vpack.c.bf16 %v8141_v61, %v8137_v36 }
 0xa26   : > { %v7981_v62 = vpop.f32.mrf.mxu2  ;;  %v8009_v42 = vpop.f32.mrf.mxu3 }
 0xa27   : > { %v7982_v15 = vadd.f32 %v7981_v62, %v17667_v13  ;;  %8531 = vmatmul.bf16.vlgmr.msra.gmra.mxu2 %v8193_v14  ;;  %v12285_v13 = vld [vmem:[%s17924_s13 + $0xe8] sm:$0xff] }
 0xa28   : > { %8553 = vmatpush.bf16.msra.mxu3 %v12285_v13 }
 0xa29   : > { %v8010_v28 = vadd.f32 %v8009_v42, %v7982_v15  ;;  %v17775_v7 = vpop.f32.mrf.mxu0 }
 0xa2a   : > { %v8477_v14 = vadd.f32 %v12301_v44, %v17775_v7 }
 0xa2b   : > { %v8145_v56 = vmax.f32 %v8010_v28, 0.0 }
 0xa2c   : > { %8554 = vmatpush.bf16.msra.mxu3 %v12284_v22 }
 0xa2d   : > { %8173 = vst [vmem:[%s17554_s2 + $0x50] sm:$0xff] %v8145_v56 }
 0xa2e   : > { %v7983_v60 = vpop.f32.mrf.mxu2  ;;  %v8011_v40 = vpop.f32.mrf.mxu3 }
 0xa2f   : > { %v7984_v6 = vadd.f32 %v7983_v60, %v17680_v50  ;;  %v12283_v50 = vld [vmem:[%s17924_s13 + $0xd8] sm:$0xff] }
 0xa30   : > { %8555 = vmatpush.bf16.msra.mxu3 %v12283_v50 }
 0xa31   : > { %v8012_v51 = vadd.f32 %v8011_v40, %v7984_v6  ;;  %v17785_v35 = vpop.f32.mrf.mxu0 }
 0xa33   : > { %v8149_v54 = vmax.f32 %v8012_v51, 0.0 }
 0xa34   : > { %8556 = vmatpush.bf16.msra.mxu3 %v12282_v20 }
 0xa35   : > { %8177 = vst [vmem:[%s17554_s2 + $0x70] sm:$0xff] %v8149_v54  ;;  %v8197_v17 = vpack.c.bf16 %v8149_v54, %v8145_v56 }
 0xa36   : > { %v7986_v39 = vpop.f32.mrf.mxu2  ;;  %v8014_v26 = vpop.f32.mrf.mxu3 }
 0xa37   : > { %v7987_v16 = vadd.f32 %v7986_v39, %v17688_v1  ;;  %8536 = vmatmul.bf16.gmra.mxu2 %v8197_v17 }
 0xa38   : > { %8557 = vmatpush.bf16.msra.mxu3 %v12281_v24 }
 0xa39   : > { %v8015_v58 = vadd.f32 %v8014_v26, %v7987_v16  ;;  %v17795_v8 = vpop.f32.mrf.mxu0 }
 0xa3a   : > { %v8482_v54 = vadd.f32 %v12301_v44, %v17795_v8 }
 0xa3b   : > { %v8153_v5 = vmax.f32 %v8015_v58, 0.0 }
 0xa3c   : > { %8558 = vmatpush.bf16.msra.mxu3 %v12280_v37 }
 0xa3d   : > { %8181 = vst [vmem:[%s17554_s2 + $0x90] sm:$0xff] %v8153_v5 }
 0xa3e   : > { %v7988_v27 = vpop.f32.mrf.mxu2  ;;  %v8016_v21 = vpop.f32.mrf.mxu3 }
 0xa3f   : > { %v7989_v1 = vadd.f32 %v7988_v27, %v17694_v38 }
 0xa41   : > { %v8017_v63 = vadd.f32 %v8016_v21, %v7989_v1  ;;  %v17805_v55 = vpop.f32.mrf.mxu0 }
 0xa43   : > { %v8157_v30 = vmax.f32 %v8017_v63, 0.0 }
 0xa45   : > { %8185 = vst [vmem:[%s17554_s2 + $0xb0] sm:$0xff] %v8157_v30  ;;  %v8201_v57 = vpack.c.bf16 %v8157_v30, %v8153_v5  ;;  %v8484_v5 = vadd.f32 %v12301_v44, %v17805_v55 }
 0xa46   : > { %v7991_v33 = vpop.f32.mrf.mxu2  ;;  %v8019_v43 = vpop.f32.mrf.mxu3 }
 0xa47   : > { %v7992_v38 = vadd.f32 %v7991_v33, %v17698_v12  ;;  %8541 = vmatmul.bf16.gmra.mxu2 %v8201_v57 }
 0xa49   : > { %v8020_v3 = vadd.f32 %v8019_v43, %v7992_v38  ;;  %v8486_v11 = vpop.f32.mrf.mxu0 }
 0xa4a   : > { %v8487_v63 = vadd.f32 %v12301_v44, %v8486_v11 }
 0xa4b   : > { %v8161_v48 = vmax.f32 %v8020_v3, 0.0 }
 0xa4d   : > { %8189 = vst [vmem:[%s17554_s2 + $0xd0] sm:$0xff] %v8161_v48  ;;  %v8205_v49 = vpack.c.bf16 %v8161_v48, %v8161_v48 }
 0xa4e   : > { %v7993_v34 = vpop.f32.mrf.mxu2  ;;  %v8021_v23 = vpop.f32.mrf.mxu3 }
 0xa51   : > { %v17813_v2 = vpop.f32.mrf.mxu0 }
 0xa52   : > { %v8489_v3 = vadd.f32 %v12301_v44, %v17813_v2 }
 0xa56   : > { %v8088_v29 = vpop.f32.mrf.mxu2  ;;  %v8116_v32 = vpop.f32.mrf.mxu3 }
 0xa57   : > { %v8089_v45 = vadd.f32 %v8088_v29, %v17711_v10  ;;  %8546 = vmatmul.bf16.gmra.mxu2 %v8205_v49 }
 0xa59   : > { %v8117_v36 = vadd.f32 %v8116_v32, %v8089_v45  ;;  %v17816_v4 = vpop.f32.mrf.mxu0 }
 0xa5a   : > { %v8492_v11 = vadd.f32 %v12301_v44, %v17816_v4  ;;  %v12302_v4 = vld [vmem:[%s17926_s15] ss:$0 sm:$0xff] }
 0xa5b   : > { %v8138_v12 = vmax.f32 %v8117_v36, 0.0 }
 0xa5d   : > { %8166 = vst [vmem:[%s17554_s2 + $0x18] sm:$0xff] %v8138_v12 }
 0xa5e   : > { %v8090_v53 = vpop.f32.mrf.mxu2  ;;  %v8118_v19 = vpop.f32.mrf.mxu3 }
 0xa5f   : > { %v8091_v25 = vadd.f32 %v8090_v53, %v17725_v18  ;;  %v8479_v18 = vadd.f32 %v12301_v44, %v17785_v35 }
 0xa61   : > { %v8119_v0 = vadd.f32 %v8118_v19, %v8091_v25  ;;  %v8493_v61 = vpop.f32.mrf.mxu0 }
 0xa63   : > { %v8142_v10 = vmax.f32 %v8119_v0, 0.0 }
 0xa64   : > { %v8504_v62 = vpop.f32.mrf.mxu1 }
 0xa65   : > { %8170 = vst [vmem:[%s17554_s2 + $0x38] sm:$0xff] %v8142_v10  ;;  %v8194_v42 = vpack.c.bf16 %v8142_v10, %v8138_v12  ;;  %v17825_v15 = vadd.f32 %v8504_v62, %v8477_v14 }
 0xa66   : > { %v8093_v31 = vpop.f32.mrf.mxu2  ;;  %v8121_v28 = vpop.f32.mrf.mxu3 }
 0xa67   : > { %v8094_v56 = vadd.f32 %v8093_v31, %v17736_v46  ;;  %8559 = vmatmul.bf16.vlgmr.msra.gmra.mxu3 %v8194_v42 }
 0xa69   : > { %v8122_v47 = vadd.f32 %v8121_v28, %v8094_v56 }
 0xa6b   : > { %v8146_v60 = vmax.f32 %v8122_v47, 0.0 }
 0xa6c   : > { %v8506_v40 = vpop.f32.mrf.mxu1 }
 0xa6d   : > { %8174 = vst [vmem:[%s17554_s2 + $0x58] sm:$0xff] %v8146_v60  ;;  %v17830_v13 = vadd.f32 %v8506_v40, %v8479_v18 }
 0xa6e   : > { %v8095_v7 = vpop.f32.mrf.mxu2  ;;  %v8123_v6 = vpop.f32.mrf.mxu3 }
 0xa6f   : > { %v8096_v51 = vadd.f32 %v8095_v7, %v17750_v41 }
 0xa71   : > { %v8124_v22 = vadd.f32 %v8123_v6, %v8096_v51 }
 0xa73   : > { %v8150_v17 = vmax.f32 %v8124_v22, 0.0 }
 0xa74   : > { %v8509_v39 = vpop.f32.mrf.mxu1 }
 0xa75   : > { %8178 = vst [vmem:[%s17554_s2 + $0x78] sm:$0xff] %v8150_v17  ;;  %v8198_v46 = vpack.c.bf16 %v8150_v17, %v8146_v60  ;;  %v8510_v26 = vadd.f32 %v8509_v39, %v8482_v54 }
 0xa76   : > { %v8098_v16 = vpop.f32.mrf.mxu2  ;;  %v8126_v35 = vpop.f32.mrf.mxu3 }
 0xa77   : > { %v8099_v50 = vadd.f32 %v8098_v16, %v17758_v52  ;;  %8564 = vmatmul.bf16.gmra.mxu3 %v8198_v46 }
 0xa79   : > { %v8127_v58 = vadd.f32 %v8126_v35, %v8099_v50 }
 0xa7b   : > { %v8154_v20 = vmax.f32 %v8127_v58, 0.0 }
 0xa7c   : > { %v8511_v41 = vpop.f32.mrf.mxu1 }
 0xa7d   : > { %8182 = vst [vmem:[%s17554_s2 + $0x98] sm:$0xff] %v8154_v20  ;;  %v8512_v27 = vadd.f32 %v8511_v41, %v8484_v5 }
 0xa7e   : > { %v8100_v21 = vpop.f32.mrf.mxu2  ;;  %v8128_v8 = vpop.f32.mrf.mxu3 }
 0xa7f   : > { %v8101_v1 = vadd.f32 %v8100_v21, %v17762_v59 }
 0xa81   : > { %v8129_v24 = vadd.f32 %v8128_v8, %v8101_v1 }
 0xa83   : > { %v8158_v30 = vmax.f32 %v8129_v24, 0.0 }
 0xa84   : > { %v8514_v37 = vpop.f32.mrf.mxu1 }
 0xa85   : > { %8186 = vst [vmem:[%s17554_s2 + $0xb8] sm:$0xff] %v8158_v30  ;;  %v8202_v57 = vpack.c.bf16 %v8158_v30, %v8154_v20  ;;  %v8515_v52 = vadd.f32 %v8514_v37, %v8487_v63 }
 0xa86   : > { %v8103_v33 = vpop.f32.mrf.mxu2  ;;  %v8131_v43 = vpop.f32.mrf.mxu3 }
 0xa87   : > { %v8104_v55 = vadd.f32 %v8103_v33, %v17766_v9  ;;  %8569 = vmatmul.bf16.gmra.mxu3 %v8202_v57 }
 0xa89   : > { %v8132_v38 = vadd.f32 %v8131_v43, %v8104_v55 }
 0xa8b   : > { %v8162_v48 = vmax.f32 %v8132_v38, 0.0 }
 0xa8c   : > { %v8516_v34 = vpop.f32.mrf.mxu1 }
 0xa8d   : > { %8190 = vst [vmem:[%s17554_s2 + $0xd8] sm:$0xff] %v8162_v48  ;;  %v8517_v59 = vadd.f32 %v8516_v34, %v8489_v3  ;;  %v8206_v32 = vpack.c.bf16 %v8162_v48, %v8162_v48  ;;  %v8620_v34 = vstv %s8619_s16 }
 0xa8e   : > { %v8105_v23 = vpop.f32.mrf.mxu2  ;;  %v8133_v49 = vpop.f32.mrf.mxu3 }
 0xa8f   : > { %v8630_v23 = vld [vmem:[%s17915_s4 + $0x10] sm:$0xff] }
 0xa94   : > { %v8519_v29 = vpop.f32.mrf.mxu1 }
 0xa95   : > { %v8520_v45 = vadd.f32 %v8519_v29, %v8492_v11  ;;  %v8631_v11 = vld [vmem:[%s17915_s4 + $0x18] sm:$0xff] }
 0xa97   : > { %8574 = vmatmul.bf16.gmra.mxu3 %v8206_v32  ;;  %v8628_v32 = vld [vmem:[%s17915_s4] sm:$0xff] }
 0xa9c   : > { %v8521_v36 = vpop.f32.mrf.mxu1 }
 0xa9d   : > { %v8629_v36 = vld [vmem:[%s17915_s4 + $0x8] sm:$0xff] }
 0xaaa   : > { %v8532_v12 = vpop.f32.mrf.mxu2 }
 0xaab   : > { %v8533_v14 = vadd.f32 %v8532_v12, %v17825_v15 }
 0xab2   : > { %v8534_v53 = vpop.f32.mrf.mxu2 }
 0xab3   : > { %v8535_v31 = vadd.f32 %v8534_v53, %v17830_v13  ;;  %v8632_v53 = vld [vmem:[%s17915_s4 + $0x20] sm:$0xff] }
 0xaba   : > { %v8537_v9 = vpop.f32.mrf.mxu2 }
 0xabb   : > { %v8538_v40 = vadd.f32 %v8537_v9, %v8510_v26  ;;  %v8633_v9 = vld [vmem:[%s17915_s4 + $0x28] sm:$0xff] }
 0xac2   : > { %v8539_v19 = vpop.f32.mrf.mxu2 }
 0xac3   : > { %v8540_v54 = vadd.f32 %v8539_v19, %v8512_v27 }
 0xaca   : > { %v8542_v25 = vpop.f32.mrf.mxu2 }
 0xacb   : > { %v8543_v35 = vadd.f32 %v8542_v25, %v8515_v52 }
 0xad2   : > { %v8544_v0 = vpop.f32.mrf.mxu2 }
 0xad3   : > { %v8545_v41 = vadd.f32 %v8544_v0, %v8517_v59 }
 0xada   : > { %v8547_v2 = vpop.f32.mrf.mxu2 }
 0xadb   : > { %v8548_v63 = vadd.f32 %v8547_v2, %v8520_v45 }
 0xae2   : > { %v8549_v61 = vpop.f32.mrf.mxu2 }
 0xae3   : > { %v8634_v61 = vld [vmem:[%s17915_s4 + $0x30] sm:$0xff] }
 0xaea   : > { %v8560_v10 = vpop.f32.mrf.mxu3 }
 0xaeb   : > { %v8561_v62 = vadd.f32 %v8560_v10, %v8533_v14  ;;  %v8635_v14 = vld [vmem:[%s17915_s4 + $0x38] sm:$0xff] }
 0xaed   : > { %v8579_v44 = vmax.f32 %v8561_v62, 0.0 }
 0xaef   : > { %v8590_v42 = vmul.f32 %v12302_v4, %v8579_v44 }
 0xaf1   : > { %v8598_v28 = vsel %vm8597_vm2, %v8590_v42, 0.0 }
 0xaf2   : > { %v8562_v56 = vpop.f32.mrf.mxu3  ;;  %8599 = vadd.xlane.f32.xlu1 %v8598_v28  ;;  %v8636_v28 = vld [vmem:[%s17915_s4 + $0x40] sm:$0xff] }
 0xaf3   : > { %v8563_v47 = vadd.f32 %v8562_v56, %v8535_v31  ;;  %v8637_v56 = vld [vmem:[%s17915_s4 + $0x48] sm:$0xff] }
 0xaf5   : > { %v8580_v18 = vmax.f32 %v8563_v47, 0.0 }
 0xaf7   : > { %v8591_v60 = vmul.f32 %v12302_v4, %v8580_v18 }
 0xaf9   : > { %v8601_v15 = vsel %vm8597_vm2, %v8591_v60, 0.0 }
 0xafa   : > { %v8565_v7 = vpop.f32.mrf.mxu3  ;;  %8602 = vadd.xlane.f32.xlu2 %v8601_v15  ;;  %v8638_v15 = vld [vmem:[%s17915_s4 + $0x50] sm:$0xff] }
 0xafb   : > { %v8566_v6 = vadd.f32 %v8565_v7, %v8538_v40  ;;  %v8639_v7 = vld [vmem:[%s17915_s4 + $0x58] sm:$0xff] }
 0xafd   : > { %v8581_v51 = vmax.f32 %v8566_v6, 0.0 }
 0xaff   : > { %v8592_v22 = vmul.f32 %v12302_v4, %v8581_v51 }
 0xb01   : > { %v8604_v17 = vsel %vm8597_vm2, %v8592_v22, 0.0 }
 0xb02   : > { %v8567_v39 = vpop.f32.mrf.mxu3  ;;  %8605 = vadd.xlane.f32.xlu0 %v8604_v17 }
 0xb03   : > { %v8568_v13 = vadd.f32 %v8567_v39, %v8540_v54 }
 0xb05   : > { %v8582_v46 = vmax.f32 %v8568_v13, 0.0 }
 0xb07   : > { %v8593_v16 = vmul.f32 %v12302_v4, %v8582_v46 }
 0xb09   : > { %v8607_v50 = vsel %vm8597_vm2, %v8593_v16, 0.0  ;;  %v8640_v16 = vld [vmem:[%s17915_s4 + $0x60] sm:$0xff] }
 0xb0a   : > { %v8570_v58 = vpop.f32.mrf.mxu3  ;;  %8608 = vadd.xlane.f32.xlu1 %v8607_v50 }
 0xb0b   : > { %v8571_v26 = vadd.f32 %v8570_v58, %v8543_v35  ;;  %v8641_v35 = vld [vmem:[%s17915_s4 + $0x68] sm:$0xff] }
 0xb0d   : > { %v8583_v5 = vmax.f32 %v8571_v26, 0.0 }
 0xb0f   : > { %v8594_v20 = vmul.f32 %v12302_v4, %v8583_v5 }
 0xb11   : > { %v8610_v21 = vsel %vm8597_vm2, %v8594_v20, 0.0 }
 0xb12   : > { %v8572_v8 = vpop.f32.mrf.mxu3  ;;  %8611 = vadd.xlane.f32.xlu2 %v8610_v21 }
 0xb13   : > { %v8573_v27 = vadd.f32 %v8572_v8, %v8545_v41 }
 0xb15   : > { %v8584_v1 = vmax.f32 %v8573_v27, 0.0 }
 0xb17   : > { %v8595_v24 = vmul.f32 %v12302_v4, %v8584_v1 }
 0xb19   : > { %v8613_v30 = vsel %vm8597_vm2, %v8595_v24, 0.0 }
 0xb1a   : > { %v8575_v37 = vpop.f32.mrf.mxu3  ;;  %8614 = vadd.xlane.f32.xlu0 %v8613_v30 }
 0xb1b   : > { %v8576_v57 = vadd.f32 %v8575_v37, %v8548_v63 }
 0xb1d   : > { %v8585_v52 = vmax.f32 %v8576_v57, 0.0 }
 0xb1f   : > { %v8596_v33 = vmul.f32 %v12302_v4, %v8585_v52 }
 0xb21   : > { %v8616_v43 = vsel %vm8597_vm2, %v8596_v33, 0.0 }
 0xb22   : > { %v8577_v55 = vpop.f32.mrf.mxu3  ;;  %8617 = vadd.xlane.f32.xlu1 %v8616_v43 }
 0xb65   : > { %v8600_v38 = vpop.xlane.xlu1 %8599 }
 0xb66   : > { %v8621_v49 = vadd.f32 %v8620_v34, %v8600_v38 }
 0xb68   : > { %v8642_v2 = vmul.f32 %v8628_v32, %v8621_v49  ;;  %v8643_v62 = vmul.f32 %v8629_v36, %v8621_v49 }
 0xb6d   : > { %v8603_v3 = vpop.xlane.xlu2 %8602 }
 0xb6e   : > { %v8622_v59 = vadd.f32 %v8620_v34, %v8603_v3 }
 0xb70   : > { %v8644_v12 = vmul.f32 %v8630_v23, %v8622_v59  ;;  %v8645_v25 = vmul.f32 %v8631_v11, %v8622_v59 }
 0xb72   : > { %v8656_v31 = vadd.f32 %v8644_v12, %v8642_v2  ;;  %v8668_v47 = vadd.f32 %v8645_v25, %v8643_v62 }
 0xb75   : > { %v8606_v48 = vpop.xlane.xlu0 %8605 }
 0xb76   : > { %v8623_v45 = vadd.f32 %v8620_v34, %v8606_v48 }
 0xb78   : > { %v8646_v4 = vmul.f32 %v8632_v53, %v8623_v45  ;;  %v8647_v44 = vmul.f32 %v8633_v9, %v8623_v45 }
 0xb7a   : > { %v8657_v6 = vadd.f32 %v8656_v31, %v8646_v4  ;;  %v8669_v51 = vadd.f32 %v8668_v47, %v8647_v44 }
 0xb7d   : > { %v8609_v29 = vpop.xlane.xlu1 %8608 }
 0xb7e   : > { %v8624_v0 = vadd.f32 %v8620_v34, %v8609_v29 }
 0xb80   : > { %v8648_v18 = vmul.f32 %v8634_v61, %v8624_v0  ;;  %v8649_v60 = vmul.f32 %v8635_v14, %v8624_v0 }
 0xb82   : > { %v8658_v17 = vadd.f32 %v8657_v6, %v8648_v18  ;;  %v8670_v39 = vadd.f32 %v8669_v51, %v8649_v60 }
 0xb85   : > { %v8612_v19 = vpop.xlane.xlu2 %8611 }
 0xb86   : > { %v8625_v42 = vadd.f32 %v8620_v34, %v8612_v19 }
 0xb88   : > { %v8650_v22 = vmul.f32 %v8636_v28, %v8625_v42  ;;  %v8651_v54 = vmul.f32 %v8637_v56, %v8625_v42 }
 0xb8a   : > { %v8659_v58 = vadd.f32 %v8658_v17, %v8650_v22  ;;  %v8671_v26 = vadd.f32 %v8670_v39, %v8651_v54 }
 0xb8d   : > { %v8615_v10 = vpop.xlane.xlu0 %8614 }
 0xb8e   : > { %v8626_v40 = vadd.f32 %v8620_v34, %v8615_v10  ;;  %v8724_v10 = vlaneseq }
 0xb90   : > { %v8652_v13 = vmul.f32 %v8638_v15, %v8626_v40  ;;  %v8653_v46 = vmul.f32 %v8639_v7, %v8626_v40  ;;  %vm8726_vm7 = vcmp.lt.s32.totalorder %v8724_v10, 256 }
 0xb92   : > { %v8660_v20 = vadd.f32 %v8659_v58, %v8652_v13  ;;  %v8672_v41 = vadd.f32 %v8671_v26, %v8653_v46 }
 0xb95   : > { %v8618_v50 = vpop.xlane.xlu1 %8617 }
 0xb96   : > { %v8627_v5 = vadd.f32 %v8620_v34, %v8618_v50 }
 0xb98   : > { %v8654_v21 = vmul.f32 %v8640_v16, %v8627_v5  ;;  %v8655_v8 = vmul.f32 %v8641_v35, %v8627_v5 }
 0xb9a   : > { %v8661_v27 = vadd.f32 %v8660_v20, %v8654_v21  ;;  %v8673_v1 = vadd.f32 %v8672_v41, %v8655_v8 }
 0xb9c   : > { %v8662_v24 = vrot.slane %v8661_v27, 4  ;;  %v8674_v63 = vrot.slane %v8673_v1, 4 }
 0xb9e   : > { %v8663_v30 = vadd.f32 %v8662_v24, %v8661_v27  ;;  %v8675_v37 = vadd.f32 %v8674_v63, %v8673_v1 }
 0xba0   : > { %v8664_v57 = vrot.slane %v8663_v30, 2  ;;  %v8676_v52 = vrot.slane %v8675_v37, 2 }
 0xba2   : > { %v8665_v33 = vadd.f32 %v8664_v57, %v8663_v30  ;;  %v8677_v43 = vadd.f32 %v8676_v52, %v8675_v37 }
 0xba4   : > { %v8666_v55 = vrot.slane %v8665_v33, 1  ;;  %v8678_v38 = vrot.slane %v8677_v43, 1 }
 0xba6   : > { %v8667_v3 = vadd.f32 %v8666_v55, %v8665_v33  ;;  %v8679_v48 = vadd.f32 %v8678_v38, %v8677_v43 }
 0xba8   : > { %v11603_v59 = vmul.f32 -1.442695, %v8667_v3  ;;  %v11604_v34 = vmul.f32 -1.442695, %v8679_v48 }
 0xbaa   : > { %12359 = vpow2.f32 %v11603_v59 }
 0xbab   : > { %12361 = vpow2.f32 %v11604_v34 }
 0xbb0   : > { %v12360_v23 = vpop.eup %12359 }
 0xbb1   : > { %v12362_v49 = vpop.eup %12361  ;;  %v8686_v11 = vadd.f32 1.0, %v12360_v23 }
 0xbb2   : > { %v8687_v29 = vadd.f32 1.0, %v12362_v49 }
 0xbb3   : > { %12363 = vrcp.f32 %v8686_v11  ;;  %vm8693_vm0 = vweird.f32 %v8686_v11  ;;  %v8699_v14 = vand.u32 2147483648, %v8686_v11  ;;  %v8697_v4 = vand.u32 2147483647, %v8686_v11 }
 0xbb4   : > { %12365 = vrcp.f32 %v8687_v29  ;;  %v8714_v25 = vand.u32 2147483648, %v8687_v29  ;;  %v8712_v2 = vand.u32 2147483647, %v8687_v29  ;;  %vm8708_vm3 = vweird.f32 %v8687_v29 }
 0xbb5   : > { %v8700_v56 = vor.u32 1.1754944e-38, %v8699_v14  ;;  %vm8698_vm8 = vcmp.eq.f32.partialorder %v8697_v4, 8.507059e+37 }
 0xbb6   : > { %v8715_v42 = vor.u32 1.1754944e-38, %v8714_v25  ;;  %vm8713_vm5 = vcmp.eq.f32.partialorder %v8712_v2, 8.507059e+37 }
 0xbb9   : > { %v12364_v32 = vpop.eup %12363 }
 0xbba   : > { %v12366_v45 = vpop.eup %12365  ;;  %v8689_v36 = vmul.f32 %v12364_v32, %v8686_v11  ;;  %vm8694_vm14 = vweird.f32 %v12364_v32 }
 0xbbb   : > { %v8704_v12 = vmul.f32 %v12366_v45, %v8687_v29  ;;  %vm8709_vm15 = vweird.f32 %v12366_v45  ;;  %vm17898_vm1 = vmor %vm8693_vm0, %vm8694_vm14 }
 0xbbc   : > { %v8690_v53 = vsub.f32 1.0, %v8689_v36  ;;  %vm8710_vm4 = vmor %vm8708_vm3, %vm8709_vm15 }
 0xbbd   : > { %v8705_v9 = vsub.f32 1.0, %v8704_v12 }
 0xbbe   : > { %v8691_v19 = vmul.f32 %v12364_v32, %v8690_v53 }
 0xbbf   : > { %v8706_v0 = vmul.f32 %v12366_v45, %v8705_v9 }
 0xbc0   : > { %v8692_v61 = vadd.f32 %v12364_v32, %v8691_v19 }
 0xbc1   : > { %v8707_v44 = vadd.f32 %v12366_v45, %v8706_v0 }
 0xbc2   : > { %v8696_v31 = vsel %vm17898_vm1, %v12364_v32, %v8692_v61 }
 0xbc3   : > { %v8711_v28 = vsel %vm8710_vm4, %v12366_v45, %v8707_v44  ;;  %v8701_v60 = vsel %vm8698_vm8, %v8700_v56, %v8696_v31 }
 0xbc4   : > { %v8716_v47 = vsel %vm8713_vm5, %v8715_v42, %v8711_v28 }
 0xbc5   : > { %v8720_v18 = vrot.slane %v8716_v47, 7 }
 0xbc7   : > { %v8722_v40 = vsel %vm8721_vm6, %v8701_v60, %v8720_v18 }
 0xbc8   : > { %8728 = vst.msk [vmem:[%s627_s21] sm:$0x3] %vm8726_vm7, %v8722_v40 }
 0xbc9 PF: > { %s30_s29 = sadd.s32 1, %s12375_s29  }
 0xbca   : > { %p27_p4 = scmp.ge.s32.totalorder %s30_s29, 4  }
 0xbcc   :  { %29 = sbr.rel (!%p27_p4) target bundleno = 5 (0x5), region = 136 }

</bundles_post_ra>
